<compile_context>
chip_gen: v6e
topology: v6e:2x2x1
jax: 0.10.0
libtpu: 0.0.40
codegen_flags: <defaults>
</compile_context>

<pallas_src>
import functools

import jax
import jax.numpy as jnp
from jax.experimental import pallas as pl
from jax.experimental.pallas import tpu as pltpu


def _round_up(x, m):
    return (x + m - 1) // m * m


def _vmem_budget_and_limit():
    """(working-set budget, vmem_limit_bytes) derived from the chip's VMEM."""
    try:
        cap = pltpu.get_tpu_info().vmem_capacity_bytes
    except Exception:
        cap = 64 * 1024 * 1024  # conservative (v7x per-TC VMEM)
    return (cap * 3) // 4, (cap * 7) // 8


def _pick_batch_block(n, per_img_bytes, fixed_bytes, budget_bytes):
    """Largest NB that fits the VMEM budget, capped so the grid has >=2 steps."""
    max_nb = max(1, (n + 1) // 2)   # >=2 grid steps when N>=2 (v7x: 2 TCs)
    nb = 1
    for cand in range(1, max_nb + 1):
        if fixed_bytes + cand * per_img_bytes <= budget_bytes:
            nb = cand
    return nb


def _erf(x):
    # Abramowitz & Stegun 7.1.26 (max abs error ~1.5e-7); uses only VPU + EUP ops.
    p = 0.3275911
    a1, a2, a3, a4, a5 = 0.254829592, -0.284496736, 1.421413741, -1.453152027, 1.061405429
    ax = jnp.abs(x)
    t = 1.0 / (1.0 + p * ax)
    poly = ((((a5 * t + a4) * t + a3) * t + a2) * t + a1) * t
    y = 1.0 - poly * jnp.exp(-ax * ax)
    return jnp.where(x < 0.0, -y, y)


def _gelu_exact(x):
    # PyTorch nn.GELU() default (exact erf form).
    return 0.5 * x * (1.0 + _erf(x * 0.7071067811865476))


def _unet_down_kernel(x_ref, w1_ref, s1_ref, b1_ref, w2_ref, s2_ref, b2_ref,
                      out_ref, y1pad_ref, pcol_ref, *, conv1_prepacked):
    # out_ref    : (NB, Ho, Wo, Coutp) bf16
    # y1pad_ref  : VMEM (NB, H+2, W+2, Coutp) bf16 (spatially padded conv1 acts)
    # pcol_ref   : VMEM (M, Kcol) bf16 im2col columns for the in-kernel packs
    NB, Ho, Wo, coutp = out_ref.shape
    H, W = 2 * Ho, 2 * Wo
    M = NB * H * W

    # ---- conv1 + folded BN + GELU ----
    if conv1_prepacked:
        # x_ref: (NB, H, W, K1p) -- taps already packed (tap-major, true Cin),
        # K padded to a lane-dense multiple of 128 in the wrapper.
        k1p = x_ref.shape[3]
        col1 = x_ref[...].reshape(M, k1p)
        acc1 = jnp.dot(col1, w1_ref[...], preferred_element_type=jnp.float32)
    else:
        # x_ref: (NB, H+2, W+2, Cinp) -- lane-aligned per-tap packing (Cinp % 128 == 0).
        cinp = x_ref.shape[3]
        for dy in range(3):
            for dx in range(3):
                t = dy * 3 + dx
                pcol_ref[:, t * cinp:(t + 1) * cinp] = (
                    x_ref[:, dy:dy + H, dx:dx + W, :].reshape(M, cinp))
        acc1 = jnp.dot(pcol_ref[:, :9 * cinp], w1_ref[...],
                       preferred_element_type=jnp.float32)
    y1 = _gelu_exact(acc1 * s1_ref[...] + b1_ref[...])            # (M, Coutp) f32

    # ---- stage conv1 activations in a spatially padded bf16 scratch ----
    # Only the 1-wide halo is zeroed (re-done every step: with a "parallel"
    # grid the scratch is per-core and step 0 may not run on every core).
    zrow = jnp.zeros((NB, 1, W + 2, coutp), jnp.bfloat16)
    zcol = jnp.zeros((NB, H + 2, 1, coutp), jnp.bfloat16)
    y1pad_ref[:, 0:1, :, :] = zrow
    y1pad_ref[:, H + 1:H + 2, :, :] = zrow
    y1pad_ref[:, :, 0:1, :] = zcol
    y1pad_ref[:, :, W + 1:W + 2, :] = zcol
    y1pad_ref[:, 1:H + 1, 1:W + 1, :] = (
        y1.astype(jnp.bfloat16).reshape(NB, H, W, coutp))

    # ---- conv2 + folded BN + GELU (lane-aligned 9-tap pack, one fat-K matmul) ----
    for dy in range(3):
        for dx in range(3):
            t = dy * 3 + dx
            pcol_ref[:, t * coutp:(t + 1) * coutp] = (
                y1pad_ref[:, dy:dy + H, dx:dx + W, :].reshape(M, coutp))
    acc2 = jnp.dot(pcol_ref[:, :9 * coutp], w2_ref[...],
                   preferred_element_type=jnp.float32)
    y2 = _gelu_exact(acc2 * s2_ref[...] + b2_ref[...])            # (M, Coutp) f32

    # ---- MaxPool2d(2): pairwise max of even/odd slices (stays in the VPU slot) ----
    y = y2.reshape(NB, Ho, 2, W, coutp)
    y = jnp.maximum(y[:, :, 0, :, :], y[:, :, 1, :, :])           # pool H -> (NB,Ho,W,C)
    y = y.reshape(NB, Ho, Wo, 2, coutp)
    y = jnp.maximum(y[:, :, :, 0, :], y[:, :, :, 1, :])           # pool W -> (NB,Ho,Wo,C)
    out_ref[...] = y.astype(out_ref.dtype)


def unet_down(x_nchw, params):
    """Forward pass of UnetDown. Input/output are NCHW float32 like PyTorch."""
    N, Cin, H, W = x_nchw.shape
    Cout = params["w1"].shape[-1]
    assert H % 2 == 0 and W % 2 == 0
    Ho, Wo = H // 2, W // 2
    Coutp = _round_up(Cout, 128)

    # NCHW -> NHWC, bf16.
    x = jnp.transpose(x_nchw, (0, 2, 3, 1)).astype(jnp.bfloat16)

    # conv1 operand: for small Cin pack the 9 taps at true width in the wrapper
    # (K = round_up(9*Cin,128), e.g. 128 for Cin=4 instead of 1152); otherwise
    # keep the spatially padded, channel-padded input and pack in-kernel.
    conv1_prepacked = (9 * Cin) <= 512
    if conv1_prepacked:
        K1 = 9 * Cin
        K1p = _round_up(K1, 128)
        xp = jnp.pad(x, ((0, 0), (1, 1), (1, 1), (0, 0)))
        taps = [xp[:, dy:dy + H, dx:dx + W, :]
                for dy in range(3) for dx in range(3)]
        x_in = jnp.concatenate(taps, axis=-1)                      # (N,H,W,9*Cin)
        x_in = jnp.pad(x_in, ((0, 0), (0, 0), (0, 0), (0, K1p - K1)))
        w1 = params["w1"].astype(jnp.bfloat16).reshape(9 * Cin, Cout)
        w1 = jnp.pad(w1, ((0, K1p - K1), (0, Coutp - Cout)))
        in_spatial = (H, W)
        Cx = K1p
        Kcol = 9 * Coutp
    else:
        Cinp = _round_up(Cin, 128)
        K1p = 9 * Cinp
        x_in = jnp.pad(x, ((0, 0), (1, 1), (1, 1), (0, Cinp - Cin)))
        w1 = jnp.pad(params["w1"].astype(jnp.bfloat16),
                     ((0, 0), (0, 0), (0, Cinp - Cin), (0, Coutp - Cout)))
        w1 = w1.reshape(K1p, Coutp)
        in_spatial = (H + 2, W + 2)
        Cx = Cinp
        Kcol = max(K1p, 9 * Coutp)

    w2 = jnp.pad(params["w2"].astype(jnp.bfloat16),
                 ((0, 0), (0, 0), (0, Coutp - Cout), (0, Coutp - Cout)))
    w2 = w2.reshape(9 * Coutp, Coutp)
    s1 = jnp.pad(params["scale1"].astype(jnp.float32), (0, Coutp - Cout)).reshape(1, Coutp)
    b1 = jnp.pad(params["bias1"].astype(jnp.float32), (0, Coutp - Cout)).reshape(1, Coutp)
    s2 = jnp.pad(params["scale2"].astype(jnp.float32), (0, Coutp - Cout)).reshape(1, Coutp)
    b2 = jnp.pad(params["bias2"].astype(jnp.float32), (0, Coutp - Cout)).reshape(1, Coutp)

    # VMEM-aware batch-block sizing (per-step working set, incl. resident weights).
    budget, vmem_limit = _vmem_budget_and_limit()
    per_img = (2 * in_spatial[0] * in_spatial[1] * Cx * 2          # input block x2 buffers, bf16
               + 2 * Ho * Wo * Coutp * 2                           # output block x2 buffers, bf16
               + (H + 2) * (W + 2) * Coutp * 2                     # padded y1 scratch, bf16
               + H * W * Kcol * 2                                  # im2col scratch, bf16
               + 3 * H * W * Coutp * 4)                            # f32 activations in flight
    fixed = 2 * (K1p * Coutp + 9 * Coutp * Coutp) * 2 + 2 * 4 * Coutp * 4
    NB = _pick_batch_block(N, per_img, fixed, budget)
    steps = -(-N // NB)
    Np = steps * NB
    if Np > N:                                                     # NB need not divide N
        x_in = jnp.pad(x_in, ((0, Np - N), (0, 0), (0, 0), (0, 0)))
    M = NB * H * W

    kernel = functools.partial(_unet_down_kernel, conv1_prepacked=conv1_prepacked)
    out = pl.pallas_call(
        kernel,
        out_shape=jax.ShapeDtypeStruct((Np, Ho, Wo, Coutp), jnp.bfloat16),
        grid=(steps,),
        in_specs=[
            pl.BlockSpec((NB,) + in_spatial + (Cx,), lambda n: (n, 0, 0, 0)),
            pl.BlockSpec((K1p, Coutp), lambda n: (0, 0)),
            pl.BlockSpec((1, Coutp), lambda n: (0, 0)),
            pl.BlockSpec((1, Coutp), lambda n: (0, 0)),
            pl.BlockSpec((9 * Coutp, Coutp), lambda n: (0, 0)),
            pl.BlockSpec((1, Coutp), lambda n: (0, 0)),
            pl.BlockSpec((1, Coutp), lambda n: (0, 0)),
        ],
        out_specs=pl.BlockSpec((NB, Ho, Wo, Coutp), lambda n: (n, 0, 0, 0)),
        scratch_shapes=[
            pltpu.VMEM((NB, H + 2, W + 2, Coutp), jnp.bfloat16),   # padded y1
            pltpu.VMEM((M, Kcol), jnp.bfloat16),                   # im2col columns
        ],
        compiler_params=pltpu.CompilerParams(
            dimension_semantics=("parallel",),
            vmem_limit_bytes=int(vmem_limit)),
    )(x_in, w1, s1, b1, w2, s2, b2)

    # Drop batch/channel padding, NHWC -> NCHW, back to f32 (PyTorch convention).
    out = out[:N, :, :, :Cout].astype(jnp.float32)
    return jnp.transpose(out, (0, 3, 1, 2))


# ---------------- deterministic parameter construction ----------------
def make_params(key, in_channels, out_channels, eps=1e-5):
    ks = jax.random.split(key, 12)
    p = {}
    # Conv weights in HWIO layout: (3, 3, Cin, Cout)
    w1 = 0.1 * jax.random.normal(ks[0], (3, 3, in_channels, out_channels), jnp.float32)
    cb1 = 0.05 * jax.random.normal(ks[1], (out_channels,), jnp.float32)
    g1 = 1.0 + 0.1 * jax.random.normal(ks[2], (out_channels,), jnp.float32)
    be1 = 0.05 * jax.random.normal(ks[3], (out_channels,), jnp.float32)
    m1 = 0.05 * jax.random.normal(ks[4], (out_channels,), jnp.float32)
    v1 = 1.0 + 0.1 * jax.nn.softplus(jax.random.normal(ks[5], (out_channels,), jnp.float32))

    w2 = 0.1 * jax.random.normal(ks[6], (3, 3, out_channels, out_channels), jnp.float32)
    cb2 = 0.05 * jax.random.normal(ks[7], (out_channels,), jnp.float32)
    g2 = 1.0 + 0.1 * jax.random.normal(ks[8], (out_channels,), jnp.float32)
    be2 = 0.05 * jax.random.normal(ks[9], (out_channels,), jnp.float32)
    m2 = 0.05 * jax.random.normal(ks[10], (out_channels,), jnp.float32)
    v2 = 1.0 + 0.1 * jax.nn.softplus(jax.random.normal(ks[11], (out_channels,), jnp.float32))

    # Fold BatchNorm (eval mode) + conv bias: y = scale * conv(x) + bias
    s1 = g1 / jnp.sqrt(v1 + eps)
    s2 = g2 / jnp.sqrt(v2 + eps)
    p["w1"], p["scale1"], p["bias1"] = w1, s1, be1 + s1 * (cb1 - m1)
    p["w2"], p["scale2"], p["bias2"] = w2, s2, be2 + s2 * (cb2 - m2)
    return p


# ---------------- pure-JAX reference (bf16 inputs, f32 accumulation) ----------------
def ref_unet_down(x_nchw, params):
    x = jnp.transpose(x_nchw, (0, 2, 3, 1)).astype(jnp.bfloat16)  # NHWC
    dn = ("NHWC", "HWIO", "NHWC")

    def conv_bn_gelu(h, w, s, b):
        y = jax.lax.conv_general_dilated(
            h, w.astype(jnp.bfloat16), (1, 1), "SAME",
            dimension_numbers=dn, preferred_element_type=jnp.float32)
        return jax.nn.gelu(y * s + b, approximate=False)

    y1 = conv_bn_gelu(x, params["w1"], params["scale1"], params["bias1"])
    y2 = conv_bn_gelu(y1.astype(jnp.bfloat16), params["w2"],
                      params["scale2"], params["bias2"])
    N, H, W, C = y2.shape
    y2 = y2.reshape(N, H, W // 2, 2, C).max(axis=3)
    y2 = y2.reshape(N, H // 2, 2, W // 2, C).max(axis=2)
    return jnp.transpose(y2, (0, 3, 1, 2))


if __name__ == "__main__":
    key = jax.random.PRNGKey(0)
    k_x, k_p = jax.random.split(key)

    N, Cin, Cout, H, W = 2, 4, 8, 16, 16
    x = jax.random.normal(k_x, (N, Cin, H, W), jnp.float32)
    params = make_params(k_p, Cin, Cout)

    out = jax.block_until_ready(unet_down(x, params))
    ref = jax.block_until_ready(ref_unet_down(x, params))

    assert out.shape == (N, Cout, H // 2, W // 2), out.shape
    assert jnp.allclose(out, ref, atol=2e-2, rtol=2e-2), (
        float(jnp.max(jnp.abs(out - ref.astype(jnp.float32)))))

    print("KERNEL_OK")
</pallas_src>

<mosaic_0001>
module attributes {stable_mosaic.version = 11 : i64} {
  func.func @_unet_down_kernel(%arg0: i32, %arg1: memref<1x16x16x128xbf16, #tpu.memory_space<vmem>>, %arg2: memref<128x128xbf16, #tpu.memory_space<vmem>>, %arg3: memref<1x128xf32, #tpu.memory_space<vmem>>, %arg4: memref<1x128xf32, #tpu.memory_space<vmem>>, %arg5: memref<1152x128xbf16, #tpu.memory_space<vmem>>, %arg6: memref<1x128xf32, #tpu.memory_space<vmem>>, %arg7: memref<1x128xf32, #tpu.memory_space<vmem>>, %arg8: memref<1x8x8x128xbf16, #tpu.memory_space<vmem>>, %arg9: memref<1x18x18x128xbf16, #tpu.memory_space<vmem>>, %arg10: memref<256x1152xbf16, #tpu.memory_space<vmem>>) attributes {dimension_semantics = [#tpu.dimension_semantics<parallel>], iteration_bounds = array<i64: 2>, scalar_prefetch = 0 : i64, scratch_operands = 2 : i64, tpu.core_type = #tpu.core_type<tc>, window_params = [{transform_indices = @transform_0, window_bounds = array<i64: 1, 16, 16, 128>}, {pipeline_mode = #tpu.pipeline_mode<synchronous>, transform_indices = @transform_1, window_bounds = array<i64: 128, 128>}, {pipeline_mode = #tpu.pipeline_mode<synchronous>, transform_indices = @transform_2, window_bounds = array<i64: 1, 128>}, {pipeline_mode = #tpu.pipeline_mode<synchronous>, transform_indices = @transform_3, window_bounds = array<i64: 1, 128>}, {pipeline_mode = #tpu.pipeline_mode<synchronous>, transform_indices = @transform_4, window_bounds = array<i64: 1152, 128>}, {pipeline_mode = #tpu.pipeline_mode<synchronous>, transform_indices = @transform_5, window_bounds = array<i64: 1, 128>}, {pipeline_mode = #tpu.pipeline_mode<synchronous>, transform_indices = @transform_6, window_bounds = array<i64: 1, 128>}, {transform_indices = @transform_7, window_bounds = array<i64: 1, 8, 8, 128>}]} {
    %c0 = arith.constant 0 : index
    %c0_0 = arith.constant 0 : index
    %c0_1 = arith.constant 0 : index
    %c0_2 = arith.constant 0 : index
    %0 = vector.load %arg1[%c0, %c0_0, %c0_1, %c0_2] : memref<1x16x16x128xbf16, #tpu.memory_space<vmem>>, vector<1x16x16x128xbf16>
    %1 = vector.shape_cast %0 : vector<1x16x16x128xbf16> to vector<256x128xbf16>
    %c0_3 = arith.constant 0 : index
    %c0_4 = arith.constant 0 : index
    %2 = vector.load %arg2[%c0_3, %c0_4] : memref<128x128xbf16, #tpu.memory_space<vmem>>, vector<128x128xbf16>
    %cst = arith.constant dense<0.000000e+00> : vector<256x128xf32>
    %3 = tpu.matmul %1, %2, %cst {dimension_numbers = #tpu.dot_dimension_numbers<[1], [0], [0], [1], [0, 0, 1, 1], [], []>} : vector<256x128xbf16>, vector<128x128xbf16>, vector<256x128xf32> -> vector<256x128xf32>
    %c0_5 = arith.constant 0 : index
    %c0_6 = arith.constant 0 : index
    %4 = vector.load %arg3[%c0_5, %c0_6] : memref<1x128xf32, #tpu.memory_space<vmem>>, vector<1x128xf32>
    %5 = vector.broadcast %4 : vector<1x128xf32> to vector<256x128xf32>
    %6 = arith.mulf %3, %5 : vector<256x128xf32>
    %c0_7 = arith.constant 0 : index
    %c0_8 = arith.constant 0 : index
    %7 = vector.load %arg4[%c0_7, %c0_8] : memref<1x128xf32, #tpu.memory_space<vmem>>, vector<1x128xf32>
    %8 = vector.broadcast %7 : vector<1x128xf32> to vector<256x128xf32>
    %9 = arith.addf %6, %8 : vector<256x128xf32>
    %cst_9 = arith.constant 5.000000e-01 : f32
    %10 = vector.broadcast %cst_9 : f32 to vector<256x128xf32>
    %11 = arith.mulf %10, %9 : vector<256x128xf32>
    %cst_10 = arith.constant 0.707106769 : f32
    %12 = vector.broadcast %cst_10 : f32 to vector<256x128xf32>
    %13 = arith.mulf %9, %12 : vector<256x128xf32>
    %14 = math.absf %13 : vector<256x128xf32>
    %cst_11 = arith.constant 0.327591091 : f32
    %15 = vector.broadcast %cst_11 : f32 to vector<256x128xf32>
    %16 = arith.mulf %15, %14 : vector<256x128xf32>
    %cst_12 = arith.constant 1.000000e+00 : f32
    %17 = vector.broadcast %cst_12 : f32 to vector<256x128xf32>
    %18 = arith.addf %17, %16 : vector<256x128xf32>
    %cst_13 = arith.constant 1.000000e+00 : f32
    %19 = vector.broadcast %cst_13 : f32 to vector<256x128xf32>
    %20 = arith.divf %19, %18 : vector<256x128xf32>
    %cst_14 = arith.constant 1.06140542 : f32
    %21 = vector.broadcast %cst_14 : f32 to vector<256x128xf32>
    %22 = arith.mulf %21, %20 : vector<256x128xf32>
    %cst_15 = arith.constant -1.45315206 : f32
    %23 = vector.broadcast %cst_15 : f32 to vector<256x128xf32>
    %24 = arith.addf %22, %23 : vector<256x128xf32>
    %25 = arith.mulf %24, %20 : vector<256x128xf32>
    %cst_16 = arith.constant 1.42141378 : f32
    %26 = vector.broadcast %cst_16 : f32 to vector<256x128xf32>
    %27 = arith.addf %25, %26 : vector<256x128xf32>
    %28 = arith.mulf %27, %20 : vector<256x128xf32>
    %cst_17 = arith.constant -0.284496725 : f32
    %29 = vector.broadcast %cst_17 : f32 to vector<256x128xf32>
    %30 = arith.addf %28, %29 : vector<256x128xf32>
    %31 = arith.mulf %30, %20 : vector<256x128xf32>
    %cst_18 = arith.constant 0.254829586 : f32
    %32 = vector.broadcast %cst_18 : f32 to vector<256x128xf32>
    %33 = arith.addf %31, %32 : vector<256x128xf32>
    %34 = arith.mulf %33, %20 : vector<256x128xf32>
    %cst_19 = arith.constant 0.000000e+00 : f32
    %35 = vector.broadcast %cst_19 : f32 to vector<256x128xf32>
    %36 = arith.subf %35, %14 : vector<256x128xf32>
    %37 = arith.mulf %36, %14 : vector<256x128xf32>
    %38 = math.exp %37 : vector<256x128xf32>
    %39 = arith.mulf %34, %38 : vector<256x128xf32>
    %cst_20 = arith.constant 1.000000e+00 : f32
    %40 = vector.broadcast %cst_20 : f32 to vector<256x128xf32>
    %41 = arith.subf %40, %39 : vector<256x128xf32>
    %cst_21 = arith.constant 0.000000e+00 : f32
    %42 = vector.broadcast %cst_21 : f32 to vector<256x128xf32>
    %43 = arith.cmpf olt, %13, %42 : vector<256x128xf32>
    %cst_22 = arith.constant 0.000000e+00 : f32
    %44 = vector.broadcast %cst_22 : f32 to vector<256x128xf32>
    %45 = arith.subf %44, %41 : vector<256x128xf32>
    %46 = arith.select %43, %45, %41 : vector<256x128xi1>, vector<256x128xf32>
    %cst_23 = arith.constant 1.000000e+00 : f32
    %47 = vector.broadcast %cst_23 : f32 to vector<256x128xf32>
    %48 = arith.addf %47, %46 : vector<256x128xf32>
    %49 = arith.mulf %11, %48 : vector<256x128xf32>
    %cst_24 = arith.constant 0.000000e+00 : bf16
    %50 = vector.broadcast %cst_24 : bf16 to vector<1x1x18x128xbf16>
    %cst_25 = arith.constant 0.000000e+00 : bf16
    %51 = vector.broadcast %cst_25 : bf16 to vector<1x18x1x128xbf16>
    %c0_26 = arith.constant 0 : index
    %c0_27 = arith.constant 0 : index
    %c0_28 = arith.constant 0 : index
    %c0_29 = arith.constant 0 : index
    %52 = vector.load %arg9[%c0_26, %c0_27, %c0_28, %c0_29] : memref<1x18x18x128xbf16, #tpu.memory_space<vmem>>, vector<1x1x18x128xbf16>
    tpu.vector_store %arg9[%c0_26, %c0_27, %c0_28, %c0_29], %50 {strides = array<i32>} : memref<1x18x18x128xbf16, #tpu.memory_space<vmem>>, vector<1x1x18x128xbf16>,
    %c0_30 = arith.constant 0 : index
    %c17 = arith.constant 17 : index
    %c0_31 = arith.constant 0 : index
    %c0_32 = arith.constant 0 : index
    %53 = vector.load %arg9[%c0_30, %c17, %c0_31, %c0_32] : memref<1x18x18x128xbf16, #tpu.memory_space<vmem>>, vector<1x1x18x128xbf16>
    tpu.vector_store %arg9[%c0_30, %c17, %c0_31, %c0_32], %50 {strides = array<i32>} : memref<1x18x18x128xbf16, #tpu.memory_space<vmem>>, vector<1x1x18x128xbf16>,
    %c0_33 = arith.constant 0 : index
    %c0_34 = arith.constant 0 : index
    %c0_35 = arith.constant 0 : index
    %c0_36 = arith.constant 0 : index
    %54 = vector.load %arg9[%c0_33, %c0_34, %c0_35, %c0_36] : memref<1x18x18x128xbf16, #tpu.memory_space<vmem>>, vector<1x18x1x128xbf16>
    tpu.vector_store %arg9[%c0_33, %c0_34, %c0_35, %c0_36], %51 {strides = array<i32>} : memref<1x18x18x128xbf16, #tpu.memory_space<vmem>>, vector<1x18x1x128xbf16>,
    %c0_37 = arith.constant 0 : index
    %c0_38 = arith.constant 0 : index
    %c17_39 = arith.constant 17 : index
    %c0_40 = arith.constant 0 : index
    %55 = vector.load %arg9[%c0_37, %c0_38, %c17_39, %c0_40] : memref<1x18x18x128xbf16, #tpu.memory_space<vmem>>, vector<1x18x1x128xbf16>
    tpu.vector_store %arg9[%c0_37, %c0_38, %c17_39, %c0_40], %51 {strides = array<i32>} : memref<1x18x18x128xbf16, #tpu.memory_space<vmem>>, vector<1x18x1x128xbf16>,
    %56 = arith.truncf %49 : vector<256x128xf32> to vector<256x128xbf16>
    %57 = vector.shape_cast %56 : vector<256x128xbf16> to vector<1x16x16x128xbf16>
    %c0_41 = arith.constant 0 : index
    %c1 = arith.constant 1 : index
    %c1_42 = arith.constant 1 : index
    %c0_43 = arith.constant 0 : index
    %58 = vector.load %arg9[%c0_41, %c1, %c1_42, %c0_43] : memref<1x18x18x128xbf16, #tpu.memory_space<vmem>>, vector<1x16x16x128xbf16>
    tpu.vector_store %arg9[%c0_41, %c1, %c1_42, %c0_43], %57 {strides = array<i32>} : memref<1x18x18x128xbf16, #tpu.memory_space<vmem>>, vector<1x16x16x128xbf16>,
    %c0_44 = arith.constant 0 : index
    %c0_45 = arith.constant 0 : index
    %c0_46 = arith.constant 0 : index
    %c0_47 = arith.constant 0 : index
    %59 = vector.load %arg9[%c0_44, %c0_45, %c0_46, %c0_47] : memref<1x18x18x128xbf16, #tpu.memory_space<vmem>>, vector<1x16x16x128xbf16>
    %60 = vector.shape_cast %59 : vector<1x16x16x128xbf16> to vector<256x128xbf16>
    %c0_48 = arith.constant 0 : index
    %c0_49 = arith.constant 0 : index
    %61 = vector.load %arg10[%c0_48, %c0_49] : memref<256x1152xbf16, #tpu.memory_space<vmem>>, vector<256x128xbf16>
    tpu.vector_store %arg10[%c0_48, %c0_49], %60 {strides = array<i32>} : memref<256x1152xbf16, #tpu.memory_space<vmem>>, vector<256x128xbf16>,
    %c0_50 = arith.constant 0 : index
    %c0_51 = arith.constant 0 : index
    %c1_52 = arith.constant 1 : index
    %c0_53 = arith.constant 0 : index
    %62 = vector.load %arg9[%c0_50, %c0_51, %c1_52, %c0_53] : memref<1x18x18x128xbf16, #tpu.memory_space<vmem>>, vector<1x16x16x128xbf16>
    %63 = vector.shape_cast %62 : vector<1x16x16x128xbf16> to vector<256x128xbf16>
    %c0_54 = arith.constant 0 : index
    %c128 = arith.constant 128 : index
    %64 = vector.load %arg10[%c0_54, %c128] : memref<256x1152xbf16, #tpu.memory_space<vmem>>, vector<256x128xbf16>
    tpu.vector_store %arg10[%c0_54, %c128], %63 {strides = array<i32>} : memref<256x1152xbf16, #tpu.memory_space<vmem>>, vector<256x128xbf16>,
    %c0_55 = arith.constant 0 : index
    %c0_56 = arith.constant 0 : index
    %c2 = arith.constant 2 : index
    %c0_57 = arith.constant 0 : index
    %65 = vector.load %arg9[%c0_55, %c0_56, %c2, %c0_57] : memref<1x18x18x128xbf16, #tpu.memory_space<vmem>>, vector<1x16x16x128xbf16>
    %66 = vector.shape_cast %65 : vector<1x16x16x128xbf16> to vector<256x128xbf16>
    %c0_58 = arith.constant 0 : index
    %c256 = arith.constant 256 : index
    %67 = vector.load %arg10[%c0_58, %c256] : memref<256x1152xbf16, #tpu.memory_space<vmem>>, vector<256x128xbf16>
    tpu.vector_store %arg10[%c0_58, %c256], %66 {strides = array<i32>} : memref<256x1152xbf16, #tpu.memory_space<vmem>>, vector<256x128xbf16>,
    %c0_59 = arith.constant 0 : index
    %c1_60 = arith.constant 1 : index
    %c0_61 = arith.constant 0 : index
    %c0_62 = arith.constant 0 : index
    %68 = vector.load %arg9[%c0_59, %c1_60, %c0_61, %c0_62] : memref<1x18x18x128xbf16, #tpu.memory_space<vmem>>, vector<1x16x16x128xbf16>
    %69 = vector.shape_cast %68 : vector<1x16x16x128xbf16> to vector<256x128xbf16>
    %c0_63 = arith.constant 0 : index
    %c384 = arith.constant 384 : index
    %70 = vector.load %arg10[%c0_63, %c384] : memref<256x1152xbf16, #tpu.memory_space<vmem>>, vector<256x128xbf16>
    tpu.vector_store %arg10[%c0_63, %c384], %69 {strides = array<i32>} : memref<256x1152xbf16, #tpu.memory_space<vmem>>, vector<256x128xbf16>,
    %c0_64 = arith.constant 0 : index
    %c1_65 = arith.constant 1 : index
    %c1_66 = arith.constant 1 : index
    %c0_67 = arith.constant 0 : index
    %71 = vector.load %arg9[%c0_64, %c1_65, %c1_66, %c0_67] : memref<1x18x18x128xbf16, #tpu.memory_space<vmem>>, vector<1x16x16x128xbf16>
    %72 = vector.shape_cast %71 : vector<1x16x16x128xbf16> to vector<256x128xbf16>
    %c0_68 = arith.constant 0 : index
    %c512 = arith.constant 512 : index
    %73 = vector.load %arg10[%c0_68, %c512] : memref<256x1152xbf16, #tpu.memory_space<vmem>>, vector<256x128xbf16>
    tpu.vector_store %arg10[%c0_68, %c512], %72 {strides = array<i32>} : memref<256x1152xbf16, #tpu.memory_space<vmem>>, vector<256x128xbf16>,
    %c0_69 = arith.constant 0 : index
    %c1_70 = arith.constant 1 : index
    %c2_71 = arith.constant 2 : index
    %c0_72 = arith.constant 0 : index
    %74 = vector.load %arg9[%c0_69, %c1_70, %c2_71, %c0_72] : memref<1x18x18x128xbf16, #tpu.memory_space<vmem>>, vector<1x16x16x128xbf16>
    %75 = vector.shape_cast %74 : vector<1x16x16x128xbf16> to vector<256x128xbf16>
    %c0_73 = arith.constant 0 : index
    %c640 = arith.constant 640 : index
    %76 = vector.load %arg10[%c0_73, %c640] : memref<256x1152xbf16, #tpu.memory_space<vmem>>, vector<256x128xbf16>
    tpu.vector_store %arg10[%c0_73, %c640], %75 {strides = array<i32>} : memref<256x1152xbf16, #tpu.memory_space<vmem>>, vector<256x128xbf16>,
    %c0_74 = arith.constant 0 : index
    %c2_75 = arith.constant 2 : index
    %c0_76 = arith.constant 0 : index
    %c0_77 = arith.constant 0 : index
    %77 = vector.load %arg9[%c0_74, %c2_75, %c0_76, %c0_77] : memref<1x18x18x128xbf16, #tpu.memory_space<vmem>>, vector<1x16x16x128xbf16>
    %78 = vector.shape_cast %77 : vector<1x16x16x128xbf16> to vector<256x128xbf16>
    %c0_78 = arith.constant 0 : index
    %c768 = arith.constant 768 : index
    %79 = vector.load %arg10[%c0_78, %c768] : memref<256x1152xbf16, #tpu.memory_space<vmem>>, vector<256x128xbf16>
    tpu.vector_store %arg10[%c0_78, %c768], %78 {strides = array<i32>} : memref<256x1152xbf16, #tpu.memory_space<vmem>>, vector<256x128xbf16>,
    %c0_79 = arith.constant 0 : index
    %c2_80 = arith.constant 2 : index
    %c1_81 = arith.constant 1 : index
    %c0_82 = arith.constant 0 : index
    %80 = vector.load %arg9[%c0_79, %c2_80, %c1_81, %c0_82] : memref<1x18x18x128xbf16, #tpu.memory_space<vmem>>, vector<1x16x16x128xbf16>
    %81 = vector.shape_cast %80 : vector<1x16x16x128xbf16> to vector<256x128xbf16>
    %c0_83 = arith.constant 0 : index
    %c896 = arith.constant 896 : index
    %82 = vector.load %arg10[%c0_83, %c896] : memref<256x1152xbf16, #tpu.memory_space<vmem>>, vector<256x128xbf16>
    tpu.vector_store %arg10[%c0_83, %c896], %81 {strides = array<i32>} : memref<256x1152xbf16, #tpu.memory_space<vmem>>, vector<256x128xbf16>,
    %c0_84 = arith.constant 0 : index
    %c2_85 = arith.constant 2 : index
    %c2_86 = arith.constant 2 : index
    %c0_87 = arith.constant 0 : index
    %83 = vector.load %arg9[%c0_84, %c2_85, %c2_86, %c0_87] : memref<1x18x18x128xbf16, #tpu.memory_space<vmem>>, vector<1x16x16x128xbf16>
    %84 = vector.shape_cast %83 : vector<1x16x16x128xbf16> to vector<256x128xbf16>
    %c0_88 = arith.constant 0 : index
    %c1024 = arith.constant 1024 : index
    %85 = vector.load %arg10[%c0_88, %c1024] : memref<256x1152xbf16, #tpu.memory_space<vmem>>, vector<256x128xbf16>
    tpu.vector_store %arg10[%c0_88, %c1024], %84 {strides = array<i32>} : memref<256x1152xbf16, #tpu.memory_space<vmem>>, vector<256x128xbf16>,
    %c0_89 = arith.constant 0 : index
    %c0_90 = arith.constant 0 : index
    %86 = vector.load %arg10[%c0_89, %c0_90] : memref<256x1152xbf16, #tpu.memory_space<vmem>>, vector<256x1152xbf16>
    %c0_91 = arith.constant 0 : index
    %c0_92 = arith.constant 0 : index
    %87 = vector.load %arg5[%c0_91, %c0_92] : memref<1152x128xbf16, #tpu.memory_space<vmem>>, vector<1152x128xbf16>
    %cst_93 = arith.constant dense<0.000000e+00> : vector<256x128xf32>
    %88 = tpu.matmul %86, %87, %cst_93 {dimension_numbers = #tpu.dot_dimension_numbers<[1], [0], [0], [1], [0, 0, 1, 1], [], []>} : vector<256x1152xbf16>, vector<1152x128xbf16>, vector<256x128xf32> -> vector<256x128xf32>
    %c0_94 = arith.constant 0 : index
    %c0_95 = arith.constant 0 : index
    %89 = vector.load %arg6[%c0_94, %c0_95] : memref<1x128xf32, #tpu.memory_space<vmem>>, vector<1x128xf32>
    %90 = vector.broadcast %89 : vector<1x128xf32> to vector<256x128xf32>
    %91 = arith.mulf %88, %90 : vector<256x128xf32>
    %c0_96 = arith.constant 0 : index
    %c0_97 = arith.constant 0 : index
    %92 = vector.load %arg7[%c0_96, %c0_97] : memref<1x128xf32, #tpu.memory_space<vmem>>, vector<1x128xf32>
    %93 = vector.broadcast %92 : vector<1x128xf32> to vector<256x128xf32>
    %94 = arith.addf %91, %93 : vector<256x128xf32>
    %cst_98 = arith.constant 5.000000e-01 : f32
    %95 = vector.broadcast %cst_98 : f32 to vector<256x128xf32>
    %96 = arith.mulf %95, %94 : vector<256x128xf32>
    %cst_99 = arith.constant 0.707106769 : f32
    %97 = vector.broadcast %cst_99 : f32 to vector<256x128xf32>
    %98 = arith.mulf %94, %97 : vector<256x128xf32>
    %99 = math.absf %98 : vector<256x128xf32>
    %cst_100 = arith.constant 0.327591091 : f32
    %100 = vector.broadcast %cst_100 : f32 to vector<256x128xf32>
    %101 = arith.mulf %100, %99 : vector<256x128xf32>
    %cst_101 = arith.constant 1.000000e+00 : f32
    %102 = vector.broadcast %cst_101 : f32 to vector<256x128xf32>
    %103 = arith.addf %102, %101 : vector<256x128xf32>
    %cst_102 = arith.constant 1.000000e+00 : f32
    %104 = vector.broadcast %cst_102 : f32 to vector<256x128xf32>
    %105 = arith.divf %104, %103 : vector<256x128xf32>
    %cst_103 = arith.constant 1.06140542 : f32
    %106 = vector.broadcast %cst_103 : f32 to vector<256x128xf32>
    %107 = arith.mulf %106, %105 : vector<256x128xf32>
    %cst_104 = arith.constant -1.45315206 : f32
    %108 = vector.broadcast %cst_104 : f32 to vector<256x128xf32>
    %109 = arith.addf %107, %108 : vector<256x128xf32>
    %110 = arith.mulf %109, %105 : vector<256x128xf32>
    %cst_105 = arith.constant 1.42141378 : f32
    %111 = vector.broadcast %cst_105 : f32 to vector<256x128xf32>
    %112 = arith.addf %110, %111 : vector<256x128xf32>
    %113 = arith.mulf %112, %105 : vector<256x128xf32>
    %cst_106 = arith.constant -0.284496725 : f32
    %114 = vector.broadcast %cst_106 : f32 to vector<256x128xf32>
    %115 = arith.addf %113, %114 : vector<256x128xf32>
    %116 = arith.mulf %115, %105 : vector<256x128xf32>
    %cst_107 = arith.constant 0.254829586 : f32
    %117 = vector.broadcast %cst_107 : f32 to vector<256x128xf32>
    %118 = arith.addf %116, %117 : vector<256x128xf32>
    %119 = arith.mulf %118, %105 : vector<256x128xf32>
    %cst_108 = arith.constant 0.000000e+00 : f32
    %120 = vector.broadcast %cst_108 : f32 to vector<256x128xf32>
    %121 = arith.subf %120, %99 : vector<256x128xf32>
    %122 = arith.mulf %121, %99 : vector<256x128xf32>
    %123 = math.exp %122 : vector<256x128xf32>
    %124 = arith.mulf %119, %123 : vector<256x128xf32>
    %cst_109 = arith.constant 1.000000e+00 : f32
    %125 = vector.broadcast %cst_109 : f32 to vector<256x128xf32>
    %126 = arith.subf %125, %124 : vector<256x128xf32>
    %cst_110 = arith.constant 0.000000e+00 : f32
    %127 = vector.broadcast %cst_110 : f32 to vector<256x128xf32>
    %128 = arith.cmpf olt, %98, %127 : vector<256x128xf32>
    %cst_111 = arith.constant 0.000000e+00 : f32
    %129 = vector.broadcast %cst_111 : f32 to vector<256x128xf32>
    %130 = arith.subf %129, %126 : vector<256x128xf32>
    %131 = arith.select %128, %130, %126 : vector<256x128xi1>, vector<256x128xf32>
    %cst_112 = arith.constant 1.000000e+00 : f32
    %132 = vector.broadcast %cst_112 : f32 to vector<256x128xf32>
    %133 = arith.addf %132, %131 : vector<256x128xf32>
    %134 = arith.mulf %96, %133 : vector<256x128xf32>
    %135 = vector.shape_cast %134 : vector<256x128xf32> to vector<1x8x2x16x128xf32>
    %136 = vector.extract_strided_slice %135 {offsets = [0, 0, 0, 0, 0], sizes = [1, 8, 1, 16, 128], strides = [1, 1, 1, 1, 1]} : vector<1x8x2x16x128xf32> to vector<1x8x1x16x128xf32>
    %137 = vector.shape_cast %136 : vector<1x8x1x16x128xf32> to vector<1x8x16x128xf32>
    %138 = vector.extract_strided_slice %135 {offsets = [0, 0, 1, 0, 0], sizes = [1, 8, 1, 16, 128], strides = [1, 1, 1, 1, 1]} : vector<1x8x2x16x128xf32> to vector<1x8x1x16x128xf32>
    %139 = vector.shape_cast %138 : vector<1x8x1x16x128xf32> to vector<1x8x16x128xf32>
    %140 = arith.maximumf %137, %139 : vector<1x8x16x128xf32>
    %141 = vector.shape_cast %140 : vector<1x8x16x128xf32> to vector<1x8x8x2x128xf32>
    %142 = vector.extract_strided_slice %141 {offsets = [0, 0, 0, 0, 0], sizes = [1, 8, 8, 1, 128], strides = [1, 1, 1, 1, 1]} : vector<1x8x8x2x128xf32> to vector<1x8x8x1x128xf32>
    %143 = vector.shape_cast %142 : vector<1x8x8x1x128xf32> to vector<1x8x8x128xf32>
    %144 = vector.extract_strided_slice %141 {offsets = [0, 0, 0, 1, 0], sizes = [1, 8, 8, 1, 128], strides = [1, 1, 1, 1, 1]} : vector<1x8x8x2x128xf32> to vector<1x8x8x1x128xf32>
    %145 = vector.shape_cast %144 : vector<1x8x8x1x128xf32> to vector<1x8x8x128xf32>
    %146 = arith.maximumf %143, %145 : vector<1x8x8x128xf32>
    %147 = arith.truncf %146 : vector<1x8x8x128xf32> to vector<1x8x8x128xbf16>
    %c0_113 = arith.constant 0 : index
    %c0_114 = arith.constant 0 : index
    %c0_115 = arith.constant 0 : index
    %c0_116 = arith.constant 0 : index
    %148 = vector.load %arg8[%c0_113, %c0_114, %c0_115, %c0_116] : memref<1x8x8x128xbf16, #tpu.memory_space<vmem>>, vector<1x8x8x128xbf16>
    tpu.vector_store %arg8[%c0_113, %c0_114, %c0_115, %c0_116], %147 {strides = array<i32>} : memref<1x8x8x128xbf16, #tpu.memory_space<vmem>>, vector<1x8x8x128xbf16>,
    return
  }
  func.func @transform_0(%arg0: i32) -> (i32, i32, i32, i32) {
    %c0_i32 = arith.constant 0 : i32
    %c0_i32_0 = arith.constant 0 : i32
    %c0_i32_1 = arith.constant 0 : i32
    %c0_i32_2 = arith.constant 0 : i32
    return %arg0, %c0_i32, %c0_i32_0, %c0_i32_1 : i32, i32, i32, i32
  }
  func.func @transform_1(%arg0: i32) -> (i32, i32) {
    %c0_i32 = arith.constant 0 : i32
    %c0_i32_0 = arith.constant 0 : i32
    %c0_i32_1 = arith.constant 0 : i32
    return %c0_i32, %c0_i32_0 : i32, i32
  }
  func.func @transform_2(%arg0: i32) -> (i32, i32) {
    %c0_i32 = arith.constant 0 : i32
    %c0_i32_0 = arith.constant 0 : i32
    %c0_i32_1 = arith.constant 0 : i32
    return %c0_i32, %c0_i32_0 : i32, i32
  }
  func.func @transform_3(%arg0: i32) -> (i32, i32) {
    %c0_i32 = arith.constant 0 : i32
    %c0_i32_0 = arith.constant 0 : i32
    %c0_i32_1 = arith.constant 0 : i32
    return %c0_i32, %c0_i32_0 : i32, i32
  }
  func.func @transform_4(%arg0: i32) -> (i32, i32) {
    %c0_i32 = arith.constant 0 : i32
    %c0_i32_0 = arith.constant 0 : i32
    %c0_i32_1 = arith.constant 0 : i32
    return %c0_i32, %c0_i32_0 : i32, i32
  }
  func.func @transform_5(%arg0: i32) -> (i32, i32) {
    %c0_i32 = arith.constant 0 : i32
    %c0_i32_0 = arith.constant 0 : i32
    %c0_i32_1 = arith.constant 0 : i32
    return %c0_i32, %c0_i32_0 : i32, i32
  }
  func.func @transform_6(%arg0: i32) -> (i32, i32) {
    %c0_i32 = arith.constant 0 : i32
    %c0_i32_0 = arith.constant 0 : i32
    %c0_i32_1 = arith.constant 0 : i32
    return %c0_i32, %c0_i32_0 : i32, i32
  }
  func.func @transform_7(%arg0: i32) -> (i32, i32, i32, i32) {
    %c0_i32 = arith.constant 0 : i32
    %c0_i32_0 = arith.constant 0 : i32
    %c0_i32_1 = arith.constant 0 : i32
    %c0_i32_2 = arith.constant 0 : i32
    return %arg0, %c0_i32, %c0_i32_0, %c0_i32_1 : i32, i32, i32, i32
  }
}

</mosaic_0001>

<bundles_post_ra>
// kernel: tpu_custom_call.1
= control target key start
LH: loop header
LB: loop body
LE: loop exit
PB: predicated region body
PF: predicated region fallthrough
CT: control target
= control target key end

     0   :  { %s14196_s0 = inlined_call_operand.hbm [shape: bf16[2,16,16,128], index: 0, kind: input, shape index: {}]   ;;  %s14197_s1 = inlined_call_operand.hbm [shape: bf16[128,128], index: 1, kind: input, shape index: {}]   ;;  %s14198_s2 = inlined_call_operand.vmem [shape: f32[1,128], index: 2, kind: input, shape index: {}]   ;;  %s14199_s3 = inlined_call_operand.vmem [shape: f32[1,128], index: 3, kind: input, shape index: {}]   ;;  %s14200_s4 = inlined_call_operand.hbm [shape: bf16[1152,128], index: 4, kind: input, shape index: {}]   ;;  %s14201_s5 = inlined_call_operand.vmem [shape: f32[1,128], index: 5, kind: input, shape index: {}]   ;;  %s14202_s6 = inlined_call_operand.vmem [shape: f32[1,128], index: 6, kind: input, shape index: {}]   ;;  %s14203_s7 = inlined_call_operand.hbm [shape: bf16[2,8,8,128], index: 7, kind: output, shape index: {}]  }
   0x1   :  { %14211 = sst [smem:[#allocation32_spill]] %s14197_s1 }
   0x2   :  { %12 = vsyncpa [#allocation5], 0 }
   0x3   :  { %14 = vsyncpa [#allocation5 + $0x1], 0 }
   0x4   :  { %15 = vsyncpa [#allocation8], 0 }
   0x5   :  { %16 = vsyncpa [#allocation6], 0 }
   0x6   :  { %18 = vsyncpa [#allocation6 + $0x1], 0  ;;  %s11174_s24 = smov 0   ;;  %s11176_s25 = smov 0  }
   0x7   :  { %s11178_s26 = smov 0   ;;  %s11180_s27 = smov 0  }
   0x8 LB: > { %s11195_s28 = sadd.s32 4294967295, %s11122_s27   ;;  %s9190_s29 = sadd.s32 4294967294, %s11122_s27   ;;  %s11122_s27 = sphi %s11180_s27, %s14279_s27   ;;  %s11118_s26 = sphi %s11178_s26, %s14278_s26   ;;  %s11114_s25 = sphi %s11176_s25, %s14277_s25   ;;  %s11110_s24 = sphi %s11174_s24, %s14276_s24  }
   0x9   : > { %p44_p0 = scmp.ne.s32.totalorder %s11114_s25, %s11110_s24  ;;  %p14205_p1 = scmp.eq.s32.totalorder %s11195_s28, 0 }
   0xa   : > { %p194_p2 = scmp.eq.s32.totalorder %s11195_s28, 1  ;;  %p200_p3 = scmp.eq.s32.totalorder %s9190_s29, 1 }
   0xb   : > { %p11204_p4 = por %p14205_p1, %p44_p0  ;;  %p9191_p5 = scmp.ge.s32.totalorder %s11122_s27, 1 }
   0xc   : > { %p11209_p6 = por %p200_p3, %p44_p0  ;;  %p207_p7 = scmp.lt.s32.totalorder %s11122_s27, 3 }
   0xd   : > { %s14212_s30 = scalar_select %p11204_p4, 1, 0 }
   0xe   : > { %s14213_s8 = scalar_select %p11209_p6, 1, 0 }
   0xf   : > { %p11214_p8 = pnand %p9191_p5, %p207_p7  ;;  %s11124_s10 = smov [#allocation7]  }
  0x10   : > { %s219_s11 = sshll.u32 %s11124_s10, 4  ;;  %s11125_s13 = smov [#allocation9]   ;;  %s220_s11 = int_to_ptr.vmem [resolvable:$true] %s219_s11 }
  0x11   : > { %s14214_s9 = scalar_select %p11214_p8, 1, 0 }
  0x12   : > { %p10362_p9 = pneg %p11214_p8  ;;  %s238_s14 = sshll.u32 %s11125_s13, 4  ;;  %s239_s14 = int_to_ptr.vmem [resolvable:$true] %s238_s14 }
  0x13   : > { %s10985_s15 = scalar_lea.vmem %s220_s11, 1024  ;;  %p10993_p5 = scmp.lt.s32.totalorder %s220_s11, %s220_s11 }
  0x14   : > { %p11223_p11 = pnand %p10362_p9, %p14205_p1  ;;  %p10986_p13 = scmp.ne.s32.totalorder %s220_s11, %s10985_s15 }
  0x15   : > { %p10994_p7 = scmp.lt.s32.totalorder %s10985_s15, %s10985_s15 }
  0x16   : > { %p10976_p12 = pneg %p11223_p11 }
  0x17   : > { %p10995_p10 = por %p10994_p7, %p10993_p5 }
  0x18   : > { %p10988_p0 = pnand %p10986_p13, %p10976_p12 }
  0x1a   : > { %p10989_p3 = pneg %p10988_p0 }
  0x1c   : > { %p10996_p9 = pnand %p10995_p10, %p10989_p3 }
  0x1e   : > { %10999 = shalt.err (!%p10996_p9)
}
  0x1f   : > { %s14204_s16 = smov 64   ;;  %s14206_s17 = smov 4  }
  0x20   : > { %s14216_s1 = sld [smem:[#allocation32_spill]]  ;;  %s11011_s20 = scalar_lea.vmem %s239_s14, 9216 }
  0x21   : > { %p11012_p13 = scmp.ne.s32.totalorder %s239_s14, %s11011_s20  ;;  %p11019_p10 = scmp.lt.s32.totalorder %s239_s14, %s239_s14 }
  0x22   : > { %p11020_p3 = scmp.lt.s32.totalorder %s11011_s20, %s11011_s20 }
  0x23   : > { %p11014_p0 = pnand %p11012_p13, %p10976_p12 }
  0x24   : > { %p11021_p7 = por %p11020_p3, %p11019_p10 }
  0x25   : > { %p11015_p5 = pneg %p11014_p0 }
  0x26   : > { %10365 = dma.hbm_to_vmem [thread:$0]  (!%p11223_p11), %s14216_s1, 1024, %s220_s11, [#allocation8], %s14204_s16, %s14204_s16, %s14206_s17  }
  0x27   : > { %p11022_p9 = pnand %p11021_p7, %p11015_p5 }
  0x29   : > { %11025 = shalt.err (!%p11022_p9)
}
  0x2a   : > { %10368 = dma.hbm_to_vmem [thread:$0]  (!%p11223_p11), %s14200_s4, 9216, %s239_s14, [#allocation8], %s14204_s16, %s14204_s16, %s14206_s17  }
  0x2b   : > { %s11252_s23 = sadd.s32 1, %s11122_s27   ;;  %s31_s29 = sadd.s32 1, %s11118_s26 }
  0x2c   : > { %s28_s10 = ssub.s32 %s11122_s27, %s11252_s23  ;;  %p38_p12 = scmp.ne.s32.totalorder %s11118_s26, %s11114_s25 }
  0x2d   : > { %p29_p13 = scmp.eq.s32.totalorder %s28_s10, 0  ;;  %p39_p0 = scmp.eq.s32.totalorder %s11122_s27, 0 }
  0x2e   : > { %p11262_p5 = por %p194_p2, %p38_p12  ;;  %p10379_p10 = scmp.lt.s32.totalorder %s11122_s27, 2 }
  0x2f   : > { %s11268_s12 = scalar_select %p29_p13, %s11118_s26, %s31_s29  }
  0x30   : > { %s14217_s11 = scalar_select %p11262_p5, 1, 0 }
  0x31   : > { %p40_p3 = por %p39_p0, %p38_p12  ;;  %s258_s13 = sand.u32 1, %s11118_s26  }
  0x32   : > { %s9195_s15 = sshll.u32 %s258_s13, 7  ;;  %s9660_s14 = sshll.u32 %s11122_s27, 11 }
  0x33   : > { %s11275_s20 = scalar_lea.hbm %s14196_s0, %s9660_s14  ;;  %s262_s21 = scalar_lea.vmem [#allocation4], %s9195_s15 }
  0x34   : > { %s269_s22 = sshll.u32 %s262_s21, 4  ;;  %p11279_p2 = pnand %p10379_p10, %p40_p3  ;;  %s11277_s22 = int_to_ptr.vmem [resolvable:$true] %s269_s22 }
  0x35   : > { %s11283_s29 = scalar_lea.sflag [#allocation5], %s258_s13  ;;  %s11026_s16 = scalar_lea.hbm %s11275_s20, 2048 }
  0x36   : > { %p11027_p11 = scmp.ne.s32.totalorder %s11275_s20, %s11026_s16  ;;  %p11028_p7 = pneg %p11279_p2 }
  0x37   : > { %s11031_s15 = scalar_lea.hbm %s14196_s0, 4096  ;;  %p11032_p13 = scmp.lt.s32.totalorder %s11275_s20, %s14196_s0 }
  0x38   : > { %p11029_p9 = pnand %p11028_p7, %p11027_p11  ;;  %p11033_p0 = scmp.lt.s32.totalorder %s11031_s15, %s11026_s16 }
  0x3a   : > { %p11030_p12 = pneg %p11029_p9  ;;  %p11034_p10 = por %p11033_p0, %p11032_p13 }
  0x3c   : > { %p11035_p3 = pnand %p11034_p10, %p11030_p12 }
  0x3e   : > { %11038 = shalt.err (!%p11035_p3)
}
  0x3f   : > { %s11039_s13 = scalar_lea.vmem %s11277_s22, 2048  ;;  %s11128_s17 = smov [#allocation4]  }
  0x40   : > { %p11040_p1 = scmp.ne.s32.totalorder %s11277_s22, %s11039_s13  ;;  %s11044_s1 = sshll.u32 %s11128_s17, 4  ;;  %s11045_s1 = int_to_ptr.vmem [resolvable:$false] %s11044_s1 }
  0x41   : > { %s11046_s14 = scalar_lea.vmem %s11045_s1, 4096  ;;  %p11047_p9 = scmp.lt.s32.totalorder %s11277_s22, %s11045_s1 }
  0x42   : > { %p11042_p6 = pnand %p11040_p1, %p11028_p7  ;;  %p11048_p5 = scmp.lt.s32.totalorder %s11046_s14, %s11039_s13 }
  0x44   : > { %p11043_p11 = pneg %p11042_p6  ;;  %p11049_p4 = por %p11048_p5, %p11047_p9 }
  0x46   : > { %p11050_p8 = pnand %p11049_p4, %p11043_p11 }
  0x48   : > { %11053 = shalt.err (!%p11050_p8)
}
  0x49   : > { %s14219_s16 = smov 4   ;;  %s14220_s18 = smov 64  }
  0x4a   : > { %10372 = dma.hbm_to_vmem [thread:$0]  (!%p11279_p2), %s11275_s20, 2048, %s11277_s22, %s11283_s29, %s14220_s18, %s14220_s18, %s14219_s16  }
  0x4b   : > { %p14221_p1 = scmp.ne.s32.totalorder %s14214_s9, 0 }
  0x4d   : > { %281 = sbr.rel (%p14221_p1) target bundleno = 1567 (0x61f), region = 48 }
  0x52   : > { %s11310_s17 = sand.u32 1, %s11114_s25   ;;  %p14222_p4 = scmp.ne.s32.totalorder %s14212_s30, 0 }
  0x53   : > { %s9199_s1 = sshll.u32 %s11310_s17, 7  ;;  %s284_s15 = scalar_lea.sflag [#allocation5], %s11310_s17 }
  0x54   : > { %s11314_s19 = scalar_lea.vmem [#allocation4], %s9199_s1 }
  0x55   : > { %11097 = dma.done.wait (%p14222_p4), %s284_s15, 2048  }
  0x56   : > { %11099 = vsyncadd (%p14222_p4), %s284_s15, 4294965248  ;;  %p14223_p6 = scmp.eq.s32.totalorder %s11195_s28, 0 }
  0x58   : > { %11101 = dma.done.wait (%p14223_p6), [#allocation8], 10240   ;;  %p14224_p8 = pmov %p14223_p6 }
  0x59   : > { %v10423_v0 = vld [vmem:[#allocation7 + $0x38] sm:$0xff]   ;;  %v10424_v1 = vld [vmem:[#allocation7 + $0x30] sm:$0xff]   ;;  %v10425_v2 = vld [vmem:[#allocation7 + $0x28] sm:$0xff]   ;;  %vm1629_vm0 = vcmask 1040384   ;;  %vm1630_vm1 = vsmask.f32 256 }
  0x5a   : > { %11103 = vsyncadd (%p14224_p8), [#allocation8], 4294957056  ;;  %10254 = vmatprep.subr.bf16.mxu0 %v10423_v0  ;;  %v10426_v3 = vld [vmem:[#allocation7 + $0x20] sm:$0xff]   ;;  %v10427_v5 = vld [vmem:[#allocation7 + $0x18] sm:$0xff]   ;;  %vm1686_vm3 = vsmask.f32 7938 }
  0x5b   : > { %10255 = vmatpush3.bf16.msra.mxu0 %v10423_v0  ;;  %v10431_v4 = vld [vmem:[%s11314_s19] sm:$0xff]   ;;  %v10428_v6 = vld [vmem:[#allocation7 + $0x10] sm:$0xff]   ;;  %v10429_v7 = vld [vmem:[#allocation7 + $0x8] sm:$0xff]   ;;  %vm2161_vm8 = vcmask 1043456   ;;  %vm1838_vm11 = vsmask.f32 4368 }
  0x5c   : > { %10256 = vmatprep.subr.bf16.mxu0 %v10424_v1  ;;  %10270 = vmatprep.mubr.bf16.mxu0 %v10431_v4  ;;  %v10430_v8 = vld [vmem:[#allocation7] sm:$0xff]   ;;  %v10432_v9 = vld [vmem:[%s11314_s19 + $0x8] sm:$0xff]   ;;  %v10433_v10 = vld [vmem:[%s11314_s19 + $0x10] sm:$0xff]   ;;  %s9202_s20 = sshll.u32 %s11310_s17, 5  ;;  %s9757_s15 = sshll.u32 %s11195_s28, 9 }
  0x5d   : > { %v10434_v11 = vld [vmem:[%s11314_s19 + $0x18] sm:$0xff]   ;;  %v10435_v12 = vld [vmem:[%s11314_s19 + $0x20] sm:$0xff]   ;;  %v10436_v13 = vld [vmem:[%s11314_s19 + $0x28] sm:$0xff]   ;;  %s13412_s22 = scalar_lea.vmem [#allocation10], %s9202_s20  ;;  %s14150_s20 = scalar_lea.hbm %s14203_s7, %s9757_s15 }
  0x5e   : > { %v10437_v14 = vld [vmem:[%s11314_s19 + $0x30] sm:$0xff]   ;;  %v10438_v15 = vld [vmem:[%s11314_s19 + $0x38] sm:$0xff]   ;;  %v10439_v16 = vld [vmem:[%s11314_s19 + $0x40] sm:$0xff]   ;;  %s9085_s28 = scalar_lea.sflag [#allocation6], %s11310_s17  ;;  %p14273_p2 = scmp.ne.s32.totalorder %s14217_s11, 0 }
  0x5f   : > { %10257 = vmatpush3.bf16.msra.mxu0 %v10424_v1  ;;  %v10440_v17 = vld [vmem:[%s11314_s19 + $0x48] sm:$0xff]   ;;  %v10441_v18 = vld [vmem:[%s11314_s19 + $0x50] sm:$0xff]   ;;  %v10442_v19 = vld [vmem:[%s11314_s19 + $0x58] sm:$0xff]   ;;  %s11131_s29 = smov [#allocation10]  }
  0x60   : > { %10258 = vmatprep.subr.bf16.mxu0 %v10425_v2  ;;  %v10443_v20 = vld [vmem:[%s11314_s19 + $0x60] sm:$0xff]   ;;  %v10444_v21 = vld [vmem:[%s11314_s19 + $0x68] sm:$0xff]   ;;  %v10445_v22 = vld [vmem:[%s11314_s19 + $0x70] sm:$0xff]   ;;  %s11058_s21 = sshll.u32 %s11131_s29, 4  ;;  %s11059_s21 = int_to_ptr.vmem [resolvable:$false] %s11058_s21 }
  0x61   : > { %v10446_v23 = vld [vmem:[%s11314_s19 + $0x78] sm:$0xff]   ;;  %vm11341_vm2 = vmand %vm1629_vm0, %vm1630_vm1  ;;  %v1638_v25 = vld [vmem:[#allocation2 + $0x18] sm:$0x1]  ;;  %s9098_s19 = sshll.u32 %s13412_s22, 4  ;;  %s11060_s13 = scalar_lea.vmem %s11059_s21, 1024  ;;  %s14152_s19 = int_to_ptr.vmem [resolvable:$true] %s9098_s19 }
  0x62   : > { %v1639_v26 = vsel %vm11341_vm2, 0, %v1638_v25  ;;  %vm11348_vm4 = vmand %vm1629_vm0, %vm1686_vm3  ;;  %v1635_v28 = vld [vmem:[#allocation2 + $0xc] sm:$0x1]  ;;  %v1694_v30 = vld [vmem:[#allocation2 + $0x20] sm:$0x1]  ;;  %s11054_s10 = scalar_lea.vmem %s14152_s19, 512  ;;  %p11061_p13 = scmp.lt.s32.totalorder %s14152_s19, %s11059_s21 }
  0x63   : > { %10259 = vmatpush3.bf16.msra.mxu0 %v10425_v2  ;;  %1640 = vst [vmem:[#allocation2 + $0x18] sm:$0x1] %v1639_v26  ;;  %v1636_v29 = vsel %vm11341_vm2, 0, %v1635_v28  ;;  %v1695_v31 = vsel %vm11348_vm4, 0, %v1694_v30  ;;  %v1691_v32 = vld [vmem:[#allocation2 + $0x14] sm:$0x1]  ;;  %vm11543_vm13 = vmand %vm2161_vm8, %vm1686_vm3  ;;  %p11055_p5 = scmp.ne.s32.totalorder %s14152_s19, %s11054_s10  ;;  %p11062_p0 = scmp.lt.s32.totalorder %s11060_s13, %s11054_s10 }
  0x64   : > { %10260 = vmatprep.subr.bf16.mxu0 %v10426_v3  ;;  %1637 = vst [vmem:[#allocation2 + $0xc] sm:$0x1] %v1636_v29  ;;  %1696 = vst [vmem:[#allocation2 + $0x20] sm:$0x1] %v1695_v31  ;;  %v1692_v33 = vsel %vm11348_vm4, 0, %v1691_v32 }
  0x65   : > { %1693 = vst [vmem:[#allocation2 + $0x14] sm:$0x1] %v1692_v33  ;;  %v1644_v34 = vld [vmem:[#allocation2 + $0x30] sm:$0x1]  ;;  %v1641_v36 = vld [vmem:[#allocation2 + $0x24] sm:$0x1]  ;;  %vm11554_vm14 = vmor %vm1630_vm1, %vm1838_vm11  ;;  %p11056_p7 = pnand %p11055_p5, %p14273_p2  ;;  %p11063_p10 = por %p11062_p0, %p11061_p13 }
  0x66   : > { %v1645_v35 = vsel %vm11341_vm2, 0, %v1644_v34  ;;  %v1642_v37 = vsel %vm11341_vm2, 0, %v1641_v36  ;;  %v1700_v38 = vld [vmem:[#allocation2 + $0x38] sm:$0x1]  ;;  %v1697_v40 = vld [vmem:[#allocation2 + $0x2c] sm:$0x1] }
  0x67   : > { %10261 = vmatpush3.bf16.msra.mxu0 %v10426_v3  ;;  %1646 = vst [vmem:[#allocation2 + $0x30] sm:$0x1] %v1645_v35  ;;  %1643 = vst [vmem:[#allocation2 + $0x24] sm:$0x1] %v1642_v37  ;;  %v1701_v39 = vsel %vm11348_vm4, 0, %v1700_v38  ;;  %v1698_v41 = vsel %vm11348_vm4, 0, %v1697_v40  ;;  %p11057_p12 = pneg %p11056_p7 }
  0x68   : > { %10262 = vmatprep.subr.bf16.mxu0 %v10427_v5  ;;  %1702 = vst [vmem:[#allocation2 + $0x38] sm:$0x1] %v1701_v39  ;;  %1699 = vst [vmem:[#allocation2 + $0x2c] sm:$0x1] %v1698_v41  ;;  %v1650_v42 = vld [vmem:[#allocation2 + $0x48] sm:$0x1] }
  0x69   : > { %v1651_v43 = vsel %vm11341_vm2, 0, %v1650_v42  ;;  %v1647_v44 = vld [vmem:[#allocation2 + $0x3c] sm:$0x1]  ;;  %v11373_v46 = vld [vmem:[%s14198_s2] ss:$0 sm:$0xff]  ;;  %p11064_p3 = pnand %p11063_p10, %p11057_p12 }
  0x6a   : > { %1652 = vst [vmem:[#allocation2 + $0x48] sm:$0x1] %v1651_v43  ;;  %v1648_v45 = vsel %vm11341_vm2, 0, %v1647_v44  ;;  %v11378_v48 = vld [vmem:[%s14199_s3] ss:$0 sm:$0xff] }
  0x6b   : > { %10263 = vmatpush3.bf16.msra.mxu0 %v10427_v5  ;;  %1649 = vst [vmem:[#allocation2 + $0x3c] sm:$0x1] %v1648_v45  ;;  %v1706_v49 = vld [vmem:[#allocation2 + $0x50] sm:$0x1] }
  0x6c   : > { %10264 = vmatprep.subr.bf16.mxu0 %v10428_v6  ;;  %v1707_v51 = vsel %vm11348_vm4, 0, %v1706_v49 }
  0x6d   : > { %1708 = vst [vmem:[#allocation2 + $0x50] sm:$0x1] %v1707_v51 }
  0x6f   : > { %10265 = vmatpush3.bf16.msra.mxu0 %v10428_v6 }
  0x70   : > { %10266 = vmatprep.subr.bf16.mxu0 %v10429_v7 }
  0x73   : > { %10267 = vmatpush3.bf16.msra.mxu0 %v10429_v7 }
  0x74   : > { %10268 = vmatprep.subr.bf16.mxu0 %v10430_v8 }
  0x77   : > { %10269 = vmatpush3.bf16.msra.mxu0 %v10430_v8 }
  0x7a   : > { %10271 = vmatmul.mubr.bf16.vlgmr.msra.gmra.mxu0 %v10432_v9 }
  0x7b   : > { %10274 = vmatprep.mubr.bf16.mxu0 %v10433_v10 }
  0x82   : > { %10275 = vmatmul.mubr.bf16.gmra.mxu0 %v10434_v11 }
  0x83   : > { %10278 = vmatprep.mubr.bf16.mxu0 %v10435_v12 }
  0x8a   : > { %10279 = vmatmul.mubr.bf16.gmra.mxu0 %v10436_v13 }
  0x8b   : > { %10282 = vmatprep.mubr.bf16.mxu0 %v10437_v14 }
  0x92   : > { %10283 = vmatmul.mubr.bf16.gmra.mxu0 %v10438_v15 }
  0x93   : > { %10286 = vmatprep.mubr.bf16.mxu0 %v10439_v16 }
  0x9a   : > { %10287 = vmatmul.mubr.bf16.gmra.mxu0 %v10440_v17 }
  0x9b   : > { %10290 = vmatprep.mubr.bf16.mxu0 %v10441_v18 }
  0xa2   : > { %10291 = vmatmul.mubr.bf16.gmra.mxu0 %v10442_v19 }
  0xa3   : > { %10294 = vmatprep.mubr.bf16.mxu0 %v10443_v20 }
  0xaa   : > { %10295 = vmatmul.mubr.bf16.gmra.mxu0 %v10444_v21 }
  0xab   : > { %10298 = vmatprep.mubr.bf16.mxu0 %v10445_v22 }
  0xb2   : > { %10299 = vmatmul.mubr.bf16.gmra.mxu0 %v10446_v23 }
 0x13a   : > { %v10272_v47 = vpop.f32.mrf.mxu0 }
 0x13b   : > { %v689_v50 = vmul.f32 %v10272_v47, %v11373_v46 }
 0x13c   : > { %v553_v52 = vpop.f32.mrf.mxu0 }
 0x13d   : > { %v728_v53 = vadd.f32 %v11378_v48, %v689_v50  ;;  %v687_v54 = vmul.f32 %v11373_v46, %v553_v52 }
 0x13e   : > { %v10273_v55 = vpop.f32.mrf.mxu0 }
 0x13f   : > { %v11385_v56 = vmul.f32 0.70710677, %v728_v53  ;;  %v726_v57 = vadd.f32 %v11378_v48, %v687_v54  ;;  %v690_v58 = vmul.f32 %v10273_v55, %v11373_v46  ;;  %v11408_v32 = vmul.f32 0.5, %v728_v53 }
 0x140   : > { %v556_v59 = vpop.f32.mrf.mxu0 }
 0x141   : > { %v824_v60 = vand.u32 2147483647, %v11385_v56  ;;  %v11390_v61 = vmul.f32 0.70710677, %v726_v57  ;;  %v729_v62 = vadd.f32 %v11378_v48, %v690_v58  ;;  %v688_v63 = vmul.f32 %v11373_v46, %v556_v59 }
 0x142   : > { %v10276_v0 = vpop.f32.mrf.mxu0  ;;  %v11412_v36 = vmul.f32 0.5, %v726_v57  ;;  %vm1464_vm5 = vcmp.lt.f32.partialorder %v11385_v56, 0.0 }
 0x143   : > { %v856_v1 = vmul.f32 0.3275911, %v824_v60  ;;  %v822_v2 = vand.u32 2147483647, %v11390_v61  ;;  %v11395_v3 = vmul.f32 0.70710677, %v729_v62  ;;  %v727_v4 = vadd.f32 %v11378_v48, %v688_v63 }
 0x144   : > { %v569_v5 = vpop.f32.mrf.mxu0  ;;  %v1272_v7 = vsub.f32 0.0, %v824_v60  ;;  %v693_v9 = vmul.f32 %v10276_v0, %v11373_v46  ;;  %v11417_v40 = vmul.f32 0.5, %v729_v62  ;;  %vm1462_vm6 = vcmp.lt.f32.partialorder %v11390_v61, 0.0 }
 0x145   : > { %v888_v6 = vadd.f32 1.0, %v856_v1  ;;  %v854_v8 = vmul.f32 0.3275911, %v822_v2  ;;  %v1270_v10 = vsub.f32 0.0, %v822_v2  ;;  %v825_v11 = vand.u32 2147483647, %v11395_v3 }
 0x146   : > { %v11400_v12 = vmul.f32 0.70710677, %v727_v4  ;;  %v10277_v14 = vpop.f32.mrf.mxu0  ;;  %v1304_v18 = vmul.f32 %v1272_v7, %v824_v60  ;;  %v732_v19 = vadd.f32 %v11378_v48, %v693_v9  ;;  %v691_v20 = vmul.f32 %v11373_v46, %v569_v5 }
 0x147   : > { %10709 = vrcp.f32 %v888_v6  ;;  %v886_v13 = vadd.f32 1.0, %v854_v8  ;;  %v857_v15 = vmul.f32 0.3275911, %v825_v11  ;;  %v1273_v16 = vsub.f32 0.0, %v825_v11 }
 0x148   : > { %v823_v17 = vand.u32 2147483647, %v11400_v12  ;;  %v1302_v21 = vmul.f32 %v1270_v10, %v822_v2  ;;  %v11405_v26 = vmul.f32 0.70710677, %v732_v19  ;;  %v572_v28 = vpop.f32.mrf.mxu0  ;;  %v730_v31 = vadd.f32 %v11378_v48, %v691_v20 }
 0x149   : > { %10711 = vrcp.f32 %v886_v13  ;;  %v889_v22 = vadd.f32 1.0, %v857_v15  ;;  %v1305_v25 = vmul.f32 %v1273_v16, %v825_v11  ;;  %v1338_v33 = vmul.f32 1.442695, %v1304_v18 }
 0x14a   : > { %v855_v23 = vmul.f32 0.3275911, %v823_v17  ;;  %v1271_v30 = vsub.f32 0.0, %v823_v17  ;;  %v828_v34 = vand.u32 2147483647, %v11405_v26  ;;  %v694_v35 = vmul.f32 %v10277_v14, %v11373_v46  ;;  %v10280_v49 = vpop.f32.mrf.mxu0 }
 0x14b   : > { %10713 = vrcp.f32 %v889_v22  ;;  %v1334_v37 = vmul.f32 1.442695, %v1302_v21  ;;  %v11414_v38 = vmul.f32 0.70710677, %v730_v31  ;;  %v692_v39 = vmul.f32 %v11373_v46, %v572_v28 }
 0x14c   : > { %v887_v29 = vadd.f32 1.0, %v855_v23  ;;  %v1340_v41 = vmul.f32 1.442695, %v1305_v25  ;;  %v860_v42 = vmul.f32 0.3275911, %v828_v34  ;;  %v1303_v43 = vmul.f32 %v1271_v30, %v823_v17  ;;  %v585_v23 = vpop.f32.mrf.mxu0 }
 0x14d   : > { %v826_v44 = vand.u32 2147483647, %v11414_v38  ;;  %v11421_v45 = vadd.f32 %v11378_v48, %v694_v35  ;;  %v11424_v47 = vadd.f32 %v11378_v48, %v692_v39  ;;  %v11426_v50 = vmul.f32 0.5, %v727_v4 }
 0x14e   : > { %10715 = vrcp.f32 %v887_v29  ;;  %v892_v51 = vadd.f32 1.0, %v860_v42  ;;  %v1276_v52 = vsub.f32 0.0, %v828_v34  ;;  %v11431_v57 = vmul.f32 0.5, %v732_v19 }
 0x14f   : > { %10717 = vpow2.f32 %v1338_v33  ;;  %v858_v53 = vmul.f32 0.3275911, %v826_v44  ;;  %v1274_v54 = vsub.f32 0.0, %v826_v44  ;;  %v11429_v55 = vmul.f32 0.70710677, %v11421_v45 }
 0x150   : > { %10719 = vpow2.f32 %v1334_v37  ;;  %v11434_v58 = vmul.f32 0.70710677, %v11424_v47  ;;  %v697_v59 = vmul.f32 %v10280_v49, %v11373_v46  ;;  %v1336_v62 = vmul.f32 1.442695, %v1303_v43 }
 0x151   : > { %10721 = vrcp.f32 %v892_v51  ;;  %v890_v63 = vadd.f32 1.0, %v858_v53  ;;  %v829_v0 = vand.u32 2147483647, %v11429_v55  ;;  %v1308_v2 = vmul.f32 %v1276_v52, %v828_v34 }
 0x152   : > { %10723 = vpow2.f32 %v1340_v41  ;;  %v11441_v4 = vmul.f32 0.5, %v730_v31  ;;  %v827_v5 = vand.u32 2147483647, %v11434_v58  ;;  %v1306_v6 = vmul.f32 %v1274_v54, %v826_v44 }
 0x153   : > { %10725 = vrcp.f32 %v890_v63  ;;  %v861_v7 = vmul.f32 0.3275911, %v829_v0  ;;  %v1277_v8 = vsub.f32 0.0, %v829_v0  ;;  %v11447_v14 = vadd.f32 %v11378_v48, %v697_v59 }
 0x154   : > { %v11437_v60 = vpop.eup %10709  ;;  %v859_v11 = vmul.f32 0.3275911, %v827_v5  ;;  %v1275_v13 = vsub.f32 0.0, %v827_v5  ;;  %10727 = vpow2.f32 %v1336_v62  ;;  %v1346_v20 = vmul.f32 1.442695, %v1308_v2 }
 0x155   : > { %v984_v1 = vmul.f32 1.0614054, %v11437_v60  ;;  %v893_v16 = vadd.f32 1.0, %v861_v7  ;;  %v1309_v17 = vmul.f32 %v1277_v8, %v829_v0  ;;  %v1342_v29 = vmul.f32 1.442695, %v1306_v6  ;;  %v10281_v6 = vpop.f32.mrf.mxu0 }
 0x156   : > { %v11444_v9 = vpop.eup %10711  ;;  %v891_v21 = vadd.f32 1.0, %v859_v11  ;;  %v1307_v22 = vmul.f32 %v1275_v13, %v827_v5  ;;  %v11455_v33 = vmul.f32 0.70710677, %v11447_v14  ;;  %v695_v41 = vmul.f32 %v11373_v46, %v585_v23 }
 0x157   : > { %v1016_v10 = vadd.f32 -1.4531521, %v984_v1  ;;  %v982_v15 = vmul.f32 1.0614054, %v11444_v9  ;;  %10729 = vrcp.f32 %v893_v16  ;;  %v1348_v31 = vmul.f32 1.442695, %v1309_v17 }
 0x158   : > { %v11450_v18 = vpop.eup %10713  ;;  %10731 = vrcp.f32 %v891_v21  ;;  %v1344_v39 = vmul.f32 1.442695, %v1307_v22  ;;  %v832_v44 = vand.u32 2147483647, %v11455_v33  ;;  %v11466_v53 = vadd.f32 %v11378_v48, %v695_v41 }
 0x159   : > { %v1048_v19 = vmul.f32 %v11437_v60, %v1016_v10  ;;  %v1014_v25 = vadd.f32 -1.4531521, %v982_v15  ;;  %v985_v28 = vmul.f32 1.0614054, %v11450_v18  ;;  %10733 = vpow2.f32 %v1346_v20 }
 0x15a   : > { %10735 = vpow2.f32 %v1342_v29  ;;  %v864_v63 = vmul.f32 0.3275911, %v832_v44  ;;  %v1280_v5 = vsub.f32 0.0, %v832_v44  ;;  %vm1465_vm7 = vcmp.lt.f32.partialorder %v11395_v3, 0.0 }
 0x15b   : > { %v1080_v30 = vadd.f32 1.4214138, %v1048_v19  ;;  %v11457_v34 = vpop.eup %10715  ;;  %v1046_v35 = vmul.f32 %v11444_v9, %v1014_v25  ;;  %v1017_v37 = vadd.f32 -1.4531521, %v985_v28  ;;  %10737 = vpow2.f32 %v1348_v31 }
 0x15c   : > { %v983_v43 = vmul.f32 1.0614054, %v11457_v34  ;;  %v10718_v49 = vpop.eup %10717  ;;  %10739 = vpow2.f32 %v1344_v39  ;;  %v896_v13 = vadd.f32 1.0, %v864_v63  ;;  %v1312_v17 = vmul.f32 %v1280_v5, %v832_v44 }
 0x15d   : > { %v1112_v42 = vmul.f32 %v11437_v60, %v1080_v30  ;;  %v1078_v51 = vadd.f32 1.4214138, %v1046_v35  ;;  %v1049_v52 = vmul.f32 %v11450_v18, %v1017_v37  ;;  %v10720_v54 = vpop.eup %10719  ;;  %v11476_v19 = vmul.f32 0.70710677, %v11466_v53 }
 0x15e   : > { %v1015_v62 = vadd.f32 -1.4531521, %v983_v43  ;;  %v11468_v0 = vpop.eup %10721  ;;  %v11481_v25 = vmul.f32 %v10281_v6, %v11373_v46  ;;  %10741 = vrcp.f32 %v896_v13  ;;  %vm1463_vm9 = vcmp.lt.f32.partialorder %v11400_v12, 0.0 }
 0x15f   : > { %v1144_v59 = vadd.f32 -0.28449672, %v1112_v42  ;;  %v1110_v1 = vmul.f32 %v11444_v9, %v1078_v51  ;;  %v1081_v2 = vadd.f32 1.4214138, %v1049_v52  ;;  %v10724_v7 = vpop.eup %10723  ;;  %v988_v11 = vmul.f32 1.0614054, %v11468_v0 }
 0x160   : > { %v1047_v10 = vmul.f32 %v11457_v34, %v1015_v62  ;;  %v11478_v20 = vpop.eup %10725  ;;  %v11490_v41 = vand.u32 2147483647, %v11476_v19  ;;  %v11493_v51 = vmul.f32 1.442695, %v1312_v17  ;;  %vm1468_vm10 = vcmp.lt.f32.partialorder %v11405_v26, 0.0 }
 0x161   : > { %v1176_v8 = vmul.f32 %v11437_v60, %v1144_v59  ;;  %v1142_v15 = vadd.f32 -0.28449672, %v1110_v1  ;;  %v1113_v16 = vmul.f32 %v11450_v18, %v1081_v2  ;;  %v1020_v23 = vadd.f32 -1.4531521, %v988_v11  ;;  %v10728_v31 = vpop.eup %10727  ;;  %v2174_v26 = vld [vmem:[#allocation2 + $0x20] sm:$0x1] }
 0x162   : > { %v1079_v22 = vadd.f32 1.4214138, %v1047_v10  ;;  %v986_v30 = vmul.f32 1.0614054, %v11478_v20  ;;  %v862_v63 = vmul.f32 0.3275911, %v11490_v41 }
 0x163   : > { %v1208_v21 = vadd.f32 0.2548296, %v1176_v8  ;;  %v1174_v28 = vmul.f32 %v11444_v9, %v1142_v15  ;;  %v1145_v29 = vadd.f32 -0.28449672, %v1113_v16  ;;  %v1052_v39 = vmul.f32 %v11468_v0, %v1020_v23 }
 0x164   : > { %v1111_v37 = vmul.f32 %v11457_v34, %v1079_v22  ;;  %v1018_v44 = vadd.f32 -1.4531521, %v986_v30  ;;  %v11495_v52 = vpop.eup %10729  ;;  %v11509_v30 = vadd.f32 1.0, %v862_v63  ;;  %vm1466_vm12 = vcmp.lt.f32.partialorder %v11414_v38, 0.0 }
 0x165   : > { %v1240_v35 = vmul.f32 %v11437_v60, %v1208_v21  ;;  %v1206_v42 = vadd.f32 0.2548296, %v1174_v28  ;;  %v1177_v43 = vmul.f32 %v11450_v18, %v1145_v29  ;;  %v1084_v60 = vadd.f32 1.4214138, %v1052_v39  ;;  %v11499_v1 = vpop.eup %10731 }
 0x166   : > { %v1143_v62 = vadd.f32 -0.28449672, %v1111_v37  ;;  %v1050_v6 = vmul.f32 %v11478_v20, %v1018_v44  ;;  %v989_v8 = vmul.f32 1.0614054, %v11495_v52  ;;  %v987_v13 = vmul.f32 1.0614054, %v11499_v1  ;;  %v10734_v15 = vpop.eup %10733 }
 0x167   : > { %v1400_v59 = vmul.f32 %v10718_v49, %v1240_v35  ;;  %v1238_v2 = vmul.f32 %v11444_v9, %v1206_v42  ;;  %v1209_v5 = vadd.f32 0.2548296, %v1177_v43  ;;  %v1116_v11 = vmul.f32 %v11468_v0, %v1084_v60  ;;  %v10736_v22 = vpop.eup %10735 }
 0x168   : > { %v1175_v49 = vmul.f32 %v11457_v34, %v1143_v62  ;;  %v1082_v21 = vadd.f32 1.4214138, %v1050_v6  ;;  %v1021_v9 = vadd.f32 -1.4531521, %v989_v8  ;;  %v11511_v35 = vpop.eup %10737  ;;  %v1019_v62 = vadd.f32 -1.4531521, %v987_v13 }
 0x169   : > { %v1432_v10 = vsub.f32 1.0, %v1400_v59  ;;  %v1398_v16 = vmul.f32 %v10720_v54, %v1238_v2  ;;  %v1241_v17 = vmul.f32 %v11450_v18, %v1209_v5  ;;  %v1148_v29 = vadd.f32 -0.28449672, %v1116_v11  ;;  %v11516_v18 = vpop.eup %10739 }
 0x16a   : > { %v1207_v28 = vadd.f32 0.2548296, %v1175_v49  ;;  %v1114_v42 = vmul.f32 %v11478_v20, %v1082_v21  ;;  %v1053_v54 = vmul.f32 %v11495_v52, %v1021_v9  ;;  %v1051_v49 = vmul.f32 %v11499_v1, %v1019_v62 }
 0x16b   : > { %v1496_v23 = vsub.f32 0.0, %v1432_v10  ;;  %v1430_v37 = vsub.f32 1.0, %v1398_v16  ;;  %v1401_v39 = vmul.f32 %v10724_v7, %v1241_v17  ;;  %v1180_v59 = vmul.f32 %v11468_v0, %v1148_v29  ;;  %v11528_v13 = vpop.eup %10741 }
 0x16c   : > { %v1239_v44 = vmul.f32 %v11457_v34, %v1207_v28  ;;  %v1146_v7 = vadd.f32 -0.28449672, %v1114_v42  ;;  %v1085_v8 = vadd.f32 1.4214138, %v1053_v54  ;;  %10743 = vrcp.f32 %v11509_v30 }
 0x16d   : > { %v1528_v43 = vsel %vm1464_vm5, %v1496_v23, %v1432_v10  ;;  %v1494_v63 = vsub.f32 0.0, %v1430_v37  ;;  %v1433_v2 = vsub.f32 1.0, %v1401_v39  ;;  %v1212_v6 = vadd.f32 0.2548296, %v1180_v59 }
 0x16e   : > { %v1560_v60 = vadd.f32 1.0, %v1528_v43  ;;  %v1399_v5 = vmul.f32 %v10728_v31, %v1239_v44  ;;  %v1178_v34 = vmul.f32 %v11478_v20, %v1146_v7  ;;  %v1117_v21 = vmul.f32 %v11495_v52, %v1085_v8 }
 0x16f   : > { %v1526_v56 = vsel %vm1462_vm6, %v1494_v63, %v1430_v37  ;;  %v1497_v10 = vsub.f32 0.0, %v1433_v2  ;;  %v1244_v31 = vmul.f32 %v11468_v0, %v1212_v6  ;;  %v1083_v23 = vadd.f32 1.4214138, %v1051_v49 }
 0x170   : > { %v1592_v11 = vmul.f32 %v1560_v60, %v11408_v32  ;;  %v1558_v16 = vadd.f32 1.0, %v1526_v56  ;;  %v1431_v17 = vsub.f32 1.0, %v1399_v5  ;;  %v1210_v61 = vadd.f32 0.2548296, %v1178_v34 }
 0x171   : > { %v1529_v32 = vsel %vm1465_vm7, %v1497_v10, %v1433_v2  ;;  %v1404_v39 = vmul.f32 %v10734_v15, %v1244_v31  ;;  %v1149_v0 = vadd.f32 -0.28449672, %v1117_v21  ;;  %10745 = vpow2.f32 %v11493_v51 }
 0x172   : > { %v9663_v9 = vpack.c.bf16 %v1592_v11, %v1592_v11  ;;  %v1590_v28 = vmul.f32 %v1558_v16, %v11412_v36  ;;  %v1561_v29 = vadd.f32 1.0, %v1529_v32  ;;  %v1495_v37 = vsub.f32 0.0, %v1431_v17 }
 0x173   : > { %v1242_v43 = vmul.f32 %v11478_v20, %v1210_v61  ;;  %v1436_v62 = vsub.f32 1.0, %v1404_v39  ;;  %v1181_v2 = vmul.f32 %v11495_v52, %v1149_v0  ;;  %v2170_v20 = vld [vmem:[#allocation2 + $0x18] sm:$0xf]  ;;  %vm1469_vm15 = vcmp.lt.f32.partialorder %v11429_v55, 0.0 }
 0x174   : > { %v1858_v42 = vshrl.u32 %v9663_v9, 16  ;;  %v1861_v54 = vshll.u32 %v9663_v9, 16  ;;  %v9661_v44 = vpack.c.bf16 %v1590_v28, %v1590_v28  ;;  %v1593_v59 = vmul.f32 %v1561_v29, %v11417_v40 }
 0x175   : > { %v1527_v3 = vsel %vm1463_vm9, %v1495_v37, %v1431_v17  ;;  %v1402_v36 = vmul.f32 %v10736_v22, %v1242_v43  ;;  %v1500_v40 = vsub.f32 0.0, %v1436_v62  ;;  %v2163_v17 = vld [vmem:[#allocation2 + $0xc] sm:$0xf]  ;;  %v1213_v29 = vadd.f32 0.2548296, %v1181_v2 }
 0x176   : > { %v1860_v60 = vrot.slane %v1858_v42, 7  ;;  %v1559_v63 = vadd.f32 1.0, %v1527_v3  ;;  %v1841_v7 = vshrl.u32 %v9661_v44, 16  ;;  %v1844_v5 = vshll.u32 %v9661_v44, 16 }
 0x177   : > { %v9664_v6 = vpack.c.bf16 %v1593_v59, %v1593_v59  ;;  %v1434_v11 = vsub.f32 1.0, %v1402_v36  ;;  %v1532_v34 = vsel %vm1468_vm10, %v1500_v40, %v1436_v62  ;;  %v1278_v55 = vsub.f32 0.0, %v11490_v41 }
 0x178   : > { %v1863_v8 = vor.u32 %v1861_v54, %v1860_v60  ;;  %v1864_v12 = vrot.slane %v1860_v60, 4  ;;  %v1591_v49 = vmul.f32 %v1559_v63, %v11426_v50  ;;  %v1843_v56 = vrot.slane %v1841_v7, 7 }
 0x179   : > { %v1866_v22 = vshrl.u32 %v9664_v6, 16  ;;  %v1869_v10 = vshll.u32 %v9664_v6, 16  ;;  %v1564_v21 = vadd.f32 1.0, %v1532_v34  ;;  %v1498_v9 = vsub.f32 0.0, %v1434_v11 }
 0x17a   : > { %v2171_v16 = vsel %vm11543_vm13, %v1863_v8, %v2170_v20  ;;  %v9662_v31 = vpack.c.bf16 %v1591_v49, %v1591_v49  ;;  %v1846_v32 = vor.u32 %v1844_v5, %v1843_v56  ;;  %v1847_v61 = vrot.slane %v1843_v56, 4  ;;  %v2184_v56 = vld [vmem:[#allocation2 + $0x30] sm:$0xf] }
 0x17b   : > { %2172 = vst [vmem:[#allocation2 + $0x18] sm:$0xf] %v2171_v16  ;;  %v1868_v28 = vrot.slane %v1866_v22, 7  ;;  %v1596_v42 = vmul.f32 %v1564_v21, %v11431_v57  ;;  %v1530_v54 = vsel %vm1466_vm12, %v1498_v9, %v1434_v11  ;;  %v1245_v60 = vmul.f32 %v11495_v52, %v1213_v29  ;;  %v2167_v57 = vld [vmem:[#allocation2 + $0x14] sm:$0x1]  ;;  %v588_v29 = vpop.f32.mrf.mxu0 }
 0x17c   : > { %v1849_v37 = vshrl.u32 %v9662_v31, 16  ;;  %v1852_v39 = vshll.u32 %v9662_v31, 16  ;;  %v2164_v43 = vsel %vm11543_vm13, %v1846_v32, %v2163_v17  ;;  %v1562_v59 = vadd.f32 1.0, %v1530_v54  ;;  %v2177_v32 = vld [vmem:[#allocation2 + $0x24] sm:$0xf] }
 0x17d   : > { %v1871_v0 = vor.u32 %v1869_v10, %v1868_v28  ;;  %v1873_v44 = vrot.slane %v1868_v28, 4  ;;  %2165 = vst [vmem:[#allocation2 + $0xc] sm:$0xf] %v2164_v43  ;;  %v9667_v62 = vpack.c.bf16 %v1596_v42, %v1596_v42  ;;  %v1115_v63 = vmul.f32 %v11499_v1, %v1083_v23 }
 0x17e   : > { %v1851_v3 = vrot.slane %v1849_v37, 7  ;;  %v1594_v2 = vmul.f32 %v1562_v59, %v11441_v4  ;;  %v992_v20 = vmul.f32 1.0614054, %v11528_v13  ;;  %v1405_v23 = vmul.f32 %v11511_v35, %v1245_v60  ;;  %v10447_v60 = vld [vmem:[#allocation9 + $0x78] sm:$0xff]  }
 0x17f   : > { %v1872_v36 = vsel %vm11554_vm14, %v1864_v12, %v1871_v0  ;;  %v2175_v38 = vsel %vm11341_vm2, %v1873_v44, %v2174_v26  ;;  %v1892_v6 = vshrl.u32 %v9667_v62, 16  ;;  %v1895_v40 = vshll.u32 %v9667_v62, 16  ;;  %9782 = vmatprep.subr.bf16.mxu1 %v10447_v60 }
 0x180   : > { %2173 = vst [vmem:[#allocation2 + $0x1c] sm:$0xf] %v1872_v36  ;;  %2176 = vst [vmem:[#allocation2 + $0x20] sm:$0x1] %v2175_v38  ;;  %v1854_v7 = vor.u32 %v1852_v39, %v1851_v3  ;;  %v1856_v5 = vrot.slane %v1851_v3, 4  ;;  %v9665_v52 = vpack.c.bf16 %v1594_v2, %v1594_v2  ;;  %v1437_v10 = vsub.f32 1.0, %v1405_v23  ;;  %v10284_v2 = vpop.f32.mrf.mxu0 }
 0x181   : > { %v1147_v8 = vadd.f32 -0.28449672, %v1115_v63  ;;  %v1024_v49 = vadd.f32 -1.4531521, %v992_v20  ;;  %v11576_v4 = vrot.slane %v1892_v6, 7  ;;  %v11590_v28 = vadd.f32 %v11378_v48, %v11481_v25 }
 0x182   : > { %v1855_v12 = vsel %vm11554_vm14, %v1847_v61, %v1854_v7  ;;  %v2168_v11 = vsel %vm11341_vm2, %v1856_v5, %v2167_v57  ;;  %v1875_v22 = vshrl.u32 %v9665_v52, 16  ;;  %v1878_v31 = vshll.u32 %v9665_v52, 16  ;;  %v1703_v39 = vld [vmem:[#allocation2 + $0x44] sm:$0x1]  ;;  %v1656_v3 = vld [vmem:[#allocation2 + $0x60] sm:$0x1] }
 0x183   : > { %2166 = vst [vmem:[#allocation2 + $0x10] sm:$0xf] %v1855_v12  ;;  %2169 = vst [vmem:[#allocation2 + $0x14] sm:$0x1] %v2168_v11  ;;  %v1179_v34 = vmul.f32 %v11499_v1, %v1147_v8  ;;  %v1897_v35 = vor.u32 %v1895_v40, %v11576_v4  ;;  %v1056_v16 = vmul.f32 %v11528_v13, %v1024_v49  ;;  %v1501_v21 = vsub.f32 0.0, %v1437_v10  ;;  %v11622_v49 = vpop.eup %10743 }
 0x184   : > { %v11583_v17 = vrot.slane %v1875_v22, 7  ;;  %v765_v42 = vmul.f32 0.5, %v11421_v45  ;;  %v11601_v44 = vmul.f32 0.70710677, %v11590_v28  ;;  %v696_v59 = vmul.f32 %v11373_v46, %v588_v29 }
 0x185   : > { %v1211_v9 = vadd.f32 0.2548296, %v1179_v34  ;;  %v2185_v30 = vsel %vm11543_vm13, %v1897_v35, %v2184_v56  ;;  %v1088_v61 = vadd.f32 1.4214138, %v1056_v16  ;;  %v1533_v26 = vsel %vm1469_vm15, %v1501_v21, %v1437_v10  ;;  %v10746_v35 = vpop.eup %10745  ;;  %v2188_v16 = vld [vmem:[#allocation2 + $0x38] sm:$0x1]  ;;  %v601_v21 = vpop.f32.mrf.mxu0 }
 0x186   : > { %2186 = vst [vmem:[#allocation2 + $0x30] sm:$0xf] %v2185_v30  ;;  %v1880_v51 = vor.u32 %v1878_v31, %v11583_v17  ;;  %v1565_v54 = vadd.f32 1.0, %v1533_v26  ;;  %v1704_v45 = vsel %vm11348_vm4, 0, %v1703_v39  ;;  %v11607_v36 = vand.u32 2147483647, %v11601_v44 }
 0x187   : > { %v1243_v37 = vmul.f32 %v11499_v1, %v1211_v9  ;;  %v1120_v43 = vmul.f32 %v11528_v13, %v1088_v61  ;;  %v11610_v38 = vadd.f32 %v11378_v48, %v696_v59  ;;  %1705 = vst [vmem:[#allocation2 + $0x44] sm:$0x1] %v1704_v45  ;;  %v1657_v20 = vsel %vm11341_vm2, 0, %v1656_v3 }
 0x188   : > { %v2178_v0 = vsel %vm11543_vm13, %v1880_v51, %v2177_v32  ;;  %v1597_v1 = vmul.f32 %v1565_v54, %v765_v42  ;;  %v763_v7 = vmul.f32 0.5, %v11424_v47  ;;  %v1310_v6 = vmul.f32 %v1278_v55, %v11490_v41  ;;  %1658 = vst [vmem:[#allocation2 + $0x60] sm:$0x1] %v1657_v20 }
 0x189   : > { %v1403_v25 = vmul.f32 %v11516_v18, %v1243_v37  ;;  %2179 = vst [vmem:[#allocation2 + $0x24] sm:$0xf] %v2178_v0  ;;  %v1152_v62 = vadd.f32 -0.28449672, %v1120_v43  ;;  %v865_v40 = vmul.f32 0.3275911, %v11607_v36  ;;  %v701_v47 = vmul.f32 %v10284_v2, %v11373_v46 }
 0x18a   : > { %v9668_v18 = vpack.c.bf16 %v1597_v1, %v1597_v1  ;;  %vm1467_vm0 = vcmp.lt.f32.partialorder %v11434_v58, 0.0  ;;  %v11620_v8 = vmul.f32 0.70710677, %v11610_v38  ;;  %v990_v34 = vmul.f32 1.0614054, %v11622_v49 }
 0x18b   : > { %v1435_v63 = vsub.f32 1.0, %v1403_v25  ;;  %v1184_v57 = vmul.f32 %v11528_v13, %v1152_v62  ;;  %v897_v56 = vadd.f32 1.0, %v865_v40  ;;  %v1350_v58 = vmul.f32 1.442695, %v1310_v6  ;;  %v1653_v0 = vld [vmem:[#allocation2 + $0x54] sm:$0x1] }
 0x18c   : > { %v1900_v52 = vshrl.u32 %v9668_v18, 16  ;;  %v1903_v12 = vshll.u32 %v9668_v18, 16  ;;  %v11628_v31 = vand.u32 2147483647, %v11620_v8  ;;  %v1898_v9 = vrot.slane %v11576_v4, 4 }
 0x18d   : > { %v1499_v5 = vsub.f32 0.0, %v1435_v63  ;;  %v1216_v23 = vadd.f32 0.2548296, %v1184_v57  ;;  %10747 = vrcp.f32 %v897_v56  ;;  %v1022_v51 = vadd.f32 -1.4531521, %v990_v34  ;;  %v10448_v57 = vld [vmem:[#allocation9 + $0x38] sm:$0xff]  }
 0x18e   : > { %v1902_v22 = vrot.slane %v1900_v52, 7  ;;  %v863_v26 = vmul.f32 0.3275911, %v11628_v31  ;;  %v699_v54 = vmul.f32 %v11373_v46, %v601_v21  ;;  %10749 = vpow2.f32 %v1350_v58  ;;  %v2181_v2 = vld [vmem:[#allocation2 + $0x2c] sm:$0x1]  ;;  %9783 = vmatpush3.bf16.msra.mxu1 %v10448_v57 }
 0x18f   : > { %v1531_v11 = vsel %vm1467_vm0, %v1499_v5, %v1435_v63  ;;  %v1248_v41 = vmul.f32 %v11528_v13, %v1216_v23  ;;  %v11633_v13 = vadd.f32 %v11378_v48, %v701_v47  ;;  %v1054_v43 = vmul.f32 %v11622_v49, %v1022_v51 }
 0x190   : > { %v1563_v10 = vadd.f32 1.0, %v1531_v11  ;;  %v1905_v30 = vor.u32 %v1903_v12, %v1902_v22  ;;  %v1907_v32 = vrot.slane %v1902_v22, 4  ;;  %v895_v55 = vadd.f32 1.0, %v863_v26  ;;  %v10285_v12 = vpop.f32.mrf.mxu0  ;;  %v1712_v11 = vld [vmem:[#allocation2 + $0x68] sm:$0x1] }
 0x191   : > { %v1408_v29 = vmul.f32 %v10746_v35, %v1248_v41  ;;  %vm1472_vm1 = vcmp.lt.f32.partialorder %v11455_v33, 0.0  ;;  %v1281_v59 = vsub.f32 0.0, %v11607_v36  ;;  %v1086_v1 = vadd.f32 1.4214138, %v1054_v43 }
 0x192   : > { %v1595_v61 = vmul.f32 %v1563_v10, %v763_v7  ;;  %v1906_v37 = vsel %vm11554_vm14, %v1898_v9, %v1905_v30  ;;  %v2189_v39 = vsel %vm11341_vm2, %v1907_v32, %v2188_v16  ;;  %10751 = vrcp.f32 %v895_v55  ;;  %v604_v51 = vpop.f32.mrf.mxu0 }
 0x193   : > { %2187 = vst [vmem:[#allocation2 + $0x34] sm:$0xf] %v1906_v37  ;;  %2190 = vst [vmem:[#allocation2 + $0x38] sm:$0x1] %v2189_v39  ;;  %v1440_v4 = vsub.f32 1.0, %v1408_v29  ;;  %v11647_v63 = vadd.f32 %v11378_v48, %v699_v54  ;;  %v1654_v18 = vsel %vm11341_vm2, 0, %v1653_v0  ;;  %v1118_v7 = vmul.f32 %v11622_v49, %v1086_v1 }
 0x194   : > { %v9666_v42 = vpack.c.bf16 %v1595_v61, %v1595_v61  ;;  %v11644_v62 = vmul.f32 0.70710677, %v11633_v13  ;;  %v768_v33 = vmul.f32 0.5, %v11447_v14  ;;  %1655 = vst [vmem:[#allocation2 + $0x54] sm:$0x1] %v1654_v18  ;;  %v1881_v6 = vrot.slane %v11583_v17, 4 }
 0x195   : > { %v1504_v3 = vsub.f32 0.0, %v1440_v4  ;;  %v1150_v56 = vadd.f32 -0.28449672, %v1118_v7  ;;  %v1313_v47 = vmul.f32 %v1281_v59, %v11607_v36  ;;  %v1279_v22 = vsub.f32 0.0, %v11628_v31 }
 0x196   : > { %v1883_v25 = vshrl.u32 %v9666_v42, 16  ;;  %v1886_v60 = vshll.u32 %v9666_v42, 16  ;;  %v836_v5 = vand.u32 2147483647, %v11644_v62  ;;  %v11662_v17 = vmul.f32 0.70710677, %v11647_v63 }
 0x197   : > { %v1536_v20 = vsel %vm1472_vm1, %v1504_v3, %v1440_v4  ;;  %v1182_v35 = vmul.f32 %v11622_v49, %v1150_v56  ;;  %v702_v36 = vmul.f32 %v10285_v12, %v11373_v46  ;;  %v1713_v30 = vsel %vm11348_vm4, 0, %v1712_v11 }
 0x198   : > { %v1885_v45 = vrot.slane %v1883_v25, 7  ;;  %v1568_v23 = vadd.f32 1.0, %v1536_v20  ;;  %v868_v14 = vmul.f32 0.3275911, %v836_v5  ;;  %v834_v9 = vand.u32 2147483647, %v11662_v17 }
 0x199   : > { %v1214_v32 = vadd.f32 0.2548296, %v1182_v35  ;;  %v1356_v29 = vmul.f32 1.442695, %v1313_v47  ;;  %1714 = vst [vmem:[#allocation2 + $0x68] sm:$0x1] %v1713_v30  ;;  %v1311_v39 = vmul.f32 %v1279_v22, %v11628_v31  ;;  %v11676_v55 = vadd.f32 %v11378_v48, %v702_v36  ;;  %v10288_v30 = vpop.f32.mrf.mxu0 }
 0x19a   : > { %v1888_v40 = vor.u32 %v1886_v60, %v1885_v45  ;;  %v1890_v52 = vrot.slane %v1885_v45, 4  ;;  %v1600_v34 = vmul.f32 %v1568_v23, %v768_v33  ;;  %v900_v16 = vadd.f32 1.0, %v868_v14  ;;  %v11666_v58 = vpop.eup %10747  ;;  %v2198_v45 = vld [vmem:[#allocation2 + $0x48] sm:$0xf]  ;;  %v1709_v47 = vld [vmem:[#allocation2 + $0x5c] sm:$0x1] }
 0x19b   : > { %v993_v61 = vmul.f32 1.0614054, %v11666_v58  ;;  %v766_v37 = vmul.f32 0.5, %v11466_v53  ;;  %v866_v42 = vmul.f32 0.3275911, %v834_v9  ;;  %v1246_v54 = vmul.f32 %v11622_v49, %v1214_v32  ;;  %v10750_v0 = vpop.eup %10749  ;;  %v10449_v22 = vld [vmem:[#allocation9 + $0x70] sm:$0xff]  }
 0x19c   : > { %v1889_v10 = vsel %vm11554_vm14, %v1881_v6, %v1888_v40  ;;  %v2182_v41 = vsel %vm11341_vm2, %v1890_v52, %v2181_v2  ;;  %v9671_v21 = vpack.c.bf16 %v1600_v34, %v1600_v34  ;;  %10753 = vrcp.f32 %v900_v16  ;;  %9784 = vmatprep.subr.bf16.mxu1 %v10449_v22 }
 0x19d   : > { %2180 = vst [vmem:[#allocation2 + $0x28] sm:$0xf] %v1889_v10  ;;  %2183 = vst [vmem:[#allocation2 + $0x2c] sm:$0x1] %v2182_v41  ;;  %v1025_v4 = vadd.f32 -1.4531521, %v993_v61  ;;  %v700_v1 = vmul.f32 %v11373_v46, %v604_v51  ;;  %v1406_v60 = vmul.f32 %v10750_v0, %v1246_v54  ;;  %10755 = vpow2.f32 %v1356_v29 }
 0x19e   : > { %v1926_v26 = vshrl.u32 %v9671_v21, 16  ;;  %v1284_v43 = vsub.f32 0.0, %v836_v5  ;;  %v1929_v59 = vshll.u32 %v9671_v21, 16  ;;  %v898_v3 = vadd.f32 1.0, %v866_v42 }
 0x19f   : > { %v1057_v53 = vmul.f32 %v11666_v58, %v1025_v4  ;;  %v11683_v31 = vmul.f32 0.70710677, %v11676_v55  ;;  %v11685_v49 = vpop.eup %10751  ;;  %vm1470_vm3 = vcmp.lt.f32.partialorder %v11476_v19, 0.0  ;;  %v1352_v57 = vmul.f32 1.442695, %v1311_v39 }
 0x1a0   : > { %v11678_v25 = vrot.slane %v1926_v26, 7  ;;  %10757 = vrcp.f32 %v898_v3  ;;  %v1438_v2 = vsub.f32 1.0, %v1406_v60  ;;  %v11690_v33 = vmul.f32 0.5, %v11590_v28  ;;  %v10451_v3 = vld [vmem:[#allocation9 + $0xf8] sm:$0xff]  }
 0x1a1   : > { %v1089_v20 = vadd.f32 1.4214138, %v1057_v53  ;;  %v11693_v7 = vadd.f32 %v11378_v48, %v700_v1  ;;  %v991_v40 = vmul.f32 1.0614054, %v11685_v49  ;;  %v1316_v52 = vmul.f32 %v1284_v43, %v836_v5  ;;  %v10452_v53 = vld [vmem:[#allocation9 + $0xb8] sm:$0xff]   ;;  %9894 = vmatprep.subr.bf16.mxu0 %v10451_v3 }
 0x1a2   : > { %v1931_v18 = vor.u32 %v1929_v59, %v11678_v25  ;;  %v837_v23 = vand.u32 2147483647, %v11683_v31  ;;  %v1502_v12 = vsub.f32 0.0, %v1438_v2  ;;  %v11701_v56 = vmul.f32 0.5, %v11610_v38  ;;  %v10450_v59 = vld [vmem:[#allocation9 + $0x30] sm:$0xff]   ;;  %9895 = vmatpush3.bf16.msra.mxu0 %v10452_v53 }
 0x1a3   : > { %v1121_v11 = vmul.f32 %v11666_v58, %v1089_v20  ;;  %v1282_v28 = vsub.f32 0.0, %v834_v9  ;;  %v1023_v48 = vadd.f32 -1.4531521, %v991_v40  ;;  %10759 = vpow2.f32 %v1352_v57  ;;  %v1662_v40 = vld [vmem:[#allocation2 + $0x78] sm:$0x1]  ;;  %9785 = vmatpush3.bf16.msra.mxu1 %v10450_v59 }
 0x1a4   : > { %v2199_v6 = vsel %vm11543_vm13, %v1931_v18, %v2198_v45  ;;  %v11704_v14 = vmul.f32 0.5, %v11633_v13  ;;  %v869_v10 = vmul.f32 0.3275911, %v837_v23  ;;  %v1534_v5 = vsel %vm1470_vm3, %v1502_v12, %v1438_v2 }
 0x1a5   : > { %2200 = vst [vmem:[#allocation2 + $0x48] sm:$0xf] %v2199_v6  ;;  %v1153_v41 = vadd.f32 -0.28449672, %v1121_v11  ;;  %v11709_v34 = vmul.f32 0.5, %v11647_v63  ;;  %v1566_v38 = vadd.f32 1.0, %v1534_v5  ;;  %v1055_v16 = vmul.f32 %v11685_v49, %v1023_v48 }
 0x1a6   : > { %v11712_v35 = vmul.f32 0.70710677, %v11693_v7  ;;  %v1362_v36 = vmul.f32 1.442695, %v1316_v52  ;;  %v901_v21 = vadd.f32 1.0, %v869_v10  ;;  %v1314_v32 = vmul.f32 %v1282_v28, %v834_v9  ;;  %v617_v52 = vpop.f32.mrf.mxu0 }
 0x1a7   : > { %v1185_v13 = vmul.f32 %v11666_v58, %v1153_v41  ;;  %v1710_v61 = vsel %vm11348_vm4, 0, %v1709_v47  ;;  %v1598_v29 = vmul.f32 %v1566_v38, %v766_v37  ;;  %v1087_v51 = vadd.f32 1.4214138, %v1055_v16  ;;  %v2191_v10 = vld [vmem:[#allocation2 + $0x3c] sm:$0xf] }
 0x1a8   : > { %v835_v19 = vand.u32 2147483647, %v11712_v35  ;;  %10761 = vrcp.f32 %v901_v21  ;;  %v1285_v26 = vsub.f32 0.0, %v837_v23  ;;  %1711 = vst [vmem:[#allocation2 + $0x5c] sm:$0x1] %v1710_v61  ;;  %v705_v4 = vmul.f32 %v10288_v30, %v11373_v46 }
 0x1a9   : > { %v11719_v63 = vpop.eup %10753  ;;  %v1217_v39 = vadd.f32 0.2548296, %v1185_v13  ;;  %v9669_v43 = vpack.c.bf16 %v1598_v29, %v1598_v29  ;;  %vm1473_vm5 = vcmp.lt.f32.partialorder %v11601_v44, 0.0  ;;  %v1119_v9 = vmul.f32 %v11685_v49, %v1087_v51  ;;  %v11729_v46 = vld [vmem:[%s14199_s3] ss:$0 sm:$0xff] }
 0x1aa   : > { %v996_v42 = vmul.f32 1.0614054, %v11719_v63  ;;  %v867_v54 = vmul.f32 0.3275911, %v835_v19  ;;  %10763 = vpow2.f32 %v1362_v36  ;;  %v1283_v0 = vsub.f32 0.0, %v835_v19  ;;  %v10756_v18 = vpop.eup %10755  ;;  %v10454_v44 = vld [vmem:[#allocation9 + $0x28] sm:$0xff]  }
 0x1ab   : > { %v1249_v37 = vmul.f32 %v11666_v58, %v1217_v39  ;;  %v1358_v45 = vmul.f32 1.442695, %v1314_v32  ;;  %v1909_v57 = vshrl.u32 %v9669_v43, 16  ;;  %v1151_v2 = vadd.f32 -0.28449672, %v1119_v9  ;;  %v10453_v32 = vld [vmem:[#allocation9 + $0x68] sm:$0xff]  }
 0x1ac   : > { %v1028_v1 = vadd.f32 -1.4531521, %v996_v42  ;;  %v899_v60 = vadd.f32 1.0, %v867_v54  ;;  %v1317_v20 = vmul.f32 %v1285_v26, %v837_v23  ;;  %v11732_v6 = vadd.f32 %v11729_v46, %v705_v4  ;;  %v11746_v16 = vld [vmem:[%s14198_s2] ss:$0 sm:$0xff]  ;;  %9786 = vmatprep.subr.bf16.mxu1 %v10453_v32 }
 0x1ad   : > { %v11734_v58 = vpop.eup %10757  ;;  %v1912_v12 = vshll.u32 %v9669_v43, 16  ;;  %v1409_v11 = vmul.f32 %v10756_v18, %v1249_v37  ;;  %v11737_v23 = vrot.slane %v1909_v57, 7  ;;  %v1183_v47 = vmul.f32 %v11685_v49, %v1151_v2  ;;  %9787 = vmatpush3.bf16.msra.mxu1 %v10454_v44 }
 0x1ae   : > { %v1060_v28 = vmul.f32 %v11719_v63, %v1028_v1  ;;  %10765 = vrcp.f32 %v899_v60  ;;  %v994_v22 = vmul.f32 1.0614054, %v11734_v58  ;;  %v1315_v48 = vmul.f32 %v1283_v0, %v835_v19 }
 0x1af   : > { %v1441_v5 = vsub.f32 1.0, %v1409_v11  ;;  %v1663_v38 = vsel %vm11341_vm2, 0, %v1662_v40  ;;  %v703_v36 = vmul.f32 %v11746_v16, %v617_v52  ;;  %v1914_v21 = vor.u32 %v1912_v12, %v11737_v23  ;;  %v10455_v52 = vld [vmem:[#allocation9 + $0xf0] sm:$0xff]  }
 0x1b0   : > { %v1092_v41 = vadd.f32 1.4214138, %v1060_v28  ;;  %v1215_v30 = vadd.f32 0.2548296, %v1183_v47  ;;  %v1026_v13 = vadd.f32 -1.4531521, %v994_v22  ;;  %10767 = vpow2.f32 %v1358_v45  ;;  %v10760_v19 = vpop.eup %10759  ;;  %9896 = vmatprep.subr.bf16.mxu0 %v10455_v52 }
 0x1b1   : > { %1664 = vst [vmem:[#allocation2 + $0x78] sm:$0x1] %v1663_v38  ;;  %v1505_v61 = vsub.f32 0.0, %v1441_v5  ;;  %vm1471_vm6 = vcmp.lt.f32.partialorder %v11620_v8, 0.0  ;;  %v1364_v51 = vmul.f32 1.442695, %v1317_v20  ;;  %v2192_v39 = vsel %vm11543_vm13, %v1914_v21, %v2191_v10 }
 0x1b2   : > { %v1124_v29 = vmul.f32 %v11719_v63, %v1092_v41  ;;  %v11753_v26 = vmul.f32 0.70710677, %v11732_v6  ;;  %v1247_v42 = vmul.f32 %v11685_v49, %v1215_v30  ;;  %v1058_v54 = vmul.f32 %v11734_v58, %v1026_v13  ;;  %2193 = vst [vmem:[#allocation2 + $0x3c] sm:$0xf] %v2192_v39  ;;  %v10456_v12 = vld [vmem:[#allocation9 + $0xb0] sm:$0xff]   ;;  %v10458_v30 = vld [vmem:[#allocation9 + $0x20] sm:$0xff]  }
 0x1b3   : > { %v11760_v4 = vadd.f32 %v11729_v46, %v703_v36  ;;  %v1537_v43 = vsel %vm1473_vm5, %v1505_v61, %v1441_v5  ;;  %v1360_v0 = vmul.f32 1.442695, %v1315_v48  ;;  %v1932_v3 = vrot.slane %v11678_v25, 4  ;;  %9897 = vmatpush3.bf16.msra.mxu0 %v10456_v12  ;;  %v10459_v13 = vld [vmem:[#allocation9 + $0xe8] sm:$0xff]   ;;  %v10461_v8 = vld [vmem:[#allocation9 + $0x58] sm:$0xff]  }
 0x1b4   : > { %v1156_v9 = vadd.f32 -0.28449672, %v1124_v29  ;;  %v840_v59 = vand.u32 2147483647, %v11753_v26  ;;  %v1569_v37 = vadd.f32 1.0, %v1537_v43  ;;  %v1407_v1 = vmul.f32 %v10760_v19, %v1247_v42  ;;  %v10460_v39 = vld [vmem:[#allocation9 + $0xa8] sm:$0xff]   ;;  %9898 = vmatprep.subr.bf16.mxu0 %v10459_v13 }
 0x1b5   : > { %v1090_v45 = vadd.f32 1.4214138, %v1058_v54  ;;  %v11766_v49 = vpop.eup %10761  ;;  %10769 = vpow2.f32 %v1364_v51  ;;  %v11770_v18 = vmul.f32 0.70710677, %v11760_v4  ;;  %vm1476_vm7 = vcmp.lt.f32.partialorder %v11644_v62, 0.0 }
 0x1b6   : > { %v1188_v60 = vmul.f32 %v11719_v63, %v1156_v9  ;;  %v872_v53 = vmul.f32 0.3275911, %v840_v59  ;;  %v1601_v57 = vmul.f32 %v1569_v37, %v11690_v33  ;;  %v1439_v2 = vsub.f32 1.0, %v1407_v1  ;;  %v10457_v33 = vld [vmem:[#allocation9 + $0x60] sm:$0xff]   ;;  %v2202_v42 = vld [vmem:[#allocation2 + $0x50] sm:$0x1] }
 0x1b7   : > { %v1122_v20 = vmul.f32 %v11734_v58, %v1090_v45  ;;  %v997_v40 = vmul.f32 1.0614054, %v11766_v49  ;;  %v10764_v11 = vpop.eup %10763  ;;  %10771 = vpow2.f32 %v1360_v0  ;;  %v1288_v22 = vsub.f32 0.0, %v840_v59  ;;  %9788 = vmatprep.subr.bf16.mxu1 %v10457_v33  ;;  %9899 = vmatpush3.bf16.msra.mxu0 %v10460_v39  ;;  %v10289_v33 = vpop.f32.mrf.mxu0 }
 0x1b8   : > { %v1220_v28 = vadd.f32 0.2548296, %v1188_v60  ;;  %v904_v47 = vadd.f32 1.0, %v872_v53  ;;  %v9672_v48 = vpack.c.bf16 %v1601_v57, %v1601_v57  ;;  %v1503_v10 = vsub.f32 0.0, %v1439_v2  ;;  %9789 = vmatpush3.bf16.msra.mxu1 %v10458_v30 }
 0x1b9   : > { %v1154_v5 = vadd.f32 -0.28449672, %v1122_v20  ;;  %v1029_v41 = vadd.f32 -1.4531521, %v997_v40  ;;  %v1915_v38 = vrot.slane %v11737_v23, 4  ;;  %v1320_v1 = vmul.f32 %v1288_v22, %v840_v59  ;;  %v10462_v20 = vld [vmem:[#allocation9 + $0x18] sm:$0xff]   ;;  %9790 = vmatprep.subr.bf16.mxu1 %v10461_v8 }
 0x1ba   : > { %v1252_v36 = vmul.f32 %v11719_v63, %v1220_v28  ;;  %10773 = vrcp.f32 %v904_v47  ;;  %v11779_v21 = vand.u32 2147483647, %v11770_v18  ;;  %v1934_v19 = vshrl.u32 %v9672_v48, 16  ;;  %v10463_v59 = vld [vmem:[#allocation9 + $0xe0] sm:$0xff]  }
 0x1bb   : > { %v11781_v32 = vpop.eup %10765  ;;  %v1937_v61 = vshll.u32 %v9672_v48, 16  ;;  %v1535_v29 = vsel %vm1471_vm6, %v1503_v10, %v1439_v2  ;;  %v1186_v51 = vmul.f32 %v11734_v58, %v1154_v5  ;;  %v1061_v43 = vmul.f32 %v11766_v49, %v1029_v41  ;;  %v10464_v28 = vld [vmem:[#allocation9 + $0xa0] sm:$0xff]   ;;  %v1659_v41 = vld [vmem:[#allocation2 + $0x6c] sm:$0x1]  ;;  %9900 = vmatprep.subr.bf16.mxu0 %v10463_v59 }
 0x1bc   : > { %v1567_v63 = vadd.f32 1.0, %v1535_v29  ;;  %v1412_v54 = vmul.f32 %v10764_v11, %v1252_v36  ;;  %v995_v9 = vmul.f32 1.0614054, %v11781_v32  ;;  %v1936_v0 = vrot.slane %v1934_v19, 7  ;;  %9791 = vmatpush3.bf16.msra.mxu1 %v10462_v20  ;;  %v10465_v36 = vld [vmem:[#allocation9 + $0x50] sm:$0xff]   ;;  %9901 = vmatpush3.bf16.msra.mxu0 %v10464_v28  ;;  %v10473_v23 = vld [vmem:[#allocation9 + $0x40] sm:$0xff]  }
 0x1bd   : > { %v1218_v37 = vadd.f32 0.2548296, %v1186_v51  ;;  %v870_v45 = vmul.f32 0.3275911, %v11779_v21  ;;  %v10768_v60 = vpop.eup %10767  ;;  %vm1474_vm8 = vcmp.lt.f32.partialorder %v11662_v17, 0.0  ;;  %9792 = vmatprep.subr.bf16.mxu1 %v10465_v36  ;;  %v706_v62 = vmul.f32 %v11746_v16, %v10289_v33 }
 0x1be   : > { %v1599_v53 = vmul.f32 %v1567_v63, %v11701_v56  ;;  %v1444_v44 = vsub.f32 1.0, %v1412_v54  ;;  %v1093_v57 = vadd.f32 1.4214138, %v1061_v43  ;;  %v1027_v2 = vadd.f32 -1.4531521, %v995_v9  ;;  %v10468_v54 = vld [vmem:[#allocation9 + $0x98] sm:$0xff]  }
 0x1bf   : > { %v1939_v40 = vor.u32 %v1937_v61, %v1936_v0  ;;  %v1941_v52 = vrot.slane %v1936_v0, 4  ;;  %v1250_v12 = vmul.f32 %v11734_v58, %v1218_v37  ;;  %v902_v11 = vadd.f32 1.0, %v870_v45  ;;  %v10466_v61 = vld [vmem:[#allocation9 + $0x10] sm:$0xff]   ;;  %v2195_v45 = vld [vmem:[#allocation2 + $0x44] sm:$0x1] }
 0x1c0   : > { %v9670_v47 = vpack.c.bf16 %v1599_v53, %v1599_v53  ;;  %v1508_v22 = vsub.f32 0.0, %v1444_v44  ;;  %v1125_v48 = vmul.f32 %v11766_v49, %v1093_v57  ;;  %v1059_v56 = vmul.f32 %v11781_v32, %v1027_v2  ;;  %9793 = vmatpush3.bf16.msra.mxu1 %v10466_v61  ;;  %v10469_v57 = vld [vmem:[#allocation9 + $0x48] sm:$0xff]   ;;  %v2853_v50 = vld [vmem:[#allocation2 + $0x3c] sm:$0xe] }
 0x1c1   : > { %v1940_v10 = vsel %vm11554_vm14, %v1932_v3, %v1939_v40  ;;  %v2203_v5 = vsel %vm11341_vm2, %v1941_v52, %v2202_v42  ;;  %v1410_v58 = vmul.f32 %v10768_v60, %v1250_v12  ;;  %10775 = vrcp.f32 %v902_v11  ;;  %v10467_v3 = vld [vmem:[#allocation9 + $0xd8] sm:$0xff]   ;;  %v10470_v12 = vld [vmem:[#allocation9 + $0x8] sm:$0xff]   ;;  %v10471_v11 = vld [vmem:[#allocation9 + $0xd0] sm:$0xff]   ;;  %9794 = vmatprep.subr.bf16.mxu1 %v10469_v57  ;;  %v620_v57 = vpop.f32.mrf.mxu0 }
 0x1c2   : > { %2201 = vst [vmem:[#allocation2 + $0x4c] sm:$0xf] %v1940_v10  ;;  %2204 = vst [vmem:[#allocation2 + $0x50] sm:$0x1] %v2203_v5  ;;  %v1917_v30 = vshrl.u32 %v9670_v47, 16  ;;  %v1920_v13 = vshll.u32 %v9670_v47, 16  ;;  %v1540_v19 = vsel %vm1476_vm7, %v1508_v22, %v1444_v44  ;;  %v10770_v29 = vpop.eup %10769  ;;  %9902 = vmatprep.subr.bf16.mxu0 %v10467_v3  ;;  %v11817_v22 = vadd.f32 %v11729_v46, %v706_v62 }
 0x1c3   : > { %v1157_v25 = vadd.f32 -0.28449672, %v1125_v48  ;;  %v1572_v51 = vadd.f32 1.0, %v1540_v19  ;;  %v1442_v39 = vsub.f32 1.0, %v1410_v58  ;;  %v1091_v42 = vadd.f32 1.4214138, %v1059_v56  ;;  %9903 = vmatpush3.bf16.msra.mxu0 %v10468_v54 }
 0x1c4   : > { %v1286_v63 = vsub.f32 0.0, %v11779_v21  ;;  %v1919_v43 = vrot.slane %v1917_v30, 7  ;;  %v1660_v0 = vsel %vm11341_vm2, 0, %v1659_v41  ;;  %v11807_v37 = vpop.eup %10771  ;;  %v1370_v44 = vmul.f32 1.442695, %v1320_v1  ;;  %v10472_v1 = vld [vmem:[#allocation9 + $0x90] sm:$0xff]   ;;  %9795 = vmatpush3.bf16.msra.mxu1 %v10470_v12  ;;  %9904 = vmatprep.subr.bf16.mxu0 %v10471_v11 }
 0x1c5   : > { %v1189_v9 = vmul.f32 %v11766_v49, %v1157_v25  ;;  %v1604_v8 = vmul.f32 %v1572_v51, %v11704_v14  ;;  %v1506_v60 = vsub.f32 0.0, %v1442_v39  ;;  %v1123_v53 = vmul.f32 %v11781_v32, %v1091_v42  ;;  %1661 = vst [vmem:[#allocation2 + $0x6c] sm:$0x1] %v1660_v0  ;;  %v1718_v5 = vld [vmem:[#allocation2 + $0x80] sm:$0x1]  ;;  %9796 = vmatprep.subr.bf16.mxu1 %v10473_v23 }
 0x1c6   : > { %v1922_v2 = vor.u32 %v1920_v13, %v1919_v43  ;;  %v1924_v20 = vrot.slane %v1919_v43, 4  ;;  %v1318_v52 = vmul.f32 %v1286_v63, %v11779_v21  ;;  %10777 = vpow2.f32 %v1370_v44  ;;  %v10475_v19 = vld [vmem:[#allocation9 + $0xc8] sm:$0xff]  }
 0x1c7   : > { %v1221_v40 = vadd.f32 0.2548296, %v1189_v9  ;;  %v11812_v59 = vpop.eup %10773  ;;  %v9675_v28 = vpack.c.bf16 %v1604_v8, %v1604_v8  ;;  %v1538_v14 = vsel %vm1474_vm8, %v1506_v60, %v1442_v39  ;;  %v1155_v47 = vadd.f32 -0.28449672, %v1123_v53  ;;  %9905 = vmatpush3.bf16.msra.mxu0 %v10472_v1 }
 0x1c8   : > { %v1923_v21 = vsel %vm11554_vm14, %v1915_v38, %v1922_v2  ;;  %v2196_v48 = vsel %vm11341_vm2, %v1924_v20, %v2195_v45  ;;  %v1570_v56 = vadd.f32 1.0, %v1538_v14  ;;  %v1000_v41 = vmul.f32 1.0614054, %v11812_v59  ;;  %v2212_v38 = vld [vmem:[#allocation2 + $0x60] sm:$0xf]  ;;  %9906 = vmatprep.subr.bf16.mxu0 %v10475_v19 }
 0x1c9   : > { %v1253_v10 = vmul.f32 %v11766_v49, %v1221_v40  ;;  %2194 = vst [vmem:[#allocation2 + $0x40] sm:$0xf] %v1923_v21  ;;  %2197 = vst [vmem:[#allocation2 + $0x44] sm:$0x1] %v2196_v48  ;;  %v1960_v17 = vshrl.u32 %v9675_v28, 16  ;;  %v1187_v58 = vmul.f32 %v11781_v32, %v1155_v47  ;;  %v1963_v33 = vshll.u32 %v9675_v28, 16 }
 0x1ca   : > { %v1602_v36 = vmul.f32 %v1570_v56, %v11709_v34  ;;  %v1366_v13 = vmul.f32 1.442695, %v1318_v52  ;;  %v10474_v49 = vld [vmem:[#allocation9] sm:$0xff]   ;;  %v1032_v3 = vadd.f32 -1.4531521, %v1000_v41  ;;  %v1719_v51 = vsel %vm11348_vm4, 0, %v1718_v5 }
 0x1cb   : > { %v1413_v30 = vmul.f32 %v10770_v29, %v1253_v10  ;;  %v11829_v25 = vrot.slane %v1960_v17, 7  ;;  %v1219_v61 = vadd.f32 0.2548296, %v1187_v58  ;;  %v773_v42 = vmul.f32 0.5, %v11676_v55  ;;  %1720 = vst [vmem:[#allocation2 + $0x80] sm:$0x1] %v1719_v51  ;;  %9797 = vmatpush3.bf16.msra.mxu1 %v10474_v49 }
 0x1cc   : > { %v9673_v39 = vpack.c.bf16 %v1602_v36, %v1602_v36  ;;  %v11835_v54 = vmul.f32 0.70710677, %v11817_v22  ;;  %v10476_v34 = vld [vmem:[#allocation9 + $0x88] sm:$0xff]   ;;  %vm1477_vm9 = vcmp.lt.f32.partialorder %v11683_v31, 0.0  ;;  %v1064_v9 = vmul.f32 %v11812_v59, %v1032_v3  ;;  %v2205_v52 = vld [vmem:[#allocation2 + $0x54] sm:$0xf] }
 0x1cd   : > { %v1445_v63 = vsub.f32 1.0, %v1413_v30  ;;  %v1965_v29 = vor.u32 %v1963_v33, %v11829_v25  ;;  %v1251_v43 = vmul.f32 %v11781_v32, %v1219_v61  ;;  %10779 = vpow2.f32 %v1366_v13  ;;  %9907 = vmatpush3.bf16.msra.mxu0 %v10476_v34  ;;  %v1715_v5 = vld [vmem:[#allocation2 + $0x74] sm:$0x1] }
 0x1ce   : > { %v11841_v0 = vpop.eup %10775  ;;  %v1943_v62 = vshrl.u32 %v9673_v39, 16  ;;  %v841_v45 = vand.u32 2147483647, %v11835_v54  ;;  %v1096_v53 = vadd.f32 1.4214138, %v1064_v9  ;;  %v1946_v2 = vshll.u32 %v9673_v39, 16 }
 0x1cf   : > { %v1509_v55 = vsub.f32 0.0, %v1445_v63  ;;  %v2213_v8 = vsel %vm11543_vm13, %v1965_v29, %v2212_v38  ;;  %v1411_v60 = vmul.f32 %v11807_v37, %v1251_v43  ;;  %v998_v44 = vmul.f32 1.0614054, %v11841_v0  ;;  %v10292_v38 = vpop.f32.mrf.mxu0 }
 0x1d0   : > { %2214 = vst [vmem:[#allocation2 + $0x60] sm:$0xf] %v2213_v8  ;;  %v11848_v32 = vrot.slane %v1943_v62, 7  ;;  %v873_v40 = vmul.f32 0.3275911, %v841_v45  ;;  %v1128_v28 = vmul.f32 %v11812_v59, %v1096_v53  ;;  %v704_v1 = vmul.f32 %v11746_v16, %v620_v57 }
 0x1d1   : > { %v1541_v20 = vsel %vm1477_vm9, %v1509_v55, %v1445_v63  ;;  %v1443_v11 = vsub.f32 1.0, %v1411_v60  ;;  %v1030_v14 = vadd.f32 -1.4531521, %v998_v44  ;;  %v771_v17 = vmul.f32 0.5, %v11693_v7  ;;  %v1668_v7 = vld [vmem:[#allocation2 + $0x90] sm:$0x1] }
 0x1d2   : > { %v1573_v12 = vadd.f32 1.0, %v1541_v20  ;;  %v1948_v37 = vor.u32 %v1946_v2, %v11848_v32  ;;  %v905_v47 = vadd.f32 1.0, %v873_v40  ;;  %v1160_v56 = vadd.f32 -0.28449672, %v1128_v28  ;;  %v2216_v55 = vld [vmem:[#allocation2 + $0x68] sm:$0x1] }
 0x1d3   : > { %v1507_v48 = vsub.f32 0.0, %v1443_v11  ;;  %v1062_v10 = vmul.f32 %v11841_v0, %v1030_v14  ;;  %vm1475_vm10 = vcmp.lt.f32.partialorder %v11712_v35, 0.0  ;;  %v10778_v36 = vpop.eup %10777  ;;  %v1289_v13 = vsub.f32 0.0, %v841_v45 }
 0x1d4   : > { %v1605_v21 = vmul.f32 %v1573_v12, %v773_v42  ;;  %v2206_v31 = vsel %vm11543_vm13, %v1948_v37, %v2205_v52  ;;  %10781 = vrcp.f32 %v905_v47  ;;  %v1192_v23 = vmul.f32 %v11812_v59, %v1160_v56  ;;  %v3113_v52 = vld [vmem:[#allocation2 + $0xc] sm:$0xf]  ;;  %v2209_v37 = vld [vmem:[#allocation2 + $0x5c] sm:$0x1] }
 0x1d5   : > { %2207 = vst [vmem:[#allocation2 + $0x54] sm:$0xf] %v2206_v31  ;;  %v1539_v41 = vsel %vm1475_vm10, %v1507_v48, %v1443_v11  ;;  %v1094_v33 = vadd.f32 1.4214138, %v1062_v10  ;;  %v11862_v49 = vadd.f32 %v11729_v46, %v704_v1  ;;  %v1716_v19 = vsel %vm11348_vm4, 0, %v1715_v5 }
 0x1d6   : > { %v9676_v58 = vpack.c.bf16 %v1605_v21, %v1605_v21  ;;  %v1571_v30 = vadd.f32 1.0, %v1539_v41  ;;  %v1966_v35 = vrot.slane %v11829_v25, 4  ;;  %v1224_v3 = vadd.f32 0.2548296, %v1192_v23  ;;  %1717 = vst [vmem:[#allocation2 + $0x74] sm:$0x1] %v1716_v19  ;;  %v633_v21 = vpop.f32.mrf.mxu0 }
 0x1d7   : > { %v1126_v51 = vmul.f32 %v11841_v0, %v1094_v33  ;;  %v11869_v63 = vmul.f32 0.70710677, %v11862_v49  ;;  %v709_v34 = vmul.f32 %v11746_v16, %v10292_v38  ;;  %v1669_v62 = vsel %vm11341_vm2, 0, %v1668_v7  ;;  %v3115_v25 = vld [vmem:[#allocation2 + $0x18] sm:$0xf] }
 0x1d8   : > { %v1968_v61 = vshrl.u32 %v9676_v58, 16  ;;  %v1971_v39 = vshll.u32 %v9676_v58, 16  ;;  %v1603_v42 = vmul.f32 %v1571_v30, %v771_v17  ;;  %v1256_v43 = vmul.f32 %v11812_v59, %v1224_v3  ;;  %1670 = vst [vmem:[#allocation2 + $0x90] sm:$0x1] %v1669_v62  ;;  %3147 = vst [vmem:[#allocation3 + $0x54] sm:$0xf] %v3115_v25 }
 0x1d9   : > { %v1158_v9 = vadd.f32 -0.28449672, %v1126_v51  ;;  %v1321_v60 = vmul.f32 %v1289_v13, %v841_v45  ;;  %v839_v53 = vand.u32 2147483647, %v11869_v63  ;;  %v11877_v44 = vadd.f32 %v11729_v46, %v709_v34  ;;  %3145 = vst [vmem:[#allocation3 + $0xc] sm:$0xf] %v3113_v52  ;;  %v10293_v51 = vpop.f32.mrf.mxu0 }
 0x1da   : > { %v1970_v29 = vrot.slane %v1968_v61, 7  ;;  %v9674_v8 = vpack.c.bf16 %v1603_v42, %v1603_v42  ;;  %v10780_v57 = vpop.eup %10779  ;;  %v1416_v40 = vmul.f32 %v10778_v36, %v1256_v43  ;;  %v776_v11 = vmul.f32 0.5, %v11732_v6  ;;  %v3114_v41 = vld [vmem:[#allocation2 + $0x10] sm:$0xf]  ;;  %v3116_v62 = vld [vmem:[#allocation2 + $0x1c] sm:$0xf] }
 0x1db   : > { %v1190_v59 = vmul.f32 %v11841_v0, %v1158_v9  ;;  %vm1480_vm11 = vcmp.lt.f32.partialorder %v11753_v26, 0.0  ;;  %v871_v45 = vmul.f32 0.3275911, %v839_v53  ;;  %v1372_v10 = vmul.f32 1.442695, %v1321_v60  ;;  %v10480_v9 = vld [vmem:[#allocation9 + $0xc0] sm:$0xff]  }
 0x1dc   : > { %v1973_v2 = vor.u32 %v1971_v39, %v1970_v29  ;;  %v1975_v20 = vrot.slane %v1970_v29, 4  ;;  %v1951_v12 = vshrl.u32 %v9674_v8, 16  ;;  %v1448_v47 = vsub.f32 1.0, %v1416_v40  ;;  %3146 = vst [vmem:[#allocation3 + $0x30] sm:$0xf] %v3114_v41  ;;  %9908 = vmatprep.subr.bf16.mxu0 %v10480_v9 }
 0x1dd   : > { %v1222_v1 = vadd.f32 0.2548296, %v1190_v59  ;;  %v1954_v56 = vshll.u32 %v9674_v8, 16  ;;  %v903_v6 = vadd.f32 1.0, %v871_v45  ;;  %v1949_v5 = vrot.slane %v11848_v32, 4 }
 0x1de   : > { %v1974_v28 = vsel %vm11554_vm14, %v1966_v35, %v1973_v2  ;;  %v2217_v14 = vsel %vm11341_vm2, %v1975_v20, %v2216_v55  ;;  %v1953_v48 = vrot.slane %v1951_v12, 7  ;;  %v1512_v31 = vsub.f32 0.0, %v1448_v47  ;;  %3148 = vst [vmem:[#allocation3 + $0x78] sm:$0xf] %v3116_v62  ;;  %v2277_v2 = vld [vmem:[#allocation2 + $0xc] sm:$0xf] }
 0x1df   : > { %2215 = vst [vmem:[#allocation2 + $0x64] sm:$0xf] %v1974_v28  ;;  %2218 = vst [vmem:[#allocation2 + $0x68] sm:$0x1] %v2217_v14  ;;  %v1254_v17 = vmul.f32 %v11841_v0, %v1222_v1  ;;  %v11889_v58 = vmul.f32 0.70710677, %v11877_v44  ;;  %10783 = vrcp.f32 %v903_v6  ;;  %v707_v38 = vmul.f32 %v11746_v16, %v633_v21 }
 0x1e0   : > { %v1956_v23 = vor.u32 %v1954_v56, %v1953_v48  ;;  %v1958_v33 = vrot.slane %v1953_v48, 4  ;;  %v1544_v30 = vsel %vm1480_vm11, %v1512_v31, %v1448_v47  ;;  %v1287_v32 = vsub.f32 0.0, %v839_v53  ;;  %v1665_v0 = vld [vmem:[#allocation2 + $0x84] sm:$0x1]  ;;  %v2278_v52 = vld [vmem:[#allocation2 + $0x10] sm:$0xf]  ;;  %v636_v48 = vpop.f32.mrf.mxu0 }
 0x1e1   : > { %v11892_v36 = vpop.eup %10781  ;;  %v1414_v13 = vmul.f32 %v10780_v57, %v1254_v17  ;;  %v11897_v19 = vand.u32 2147483647, %v11889_v58  ;;  %v1576_v61 = vadd.f32 1.0, %v1544_v30  ;;  %10785 = vpow2.f32 %v1372_v10  ;;  %v10481_v57 = vld [vmem:[#allocation9 + $0x80] sm:$0xff]   ;;  %2309 = vst [vmem:[#allocation3 + $0x48] sm:$0xf] %v2277_v2 }
 0x1e2   : > { %v1957_v7 = vsel %vm11554_vm14, %v1949_v5, %v1956_v23  ;;  %v2210_v35 = vsel %vm11341_vm2, %v1958_v33, %v2209_v37  ;;  %v1001_v3 = vmul.f32 1.0614054, %v11892_v36  ;;  %v11906_v29 = vadd.f32 %v11729_v46, %v707_v38  ;;  %9909 = vmatpush3.bf16.msra.mxu0 %v10481_v57  ;;  %2310 = vst [vmem:[#allocation3 + $0x6c] sm:$0xf] %v2278_v52  ;;  %v2226_v10 = vld [vmem:[#allocation2 + $0x78] sm:$0xf] }
 0x1e3   : > { %2208 = vst [vmem:[#allocation2 + $0x58] sm:$0xf] %v1957_v7  ;;  %2211 = vst [vmem:[#allocation2 + $0x5c] sm:$0x1] %v2210_v35  ;;  %v1446_v26 = vsub.f32 1.0, %v1414_v13  ;;  %v1608_v42 = vmul.f32 %v1576_v61, %v776_v11  ;;  %v1666_v43 = vsel %vm11341_vm2, 0, %v1665_v0  ;;  %v1319_v55 = vmul.f32 %v1287_v32, %v839_v53 }
 0x1e4   : > { %v876_v39 = vmul.f32 0.3275911, %v11897_v19  ;;  %v1033_v34 = vadd.f32 -1.4531521, %v1001_v3  ;;  %1667 = vst [vmem:[#allocation2 + $0x84] sm:$0x1] %v1666_v43  ;;  %v710_v60 = vmul.f32 %v11746_v16, %v10293_v51  ;;  %v708_v13 = vmul.f32 %v11746_v16, %v636_v48 }
 0x1e5   : > { %v1510_v25 = vsub.f32 0.0, %v1446_v26  ;;  %v9679_v20 = vpack.c.bf16 %v1608_v42, %v1608_v42  ;;  %vm1478_vm12 = vcmp.lt.f32.partialorder %v11770_v18, 0.0  ;;  %v11914_v59 = vmul.f32 0.70710677, %v11906_v29  ;;  %v1724_v11 = vld [vmem:[#allocation2 + $0x98] sm:$0x1] }
 0x1e6   : > { %v908_v8 = vadd.f32 1.0, %v876_v39  ;;  %v1065_v40 = vmul.f32 %v11892_v36, %v1033_v34  ;;  %v11917_v53 = vadd.f32 %v11729_v46, %v710_v60  ;;  %v774_v28 = vmul.f32 0.5, %v11760_v4  ;;  %v1721_v51 = vld [vmem:[#allocation2 + $0x8c] sm:$0x1]  ;;  %v3117_v60 = vld [vmem:[#allocation2 + $0x24] sm:$0xf] }
 0x1e7   : > { %v1542_v12 = vsel %vm1478_vm12, %v1510_v25, %v1446_v26  ;;  %v1994_v45 = vshrl.u32 %v9679_v20, 16  ;;  %v1997_v37 = vshll.u32 %v9679_v20, 16  ;;  %v1368_v47 = vmul.f32 1.442695, %v1319_v55  ;;  %v2279_v26 = vld [vmem:[#allocation2 + $0x18] sm:$0xf] }
 0x1e8   : > { %10787 = vrcp.f32 %v908_v8  ;;  %v1574_v18 = vadd.f32 1.0, %v1542_v12  ;;  %v1097_v14 = vadd.f32 1.4214138, %v1065_v40  ;;  %v1292_v1 = vsub.f32 0.0, %v11897_v19  ;;  %v2219_v42 = vld [vmem:[#allocation2 + $0x6c] sm:$0xf] }
 0x1e9   : > { %v842_v21 = vand.u32 2147483647, %v11914_v59  ;;  %v11922_v56 = vrot.slane %v1994_v45, 7  ;;  %v11926_v31 = vmul.f32 0.70710677, %v11917_v53  ;;  %v11929_v4 = vmul.f32 0.5, %v11817_v22 }
 0x1ea   : > { %v1606_v6 = vmul.f32 %v1574_v18, %v774_v28  ;;  %v1129_v5 = vmul.f32 %v11892_v36, %v1097_v14  ;;  %v11932_v17 = vmul.f32 0.5, %v11862_v49  ;;  %v1725_v23 = vsel %vm11348_vm4, 0, %v1724_v11  ;;  %2311 = vst [vmem:[#allocation3 + $0x90] sm:$0xf] %v2279_v26  ;;  %3149 = vst [vmem:[#allocation3 + $0x9c] sm:$0xf] %v3117_v60 }
 0x1eb   : > { %v874_v41 = vmul.f32 0.3275911, %v842_v21  ;;  %v1999_v33 = vor.u32 %v1997_v37, %v11922_v56  ;;  %1726 = vst [vmem:[#allocation2 + $0x98] sm:$0x1] %v1725_v23  ;;  %10789 = vpow2.f32 %v1368_v47  ;;  %v1324_v22 = vmul.f32 %v1292_v1, %v11897_v19  ;;  %v10296_v19 = vpop.f32.mrf.mxu0  ;;  %v2280_v28 = vld [vmem:[#allocation2 + $0x1c] sm:$0xf] }
 0x1ec   : > { %v9677_v38 = vpack.c.bf16 %v1606_v6, %v1606_v6  ;;  %v1161_v30 = vadd.f32 -0.28449672, %v1129_v5  ;;  %v11938_v32 = vpop.eup %10783  ;;  %v845_v49 = vand.u32 2147483647, %v11926_v31  ;;  %v1290_v3 = vsub.f32 0.0, %v842_v21 }
 0x1ed   : > { %v906_v0 = vadd.f32 1.0, %v874_v41  ;;  %v2227_v7 = vsel %vm11543_vm13, %v1999_v33, %v2226_v10  ;;  %v999_v34 = vmul.f32 1.0614054, %v11938_v32  ;;  %v11949_v8 = vadd.f32 %v11729_v46, %v708_v13  ;;  %v649_v47 = vpop.f32.mrf.mxu0  ;;  %2312 = vst [vmem:[#allocation3 + $0xb4] sm:$0xf] %v2280_v28 }
 0x1ee   : > { %v1977_v35 = vshrl.u32 %v9677_v38, 16  ;;  %v1193_v61 = vmul.f32 %v11892_v36, %v1161_v30  ;;  %2228 = vst [vmem:[#allocation2 + $0x78] sm:$0xf] %v2227_v7  ;;  %v1980_v39 = vshll.u32 %v9677_v38, 16  ;;  %v877_v43 = vmul.f32 0.3275911, %v845_v49  ;;  %v10786_v9 = vpop.eup %10785 }
 0x1ef   : > { %10791 = vrcp.f32 %v906_v0  ;;  %v1293_v55 = vsub.f32 0.0, %v845_v49  ;;  %vm1481_vm15 = vcmp.lt.f32.partialorder %v11835_v54, 0.0  ;;  %v1031_v57 = vadd.f32 -1.4531521, %v999_v34  ;;  %v1674_v10 = vld [vmem:[#allocation2 + $0xa8] sm:$0x1] }
 0x1f0   : > { %v11946_v62 = vrot.slane %v1977_v35, 7  ;;  %v1225_v25 = vadd.f32 0.2548296, %v1193_v61  ;;  %v1378_v2 = vmul.f32 1.442695, %v1324_v22  ;;  %v909_v20 = vadd.f32 1.0, %v877_v43 }
 0x1f1   : > { %v1722_v40 = vsel %vm11348_vm4, 0, %v1721_v51  ;;  %v11957_v11 = vmul.f32 0.5, %v11877_v44  ;;  %v1322_v45 = vmul.f32 %v1290_v3, %v842_v21  ;;  %v1063_v18 = vmul.f32 %v11938_v32, %v1031_v57  ;;  %v3118_v6 = vld [vmem:[#allocation2 + $0x28] sm:$0xf] }
 0x1f2   : > { %v1982_v52 = vor.u32 %v1980_v39, %v11946_v62  ;;  %v1257_v12 = vmul.f32 %v11892_v36, %v1225_v25  ;;  %1723 = vst [vmem:[#allocation2 + $0x8c] sm:$0x1] %v1722_v40  ;;  %v11961_v14 = vmul.f32 0.5, %v11906_v29  ;;  %10793 = vrcp.f32 %v909_v20  ;;  %3150 = vst [vmem:[#allocation3 + $0xc0] sm:$0xf] %v3118_v6  ;;  %v10485_v25 = vld [vmem:[#allocation9 + $0x178] sm:$0xff]  }
 0x1f3   : > { %v11964_v37 = vmul.f32 0.70710677, %v11949_v8  ;;  %v1325_v21 = vmul.f32 %v1293_v55, %v845_v49  ;;  %v713_v48 = vmul.f32 %v11746_v16, %v10296_v19  ;;  %v1095_v29 = vadd.f32 1.4214138, %v1063_v18  ;;  %10006 = vmatprep.subr.bf16.mxu1 %v10485_v25  ;;  %v3120_v6 = vld [vmem:[#allocation2 + $0x34] sm:$0xf] }
 0x1f4   : > { %v2220_v44 = vsel %vm11543_vm13, %v1982_v52, %v2219_v42  ;;  %v1417_v36 = vmul.f32 %v10786_v9, %v1257_v12  ;;  %10795 = vpow2.f32 %v1378_v2  ;;  %v1374_v33 = vmul.f32 1.442695, %v1322_v45  ;;  %3152 = vst [vmem:[#allocation3 + $0x108] sm:$0xf] %v3120_v6 }
 0x1f5   : > { %v11966_v1 = vpop.eup %10787  ;;  %2221 = vst [vmem:[#allocation2 + $0x6c] sm:$0xf] %v2220_v44  ;;  %v843_v41 = vand.u32 2147483647, %v11964_v37  ;;  %v11974_v38 = vadd.f32 %v11729_v46, %v713_v48  ;;  %v711_v30 = vmul.f32 %v11746_v16, %v649_v47  ;;  %v1127_v13 = vmul.f32 %v11938_v32, %v1095_v29  ;;  %v3119_v44 = vld [vmem:[#allocation2 + $0x30] sm:$0xf] }
 0x1f6   : > { %v1004_v5 = vmul.f32 1.0614054, %v11966_v1  ;;  %v1449_v23 = vsub.f32 1.0, %v1417_v36  ;;  %v1380_v35 = vmul.f32 1.442695, %v1325_v21  ;;  %v1675_v3 = vsel %vm11341_vm2, 0, %v1674_v10  ;;  %v10297_v10 = vpop.f32.mrf.mxu0 }
 0x1f7   : > { %v875_v0 = vmul.f32 0.3275911, %v843_v41  ;;  %v1291_v49 = vsub.f32 0.0, %v843_v41  ;;  %v11979_v61 = vmul.f32 0.70710677, %v11974_v38  ;;  %10797 = vpow2.f32 %v1374_v33 }
 0x1f8   : > { %v1036_v22 = vadd.f32 -1.4531521, %v1004_v5  ;;  %v1513_v7 = vsub.f32 0.0, %v1449_v23  ;;  %v1159_v51 = vadd.f32 -0.28449672, %v1127_v13  ;;  %v10790_v34 = vpop.eup %10789  ;;  %v11988_v9 = vadd.f32 %v11729_v46, %v711_v30 }
 0x1f9   : > { %v907_v39 = vadd.f32 1.0, %v875_v0  ;;  %v1323_v42 = vmul.f32 %v1291_v49, %v843_v41  ;;  %1676 = vst [vmem:[#allocation2 + $0xa8] sm:$0x1] %v1675_v3  ;;  %v848_v19 = vand.u32 2147483647, %v11979_v61  ;;  %vm1479_vm0 = vcmp.lt.f32.partialorder %v11869_v63, 0.0 }
 0x1fa   : > { %v1068_v26 = vmul.f32 %v11966_v1, %v1036_v22  ;;  %v1545_v43 = vsel %vm1481_vm15, %v1513_v7, %v1449_v23  ;;  %v1191_v60 = vmul.f32 %v11938_v32, %v1159_v51  ;;  %v11998_v28 = vmul.f32 0.5, %v11917_v53  ;;  %3151 = vst [vmem:[#allocation3 + $0xe4] sm:$0xf] %v3119_v44  ;;  %v2281_v13 = vld [vmem:[#allocation2 + $0x24] sm:$0xf] }
 0x1fb   : > { %v1577_v55 = vadd.f32 1.0, %v1545_v43  ;;  %10799 = vrcp.f32 %v907_v39  ;;  %v1376_v20 = vmul.f32 1.442695, %v1323_v42  ;;  %v880_v40 = vmul.f32 0.3275911, %v848_v19 }
 0x1fc   : > { %v1100_v57 = vadd.f32 1.4214138, %v1068_v26  ;;  %v11991_v2 = vpop.eup %10791  ;;  %10801 = vpow2.f32 %v1380_v35  ;;  %v1296_v52 = vsub.f32 0.0, %v848_v19  ;;  %v1223_v12 = vadd.f32 0.2548296, %v1191_v60 }
 0x1fd   : > { %v1609_v54 = vmul.f32 %v1577_v55, %v11929_v4  ;;  %v1002_v46 = vmul.f32 1.0614054, %v11991_v2  ;;  %10803 = vpow2.f32 %v1376_v20  ;;  %v912_v18 = vadd.f32 1.0, %v880_v40  ;;  %v2230_v0 = vld [vmem:[#allocation2 + $0x80] sm:$0x1] }
 0x1fe   : > { %v1132_v45 = vmul.f32 %v11966_v1, %v1100_v57  ;;  %v12001_v47 = vmul.f32 0.70710677, %v11988_v9  ;;  %v1255_v21 = vmul.f32 %v11938_v32, %v1223_v12  ;;  %v2000_v5 = vrot.slane %v11922_v56, 4  ;;  %v2282_v3 = vld [vmem:[#allocation2 + $0x28] sm:$0xf] }
 0x1ff   : > { %v9680_v36 = vpack.c.bf16 %v1609_v54, %v1609_v54  ;;  %v1034_v48 = vadd.f32 -1.4531521, %v1002_v46  ;;  %v12004_v29 = vpop.eup %10793  ;;  %v1983_v53 = vrot.slane %v11946_v62, 4  ;;  %10805 = vrcp.f32 %v912_v18  ;;  %2313 = vst [vmem:[#allocation3 + $0xd8] sm:$0xf] %v2281_v13 }
 0x200   : > { %v1164_v4 = vadd.f32 -0.28449672, %v1132_v45  ;;  %v846_v41 = vand.u32 2147483647, %v12001_v47  ;;  %v1415_v33 = vmul.f32 %v10790_v34, %v1255_v21  ;;  %v1328_v32 = vmul.f32 %v1296_v52, %v848_v19  ;;  %2314 = vst [vmem:[#allocation3 + $0xfc] sm:$0xf] %v2282_v3 }
 0x201   : > { %v2002_v23 = vshrl.u32 %v9680_v36, 16  ;;  %v10796_v22 = vpop.eup %10795  ;;  %v1066_v49 = vmul.f32 %v11991_v2, %v1034_v48  ;;  %v1005_v7 = vmul.f32 1.0614054, %v12004_v29  ;;  %v714_v56 = vmul.f32 %v11746_v16, %v10297_v10  ;;  %v1671_v40 = vld [vmem:[#allocation2 + $0x9c] sm:$0x1] }
 0x202   : > { %v1196_v30 = vmul.f32 %v11966_v1, %v1164_v4  ;;  %v878_v35 = vmul.f32 0.3275911, %v846_v41  ;;  %v2005_v26 = vshll.u32 %v9680_v36, 16  ;;  %v1447_v39 = vsub.f32 1.0, %v1415_v33  ;;  %v3121_v36 = vld [vmem:[#allocation2 + $0x3c] sm:$0xf] }
 0x203   : > { %v2004_v51 = vrot.slane %v2002_v23, 7  ;;  %vm1484_vm1 = vcmp.lt.f32.partialorder %v11889_v58, 0.0  ;;  %v1098_v34 = vadd.f32 1.4214138, %v1066_v49  ;;  %v1037_v43 = vadd.f32 -1.4531521, %v1005_v7 }
 0x204   : > { %v1228_v42 = vadd.f32 0.2548296, %v1196_v30  ;;  %v910_v19 = vadd.f32 1.0, %v878_v35  ;;  %v1294_v25 = vsub.f32 0.0, %v846_v41  ;;  %v1511_v57 = vsub.f32 0.0, %v1447_v39  ;;  %v12017_v12 = vpop.eup %10797 }
 0x205   : > { %v2007_v55 = vor.u32 %v2005_v26, %v2004_v51  ;;  %v2009_v60 = vrot.slane %v2004_v51, 4  ;;  %v1130_v16 = vmul.f32 %v11991_v2, %v1098_v34  ;;  %v1069_v52 = vmul.f32 %v12004_v29, %v1037_v43  ;;  %v3122_v21 = vld [vmem:[#allocation2 + $0x40] sm:$0xf]  ;;  %3153 = vst [vmem:[#allocation3 + $0x12c] sm:$0xf] %v3121_v36 }
 0x206   : > { %v1260_v20 = vmul.f32 %v11966_v1, %v1228_v42  ;;  %v1386_v54 = vmul.f32 1.442695, %v1328_v32  ;;  %10807 = vrcp.f32 %v910_v19  ;;  %v1543_v18 = vsel %vm1479_vm0, %v1511_v57, %v1447_v39  ;;  %v1730_v1 = vld [vmem:[#allocation2 + $0xb0] sm:$0x1]  ;;  %3154 = vst [vmem:[#allocation3 + $0x150] sm:$0xf] %v3122_v21  ;;  %v652_v42 = vpop.f32.mrf.mxu0 }
 0x207   : > { %v2008_v45 = vsel %vm11554_vm14, %v2000_v5, %v2007_v55  ;;  %v2231_v46 = vsel %vm11341_vm2, %v2009_v60, %v2230_v0  ;;  %v1575_v48 = vadd.f32 1.0, %v1543_v18  ;;  %v1162_v10 = vadd.f32 -0.28449672, %v1130_v16  ;;  %v12035_v32 = vld [vmem:[%s14199_s3] ss:$0 sm:$0xff] }
 0x208   : > { %v1420_v44 = vmul.f32 %v10796_v22, %v1260_v20  ;;  %v12025_v4 = vpop.eup %10799  ;;  %2229 = vst [vmem:[#allocation2 + $0x7c] sm:$0xf] %v2008_v45  ;;  %2232 = vst [vmem:[#allocation2 + $0x80] sm:$0x1] %v2231_v46  ;;  %v1101_v6 = vadd.f32 1.4214138, %v1069_v52  ;;  %v1326_v30 = vmul.f32 %v1294_v25, %v846_v41  ;;  %v12038_v13 = vadd.f32 %v12035_v32, %v714_v56 }
 0x209   : > { %v1672_v5 = vsel %vm11341_vm2, 0, %v1671_v40  ;;  %v12029_v23 = vpop.eup %10801  ;;  %v1003_v33 = vmul.f32 1.0614054, %v12025_v4  ;;  %v1727_v22 = vld [vmem:[#allocation2 + $0xa4] sm:$0x1]  ;;  %v1607_v0 = vmul.f32 %v1575_v48, %v11932_v17  ;;  %v1194_v49 = vmul.f32 %v11991_v2, %v1162_v10 }
 0x20a   : > { %v1452_v63 = vsub.f32 1.0, %v1420_v44  ;;  %1673 = vst [vmem:[#allocation2 + $0x9c] sm:$0x1] %v1672_v5  ;;  %v1133_v7 = vmul.f32 %v12004_v29, %v1101_v6  ;;  %v1731_v35 = vsel %vm11348_vm4, 0, %v1730_v1  ;;  %v2283_v41 = vld [vmem:[#allocation2 + $0x30] sm:$0xf]  ;;  %v12045_v51 = vpop.eup %10803  ;;  %10809 = vpow2.f32 %v1386_v54 }
 0x20b   : > { %v2284_v3 = vld [vmem:[#allocation2 + $0x34] sm:$0xf]  ;;  %v12048_v39 = vmul.f32 0.5, %v11949_v8  ;;  %v1035_v56 = vadd.f32 -1.4531521, %v1003_v33  ;;  %v9678_v17 = vpack.c.bf16 %v1607_v0, %v1607_v0  ;;  %v1728_v57 = vsel %vm11348_vm4, 0, %v1727_v22 }
 0x20c   : > { %v1516_v26 = vsub.f32 0.0, %v1452_v63  ;;  %1732 = vst [vmem:[#allocation2 + $0xb0] sm:$0x1] %v1731_v35  ;;  %2315 = vst [vmem:[#allocation3 + $0x120] sm:$0xf] %v2283_v41  ;;  %v12053_v25 = vpop.eup %10805  ;;  %vm1482_vm3 = vcmp.lt.f32.partialorder %v11914_v59, 0.0 }
 0x20d   : > { %2316 = vst [vmem:[#allocation3 + $0x144] sm:$0xf] %v2284_v3  ;;  %v1226_v34 = vadd.f32 0.2548296, %v1194_v49  ;;  %v1165_v43 = vadd.f32 -0.28449672, %v1133_v7  ;;  %v1067_v8 = vmul.f32 %v12025_v4, %v1035_v56 }
 0x20e   : > { %v12051_v19 = vmul.f32 0.70710677, %v12038_v13  ;;  %v1548_v55 = vsel %vm1484_vm1, %v1516_v26, %v1452_v63  ;;  %v1382_v60 = vmul.f32 1.442695, %v1326_v30  ;;  %v1985_v20 = vshrl.u32 %v9678_v17, 16 }
 0x20f   : > { %v1580_v40 = vadd.f32 1.0, %v1548_v55  ;;  %v1258_v16 = vmul.f32 %v11991_v2, %v1226_v34  ;;  %v12065_v52 = vld [vmem:[%s14198_s2] ss:$0 sm:$0xff]  ;;  %1729 = vst [vmem:[#allocation2 + $0xa4] sm:$0x1] %v1728_v57  ;;  %v1197_v54 = vmul.f32 %v12004_v29, %v1165_v43  ;;  %v1988_v2 = vshll.u32 %v9678_v17, 16 }
 0x210   : > { %v12068_v58 = vmul.f32 %v12065_v52, %v652_v42  ;;  %v1099_v45 = vadd.f32 1.4214138, %v1067_v8  ;;  %v1008_v46 = vmul.f32 1.0614054, %v12053_v25  ;;  %v849_v18 = vand.u32 2147483647, %v12051_v19 }
 0x211   : > { %v1987_v44 = vrot.slane %v1985_v20, 7  ;;  %v2223_v1 = vld [vmem:[#allocation2 + $0x74] sm:$0x1]  ;;  %v1612_v36 = vmul.f32 %v1580_v40, %v11957_v11  ;;  %v1418_v21 = vmul.f32 %v12017_v12, %v1258_v16  ;;  %v1229_v48 = vadd.f32 0.2548296, %v1197_v54 }
 0x212   : > { %v1131_v10 = vmul.f32 %v12025_v4, %v1099_v45  ;;  %v1040_v6 = vadd.f32 -1.4531521, %v1008_v46  ;;  %v881_v5 = vmul.f32 0.3275911, %v849_v18  ;;  %vm1485_vm5 = vcmp.lt.f32.partialorder %v11926_v31, 0.0 }
 0x213   : > { %v1990_v63 = vor.u32 %v1988_v2, %v1987_v44  ;;  %v1992_v33 = vrot.slane %v1987_v44, 4  ;;  %v9683_v30 = vpack.c.bf16 %v1612_v36, %v1612_v36  ;;  %v1450_v22 = vsub.f32 1.0, %v1418_v21  ;;  %v12077_v0 = vpop.eup %10807  ;;  %v3123_v12 = vld [vmem:[#allocation2 + $0x48] sm:$0xf]  ;;  %v3124_v42 = vld [vmem:[#allocation2 + $0x4c] sm:$0xf] }
 0x214   : > { %v1261_v49 = vmul.f32 %v12004_v29, %v1229_v48  ;;  %v1163_v7 = vadd.f32 -0.28449672, %v1131_v10  ;;  %v1072_v11 = vmul.f32 %v12053_v25, %v1040_v6  ;;  %v913_v35 = vadd.f32 1.0, %v881_v5  ;;  %3155 = vst [vmem:[#allocation3 + $0x174] sm:$0xf] %v3123_v12 }
 0x215   : > { %v1991_v41 = vsel %vm11554_vm14, %v1983_v53, %v1990_v63  ;;  %v2224_v3 = vsel %vm11341_vm2, %v1992_v33, %v2223_v1  ;;  %v2028_v26 = vshrl.u32 %v9683_v30, 16  ;;  %v2031_v56 = vshll.u32 %v9683_v30, 16  ;;  %v2285_v17 = vld [vmem:[#allocation2 + $0x3c] sm:$0xf]  ;;  %3156 = vst [vmem:[#allocation3 + $0x198] sm:$0xf] %v3124_v42 }
 0x216   : > { %2222 = vst [vmem:[#allocation2 + $0x70] sm:$0xf] %v1991_v41  ;;  %2225 = vst [vmem:[#allocation2 + $0x74] sm:$0x1] %v2224_v3  ;;  %v1514_v29 = vsub.f32 0.0, %v1450_v22  ;;  %v1421_v34 = vmul.f32 %v12029_v23, %v1261_v49  ;;  %v1195_v43 = vmul.f32 %v12025_v4, %v1163_v7  ;;  %10811 = vrcp.f32 %v913_v35 }
 0x217   : > { %v1104_v55 = vadd.f32 1.4214138, %v1072_v11  ;;  %2317 = vst [vmem:[#allocation3 + $0x168] sm:$0xf] %v2285_v17  ;;  %v12089_v62 = vrot.slane %v2028_v26, 7  ;;  %v1297_v8 = vsub.f32 0.0, %v849_v18  ;;  %v10810_v45 = vpop.eup %10809  ;;  %10813 = vpow2.f32 %v1382_v60  ;;  %v10300_v17 = vpop.f32.mrf.mxu0 }
 0x218   : > { %v1006_v53 = vmul.f32 1.0614054, %v12077_v0  ;;  %v2286_v57 = vld [vmem:[#allocation2 + $0x40] sm:$0xf]  ;;  %v2240_v20 = vld [vmem:[#allocation2 + $0x90] sm:$0xf]  ;;  %v1546_v40 = vsel %vm1482_vm3, %v1514_v29, %v1450_v22  ;;  %v12103_v5 = vadd.f32 %v12035_v32, %v12068_v58 }
 0x219   : > { %v1453_v16 = vsub.f32 1.0, %v1421_v34  ;;  %v1227_v54 = vadd.f32 0.2548296, %v1195_v43  ;;  %v1136_v23 = vmul.f32 %v12053_v25, %v1104_v55  ;;  %2318 = vst [vmem:[#allocation3 + $0x18c] sm:$0xf] %v2286_v57  ;;  %v2033_v46 = vor.u32 %v2031_v56, %v12089_v62 }
 0x21a   : > { %v1578_v44 = vadd.f32 1.0, %v1546_v40  ;;  %v1038_v2 = vadd.f32 -1.4531521, %v1006_v53  ;;  %v1329_v48 = vmul.f32 %v1297_v8, %v849_v18  ;;  %vm1483_vm6 = vcmp.lt.f32.partialorder %v11964_v37, 0.0  ;;  %v3125_v18 = vld [vmem:[#allocation2 + $0x54] sm:$0xf] }
 0x21b   : > { %v1517_v1 = vsub.f32 0.0, %v1453_v16  ;;  %v1259_v36 = vmul.f32 %v12025_v4, %v1227_v54  ;;  %v1168_v21 = vadd.f32 -0.28449672, %v1136_v23  ;;  %v2241_v59 = vsel %vm11543_vm13, %v2033_v46, %v2240_v20  ;;  %v3126_v33 = vld [vmem:[#allocation2 + $0x58] sm:$0xf] }
 0x21c   : > { %v1610_v10 = vmul.f32 %v1578_v44, %v11961_v14  ;;  %v1070_v6 = vmul.f32 %v12077_v0, %v1038_v2  ;;  %2242 = vst [vmem:[#allocation2 + $0x90] sm:$0xf] %v2241_v59  ;;  %v12111_v22 = vmul.f32 0.5, %v11974_v38  ;;  %3157 = vst [vmem:[#allocation3 + $0x1bc] sm:$0xf] %v3125_v18  ;;  %vm1488_vm7 = vcmp.lt.f32.partialorder %v11979_v61, 0.0 }
 0x21d   : > { %v1549_v60 = vsel %vm1485_vm5, %v1517_v1, %v1453_v16  ;;  %v1419_v63 = vmul.f32 %v12045_v51, %v1259_v36  ;;  %v1200_v4 = vmul.f32 %v12053_v25, %v1168_v21  ;;  %3158 = vst [vmem:[#allocation3 + $0x1e0] sm:$0xf] %v3126_v33  ;;  %v2287_v58 = vld [vmem:[#allocation2 + $0x48] sm:$0xf]  ;;  %v12115_v51 = vmul.f32 0.70710677, %v12103_v5 }
 0x21e   : > { %v9681_v30 = vpack.c.bf16 %v1610_v10, %v1610_v10  ;;  %v1581_v14 = vadd.f32 1.0, %v1549_v60  ;;  %v1102_v49 = vadd.f32 1.4214138, %v1070_v6  ;;  %2319 = vst [vmem:[#allocation3 + $0x1b0] sm:$0xf] %v2287_v58  ;;  %v12121_v56 = vmul.f32 0.5, %v11988_v9 }
 0x21f   : > { %v1451_v7 = vsub.f32 1.0, %v1419_v63  ;;  %v1232_v31 = vadd.f32 0.2548296, %v1200_v4  ;;  %v1388_v41 = vmul.f32 1.442695, %v1329_v48  ;;  %v2034_v55 = vrot.slane %v12089_v62, 4 }
 0x220   : > { %v2011_v11 = vshrl.u32 %v9681_v30, 16  ;;  %v1613_v35 = vmul.f32 %v1581_v14, %v11998_v28  ;;  %v1134_v12 = vmul.f32 %v12077_v0, %v1102_v49  ;;  %v2288_v38 = vld [vmem:[#allocation2 + $0x4c] sm:$0xf]  ;;  %v12124_v42 = vand.u32 2147483647, %v12115_v51 }
 0x221   : > { %v1515_v3 = vsub.f32 0.0, %v1451_v7  ;;  %v1264_v26 = vmul.f32 %v12053_v25, %v1232_v31  ;;  %2320 = vst [vmem:[#allocation3 + $0x1d4] sm:$0xf] %v2288_v38  ;;  %v2014_v34 = vshll.u32 %v9681_v30, 16  ;;  %v2233_v53 = vld [vmem:[#allocation2 + $0x84] sm:$0xf]  ;;  %10815 = vpow2.f32 %v1388_v41  ;;  %v665_v41 = vpop.f32.mrf.mxu0 }
 0x222   : > { %v12126_v29 = vrot.slane %v2011_v11, 7  ;;  %v9684_v43 = vpack.c.bf16 %v1613_v35, %v1613_v35  ;;  %v1166_v28 = vadd.f32 -0.28449672, %v1134_v12  ;;  %v879_v9 = vmul.f32 0.3275911, %v12124_v42 }
 0x223   : > { %v1547_v8 = vsel %vm1483_vm6, %v1515_v3, %v1451_v7  ;;  %v1424_v25 = vmul.f32 %v10810_v45, %v1264_v26  ;;  %v717_v40 = vmul.f32 %v12065_v52, %v10300_v17  ;;  %v12134_v16 = vpop.eup %10811  ;;  %v2244_v54 = vld [vmem:[#allocation2 + $0x98] sm:$0x1]  ;;  %v3127_v36 = vld [vmem:[#allocation2 + $0x60] sm:$0xf]  ;;  %v3128_v6 = vld [vmem:[#allocation2 + $0x64] sm:$0xf] }
 0x224   : > { %v2016_v57 = vor.u32 %v2014_v34, %v12126_v29  ;;  %v2036_v20 = vshrl.u32 %v9684_v43, 16  ;;  %v1579_v23 = vadd.f32 1.0, %v1547_v8  ;;  %v1198_v62 = vmul.f32 %v12077_v0, %v1166_v28  ;;  %v10814_v21 = vpop.eup %10813  ;;  %3159 = vst [vmem:[#allocation3 + $0x204] sm:$0xf] %v3127_v36  ;;  %3160 = vst [vmem:[#allocation3 + $0x228] sm:$0xf] %v3128_v6 }
 0x225   : > { %v1456_v46 = vsub.f32 1.0, %v1424_v25  ;;  %v911_v44 = vadd.f32 1.0, %v879_v9  ;;  %v2039_v2 = vshll.u32 %v9684_v43, 16  ;;  %v1009_v1 = vmul.f32 1.0614054, %v12134_v16  ;;  %v10532_v43 = vld [vmem:[#allocation9 + $0x1f8] sm:$0xff]  }
 0x226   : > { %v2234_v37 = vsel %vm11543_vm13, %v2016_v57, %v2233_v53  ;;  %v2038_v45 = vrot.slane %v2036_v20, 7  ;;  %v1611_v48 = vmul.f32 %v1579_v23, %v12048_v39  ;;  %v1230_v10 = vadd.f32 0.2548296, %v1198_v62  ;;  %v2289_v39 = vld [vmem:[#allocation2 + $0x54] sm:$0xf]  ;;  %10118 = vmatprep.subr.bf16.mxu0 %v10532_v43 }
 0x227   : > { %2235 = vst [vmem:[#allocation2 + $0x84] sm:$0xf] %v2234_v37  ;;  %v1520_v59 = vsub.f32 0.0, %v1456_v46  ;;  %10817 = vrcp.f32 %v911_v44  ;;  %v1041_v4 = vadd.f32 -1.4531521, %v1009_v1  ;;  %v1295_v18 = vsub.f32 0.0, %v12124_v42 }
 0x228   : > { %v2041_v60 = vor.u32 %v2039_v2, %v2038_v45  ;;  %v2043_v63 = vrot.slane %v2038_v45, 4  ;;  %v9682_v33 = vpack.c.bf16 %v1611_v48, %v1611_v48  ;;  %v1262_v14 = vmul.f32 %v12077_v0, %v1230_v10  ;;  %v2290_v58 = vld [vmem:[#allocation2 + $0x58] sm:$0xf]  ;;  %v1680_v12 = vld [vmem:[#allocation2 + $0xc0] sm:$0x1] }
 0x229   : > { %v1552_v30 = vsel %vm1488_vm7, %v1520_v59, %v1456_v46  ;;  %v12146_v49 = vadd.f32 %v12035_v32, %v717_v40  ;;  %v1073_v35 = vmul.f32 %v12134_v16, %v1041_v4  ;;  %2321 = vst [vmem:[#allocation3 + $0x1f8] sm:$0xf] %v2289_v39  ;;  %2322 = vst [vmem:[#allocation3 + $0x21c] sm:$0xf] %v2290_v58  ;;  %v2017_v61 = vrot.slane %v12126_v29, 4 }
 0x22a   : > { %v2042_v7 = vsel %vm11554_vm14, %v2034_v55, %v2041_v60  ;;  %v2245_v31 = vsel %vm11341_vm2, %v2043_v63, %v2244_v54  ;;  %v1584_v11 = vadd.f32 1.0, %v1552_v30  ;;  %v2019_v0 = vshrl.u32 %v9682_v33, 16  ;;  %v2237_v8 = vld [vmem:[#allocation2 + $0x8c] sm:$0x1]  ;;  %v1677_v20 = vld [vmem:[#allocation2 + $0xb4] sm:$0x1] }
 0x22b   : > { %2243 = vst [vmem:[#allocation2 + $0x94] sm:$0xf] %v2042_v7  ;;  %2246 = vst [vmem:[#allocation2 + $0x98] sm:$0x1] %v2245_v31  ;;  %v1422_v38 = vmul.f32 %v10814_v21, %v1262_v14  ;;  %vm1486_vm8 = vcmp.lt.f32.partialorder %v12001_v47, 0.0  ;;  %v2022_v3 = vshll.u32 %v9682_v33, 16  ;;  %v715_v29 = vmul.f32 %v12065_v52, %v665_v41  ;;  %v10301_v33 = vpop.f32.mrf.mxu0 }
 0x22c   : > { %v1616_v26 = vmul.f32 %v1584_v11, %v12111_v22  ;;  %v1105_v17 = vadd.f32 1.4214138, %v1073_v35  ;;  %v12157_v34 = vmul.f32 0.70710677, %v12146_v49  ;;  %v2021_v28 = vrot.slane %v2019_v0, 7 }
 0x22d   : > { %v1454_v55 = vsub.f32 1.0, %v1422_v38  ;;  %v1681_v53 = vsel %vm11341_vm2, 0, %v1680_v12  ;;  %v1327_v57 = vmul.f32 %v1295_v18, %v12124_v42  ;;  %v3129_v40 = vld [vmem:[#allocation2 + $0x6c] sm:$0xf]  ;;  %v12166_v62 = vadd.f32 %v12035_v32, %v715_v29  ;;  %v3130_v44 = vld [vmem:[#allocation2 + $0x70] sm:$0xf] }
 0x22e   : > { %v9687_v25 = vpack.c.bf16 %v1616_v26, %v1616_v26  ;;  %v1137_v9 = vmul.f32 %v12134_v16, %v1105_v17  ;;  %v852_v22 = vand.u32 2147483647, %v12157_v34  ;;  %1682 = vst [vmem:[#allocation2 + $0xc0] sm:$0x1] %v1681_v53  ;;  %v2024_v54 = vor.u32 %v2022_v3, %v2021_v28  ;;  %3161 = vst [vmem:[#allocation3 + $0x24c] sm:$0xf] %v3129_v40  ;;  %v10816_v42 = vpop.eup %10815 }
 0x22f   : > { %v2026_v23 = vrot.slane %v2021_v28, 4  ;;  %v1518_v46 = vsub.f32 0.0, %v1454_v55  ;;  %v2291_v37 = vld [vmem:[#allocation2 + $0x60] sm:$0xf]  ;;  %3162 = vst [vmem:[#allocation3 + $0x270] sm:$0xf] %v3130_v44  ;;  %v718_v12 = vmul.f32 %v12065_v52, %v10301_v33 }
 0x230   : > { %v2062_v45 = vshrl.u32 %v9687_v25, 16  ;;  %v2065_v2 = vshll.u32 %v9687_v25, 16  ;;  %v1169_v1 = vadd.f32 -0.28449672, %v1137_v9  ;;  %v884_v36 = vmul.f32 0.3275911, %v852_v22 }
 0x231   : > { %2323 = vst [vmem:[#allocation3 + $0x240] sm:$0xf] %v2291_v37  ;;  %v2025_v21 = vsel %vm11554_vm14, %v2017_v61, %v2024_v54  ;;  %v2238_v48 = vsel %vm11341_vm2, %v2026_v23, %v2237_v8  ;;  %v1550_v59 = vsel %vm1486_vm8, %v1518_v46, %v1454_v55  ;;  %v2292_v10 = vld [vmem:[#allocation2 + $0x64] sm:$0xf]  ;;  %v2254_v60 = vld [vmem:[#allocation2 + $0xa8] sm:$0xf]  ;;  %v12194_v17 = vadd.f32 %v12035_v32, %v718_v12  ;;  %v668_v8 = vpop.f32.mrf.mxu0 }
 0x232   : > { %2236 = vst [vmem:[#allocation2 + $0x88] sm:$0xf] %v2025_v21  ;;  %2239 = vst [vmem:[#allocation2 + $0x8c] sm:$0x1] %v2238_v48  ;;  %v12174_v6 = vrot.slane %v2062_v45, 7  ;;  %v1582_v63 = vadd.f32 1.0, %v1550_v59  ;;  %v1201_v4 = vmul.f32 %v12134_v16, %v1169_v1 }
 0x233   : > { %v916_v18 = vadd.f32 1.0, %v884_v36  ;;  %2324 = vst [vmem:[#allocation3 + $0x264] sm:$0xf] %v2292_v10  ;;  %v1384_v30 = vmul.f32 1.442695, %v1327_v57  ;;  %v1678_v47 = vsel %vm11341_vm2, 0, %v1677_v20 }
 0x234   : > { %v12178_v14 = vmul.f32 0.70710677, %v12166_v62  ;;  %v12182_v39 = vpop.eup %10817  ;;  %v2067_v58 = vor.u32 %v2065_v2, %v12174_v6  ;;  %v1614_v7 = vmul.f32 %v1582_v63, %v12121_v56  ;;  %v1233_v31 = vadd.f32 0.2548296, %v1201_v4  ;;  %1679 = vst [vmem:[#allocation2 + $0xb4] sm:$0x1] %v1678_v47 }
 0x235   : > { %v1300_v11 = vsub.f32 0.0, %v852_v22  ;;  %v1007_v35 = vmul.f32 1.0614054, %v12182_v39  ;;  %10819 = vrcp.f32 %v916_v18  ;;  %v1736_v3 = vld [vmem:[#allocation2 + $0xc8] sm:$0x1]  ;;  %v785_v56 = vmul.f32 0.5, %v12038_v13 }
 0x236   : > { %v2255_v41 = vsel %vm11543_vm13, %v2067_v58, %v2254_v60  ;;  %v9685_v61 = vpack.c.bf16 %v1614_v7, %v1614_v7  ;;  %v1265_v0 = vmul.f32 %v12134_v16, %v1233_v31  ;;  %v850_v38 = vand.u32 2147483647, %v12178_v14  ;;  %v3131_v43 = vld [vmem:[#allocation2 + $0x78] sm:$0xf]  ;;  %v3132_v25 = vld [vmem:[#allocation2 + $0x7c] sm:$0xf] }
 0x237   : > { %2256 = vst [vmem:[#allocation2 + $0xa8] sm:$0xf] %v2255_v41  ;;  %v1039_v26 = vadd.f32 -1.4531521, %v1007_v35  ;;  %10821 = vpow2.f32 %v1384_v30  ;;  %v1332_v53 = vmul.f32 %v1300_v11, %v852_v22  ;;  %3163 = vst [vmem:[#allocation3 + $0x294] sm:$0xf] %v3131_v43  ;;  %v716_v2 = vmul.f32 %v12065_v52, %v668_v8 }
 0x238   : > { %v2045_v28 = vshrl.u32 %v9685_v61, 16  ;;  %v1425_v55 = vmul.f32 %v10816_v42, %v1265_v0  ;;  %v882_v29 = vmul.f32 0.3275911, %v850_v38  ;;  %v2048_v16 = vshll.u32 %v9685_v61, 16  ;;  %v2247_v9 = vld [vmem:[#allocation2 + $0x9c] sm:$0xf] }
 0x239   : > { %v1071_v57 = vmul.f32 %v12182_v39, %v1039_v26  ;;  %v1298_v20 = vsub.f32 0.0, %v850_v38  ;;  %v12198_v13 = vmul.f32 0.70710677, %v12194_v17  ;;  %3164 = vst [vmem:[#allocation3 + $0x2b8] sm:$0xf] %v3132_v25  ;;  %v1737_v22 = vsel %vm11348_vm4, 0, %v1736_v3 }
 0x23a   : > { %v2293_v40 = vld [vmem:[#allocation2 + $0x6c] sm:$0xf]  ;;  %v12200_v54 = vrot.slane %v2045_v28, 7  ;;  %v1457_v23 = vsub.f32 1.0, %v1425_v55  ;;  %v914_v46 = vadd.f32 1.0, %v882_v29  ;;  %vm1489_vm9 = vcmp.lt.f32.partialorder %v12051_v19, 0.0 }
 0x23b   : > { %v2294_v44 = vld [vmem:[#allocation2 + $0x70] sm:$0xf]  ;;  %2325 = vst [vmem:[#allocation3 + $0x288] sm:$0xf] %v2293_v40  ;;  %v1103_v37 = vadd.f32 1.4214138, %v1071_v57  ;;  %v1330_v42 = vmul.f32 %v1298_v20, %v850_v38  ;;  %v12217_v18 = vadd.f32 %v12035_v32, %v716_v2 }
 0x23c   : > { %v853_v45 = vand.u32 2147483647, %v12198_v13  ;;  %1738 = vst [vmem:[#allocation2 + $0xc8] sm:$0x1] %v1737_v22  ;;  %2326 = vst [vmem:[#allocation3 + $0x2ac] sm:$0xf] %v2294_v44  ;;  %v2050_v1 = vor.u32 %v2048_v16, %v12200_v54  ;;  %10823 = vrcp.f32 %v914_v46 }
 0x23d   : > { %v1521_v36 = vsub.f32 0.0, %v1457_v23  ;;  %v12209_v21 = vmul.f32 0.5, %v12103_v5  ;;  %v1135_v48 = vmul.f32 %v12182_v39, %v1103_v37  ;;  %v1733_v60 = vld [vmem:[#allocation2 + $0xbc] sm:$0x1]  ;;  %v1394_v4 = vmul.f32 1.442695, %v1332_v53 }
 0x23e   : > { %v885_v59 = vmul.f32 0.3275911, %v853_v45  ;;  %v1301_v10 = vsub.f32 0.0, %v853_v45  ;;  %v2248_v63 = vsel %vm11543_vm13, %v2050_v1, %v2247_v9  ;;  %v12220_v5 = vmul.f32 0.5, %v12146_v49  ;;  %v3133_v32 = vld [vmem:[#allocation2 + $0x84] sm:$0xf] }
 0x23f   : > { %v1553_v52 = vsel %vm1489_vm9, %v1521_v36, %v1457_v23  ;;  %2249 = vst [vmem:[#allocation2 + $0x9c] sm:$0xf] %v2248_v63  ;;  %v1167_v30 = vadd.f32 -0.28449672, %v1135_v48  ;;  %v1390_v58 = vmul.f32 1.442695, %v1330_v42 }
 0x240   : > { %v1585_v33 = vadd.f32 1.0, %v1553_v52  ;;  %v917_v47 = vadd.f32 1.0, %v885_v59  ;;  %v1333_v7 = vmul.f32 %v1301_v10, %v853_v45  ;;  %v12223_v31 = vmul.f32 0.70710677, %v12217_v18  ;;  %v3134_v12 = vld [vmem:[#allocation2 + $0x88] sm:$0xf] }
 0x241   : > { %v1734_v19 = vsel %vm11348_vm4, 0, %v1733_v60  ;;  %v1199_v35 = vmul.f32 %v12182_v39, %v1167_v30  ;;  %v2068_v49 = vrot.slane %v12174_v6, 4  ;;  %vm1487_vm10 = vcmp.lt.f32.partialorder %v12115_v51, 0.0  ;;  %3165 = vst [vmem:[#allocation3 + $0x2dc] sm:$0xf] %v3133_v32 }
 0x242   : > { %v1617_v11 = vmul.f32 %v1585_v33, %v785_v56  ;;  %10825 = vrcp.f32 %v917_v47  ;;  %1735 = vst [vmem:[#allocation2 + $0xbc] sm:$0x1] %v1734_v19  ;;  %v12228_v41 = vpop.eup %10819  ;;  %v12233_v61 = vmul.f32 0.5, %v12166_v62  ;;  %v851_v0 = vand.u32 2147483647, %v12223_v31 }
 0x243   : > { %10827 = vpow2.f32 %v1394_v4  ;;  %v11129_v38 = vmov 0   ;;  %3166 = vst [vmem:[#allocation3 + $0x300] sm:$0xf] %v3134_v12  ;;  %v1231_v56 = vadd.f32 0.2548296, %v1199_v35  ;;  %v12238_v26 = vmul.f32 0.5, %v12194_v17 }
 0x244   : > { %1622 = vst [vmem:[#allocation2] sm:$0xf] %v11129_v38  ;;  %1623 = vst [vmem:[#allocation2 + $0x4] sm:$0xf] %v11129_v38  ;;  %v9688_v3 = vpack.c.bf16 %v1617_v11, %v1617_v11  ;;  %v1012_v6 = vmul.f32 1.0614054, %v12228_v41  ;;  %v10822_v28 = vpop.eup %10821  ;;  %10829 = vpow2.f32 %v1390_v58 }
 0x245   : > { %1624 = vst [vmem:[#allocation2 + $0x8] sm:$0x1] %v11129_v38  ;;  %1626 = vst [vmem:[#allocation2 + $0xcc] sm:$0xf] %v11129_v38  ;;  %v2841_v62 = vld [vmem:[#allocation2 + $0xc] sm:$0xe]  ;;  %v1263_v16 = vmul.f32 %v12182_v39, %v1231_v56 }
 0x246   : > { %1627 = vst [vmem:[#allocation2 + $0xd0] sm:$0xf] %v11129_v38  ;;  %1628 = vst [vmem:[#allocation2 + $0xd4] sm:$0x1] %v11129_v38  ;;  %v12240_v43 = vld [vmem:[#allocation2 + $0x10] sm:$0xf] }
 0x247   : > { %v2051_v55 = vrot.slane %v12200_v54, 4  ;;  %v1396_v53 = vmul.f32 1.442695, %v1333_v7  ;;  %v883_v29 = vmul.f32 0.3275911, %v851_v0  ;;  %v1299_v8 = vsub.f32 0.0, %v851_v0 }
 0x248   : > { %v2070_v25 = vshrl.u32 %v9688_v3, 16  ;;  %v1044_v9 = vadd.f32 -1.4531521, %v1012_v6  ;;  %v2295_v57 = vld [vmem:[#allocation2 + $0x78] sm:$0xf]  ;;  %v2073_v20 = vshll.u32 %v9688_v3, 16  ;;  %v1423_v22 = vmul.f32 %v10822_v28, %v1263_v16 }
 0x249   : > { %v915_v40 = vadd.f32 1.0, %v883_v29  ;;  %v1331_v23 = vmul.f32 %v1299_v8, %v851_v0  ;;  %vm2934_vm11 = vcmask 1042432   ;;  %v2296_v17 = vld [vmem:[#allocation2 + $0x7c] sm:$0xf]  ;;  %2327 = vst [vmem:[#allocation3 + $0x2d0] sm:$0xf] %v2295_v57  ;;  %v12246_v1 = vpop.eup %10823 }
 0x24a   : > { %v2072_v46 = vrot.slane %v2070_v25, 7  ;;  %v1076_v44 = vmul.f32 %v12228_v41, %v1044_v9  ;;  %vm2935_vm12 = vcmask 1046532   ;;  %2328 = vst [vmem:[#allocation3 + $0x2f4] sm:$0xf] %v2296_v17  ;;  %v2258_v37 = vld [vmem:[#allocation2 + $0xb0] sm:$0x1] }
 0x24b   : > { %10831 = vrcp.f32 %v915_v40  ;;  %v1392_v45 = vmul.f32 1.442695, %v1331_v23  ;;  %v9262_v2 = vrot.slane %v2841_v62, 9  ;;  %v2946_v39 = vrot.slane %v12240_v43, 5  ;;  %v1632_v10 = vld [vmem:[#allocation2] sm:$0x1]  ;;  %vm12249_vm15 = vmor %vm2934_vm11, %vm2935_vm12 }
 0x24c   : > { %v2075_v36 = vor.u32 %v2073_v20, %v2072_v46  ;;  %v2077_v42 = vrot.slane %v2072_v46, 4  ;;  %v1455_v48 = vsub.f32 1.0, %v1423_v22  ;;  %v1108_v59 = vadd.f32 1.4214138, %v1076_v44  ;;  %v1688_v4 = vld [vmem:[#allocation2 + $0x8] sm:$0x1] }
 0x24d   : > { %v1010_v63 = vmul.f32 1.0614054, %v12246_v1  ;;  %10833 = vpow2.f32 %v1396_v53  ;;  %v1633_v52 = vsel %vm11341_vm2, 0, %v1632_v10  ;;  %v2947_v33 = vsel %vm12249_vm15, %v9262_v2, %v2946_v39  ;;  %v2276_v19 = vld [vmem:[#allocation2 + $0x4] sm:$0xf] }
 0x24e   : > { %v2076_v30 = vsel %vm11554_vm14, %v2068_v49, %v2075_v36  ;;  %v2259_v47 = vsel %vm11341_vm2, %v2077_v42, %v2258_v37  ;;  %v1519_v58 = vsub.f32 0.0, %v1455_v48  ;;  %v1140_v7 = vmul.f32 %v12228_v41, %v1108_v59  ;;  %1634 = vst [vmem:[#allocation2] sm:$0x1] %v1633_v52  ;;  %v2340_v11 = vld [vmem:[#allocation2 + $0x4] sm:$0xf] }
 0x24f   : > { %3083 = vst [vmem:[#allocation3 + $0x50] sm:$0xf] %v2947_v33  ;;  %2257 = vst [vmem:[#allocation2 + $0xac] sm:$0xf] %v2076_v30  ;;  %v1042_v35 = vadd.f32 -1.4531521, %v1010_v63  ;;  %10835 = vpow2.f32 %v1392_v45  ;;  %v12267_v6 = vpop.eup %10825 }
 0x250   : > { %2260 = vst [vmem:[#allocation2 + $0xb0] sm:$0x1] %v2259_v47  ;;  %v1689_v32 = vsel %vm11348_vm4, 0, %v1688_v4  ;;  %2308 = vst [vmem:[#allocation3 + $0x24] sm:$0xf] %v2276_v19  ;;  %v2400_v12 = vshll.u32 %v2340_v11, 16  ;;  %v1551_v49 = vsel %vm1487_vm10, %v1519_v58, %v1455_v48  ;;  %v10828_v29 = vpop.eup %10827 }
 0x251   : > { %v2404_v0 = vshrl.u32 %v2340_v11, 16  ;;  %v1172_v38 = vadd.f32 -0.28449672, %v1140_v7  ;;  %1690 = vst [vmem:[#allocation2 + $0x8] sm:$0x1] %v1689_v32  ;;  %v1583_v62 = vadd.f32 1.0, %v1551_v49  ;;  %v1074_v43 = vmul.f32 %v12246_v1, %v1042_v35  ;;  %v12281_v37 = vpop.eup %10829 }
 0x252   : > { %vm2387_vm0 = vsmask.f32 3328  ;;  %vm2388_vm1 = vsmask.f32 7440  ;;  %v2838_v3 = vld [vmem:[#allocation2] sm:$0xe] }
 0x253   : > { %v2839_v56 = vld [vmem:[#allocation2 + $0x4] sm:$0xf]  ;;  %v12270_v28 = vrot.slane %v2400_v12, 5  ;;  %v2406_v53 = vrot.slane %v2404_v0, 4  ;;  %v1204_v8 = vmul.f32 %v12228_v41, %v1172_v38  ;;  %v1013_v51 = vmul.f32 1.0614054, %v12267_v6  ;;  %vm12300_vm6 = vmor %vm2387_vm0, %vm2388_vm1 }
 0x254   : > { %v9261_v25 = vrot.slane %v2838_v3, 9  ;;  %v2939_v16 = vrot.slane %v2839_v56, 5  ;;  %v2843_v9 = vld [vmem:[#allocation2 + $0x14] sm:$0x1]  ;;  %v1615_v57 = vmul.f32 %v1583_v62, %v12209_v21  ;;  %vm1492_vm3 = vcmp.lt.f32.partialorder %v12157_v34, 0.0 }
 0x255   : > { %v1106_v20 = vadd.f32 1.4214138, %v1074_v43  ;;  %v2407_v40 = vor.u32 %v2406_v53, %v12270_v28  ;;  %v2948_v23 = vrot.slane %v2946_v39, 4  ;;  %v1236_v17 = vadd.f32 0.2548296, %v1204_v8 }
 0x256   : > { %v1045_v46 = vadd.f32 -1.4531521, %v1013_v51  ;;  %v2940_v22 = vsel %vm12249_vm15, %v9261_v25, %v2939_v16  ;;  %v12279_v44 = vrot.slane %v2939_v16, 4  ;;  %v9686_v45 = vpack.c.bf16 %v1615_v57, %v1615_v57  ;;  %v2275_v36 = vld [vmem:[#allocation2] sm:$0xf] }
 0x257   : > { %v1138_v2 = vmul.f32 %v12246_v1, %v1106_v20  ;;  %v2339_v21 = vld [vmem:[#allocation2] sm:$0xf]  ;;  %v12284_v42 = vrot.slane %v2407_v40, 4  ;;  %3081 = vst [vmem:[#allocation3 + $0x8] sm:$0xf] %v2940_v22  ;;  %v2949_v48 = vrot.slane %v2843_v9, 5  ;;  %v1268_v39 = vmul.f32 %v12228_v41, %v1236_v17 }
 0x258   : > { %v1077_v59 = vmul.f32 %v12267_v6, %v1045_v46  ;;  %2307 = vst [vmem:[#allocation3] sm:$0xf] %v2275_v36  ;;  %v2391_v10 = vshrl.u32 %v2339_v21, 16  ;;  %v2394_v63 = vshll.u32 %v2339_v21, 16  ;;  %v2053_v52 = vshrl.u32 %v9686_v45, 16  ;;  %v12290_v58 = vpop.eup %10831 }
 0x259   : > { %v2056_v4 = vshll.u32 %v9686_v45, 16  ;;  %v1170_v33 = vadd.f32 -0.28449672, %v1138_v2  ;;  %v2341_v30 = vld [vmem:[#allocation2 + $0x8] sm:$0x1]  ;;  %v2950_v47 = vsel %vm12249_vm15, %v2948_v23, %v2949_v48  ;;  %v1428_v19 = vmul.f32 %v10828_v29, %v1268_v39 }
 0x25a   : > { %v2251_v7 = vld [vmem:[#allocation2 + $0xa4] sm:$0x1]  ;;  %v1109_v11 = vadd.f32 1.4214138, %v1077_v59  ;;  %v2393_v35 = vrot.slane %v2391_v10, 4  ;;  %v2396_v32 = vrot.slane %v2394_v63, 5  ;;  %v12294_v56 = vpop.eup %10833 }
 0x25b   : > { %v2840_v41 = vld [vmem:[#allocation2 + $0x8] sm:$0x1]  ;;  %3084 = vst [vmem:[#allocation3 + $0x74] sm:$0xf] %v2950_v47  ;;  %v2055_v12 = vrot.slane %v2053_v52, 7  ;;  %v1202_v0 = vmul.f32 %v12246_v1, %v1170_v33  ;;  %v2410_v38 = vshll.u32 %v2341_v30, 16 }
 0x25c   : > { %v1011_v49 = vmul.f32 1.0614054, %v12290_v58  ;;  %v3135_v3 = vld [vmem:[#allocation2 + $0x90] sm:$0xf]  ;;  %v1460_v62 = vsub.f32 1.0, %v1428_v19  ;;  %vm1490_vm5 = vcmp.lt.f32.partialorder %v12178_v14, 0.0  ;;  %v1141_v43 = vmul.f32 %v12267_v6, %v1109_v11  ;;  %v12304_v22 = vpop.eup %10835 }
 0x25d   : > { %v2397_v53 = vor.u32 %v2396_v32, %v2393_v35  ;;  %v2942_v29 = vrot.slane %v2840_v41, 5  ;;  %v3136_v8 = vld [vmem:[#allocation2 + $0x94] sm:$0xf]  ;;  %3167 = vst [vmem:[#allocation3 + $0x324] sm:$0xf] %v3135_v3  ;;  %v2058_v25 = vor.u32 %v2056_v4, %v2055_v12  ;;  %v2060_v16 = vrot.slane %v2055_v12, 4 }
 0x25e   : > { %v2297_v51 = vld [vmem:[#allocation2 + $0x84] sm:$0xf]  ;;  %v1234_v9 = vadd.f32 0.2548296, %v1202_v0  ;;  %v1043_v57 = vadd.f32 -1.4531521, %v1011_v49 }
 0x25f   : > { %3168 = vst [vmem:[#allocation3 + $0x348] sm:$0xf] %v3136_v8  ;;  %2329 = vst [vmem:[#allocation3 + $0x318] sm:$0xf] %v2297_v51  ;;  %v1524_v40 = vsub.f32 0.0, %v1460_v62  ;;  %v2398_v17 = vrot.slane %v2397_v53, 4  ;;  %v2059_v45 = vsel %vm11554_vm14, %v2051_v55, %v2058_v25  ;;  %v2252_v2 = vsel %vm11341_vm2, %v2060_v16, %v2251_v7 }
 0x260   : > { %v1173_v23 = vadd.f32 -0.28449672, %v1141_v43  ;;  %v2412_v46 = vrot.slane %v2410_v38, 5  ;;  %v1266_v36 = vmul.f32 %v12246_v1, %v1234_v9  ;;  %v1075_v21 = vmul.f32 %v12290_v58, %v1043_v57  ;;  %v2342_v48 = vld [vmem:[#allocation2 + $0xc] sm:$0xf]  ;;  %v10486_v9 = vld [vmem:[#allocation9 + $0x138] sm:$0xff]  }
 0x261   : > { %v2343_v39 = vld [vmem:[#allocation2 + $0x10] sm:$0xf]  ;;  %v2298_v59 = vld [vmem:[#allocation2 + $0x88] sm:$0xf]  ;;  %2250 = vst [vmem:[#allocation2 + $0xa0] sm:$0xf] %v2059_v45  ;;  %v1556_v10 = vsel %vm1492_vm3, %v1524_v40, %v1460_v62  ;;  %v2403_v55 = vsel %vm12300_vm6, %v2398_v17, %v12270_v28  ;;  %v2943_v34 = vsel %vm12249_vm15, %v12279_v44, %v2942_v29 }
 0x262   : > { %2253 = vst [vmem:[#allocation2 + $0xa4] sm:$0x1] %v2252_v2  ;;  %v1205_v54 = vmul.f32 %v12267_v6, %v1173_v23  ;;  %v2413_v1 = vsel %vm12300_vm6, %v12284_v42, %v2412_v46  ;;  %2330 = vst [vmem:[#allocation3 + $0x33c] sm:$0xf] %v2298_v59  ;;  %v1588_v63 = vadd.f32 1.0, %v1556_v10  ;;  %v1426_v52 = vmul.f32 %v12281_v37, %v1266_v36  ;;  %v12340_v57 = vld [vmem:[#allocation3 + $0x50] sm:$0xff] }
 0x263   : > { %vm1493_vm7 = vcmp.lt.f32.partialorder %v12198_v13, 0.0  ;;  %v1107_v4 = vadd.f32 1.4214138, %v1075_v21  ;;  %2806 = vst [vmem:[#allocation3 + $0x4] sm:$0xf] %v2403_v55  ;;  %v2415_v28 = vshrl.u32 %v2342_v48, 16 }
 0x264   : > { %2807 = vst [vmem:[#allocation3 + $0x28] sm:$0xf] %v2413_v1  ;;  %v1237_v33 = vadd.f32 0.2548296, %v1205_v54  ;;  %3082 = vst [vmem:[#allocation3 + $0x2c] sm:$0xf] %v2943_v34  ;;  %v1620_v42 = vmul.f32 %v1588_v63, %v12220_v5 }
 0x265   : > { %v2418_v30 = vshll.u32 %v2342_v48, 16  ;;  %v2424_v47 = vshll.u32 %v2343_v39, 16  ;;  %v1458_v7 = vsub.f32 1.0, %v1426_v52  ;;  %v1139_v19 = vmul.f32 %v12290_v58, %v1107_v4  ;;  %v2344_v37 = vld [vmem:[#allocation2 + $0x14] sm:$0x1]  ;;  %v12342_v40 = vld [vmem:[#allocation3 + $0x74] sm:$0xff] }
 0x266   : > { %v2428_v11 = vshrl.u32 %v2343_v39, 16  ;;  %v3137_v35 = vld [vmem:[#allocation2 + $0x9c] sm:$0xf]  ;;  %v1269_v32 = vmul.f32 %v12267_v6, %v1237_v33  ;;  %v2417_v41 = vrot.slane %v2415_v28, 4  ;;  %v2299_v44 = vld [vmem:[#allocation2 + $0x90] sm:$0xf]  ;;  %v9691_v49 = vpack.c.bf16 %v1620_v42, %v1620_v42 }
 0x267   : > { %v2420_v12 = vrot.slane %v2418_v30, 5  ;;  %v12331_v0 = vrot.slane %v2424_v47, 5  ;;  %3169 = vst [vmem:[#allocation3 + $0x36c] sm:$0xf] %v3137_v35  ;;  %v1522_v38 = vsub.f32 0.0, %v1458_v7  ;;  %v12335_v53 = vmul.f32 0.5, %v12217_v18 }
 0x268   : > { %v1171_v3 = vadd.f32 -0.28449672, %v1139_v19  ;;  %v2430_v62 = vrot.slane %v2428_v11, 4  ;;  %v2300_v43 = vld [vmem:[#allocation2 + $0x94] sm:$0xf]  ;;  %v1429_v5 = vmul.f32 %v12294_v56, %v1269_v32  ;;  %v2434_v8 = vshll.u32 %v2344_v37, 16 }
 0x269   : > { %2331 = vst [vmem:[#allocation3 + $0x360] sm:$0xf] %v2299_v44  ;;  %v2421_v29 = vor.u32 %v2420_v12, %v2417_v41  ;;  %2332 = vst [vmem:[#allocation3 + $0x384] sm:$0xf] %v2300_v43  ;;  %v2096_v6 = vshrl.u32 %v9691_v49, 16  ;;  %v2099_v51 = vshll.u32 %v9691_v49, 16  ;;  %v1554_v25 = vsel %vm1490_vm5, %v1522_v38, %v1458_v7 }
 0x26a   : > { %v1203_v16 = vmul.f32 %v12290_v58, %v1171_v3  ;;  %v3138_v23 = vld [vmem:[#allocation2 + $0xa0] sm:$0xf]  ;;  %v1586_v17 = vadd.f32 1.0, %v1554_v25  ;;  %v1461_v18 = vsub.f32 1.0, %v1429_v5  ;;  %vm1491_vm8 = vcmp.lt.f32.partialorder %v12223_v31, 0.0  ;;  %v10496_v14 = vld [vmem:[#allocation9 + $0x170] sm:$0xff]  }
 0x26b   : > { %v2268_v56 = vld [vmem:[#allocation2 + $0xc0] sm:$0xf]  ;;  %v10477_v46 = vld [vmem:[#allocation3] ss:$36 sps:$4 sm:$0xff]   ;;  %v10487_v45 = vld [vmem:[#allocation3 + $0x54] ss:$36 sps:$4 sm:$0xff]   ;;  %v2431_v2 = vor.u32 %v2430_v62, %v12331_v0  ;;  %v9320_v52 = vcombine.low %v12340_v57, %v12342_v40 }
 0x26c   : > { %v12346_v36 = vld [vmem:[#allocation2 + $0x18] sm:$0xe]  ;;  %3170 = vst [vmem:[#allocation3 + $0x390] sm:$0xf] %v3138_v23  ;;  %v12348_v21 = vrot.slane %v2096_v6, 7  ;;  %v1618_v10 = vmul.f32 %v1586_v17, %v12233_v61  ;;  %v1525_v54 = vsub.f32 0.0, %v1461_v18 }
 0x26d   : > { %v1235_v48 = vadd.f32 0.2548296, %v1203_v16  ;;  %v10479_v39 = vld [vmem:[#allocation3 + $0x4] ss:$36 sps:$4 sm:$0xff]   ;;  %v10484_v1 = vld [vmem:[#allocation3 + $0xc] ss:$36 sps:$4 sm:$0xff]  }
 0x26e   : > { %v2845_v59 = vld [vmem:[#allocation2 + $0x1c] sm:$0xf]  ;;  %v10482_v55 = vld [vmem:[#allocation3 + $0x8] ss:$36 sps:$4 sm:$0xff]   ;;  %v2422_v63 = vrot.slane %v2421_v29, 4  ;;  %v2101_v34 = vor.u32 %v2099_v51, %v12348_v21  ;;  %v2102_v33 = vrot.slane %v12348_v21, 4  ;;  %6282 = vmatprep.mubr.bf16.mxu1 %v10479_v39  ;;  %v9689_v61 = vpack.c.bf16 %v1618_v10, %v1618_v10  ;;  %6443 = vmatprep.mubr.bf16.mxu0 %v10484_v1 }
 0x26f   : > { %v12353_v4 = vld [vmem:[#allocation2 + $0x20] sm:$0x1]  ;;  %v1267_v28 = vmul.f32 %v12290_v58, %v1235_v48  ;;  %v2432_v30 = vrot.slane %v2431_v2, 4  ;;  %v2345_v47 = vld [vmem:[#allocation2 + $0x18] sm:$0xf]  ;;  %v10533_v42 = vld [vmem:[#allocation9 + $0x1b8] sm:$0xff]   ;;  %v1557_v7 = vsel %vm1493_vm7, %v1525_v54, %v1461_v18  ;;  %6283 = vmatmul.mubr.bf16.vlgmr.msra.gmra.mxu1 %v10477_v46  ;;  %6444 = vmatmul.mubr.bf16.vlgmr.msra.gmra.mxu0 %v10482_v55 }
 0x270   : > { %v2427_v19 = vsel %vm12300_vm6, %v2422_v63, %v12331_v0  ;;  %v2436_v37 = vrot.slane %v2434_v8, 5  ;;  %v12363_v11 = vld [vmem:[#allocation2 + $0x1c] sm:$0xf]  ;;  %v10500_v35 = vld [vmem:[#allocation9 + $0x130] sm:$0xff]   ;;  %v2269_v41 = vsel %vm11543_vm13, %v2101_v34, %v2268_v56  ;;  %v1589_v12 = vadd.f32 1.0, %v1557_v7  ;;  %10007 = vmatpush3.bf16.msra.mxu1 %v10486_v9  ;;  %6451 = vmatprep.mubr.bf16.mxu0 %v10487_v45  ;;  %v10508_v5 = vld [vmem:[#allocation9 + $0x168] sm:$0xff]  }
 0x271   : > { %v10546_v32 = vld [vmem:[#allocation9 + $0x1f0] sm:$0xff]   ;;  %v1427_v44 = vmul.f32 %v12304_v22, %v1267_v28  ;;  %2808 = vst [vmem:[#allocation3 + $0x4c] sm:$0xf] %v2427_v19  ;;  %v9263_v13 = vrot.slane %v12346_v36, 9  ;;  %v2301_v0 = vld [vmem:[#allocation2 + $0x9c] sm:$0xf]  ;;  %10008 = vmatprep.subr.bf16.mxu1 %v10496_v14  ;;  %10119 = vmatpush3.bf16.msra.mxu0 %v10533_v42 }
 0x272   : > { %v3139_v58 = vld [vmem:[#allocation2 + $0xa8] sm:$0xf]  ;;  %v3140_v49 = vld [vmem:[#allocation2 + $0xac] sm:$0xf]  ;;  %2270 = vst [vmem:[#allocation2 + $0xc0] sm:$0xf] %v2269_v41  ;;  %v2437_v62 = vsel %vm12300_vm6, %v2432_v30, %v2436_v37  ;;  %v1621_v29 = vmul.f32 %v1589_v12, %v12238_v26  ;;  %10120 = vmatprep.subr.bf16.mxu0 %v10546_v32 }
 0x273   : > { %3171 = vst [vmem:[#allocation3 + $0x3b4] sm:$0xf] %v3139_v58  ;;  %v2079_v38 = vshrl.u32 %v9689_v61, 16  ;;  %v2082_v3 = vshll.u32 %v9689_v61, 16  ;;  %v2953_v43 = vrot.slane %v2845_v59, 5  ;;  %v1459_v8 = vsub.f32 1.0, %v1427_v44 }
 0x274   : > { %3172 = vst [vmem:[#allocation3 + $0x3d8] sm:$0xf] %v3140_v49  ;;  %v2302_v22 = vld [vmem:[#allocation2 + $0xa0] sm:$0xf]  ;;  %2333 = vst [vmem:[#allocation3 + $0x3a8] sm:$0xf] %v2301_v0  ;;  %v9692_v45 = vpack.c.bf16 %v1621_v29, %v1621_v29  ;;  %10009 = vmatpush3.bf16.msra.mxu1 %v10500_v35 }
 0x275   : > { %2809 = vst [vmem:[#allocation3 + $0x70] sm:$0xf] %v2437_v62  ;;  %v2956_v6 = vrot.slane %v12353_v4, 5  ;;  %v2439_v51 = vshrl.u32 %v2345_v47, 16  ;;  %v10547_v25 = vld [vmem:[#allocation9 + $0x1b0] sm:$0xff]   ;;  %v12373_v16 = vrot.slane %v2079_v38, 7  ;;  %v2954_v9 = vsel %vm12249_vm15, %v9263_v13, %v2953_v43  ;;  %10010 = vmatprep.subr.bf16.mxu1 %v10508_v5 }
 0x276   : > { %2334 = vst [vmem:[#allocation3 + $0x3cc] sm:$0xf] %v2302_v22  ;;  %v2955_v23 = vrot.slane %v2953_v43, 4  ;;  %v2347_v56 = vld [vmem:[#allocation2 + $0x20] sm:$0x1]  ;;  %v2442_v17 = vshll.u32 %v2345_v47, 16  ;;  %10121 = vmatpush3.bf16.msra.mxu0 %v10547_v25 }
 0x277   : > { %v12377_v18 = vld [vmem:[#allocation2 + $0x24] sm:$0xe]  ;;  %v2261_v46 = vld [vmem:[#allocation2 + $0xb4] sm:$0xf]  ;;  %v1523_v2 = vsub.f32 0.0, %v1459_v8  ;;  %v2441_v36 = vrot.slane %v2439_v51, 4  ;;  %v2084_v39 = vor.u32 %v2082_v3, %v12373_v16  ;;  %6452 = vmatmul.mubr.bf16.gmra.mxu0 %v9320_v52 }
 0x278   : > { %v10560_v26 = vld [vmem:[#allocation9 + $0x1e8] sm:$0xff]   ;;  %3085 = vst [vmem:[#allocation3 + $0x98] sm:$0xf] %v2954_v9  ;;  %v2448_v14 = vshll.u32 %v12363_v11, 16  ;;  %v2085_v59 = vrot.slane %v12373_v16, 4  ;;  %v2957_v10 = vsel %vm12249_vm15, %v2955_v23, %v2956_v6  ;;  %v2444_v54 = vrot.slane %v2442_v17, 5 }
 0x279   : > { %v10512_v48 = vld [vmem:[#allocation9 + $0x128] sm:$0xff]   ;;  %v2848_v55 = vld [vmem:[#allocation2 + $0x28] sm:$0xf]  ;;  %v10520_v1 = vld [vmem:[#allocation9 + $0x160] sm:$0xff]   ;;  %v2104_v63 = vshrl.u32 %v9692_v45, 16  ;;  %v2107_v4 = vshll.u32 %v9692_v45, 16  ;;  %v1555_v34 = vsel %vm1491_vm8, %v1523_v2, %v1459_v8  ;;  %v2262_v47 = vsel %vm11543_vm13, %v2084_v39, %v2261_v46  ;;  %10122 = vmatprep.subr.bf16.mxu0 %v10560_v26 }
 0x27a   : > { %3086 = vst [vmem:[#allocation3 + $0xbc] sm:$0xf] %v2957_v10  ;;  %v12386_v28 = vrot.slane %v2448_v14, 5  ;;  %v10561_v30 = vld [vmem:[#allocation9 + $0x1a8] sm:$0xff]   ;;  %v2272_v42 = vld [vmem:[#allocation2 + $0xc8] sm:$0x1]  ;;  %v2445_v7 = vor.u32 %v2444_v54, %v2441_v36  ;;  %10011 = vmatpush3.bf16.msra.mxu1 %v10512_v48 }
 0x27b   : > { %v1587_v61 = vadd.f32 1.0, %v1555_v34  ;;  %v2452_v19 = vshrl.u32 %v12363_v11, 16  ;;  %v12391_v37 = vld [vmem:[#allocation2 + $0x2c] sm:$0x1]  ;;  %v10524_v35 = vld [vmem:[#allocation9 + $0x120] sm:$0xff]   ;;  %v2106_v58 = vrot.slane %v2104_v63, 7  ;;  %10012 = vmatprep.subr.bf16.mxu1 %v10520_v1  ;;  %10123 = vmatpush3.bf16.msra.mxu0 %v10561_v30 }
 0x27c   : > { %v2303_v32 = vld [vmem:[#allocation2 + $0xa8] sm:$0xf]  ;;  %v10574_v31 = vld [vmem:[#allocation9 + $0x1e0] sm:$0xff]   ;;  %2263 = vst [vmem:[#allocation2 + $0xb4] sm:$0xf] %v2262_v47  ;;  %v2458_v41 = vshll.u32 %v2347_v56, 16 }
 0x27d   : > { %v9264_v15 = vrot.slane %v12377_v18, 9  ;;  %v2960_v12 = vrot.slane %v2848_v55, 5  ;;  %v12397_v44 = vld [vmem:[#allocation2 + $0x24] sm:$0xf]  ;;  %v2304_v11 = vld [vmem:[#allocation2 + $0xac] sm:$0xf]  ;;  %v1619_v13 = vmul.f32 %v1587_v61, %v12335_v53  ;;  %v2109_v3 = vor.u32 %v2107_v4, %v2106_v58  ;;  %10124 = vmatprep.subr.bf16.mxu0 %v10574_v31 }
 0x27e   : > { %2335 = vst [vmem:[#allocation3 + $0x3f0] sm:$0xf] %v2303_v32  ;;  %v10489_v49 = vld [vmem:[#allocation3 + $0x4c] ss:$36 sps:$4 sm:$0xff]   ;;  %v2446_v38 = vrot.slane %v2445_v7, 4  ;;  %v2111_v62 = vrot.slane %v2106_v58, 4  ;;  %10013 = vmatpush3.bf16.msra.mxu1 %v10524_v35 }
 0x27f   : > { %v10491_v0 = vld [vmem:[#allocation3 + $0x48] ss:$36 sps:$4 sm:$0xff]   ;;  %2336 = vst [vmem:[#allocation3 + $0x414] sm:$0xf] %v2304_v11  ;;  %v2454_v57 = vrot.slane %v2452_v19, 4  ;;  %v12400_v40 = vrot.slane %v2458_v41, 5  ;;  %v9690_v22 = vpack.c.bf16 %v1619_v13, %v1619_v13  ;;  %6290 = vmatprep.mubr.bf16.mxu1 %v10489_v49  ;;  %v2961_v29 = vsel %vm12249_vm15, %v9264_v15, %v2960_v12 }
 0x280   : > { %v12402_v52 = vld [vmem:[#allocation2 + $0x28] sm:$0xf]  ;;  %v10534_v43 = vld [vmem:[#allocation9 + $0x158] sm:$0xff]   ;;  %v10575_v5 = vld [vmem:[#allocation9 + $0x1a0] sm:$0xff]   ;;  %v2451_v53 = vsel %vm12300_vm6, %v2446_v38, %v12386_v28  ;;  %v2962_v8 = vrot.slane %v2960_v12, 4  ;;  %v2110_v23 = vsel %vm11554_vm14, %v2102_v33, %v2109_v3  ;;  %v2273_v56 = vsel %vm11341_vm2, %v2111_v62, %v2272_v42  ;;  %6291 = vmatmul.mubr.bf16.gmra.mxu1 %v10491_v0 }
 0x281   : > { %v12409_v6 = vld [vmem:[#allocation2 + $0x2c] sm:$0x1]  ;;  %v12411_v51 = vld [vmem:[#allocation2 + $0x30] sm:$0xe]  ;;  %v2455_v18 = vor.u32 %v2454_v57, %v12386_v28  ;;  %2810 = vst [vmem:[#allocation3 + $0x94] sm:$0xf] %v2451_v53  ;;  %10014 = vmatprep.subr.bf16.mxu1 %v10534_v43  ;;  %10125 = vmatpush3.bf16.msra.mxu0 %v10575_v5 }
 0x282   : > { %v10538_v25 = vld [vmem:[#allocation9 + $0x118] sm:$0xff]   ;;  %v2963_v26 = vrot.slane %v12391_v37, 5  ;;  %3087 = vst [vmem:[#allocation3 + $0xe0] sm:$0xf] %v2961_v29  ;;  %v10548_v46 = vld [vmem:[#allocation9 + $0x150] sm:$0xff]   ;;  %v2087_v21 = vshrl.u32 %v9690_v22, 16 }
 0x283   : > { %v10577_v9 = vld [vmem:[#allocation9 + $0x1d8] sm:$0xff]   ;;  %v3143_v45 = vld [vmem:[#allocation2 + $0xc0] sm:$0xf]  ;;  %v3946_v2 = vld [vmem:[#allocation2 + $0x18] sm:$0xf]  ;;  %v2090_v36 = vshll.u32 %v9690_v22, 16  ;;  %10015 = vmatpush3.bf16.msra.mxu1 %v10538_v25 }
 0x284   : > { %v4799_v17 = vld [vmem:[#allocation3 + $0x98] sm:$0xff]  ;;  %2271 = vst [vmem:[#allocation2 + $0xc4] sm:$0xf] %v2110_v23  ;;  %2274 = vst [vmem:[#allocation2 + $0xc8] sm:$0x1] %v2273_v56  ;;  %v2463_v48 = vshrl.u32 %v12397_v44, 16  ;;  %v2964_v1 = vsel %vm12249_vm15, %v2962_v8, %v2963_v26  ;;  %10126 = vmatprep.subr.bf16.mxu0 %v10577_v9  ;;  %10016 = vmatprep.subr.bf16.mxu1 %v10548_v46 }
 0x285   : > { %v4804_v14 = vld [vmem:[#allocation3 + $0xbc] sm:$0xff]  ;;  %3175 = vst [vmem:[#allocation3 + $0x444] sm:$0xf] %v3143_v45  ;;  %3978 = vst [vmem:[#allocation3 + $0x18] sm:$0xf] %v3946_v2  ;;  %v2456_v54 = vrot.slane %v2455_v18, 4 }
 0x286   : > { %v10492_v33 = vld [vmem:[#allocation3 + $0x9c] ss:$36 sps:$4 sm:$0xff]   ;;  %v9329_v55 = vcombine.low %v4799_v17, %v4804_v14  ;;  %v2466_v63 = vshll.u32 %v12397_v44, 16  ;;  %v12427_v4 = vld [vmem:[#allocation2 + $0x30] sm:$0xf]  ;;  %v10585_v28 = vld [vmem:[#allocation9 + $0x1d0] sm:$0xff]  }
 0x287   : > { %v2851_v39 = vld [vmem:[#allocation2 + $0x34] sm:$0xf]  ;;  %v12422_v10 = vld [vmem:[#allocation2 + $0x38] sm:$0x1]  ;;  %v3947_v30 = vld [vmem:[#allocation2 + $0x1c] sm:$0xf]  ;;  %6459 = vmatprep.mubr.bf16.mxu0 %v10492_v33  ;;  %v2461_v35 = vsel %vm12300_vm6, %v2456_v54, %v12400_v40 }
 0x288   : > { %v10582_v34 = vld [vmem:[#allocation9 + $0x198] sm:$0xff]   ;;  %v2089_v47 = vrot.slane %v2087_v21, 7  ;;  %3088 = vst [vmem:[#allocation3 + $0x104] sm:$0xf] %v2964_v1  ;;  %v2465_v42 = vrot.slane %v2463_v48, 4  ;;  %v2472_v61 = vshll.u32 %v12402_v52, 16  ;;  %6460 = vmatmul.mubr.bf16.gmra.mxu0 %v9329_v55 }
 0x289   : > { %v2476_v7 = vshrl.u32 %v12402_v52, 16  ;;  %v3141_v19 = vld [vmem:[#allocation2 + $0xb4] sm:$0xf]  ;;  %3979 = vst [vmem:[#allocation3 + $0x3c] sm:$0xf] %v3947_v30  ;;  %v2468_v32 = vrot.slane %v2466_v63, 5  ;;  %10127 = vmatpush3.bf16.msra.mxu0 %v10582_v34 }
 0x28a   : > { %v2265_v37 = vld [vmem:[#allocation2 + $0xbc] sm:$0x1]  ;;  %v2482_v31 = vshll.u32 %v12409_v6, 16  ;;  %v9265_v58 = vrot.slane %v12411_v51, 9  ;;  %v2352_v41 = vld [vmem:[#allocation2 + $0x34] sm:$0xf]  ;;  %v2092_v15 = vor.u32 %v2090_v36, %v2089_v47  ;;  %10128 = vmatprep.subr.bf16.mxu0 %v10585_v28 }
 0x28b   : > { %3173 = vst [vmem:[#allocation3 + $0x3fc] sm:$0xf] %v3141_v19  ;;  %v2094_v12 = vrot.slane %v2089_v47, 4  ;;  %2811 = vst [vmem:[#allocation3 + $0xb8] sm:$0xf] %v2461_v35  ;;  %v2474_v44 = vrot.slane %v2472_v61, 5  ;;  %v2469_v0 = vor.u32 %v2468_v32, %v2465_v42 }
 0x28c   : > { %v2478_v11 = vrot.slane %v2476_v7, 4  ;;  %v10552_v13 = vld [vmem:[#allocation9 + $0x110] sm:$0xff]   ;;  %v2305_v49 = vld [vmem:[#allocation2 + $0xb4] sm:$0xf]  ;;  %v2484_v38 = vrot.slane %v2482_v31, 5  ;;  %v2967_v3 = vrot.slane %v2851_v39, 5  ;;  %v2093_v52 = vsel %vm11554_vm14, %v2085_v59, %v2092_v15 }
 0x28d   : > { %v2970_v62 = vrot.slane %v12422_v10, 5  ;;  %v10562_v57 = vld [vmem:[#allocation9 + $0x148] sm:$0xff]   ;;  %2337 = vst [vmem:[#allocation3 + $0x438] sm:$0xf] %v2305_v49  ;;  %v10586_v40 = vld [vmem:[#allocation9 + $0x190] sm:$0xff]   ;;  %v2266_v43 = vsel %vm11341_vm2, %v2094_v12, %v2265_v37  ;;  %v2487_v53 = vshrl.u32 %v12427_v4, 16  ;;  %10017 = vmatpush3.bf16.msra.mxu1 %v10552_v13 }
 0x28e   : > { %v2479_v5 = vor.u32 %v2478_v11, %v2474_v44  ;;  %v2353_v22 = vld [vmem:[#allocation2 + $0x38] sm:$0x1]  ;;  %v10587_v29 = vld [vmem:[#allocation9 + $0x1c8] sm:$0xff]   ;;  %2264 = vst [vmem:[#allocation2 + $0xb8] sm:$0xf] %v2093_v52  ;;  %v2470_v8 = vrot.slane %v2469_v0, 4  ;;  %v2968_v6 = vsel %vm12249_vm15, %v9265_v58, %v2967_v3  ;;  %10018 = vmatprep.subr.bf16.mxu1 %v10562_v57  ;;  %10129 = vmatpush3.bf16.msra.mxu0 %v10586_v40 }
 0x28f   : > { %2267 = vst [vmem:[#allocation2 + $0xbc] sm:$0x1] %v2266_v43  ;;  %v2969_v51 = vrot.slane %v2967_v3, 4  ;;  %v2490_v16 = vshll.u32 %v12427_v4, 16  ;;  %v2854_v59 = vld [vmem:[#allocation2 + $0x40] sm:$0xf]  ;;  %10130 = vmatprep.subr.bf16.mxu0 %v10587_v29 }
 0x290   : > { %v12447_v25 = vld [vmem:[#allocation2 + $0x44] sm:$0x1]  ;;  %v2480_v23 = vrot.slane %v2479_v5, 4  ;;  %3089 = vst [vmem:[#allocation3 + $0x128] sm:$0xf] %v2968_v6  ;;  %v2489_v56 = vrot.slane %v2487_v53, 4  ;;  %v2475_v14 = vsel %vm12300_vm6, %v2470_v8, %v2474_v44 }
 0x291   : > { %v3144_v9 = vld [vmem:[#allocation2 + $0xc4] sm:$0xf]  ;;  %v2496_v17 = vshll.u32 %v2352_v41, 16  ;;  %v2500_v18 = vshrl.u32 %v2352_v41, 16  ;;  %v2354_v26 = vld [vmem:[#allocation2 + $0x3c] sm:$0xf]  ;;  %v2971_v33 = vsel %vm12249_vm15, %v2969_v51, %v2970_v62 }
 0x292   : > { %v10566_v46 = vld [vmem:[#allocation9 + $0x108] sm:$0xff]   ;;  %v10576_v45 = vld [vmem:[#allocation9 + $0x140] sm:$0xff]   ;;  %3176 = vst [vmem:[#allocation3 + $0x468] sm:$0xf] %v3144_v9  ;;  %v2492_v48 = vrot.slane %v2490_v16, 5  ;;  %v2506_v39 = vshll.u32 %v2353_v22, 16  ;;  %v2485_v10 = vsel %vm12300_vm6, %v2480_v23, %v2484_v38 }
 0x293   : > { %v4809_v2 = vld [vmem:[#allocation3 + $0xe0] sm:$0xff]  ;;  %2812 = vst [vmem:[#allocation3 + $0xdc] sm:$0xf] %v2475_v14  ;;  %3090 = vst [vmem:[#allocation3 + $0x14c] sm:$0xf] %v2971_v33  ;;  %v2498_v55 = vrot.slane %v2496_v17, 5  ;;  %10019 = vmatpush3.bf16.msra.mxu1 %v10566_v46 }
 0x294   : > { %v4814_v21 = vld [vmem:[#allocation3 + $0x104] sm:$0xff]  ;;  %v2502_v1 = vrot.slane %v2500_v18, 4  ;;  %v10494_v34 = vld [vmem:[#allocation3 + $0x94] ss:$36 sps:$4 sm:$0xff]   ;;  %2813 = vst [vmem:[#allocation3 + $0x100] sm:$0xf] %v2485_v10  ;;  %v2493_v28 = vor.u32 %v2492_v48, %v2489_v56  ;;  %10020 = vmatprep.subr.bf16.mxu1 %v10576_v45 }
 0x295   : > { %v10498_v36 = vld [vmem:[#allocation3 + $0xe4] ss:$36 sps:$4 sm:$0xff]   ;;  %v9338_v54 = vcombine.low %v4809_v2, %v4814_v21  ;;  %v2508_v30 = vrot.slane %v2506_v39, 5  ;;  %v2356_v47 = vld [vmem:[#allocation2 + $0x44] sm:$0x1]  ;;  %v9266_v19 = vrot.slane %v2853_v50, 9  ;;  %6298 = vmatprep.mubr.bf16.mxu1 %v10494_v34 }
 0x296   : > { %v2355_v63 = vld [vmem:[#allocation2 + $0x40] sm:$0xf]  ;;  %6467 = vmatprep.mubr.bf16.mxu0 %v10498_v36  ;;  %v10596_v42 = vld [vmem:[#allocation9 + $0x1c0] sm:$0xff]   ;;  %v10497_v61 = vld [vmem:[#allocation3 + $0x90] ss:$36 sps:$4 sm:$0xff]   ;;  %v2503_v7 = vor.u32 %v2502_v1, %v2498_v55  ;;  %v2974_v37 = vrot.slane %v2854_v59, 5 }
 0x297   : > { %v10589_v4 = vld [vmem:[#allocation9 + $0x188] sm:$0xff]   ;;  %6468 = vmatmul.mubr.bf16.gmra.mxu0 %v9338_v54  ;;  %v2977_v35 = vrot.slane %v12447_v25, 5  ;;  %v2856_v32 = vld [vmem:[#allocation2 + $0x48] sm:$0xe]  ;;  %v2857_v31 = vld [vmem:[#allocation2 + $0x4c] sm:$0xf]  ;;  %6299 = vmatmul.mubr.bf16.gmra.mxu1 %v10497_v61 }
 0x298   : > { %v10581_v58 = vld [vmem:[#allocation9 + $0x100] sm:$0xff]   ;;  %v2494_v41 = vrot.slane %v2493_v28, 4  ;;  %v2511_v15 = vshrl.u32 %v2354_v26, 16  ;;  %v2514_v12 = vshll.u32 %v2354_v26, 16  ;;  %v2520_v44 = vshll.u32 %v2355_v63, 16  ;;  %v10598_v11 = vld [vmem:[#allocation9 + $0x238] sm:$0xff]   ;;  %10131 = vmatpush3.bf16.msra.mxu0 %v10589_v4 }
 0x299   : > { %v2504_v13 = vrot.slane %v2503_v7, 4  ;;  %v2975_v49 = vsel %vm12249_vm15, %v9266_v19, %v2974_v37  ;;  %v2976_v0 = vrot.slane %v2974_v37, 4  ;;  %v2524_v38 = vshrl.u32 %v2355_v63, 16  ;;  %v2858_v3 = vld [vmem:[#allocation2 + $0x50] sm:$0x1]  ;;  %v10597_v57 = vld [vmem:[#allocation9 + $0x180] sm:$0xff]   ;;  %10132 = vmatprep.subr.bf16.mxu0 %v10596_v42  ;;  %10021 = vmatpush3.bf16.msra.mxu1 %v10581_v58 }
 0x29a   : > { %v3142_v62 = vld [vmem:[#allocation2 + $0xb8] sm:$0xf]  ;;  %v2499_v40 = vsel %vm12300_vm6, %v2494_v41, %v2498_v55  ;;  %3091 = vst [vmem:[#allocation3 + $0x170] sm:$0xf] %v2975_v49  ;;  %v2513_v52 = vrot.slane %v2511_v15, 4  ;;  %v2516_v43 = vrot.slane %v2514_v12, 5  ;;  %10302 = vmatprep.subr.bf16.mxu1 %v10598_v11 }
 0x29b   : > { %v2522_v5 = vrot.slane %v2520_v44, 5  ;;  %v2357_v22 = vld [vmem:[#allocation2 + $0x48] sm:$0xf]  ;;  %v2358_v53 = vld [vmem:[#allocation2 + $0x4c] sm:$0xf]  ;;  %v4819_v29 = vld [vmem:[#allocation3 + $0x128] sm:$0xff]  ;;  %v2509_v8 = vsel %vm12300_vm6, %v2504_v13, %v2508_v30  ;;  %v2978_v6 = vsel %vm12249_vm15, %v2976_v0, %v2977_v35 }
 0x29c   : > { %3174 = vst [vmem:[#allocation3 + $0x420] sm:$0xf] %v3142_v62  ;;  %2814 = vst [vmem:[#allocation3 + $0x124] sm:$0xf] %v2499_v40  ;;  %v2526_v51 = vrot.slane %v2524_v38, 4  ;;  %v2530_v16 = vshll.u32 %v2356_v47, 16  ;;  %v2517_v23 = vor.u32 %v2516_v43, %v2513_v52  ;;  %10133 = vmatpush3.bf16.msra.mxu0 %v10597_v57 }
 0x29d   : > { %v2359_v50 = vld [vmem:[#allocation2 + $0x50] sm:$0x1]  ;;  %v2306_v59 = vld [vmem:[#allocation2 + $0xb8] sm:$0xf]  ;;  %v4824_v25 = vld [vmem:[#allocation3 + $0x14c] sm:$0xff]  ;;  %v9267_v56 = vrot.slane %v2856_v32, 9 }
 0x29e   : > { %v10504_v9 = vld [vmem:[#allocation3 + $0x12c] ss:$36 sps:$4 sm:$0xff]   ;;  %2815 = vst [vmem:[#allocation3 + $0x148] sm:$0xf] %v2509_v8  ;;  %3092 = vst [vmem:[#allocation3 + $0x194] sm:$0xf] %v2978_v6  ;;  %v9347_v26 = vcombine.low %v4819_v29, %v4824_v25  ;;  %v2527_v46 = vor.u32 %v2526_v51, %v2522_v5 }
 0x29f   : > { %v2981_v17 = vrot.slane %v2857_v31, 5  ;;  %2338 = vst [vmem:[#allocation3 + $0x45c] sm:$0xf] %v2306_v59  ;;  %v10501_v18 = vld [vmem:[#allocation3 + $0xdc] ss:$36 sps:$4 sm:$0xff]   ;;  %v2532_v45 = vrot.slane %v2530_v16, 5  ;;  %6475 = vmatprep.mubr.bf16.mxu0 %v10504_v9 }
 0x2a0   : > { %v2859_v2 = vld [vmem:[#allocation2 + $0x54] sm:$0xe]  ;;  %v2860_v21 = vld [vmem:[#allocation2 + $0x58] sm:$0xf]  ;;  %v2518_v36 = vrot.slane %v2517_v23, 4  ;;  %v2984_v48 = vrot.slane %v2858_v3, 5  ;;  %6306 = vmatprep.mubr.bf16.mxu1 %v10501_v18  ;;  %6476 = vmatmul.mubr.bf16.gmra.mxu0 %v9347_v26 }
 0x2a1   : > { %v2982_v14 = vsel %vm12249_vm15, %v9267_v56, %v2981_v17  ;;  %v2983_v33 = vrot.slane %v2981_v17, 4  ;;  %v2861_v39 = vld [vmem:[#allocation2 + $0x5c] sm:$0x1]  ;;  %v10503_v10 = vld [vmem:[#allocation3 + $0xd8] ss:$36 sps:$4 sm:$0xff]   ;;  %v2528_v54 = vrot.slane %v2527_v46, 4 }
 0x2a2   : > { %3093 = vst [vmem:[#allocation3 + $0x1b8] sm:$0xf] %v2982_v14  ;;  %v2535_v55 = vshrl.u32 %v2357_v22, 16  ;;  %v2538_v1 = vshll.u32 %v2357_v22, 16  ;;  %v2544_v63 = vshll.u32 %v2358_v53, 16  ;;  %v2523_v4 = vsel %vm12300_vm6, %v2518_v36, %v2522_v5  ;;  %6307 = vmatmul.mubr.bf16.gmra.mxu1 %v10503_v10  ;;  %v4829_v13 = vld [vmem:[#allocation3 + $0x170] sm:$0xff] }
 0x2a3   : > { %v2985_v34 = vsel %vm12249_vm15, %v2983_v33, %v2984_v48  ;;  %v2548_v28 = vshrl.u32 %v2358_v53, 16  ;;  %v2554_v30 = vshll.u32 %v2359_v50, 16  ;;  %v2360_v47 = vld [vmem:[#allocation2 + $0x54] sm:$0xf]  ;;  %v2361_v42 = vld [vmem:[#allocation2 + $0x58] sm:$0xf]  ;;  %v2533_v61 = vsel %vm12300_vm6, %v2528_v54, %v2532_v45 }
 0x2a4   : > { %2816 = vst [vmem:[#allocation3 + $0x16c] sm:$0xf] %v2523_v4  ;;  %3094 = vst [vmem:[#allocation3 + $0x1dc] sm:$0xf] %v2985_v34  ;;  %v2537_v7 = vrot.slane %v2535_v55, 4  ;;  %v2540_v19 = vrot.slane %v2538_v1, 5 }
 0x2a5   : > { %v2546_v37 = vrot.slane %v2544_v63, 5  ;;  %v3948_v35 = vld [vmem:[#allocation2 + $0x24] sm:$0xf]  ;;  %2817 = vst [vmem:[#allocation3 + $0x190] sm:$0xf] %v2533_v61  ;;  %v2550_v32 = vrot.slane %v2548_v28, 4 }
 0x2a6   : > { %v9268_v31 = vrot.slane %v2859_v2, 9  ;;  %v2988_v58 = vrot.slane %v2860_v21, 5  ;;  %v2362_v41 = vld [vmem:[#allocation2 + $0x5c] sm:$0x1]  ;;  %3980 = vst [vmem:[#allocation3 + $0x60] sm:$0xf] %v3948_v35  ;;  %v2541_v12 = vor.u32 %v2540_v19, %v2537_v7 }
 0x2a7   : > { %v10506_v15 = vld [vmem:[#allocation3 + $0x124] ss:$36 sps:$4 sm:$0xff]   ;;  %v2556_v44 = vrot.slane %v2554_v30, 5  ;;  %v2991_v11 = vrot.slane %v2861_v39, 5  ;;  %v4834_v49 = vld [vmem:[#allocation3 + $0x194] sm:$0xff]  ;;  %v2551_v38 = vor.u32 %v2550_v32, %v2546_v37  ;;  %v2559_v57 = vshrl.u32 %v2360_v47, 16 }
 0x2a8   : > { %v10510_v0 = vld [vmem:[#allocation3 + $0x174] ss:$36 sps:$4 sm:$0xff]   ;;  %v2989_v3 = vsel %vm12249_vm15, %v9268_v31, %v2988_v58  ;;  %v2990_v62 = vrot.slane %v2988_v58, 4  ;;  %v2862_v40 = vld [vmem:[#allocation2 + $0x60] sm:$0xe]  ;;  %6314 = vmatprep.mubr.bf16.mxu1 %v10506_v15  ;;  %v9356_v52 = vcombine.low %v4829_v13, %v4834_v49  ;;  %v2542_v43 = vrot.slane %v2541_v12, 4 }
 0x2a9   : > { %3095 = vst [vmem:[#allocation3 + $0x200] sm:$0xf] %v2989_v3  ;;  %v2562_v5 = vshll.u32 %v2360_v47, 16  ;;  %v2568_v22 = vshll.u32 %v2361_v42, 16  ;;  %v2863_v53 = vld [vmem:[#allocation2 + $0x64] sm:$0xf]  ;;  %6483 = vmatprep.mubr.bf16.mxu0 %v10510_v0 }
 0x2aa   : > { %v2864_v29 = vld [vmem:[#allocation2 + $0x68] sm:$0x1]  ;;  %v2363_v8 = vld [vmem:[#allocation2 + $0x60] sm:$0xf]  ;;  %v2552_v51 = vrot.slane %v2551_v38, 4  ;;  %v2992_v16 = vsel %vm12249_vm15, %v2990_v62, %v2991_v11  ;;  %v2561_v50 = vrot.slane %v2559_v57, 4  ;;  %6484 = vmatmul.mubr.bf16.gmra.mxu0 %v9356_v52  ;;  %v2547_v56 = vsel %vm12300_vm6, %v2542_v43, %v2546_v37 }
 0x2ab   : > { %v3949_v6 = vld [vmem:[#allocation2 + $0x28] sm:$0xf]  ;;  %v2572_v59 = vshrl.u32 %v2361_v42, 16  ;;  %v2364_v25 = vld [vmem:[#allocation2 + $0x64] sm:$0xf]  ;;  %v4839_v23 = vld [vmem:[#allocation3 + $0x1b8] sm:$0xff] }
 0x2ac   : > { %3981 = vst [vmem:[#allocation3 + $0x84] sm:$0xf] %v3949_v6  ;;  %v10509_v9 = vld [vmem:[#allocation3 + $0x120] ss:$36 sps:$4 sm:$0xff]   ;;  %3096 = vst [vmem:[#allocation3 + $0x224] sm:$0xf] %v2992_v16  ;;  %v2557_v2 = vsel %vm12300_vm6, %v2552_v51, %v2556_v44 }
 0x2ad   : > { %v2564_v17 = vrot.slane %v2562_v5, 5  ;;  %v2570_v18 = vrot.slane %v2568_v22, 5  ;;  %v2578_v26 = vshll.u32 %v2362_v41, 16  ;;  %v4844_v46 = vld [vmem:[#allocation3 + $0x1dc] sm:$0xff]  ;;  %2818 = vst [vmem:[#allocation3 + $0x1b4] sm:$0xf] %v2547_v56  ;;  %6315 = vmatmul.mubr.bf16.gmra.mxu1 %v10509_v9 }
 0x2ae   : > { %v10516_v45 = vld [vmem:[#allocation3 + $0x1bc] ss:$36 sps:$4 sm:$0xff]   ;;  %v2574_v21 = vrot.slane %v2572_v59, 4  ;;  %v10513_v36 = vld [vmem:[#allocation3 + $0x16c] ss:$36 sps:$4 sm:$0xff]   ;;  %v9365_v14 = vcombine.low %v4839_v23, %v4844_v46  ;;  %v9269_v39 = vrot.slane %v2862_v40, 9 }
 0x2af   : > { %2819 = vst [vmem:[#allocation3 + $0x1d8] sm:$0xf] %v2557_v2  ;;  %v2565_v33 = vor.u32 %v2564_v17, %v2561_v50  ;;  %v2580_v48 = vrot.slane %v2578_v26, 5  ;;  %6491 = vmatprep.mubr.bf16.mxu0 %v10516_v45  ;;  %v2995_v54 = vrot.slane %v2863_v53, 5  ;;  %v2998_v55 = vrot.slane %v2864_v29, 5  ;;  %6322 = vmatprep.mubr.bf16.mxu1 %v10513_v36 }
 0x2b0   : > { %v2575_v10 = vor.u32 %v2574_v21, %v2570_v18  ;;  %v2365_v1 = vld [vmem:[#allocation2 + $0x68] sm:$0x1]  ;;  %v2583_v63 = vshrl.u32 %v2363_v8, 16  ;;  %v2586_v34 = vshll.u32 %v2363_v8, 16  ;;  %v2592_v28 = vshll.u32 %v2364_v25, 16  ;;  %v4849_v45 = vld [vmem:[#allocation3 + $0x200] sm:$0xff] }
 0x2b1   : > { %v2566_v4 = vrot.slane %v2565_v33, 4  ;;  %v2596_v30 = vshrl.u32 %v2364_v25, 16  ;;  %v2865_v47 = vld [vmem:[#allocation2 + $0x6c] sm:$0xe]  ;;  %v2996_v61 = vsel %vm12249_vm15, %v9269_v39, %v2995_v54  ;;  %v2997_v7 = vrot.slane %v2995_v54, 4 }
 0x2b2   : > { %v2576_v42 = vrot.slane %v2575_v10, 4  ;;  %v2585_v19 = vrot.slane %v2583_v63, 4  ;;  %v2866_v37 = vld [vmem:[#allocation2 + $0x70] sm:$0xf]  ;;  %3097 = vst [vmem:[#allocation3 + $0x248] sm:$0xf] %v2996_v61  ;;  %6492 = vmatmul.mubr.bf16.gmra.mxu0 %v9365_v14 }
 0x2b3   : > { %v2571_v35 = vsel %vm12300_vm6, %v2566_v4, %v2570_v18  ;;  %v2588_v32 = vrot.slane %v2586_v34, 5  ;;  %v2594_v31 = vrot.slane %v2592_v28, 5  ;;  %v2598_v58 = vrot.slane %v2596_v30, 4  ;;  %v2867_v41 = vld [vmem:[#allocation2 + $0x74] sm:$0x1]  ;;  %v4854_v22 = vld [vmem:[#allocation3 + $0x224] sm:$0xff] }
 0x2b4   : > { %v2366_v15 = vld [vmem:[#allocation2 + $0x6c] sm:$0xf]  ;;  %v2367_v12 = vld [vmem:[#allocation2 + $0x70] sm:$0xf]  ;;  %v10522_v44 = vld [vmem:[#allocation3 + $0x204] ss:$36 sps:$4 sm:$0xff]   ;;  %v2581_v11 = vsel %vm12300_vm6, %v2576_v42, %v2580_v48  ;;  %v2999_v13 = vsel %vm12249_vm15, %v2997_v7, %v2998_v55  ;;  %v9374_v48 = vcombine.low %v4849_v45, %v4854_v22 }
 0x2b5   : > { %2820 = vst [vmem:[#allocation3 + $0x1fc] sm:$0xf] %v2571_v35  ;;  %v2602_v49 = vshll.u32 %v2365_v1, 16  ;;  %v2368_v0 = vld [vmem:[#allocation2 + $0x74] sm:$0x1]  ;;  %v2589_v3 = vor.u32 %v2588_v32, %v2585_v19  ;;  %v2599_v62 = vor.u32 %v2598_v58, %v2594_v31  ;;  %v9270_v57 = vrot.slane %v2865_v47, 9  ;;  %6499 = vmatprep.mubr.bf16.mxu0 %v10522_v44 }
 0x2b6   : > { %v10515_v38 = vld [vmem:[#allocation3 + $0x168] ss:$36 sps:$4 sm:$0xff]   ;;  %2821 = vst [vmem:[#allocation3 + $0x220] sm:$0xf] %v2581_v11  ;;  %3098 = vst [vmem:[#allocation3 + $0x26c] sm:$0xf] %v2999_v13 }
 0x2b7   : > { %v3002_v40 = vrot.slane %v2866_v37, 5  ;;  %v10518_v52 = vld [vmem:[#allocation3 + $0x1b4] ss:$36 sps:$4 sm:$0xff]   ;;  %v2604_v43 = vrot.slane %v2602_v49, 5  ;;  %v2868_v5 = vld [vmem:[#allocation2 + $0x78] sm:$0xe]  ;;  %6323 = vmatmul.mubr.bf16.gmra.mxu1 %v10515_v38 }
 0x2b8   : > { %v2590_v53 = vrot.slane %v2589_v3, 4  ;;  %v2600_v29 = vrot.slane %v2599_v62, 4  ;;  %v2869_v51 = vld [vmem:[#allocation2 + $0x7c] sm:$0xf]  ;;  %6330 = vmatprep.mubr.bf16.mxu1 %v10518_v52  ;;  %v3005_v16 = vrot.slane %v2867_v41, 5  ;;  %v2607_v50 = vshrl.u32 %v2366_v15, 16 }
 0x2b9   : > { %v3003_v8 = vsel %vm12249_vm15, %v9270_v57, %v3002_v40  ;;  %v3004_v6 = vrot.slane %v3002_v40, 4  ;;  %v2610_v59 = vshll.u32 %v2366_v15, 16  ;;  %v2616_v25 = vshll.u32 %v2367_v12, 16  ;;  %v3950_v9 = vld [vmem:[#allocation2 + $0x30] sm:$0xf]  ;;  %v4859_v40 = vld [vmem:[#allocation3 + $0x248] sm:$0xff] }
 0x2ba   : > { %3099 = vst [vmem:[#allocation3 + $0x290] sm:$0xf] %v3003_v8  ;;  %v2595_v23 = vsel %vm12300_vm6, %v2590_v53, %v2594_v31  ;;  %v2605_v56 = vsel %vm12300_vm6, %v2600_v29, %v2604_v43  ;;  %v2620_v17 = vshrl.u32 %v2367_v12, 16  ;;  %v2626_v18 = vshll.u32 %v2368_v0, 16  ;;  %v2870_v26 = vld [vmem:[#allocation2 + $0x80] sm:$0x1]  ;;  %6500 = vmatmul.mubr.bf16.gmra.mxu0 %v9374_v48 }
 0x2bb   : > { %v3951_v46 = vld [vmem:[#allocation2 + $0x34] sm:$0xf]  ;;  %3982 = vst [vmem:[#allocation3 + $0xa8] sm:$0xf] %v3950_v9  ;;  %2822 = vst [vmem:[#allocation3 + $0x244] sm:$0xf] %v2595_v23  ;;  %v3006_v2 = vsel %vm12249_vm15, %v3004_v6, %v3005_v16 }
 0x2bc   : > { %2823 = vst [vmem:[#allocation3 + $0x268] sm:$0xf] %v2605_v56  ;;  %v2609_v21 = vrot.slane %v2607_v50, 4  ;;  %v2612_v36 = vrot.slane %v2610_v59, 5  ;;  %v2618_v14 = vrot.slane %v2616_v25, 5  ;;  %v2622_v39 = vrot.slane %v2620_v17, 4 }
 0x2bd   : > { %v2369_v33 = vld [vmem:[#allocation2 + $0x78] sm:$0xf]  ;;  %3983 = vst [vmem:[#allocation3 + $0xcc] sm:$0xf] %v3951_v46  ;;  %3100 = vst [vmem:[#allocation3 + $0x2b4] sm:$0xf] %v3006_v2 }
 0x2be   : > { %v9271_v10 = vrot.slane %v2868_v5, 9  ;;  %v3009_v54 = vrot.slane %v2869_v51, 5  ;;  %v2370_v55 = vld [vmem:[#allocation2 + $0x7c] sm:$0xf]  ;;  %v2613_v1 = vor.u32 %v2612_v36, %v2609_v21  ;;  %v3012_v63 = vrot.slane %v2870_v26, 5  ;;  %v4864_v15 = vld [vmem:[#allocation3 + $0x26c] sm:$0xff] }
 0x2bf   : > { %v2371_v4 = vld [vmem:[#allocation2 + $0x80] sm:$0x1]  ;;  %v10521_v34 = vld [vmem:[#allocation3 + $0x1b0] ss:$36 sps:$4 sm:$0xff]   ;;  %v2623_v30 = vor.u32 %v2622_v39, %v2618_v14  ;;  %v2631_v61 = vshrl.u32 %v2369_v33, 16  ;;  %v2628_v35 = vrot.slane %v2626_v18, 5  ;;  %v9383_v5 = vcombine.low %v4859_v40, %v4864_v15 }
 0x2c0   : > { %v10528_v28 = vld [vmem:[#allocation3 + $0x24c] ss:$36 sps:$4 sm:$0xff]   ;;  %v3010_v47 = vsel %vm12249_vm15, %v9271_v10, %v3009_v54  ;;  %v3011_v42 = vrot.slane %v3009_v54, 4  ;;  %v10525_v19 = vld [vmem:[#allocation3 + $0x1fc] ss:$36 sps:$4 sm:$0xff]   ;;  %v2614_v37 = vrot.slane %v2613_v1, 4  ;;  %6331 = vmatmul.mubr.bf16.gmra.mxu1 %v10521_v34 }
 0x2c1   : > { %v2871_v7 = vld [vmem:[#allocation2 + $0x84] sm:$0xe]  ;;  %3101 = vst [vmem:[#allocation3 + $0x2d8] sm:$0xf] %v3010_v47  ;;  %v2634_v32 = vshll.u32 %v2369_v33, 16  ;;  %v2640_v31 = vshll.u32 %v2370_v55, 16  ;;  %6507 = vmatprep.mubr.bf16.mxu0 %v10528_v28  ;;  %6338 = vmatprep.mubr.bf16.mxu1 %v10525_v19 }
 0x2c2   : > { %v2872_v58 = vld [vmem:[#allocation2 + $0x88] sm:$0xf]  ;;  %v2873_v41 = vld [vmem:[#allocation2 + $0x8c] sm:$0x1]  ;;  %v2624_v12 = vrot.slane %v2623_v30, 4  ;;  %v3013_v44 = vsel %vm12249_vm15, %v3011_v42, %v3012_v63  ;;  %v2633_v11 = vrot.slane %v2631_v61, 4  ;;  %v2619_v0 = vsel %vm12300_vm6, %v2614_v37, %v2618_v14  ;;  %6508 = vmatmul.mubr.bf16.gmra.mxu0 %v9383_v5 }
 0x2c3   : > { %v2644_v13 = vshrl.u32 %v2370_v55, 16  ;;  %v2372_v49 = vld [vmem:[#allocation2 + $0x84] sm:$0xf]  ;;  %3102 = vst [vmem:[#allocation3 + $0x2fc] sm:$0xf] %v3013_v44  ;;  %v2636_v38 = vrot.slane %v2634_v32, 5 }
 0x2c4   : > { %v2642_v3 = vrot.slane %v2640_v31, 5  ;;  %v2650_v62 = vshll.u32 %v2371_v4, 16  ;;  %v2373_v57 = vld [vmem:[#allocation2 + $0x88] sm:$0xf]  ;;  %v2629_v52 = vsel %vm12300_vm6, %v2624_v12, %v2628_v35  ;;  %2824 = vst [vmem:[#allocation3 + $0x28c] sm:$0xf] %v2619_v0 }
 0x2c5   : > { %v2646_v43 = vrot.slane %v2644_v13, 4  ;;  %2825 = vst [vmem:[#allocation3 + $0x2b0] sm:$0xf] %v2629_v52  ;;  %v2637_v22 = vor.u32 %v2636_v38, %v2633_v11  ;;  %v9272_v53 = vrot.slane %v2871_v7, 9  ;;  %v2374_v29 = vld [vmem:[#allocation2 + $0x8c] sm:$0x1] }
 0x2c6   : > { %v10527_v8 = vld [vmem:[#allocation3 + $0x1f8] ss:$36 sps:$4 sm:$0xff]   ;;  %v2652_v51 = vrot.slane %v2650_v62, 5  ;;  %v3016_v16 = vrot.slane %v2872_v58, 5  ;;  %v3019_v50 = vrot.slane %v2873_v41, 5  ;;  %v2655_v56 = vshrl.u32 %v2372_v49, 16 }
 0x2c7   : > { %v2647_v6 = vor.u32 %v2646_v43, %v2642_v3  ;;  %v2874_v59 = vld [vmem:[#allocation2 + $0x90] sm:$0xe]  ;;  %v2875_v25 = vld [vmem:[#allocation2 + $0x94] sm:$0xf]  ;;  %v2638_v23 = vrot.slane %v2637_v22, 4  ;;  %v2658_v17 = vshll.u32 %v2372_v49, 16 }
 0x2c8   : > { %v10536_v9 = vld [vmem:[#allocation3 + $0x294] ss:$36 sps:$4 sm:$0xff]   ;;  %v2664_v18 = vshll.u32 %v2373_v57, 16  ;;  %v10530_v26 = vld [vmem:[#allocation3 + $0x244] ss:$36 sps:$4 sm:$0xff]   ;;  %v3017_v45 = vsel %vm12249_vm15, %v9272_v53, %v3016_v16  ;;  %v3018_v2 = vrot.slane %v3016_v16, 4  ;;  %6339 = vmatmul.mubr.bf16.gmra.mxu1 %v10527_v8 }
 0x2c9   : > { %v2648_v46 = vrot.slane %v2647_v6, 4  ;;  %v2668_v21 = vshrl.u32 %v2373_v57, 16  ;;  %v2876_v36 = vld [vmem:[#allocation2 + $0x98] sm:$0x1]  ;;  %v4874_v14 = vld [vmem:[#allocation3 + $0x2b4] sm:$0xff]  ;;  %6515 = vmatprep.mubr.bf16.mxu0 %v10536_v9  ;;  %v2643_v33 = vsel %vm12300_vm6, %v2638_v23, %v2642_v3  ;;  %v2657_v48 = vrot.slane %v2655_v56, 4  ;;  %6346 = vmatprep.mubr.bf16.mxu1 %v10530_v26 }
 0x2ca   : > { %3103 = vst [vmem:[#allocation3 + $0x320] sm:$0xf] %v3017_v45  ;;  %v2660_v39 = vrot.slane %v2658_v17, 5  ;;  %v2666_v10 = vrot.slane %v2664_v18, 5  ;;  %v2375_v54 = vld [vmem:[#allocation2 + $0x90] sm:$0xf]  ;;  %v3020_v63 = vsel %vm12249_vm15, %v3018_v2, %v3019_v50 }
 0x2cb   : > { %v3952_v55 = vld [vmem:[#allocation2 + $0x3c] sm:$0xf]  ;;  %v2653_v1 = vsel %vm12300_vm6, %v2648_v46, %v2652_v51  ;;  %2826 = vst [vmem:[#allocation3 + $0x2d4] sm:$0xf] %v2643_v33  ;;  %v2670_v4 = vrot.slane %v2668_v21, 4  ;;  %v2674_v34 = vshll.u32 %v2374_v29, 16 }
 0x2cc   : > { %v2376_v28 = vld [vmem:[#allocation2 + $0x94] sm:$0xf]  ;;  %v2377_v30 = vld [vmem:[#allocation2 + $0x98] sm:$0x1]  ;;  %3984 = vst [vmem:[#allocation3 + $0xf0] sm:$0xf] %v3952_v55  ;;  %v2661_v42 = vor.u32 %v2660_v39, %v2657_v48 }
 0x2cd   : > { %v4869_v47 = vld [vmem:[#allocation3 + $0x290] sm:$0xff]  ;;  %2827 = vst [vmem:[#allocation3 + $0x2f8] sm:$0xf] %v2653_v1  ;;  %3104 = vst [vmem:[#allocation3 + $0x344] sm:$0xf] %v3020_v63  ;;  %v9273_v61 = vrot.slane %v2874_v59, 9  ;;  %v2671_v35 = vor.u32 %v2670_v4, %v2666_v10 }
 0x2ce   : > { %v3023_v7 = vrot.slane %v2875_v25, 5  ;;  %v3953_v19 = vld [vmem:[#allocation2 + $0x40] sm:$0xf]  ;;  %v9392_v37 = vcombine.low %v4869_v47, %v4874_v14  ;;  %v2676_v32 = vrot.slane %v2674_v34, 5  ;;  %v2877_v31 = vld [vmem:[#allocation2 + $0x9c] sm:$0xe] }
 0x2cf   : > { %v2878_v58 = vld [vmem:[#allocation2 + $0xa0] sm:$0xf]  ;;  %3985 = vst [vmem:[#allocation3 + $0x114] sm:$0xf] %v3953_v19  ;;  %v2662_v41 = vrot.slane %v2661_v42, 4  ;;  %v3026_v44 = vrot.slane %v2876_v36, 5 }
 0x2d0   : > { %v3024_v15 = vsel %vm12249_vm15, %v9273_v61, %v3023_v7  ;;  %v3025_v12 = vrot.slane %v3023_v7, 4  ;;  %v2879_v11 = vld [vmem:[#allocation2 + $0xa4] sm:$0x1]  ;;  %v2672_v13 = vrot.slane %v2671_v35, 4  ;;  %v2679_v49 = vshrl.u32 %v2375_v54, 16  ;;  %v4884_v62 = vld [vmem:[#allocation3 + $0x2fc] sm:$0xff]  ;;  %6516 = vmatmul.mubr.bf16.gmra.mxu0 %v9392_v37 }
 0x2d1   : > { %3105 = vst [vmem:[#allocation3 + $0x368] sm:$0xf] %v3024_v15  ;;  %v2682_v0 = vshll.u32 %v2375_v54, 16  ;;  %v2688_v38 = vshll.u32 %v2376_v28, 16  ;;  %v2378_v3 = vld [vmem:[#allocation2 + $0x9c] sm:$0xf]  ;;  %v2667_v40 = vsel %vm12300_vm6, %v2662_v41, %v2666_v10 }
 0x2d2   : > { %v10542_v57 = vld [vmem:[#allocation3 + $0x2dc] ss:$36 sps:$4 sm:$0xff]   ;;  %v3027_v52 = vsel %vm12249_vm15, %v3025_v12, %v3026_v44  ;;  %v2692_v43 = vshrl.u32 %v2376_v28, 16  ;;  %v2698_v5 = vshll.u32 %v2377_v30, 16  ;;  %v2379_v22 = vld [vmem:[#allocation2 + $0xa0] sm:$0xf]  ;;  %v2677_v8 = vsel %vm12300_vm6, %v2672_v13, %v2676_v32 }
 0x2d3   : > { %v10535_v53 = vld [vmem:[#allocation3 + $0x240] ss:$36 sps:$4 sm:$0xff]   ;;  %v4879_v29 = vld [vmem:[#allocation3 + $0x2d8] sm:$0xff]  ;;  %2828 = vst [vmem:[#allocation3 + $0x31c] sm:$0xf] %v2667_v40  ;;  %v2681_v6 = vrot.slane %v2679_v49, 4  ;;  %6523 = vmatprep.mubr.bf16.mxu0 %v10542_v57 }
 0x2d4   : > { %3106 = vst [vmem:[#allocation3 + $0x38c] sm:$0xf] %v3027_v52  ;;  %v2684_v51 = vrot.slane %v2682_v0, 5  ;;  %v2690_v16 = vrot.slane %v2688_v38, 5  ;;  %v10539_v50 = vld [vmem:[#allocation3 + $0x28c] ss:$36 sps:$4 sm:$0xff]   ;;  %6347 = vmatmul.mubr.bf16.gmra.mxu1 %v10535_v53  ;;  %v9401_v23 = vcombine.low %v4879_v29, %v4884_v62 }
 0x2d5   : > { %2829 = vst [vmem:[#allocation3 + $0x340] sm:$0xf] %v2677_v8  ;;  %v2694_v59 = vrot.slane %v2692_v43, 4  ;;  %v9274_v25 = vrot.slane %v2877_v31, 9  ;;  %v3030_v9 = vrot.slane %v2878_v58, 5  ;;  %v3033_v17 = vrot.slane %v2879_v11, 5  ;;  %6354 = vmatprep.mubr.bf16.mxu1 %v10539_v50 }
 0x2d6   : > { %v2685_v56 = vor.u32 %v2684_v51, %v2681_v6  ;;  %v2380_v45 = vld [vmem:[#allocation2 + $0xa4] sm:$0x1]  ;;  %v2703_v2 = vshrl.u32 %v2378_v3, 16  ;;  %v2880_v21 = vld [vmem:[#allocation2 + $0xa8] sm:$0xe]  ;;  %v2700_v14 = vrot.slane %v2698_v5, 5 }
 0x2d7   : > { %v2695_v18 = vor.u32 %v2694_v59, %v2690_v16  ;;  %v3031_v26 = vsel %vm12249_vm15, %v9274_v25, %v3030_v9  ;;  %v3032_v46 = vrot.slane %v3030_v9, 4  ;;  %v2706_v33 = vshll.u32 %v2378_v3, 16  ;;  %v2881_v39 = vld [vmem:[#allocation2 + $0xac] sm:$0xf]  ;;  %v2882_v63 = vld [vmem:[#allocation2 + $0xb0] sm:$0x1] }
 0x2d8   : > { %v2686_v36 = vrot.slane %v2685_v56, 4  ;;  %3107 = vst [vmem:[#allocation3 + $0x3b0] sm:$0xf] %v3031_v26  ;;  %v2712_v48 = vshll.u32 %v2379_v22, 16  ;;  %v2705_v55 = vrot.slane %v2703_v2, 4  ;;  %v2716_v1 = vshrl.u32 %v2379_v22, 16  ;;  %6524 = vmatmul.mubr.bf16.gmra.mxu0 %v9401_v23 }
 0x2d9   : > { %v2696_v10 = vrot.slane %v2695_v18, 4  ;;  %v3034_v54 = vsel %vm12249_vm15, %v3032_v46, %v3033_v17  ;;  %v2708_v34 = vrot.slane %v2706_v33, 5  ;;  %v2722_v30 = vshll.u32 %v2380_v45, 16  ;;  %v2381_v47 = vld [vmem:[#allocation2 + $0xa8] sm:$0xf]  ;;  %v4894_v40 = vld [vmem:[#allocation3 + $0x344] sm:$0xff] }
 0x2da   : > { %v2691_v4 = vsel %vm12300_vm6, %v2686_v36, %v2690_v16  ;;  %3108 = vst [vmem:[#allocation3 + $0x3d4] sm:$0xf] %v3034_v54  ;;  %v2714_v28 = vrot.slane %v2712_v48, 5  ;;  %v10550_v42 = vld [vmem:[#allocation3 + $0x324] ss:$36 sps:$4 sm:$0xff]   ;;  %v2718_v7 = vrot.slane %v2716_v1, 4 }
 0x2db   : > { %v2701_v61 = vsel %vm12300_vm6, %v2696_v10, %v2700_v14  ;;  %2830 = vst [vmem:[#allocation3 + $0x364] sm:$0xf] %v2691_v4  ;;  %v2382_v19 = vld [vmem:[#allocation2 + $0xac] sm:$0xf]  ;;  %v10541_v37 = vld [vmem:[#allocation3 + $0x288] ss:$36 sps:$4 sm:$0xff]   ;;  %v2709_v35 = vor.u32 %v2708_v34, %v2705_v55  ;;  %6531 = vmatprep.mubr.bf16.mxu0 %v10550_v42 }
 0x2dc   : > { %2831 = vst [vmem:[#allocation3 + $0x388] sm:$0xf] %v2701_v61  ;;  %v2724_v32 = vrot.slane %v2722_v30, 5  ;;  %v9275_v31 = vrot.slane %v2880_v21, 9  ;;  %v2383_v58 = vld [vmem:[#allocation2 + $0xb0] sm:$0x1]  ;;  %v2719_v12 = vor.u32 %v2718_v7, %v2714_v28  ;;  %6355 = vmatmul.mubr.bf16.gmra.mxu1 %v10541_v37 }
 0x2dd   : > { %v2883_v41 = vld [vmem:[#allocation2 + $0xb4] sm:$0xe]  ;;  %v10544_v15 = vld [vmem:[#allocation3 + $0x2d4] ss:$36 sps:$4 sm:$0xff]   ;;  %v3037_v44 = vrot.slane %v2881_v39, 5  ;;  %v3040_v11 = vrot.slane %v2882_v63, 5 }
 0x2de   : > { %v2727_v13 = vshrl.u32 %v2381_v47, 16  ;;  %v2884_v49 = vld [vmem:[#allocation2 + $0xb8] sm:$0xf]  ;;  %v2710_v0 = vrot.slane %v2709_v35, 4  ;;  %v2730_v38 = vshll.u32 %v2381_v47, 16  ;;  %v2736_v3 = vshll.u32 %v2382_v19, 16  ;;  %6362 = vmatprep.mubr.bf16.mxu1 %v10544_v15 }
 0x2df   : > { %v2740_v62 = vshrl.u32 %v2382_v19, 16  ;;  %v3954_v57 = vld [vmem:[#allocation2 + $0x48] sm:$0xf]  ;;  %v2720_v52 = vrot.slane %v2719_v12, 4  ;;  %v3038_v43 = vsel %vm12249_vm15, %v9275_v31, %v3037_v44  ;;  %v3039_v5 = vrot.slane %v3037_v44, 4  ;;  %v4889_v16 = vld [vmem:[#allocation3 + $0x320] sm:$0xff] }
 0x2e0   : > { %v2729_v22 = vrot.slane %v2727_v13, 4  ;;  %v3955_v53 = vld [vmem:[#allocation2 + $0x4c] sm:$0xf]  ;;  %3986 = vst [vmem:[#allocation3 + $0x138] sm:$0xf] %v3954_v57  ;;  %v2715_v29 = vsel %vm12300_vm6, %v2710_v0, %v2714_v28  ;;  %v2732_v8 = vrot.slane %v2730_v38, 5  ;;  %v9410_v56 = vcombine.low %v4889_v16, %v4894_v40 }
 0x2e1   : > { %3109 = vst [vmem:[#allocation3 + $0x3f8] sm:$0xf] %v3038_v43  ;;  %v2738_v6 = vrot.slane %v2736_v3, 5  ;;  %v2742_v51 = vrot.slane %v2740_v62, 4  ;;  %3987 = vst [vmem:[#allocation3 + $0x15c] sm:$0xf] %v3955_v53  ;;  %v2725_v50 = vsel %vm12300_vm6, %v2720_v52, %v2724_v32  ;;  %v3041_v59 = vsel %vm12249_vm15, %v3039_v5, %v3040_v11 }
 0x2e2   : > { %2832 = vst [vmem:[#allocation3 + $0x3ac] sm:$0xf] %v2715_v29  ;;  %v2746_v25 = vshll.u32 %v2383_v58, 16  ;;  %v9276_v9 = vrot.slane %v2883_v41, 9  ;;  %v2384_v23 = vld [vmem:[#allocation2 + $0xb4] sm:$0xf]  ;;  %v2733_v17 = vor.u32 %v2732_v8, %v2729_v22  ;;  %6532 = vmatmul.mubr.bf16.gmra.mxu0 %v9410_v56 }
 0x2e3   : > { %2833 = vst [vmem:[#allocation3 + $0x3d0] sm:$0xf] %v2725_v50  ;;  %3110 = vst [vmem:[#allocation3 + $0x41c] sm:$0xf] %v3041_v59  ;;  %v2743_v18 = vor.u32 %v2742_v51, %v2738_v6  ;;  %v2885_v26 = vld [vmem:[#allocation2 + $0xbc] sm:$0x1] }
 0x2e4   : > { %v3044_v46 = vrot.slane %v2884_v49, 5  ;;  %v2385_v45 = vld [vmem:[#allocation2 + $0xb8] sm:$0xf]  ;;  %v10556_v2 = vld [vmem:[#allocation3 + $0x36c] ss:$36 sps:$4 sm:$0xff]   ;;  %v2748_v21 = vrot.slane %v2746_v25, 5 }
 0x2e5   : > { %v2386_v36 = vld [vmem:[#allocation2 + $0xbc] sm:$0x1]  ;;  %v4010_v14 = vld [vmem:[#allocation2 + $0x18] sm:$0xf]  ;;  %v10549_v33 = vld [vmem:[#allocation3 + $0x2d0] ss:$36 sps:$4 sm:$0xff]   ;;  %6539 = vmatprep.mubr.bf16.mxu0 %v10556_v2 }
 0x2e6   : > { %v2734_v48 = vrot.slane %v2733_v17, 4  ;;  %v2744_v39 = vrot.slane %v2743_v18, 4  ;;  %v3045_v10 = vsel %vm12249_vm15, %v9276_v9, %v3044_v46  ;;  %v3046_v54 = vrot.slane %v3044_v46, 4  ;;  %v4011_v55 = vld [vmem:[#allocation2 + $0x1c] sm:$0xf]  ;;  %6363 = vmatmul.mubr.bf16.gmra.mxu1 %v10549_v33  ;;  %v4904_v30 = vld [vmem:[#allocation3 + $0x38c] sm:$0xff] }
 0x2e7   : > { %v10553_v1 = vld [vmem:[#allocation3 + $0x31c] ss:$36 sps:$4 sm:$0xff]   ;;  %v3047_v63 = vrot.slane %v2885_v26, 5  ;;  %3111 = vst [vmem:[#allocation3 + $0x440] sm:$0xf] %v3045_v10  ;;  %v2751_v4 = vshrl.u32 %v2384_v23, 16 }
 0x2e8   : > { %v2754_v34 = vshll.u32 %v2384_v23, 16  ;;  %v2760_v28 = vshll.u32 %v2385_v45, 16  ;;  %v2739_v47 = vsel %vm12300_vm6, %v2734_v48, %v2738_v6  ;;  %v2749_v42 = vsel %vm12300_vm6, %v2744_v39, %v2748_v21  ;;  %v4012_v19 = vld [vmem:[#allocation2 + $0x20] sm:$0x1]  ;;  %6370 = vmatprep.mubr.bf16.mxu1 %v10553_v1  ;;  %v3177_v58 = vld [vmem:[#allocation2 + $0xc] sm:$0xf] }
 0x2e9   : > { %v2764_v61 = vshrl.u32 %v2385_v45, 16  ;;  %v2770_v7 = vshll.u32 %v2386_v36, 16  ;;  %2834 = vst [vmem:[#allocation3 + $0x3f4] sm:$0xf] %v2739_v47  ;;  %2835 = vst [vmem:[#allocation3 + $0x418] sm:$0xf] %v2749_v42  ;;  %v3048_v37 = vsel %vm12249_vm15, %v3046_v54, %v3047_v63 }
 0x2ea   : > { %v2753_v35 = vrot.slane %v2751_v4, 4  ;;  %v2756_v32 = vrot.slane %v2754_v34, 5  ;;  %v2762_v31 = vrot.slane %v2760_v28, 5  ;;  %v4899_v41 = vld [vmem:[#allocation3 + $0x368] sm:$0xff]  ;;  %3112 = vst [vmem:[#allocation3 + $0x464] sm:$0xf] %v3048_v37 }
 0x2eb   : > { %v2766_v15 = vrot.slane %v2764_v61, 4  ;;  %v4059_v12 = vshrl.u32 %v4010_v14, 16  ;;  %v4062_v44 = vshll.u32 %v4010_v14, 16  ;;  %v9419_v11 = vcombine.low %v4899_v41, %v4904_v30  ;;  %v3178_v38 = vld [vmem:[#allocation2 + $0x10] sm:$0xf]  ;;  %v4909_v21 = vld [vmem:[#allocation3 + $0x3b0] sm:$0xff] }
 0x2ec   : > { %v2757_v13 = vor.u32 %v2756_v32, %v2753_v35  ;;  %v2772_v49 = vrot.slane %v2770_v7, 5  ;;  %v4068_v0 = vshll.u32 %v4011_v55, 16  ;;  %v10555_v3 = vld [vmem:[#allocation3 + $0x318] ss:$36 sps:$4 sm:$0xff]   ;;  %v4072_v52 = vshrl.u32 %v4011_v55, 16 }
 0x2ed   : > { %v2767_v62 = vor.u32 %v2766_v15, %v2762_v31  ;;  %v4061_v57 = vrot.slane %v4059_v12, 4  ;;  %v4064_v40 = vrot.slane %v4062_v44, 5  ;;  %v10564_v43 = vld [vmem:[#allocation3 + $0x3b4] ss:$36 sps:$4 sm:$0xff]   ;;  %v4078_v53 = vshll.u32 %v4012_v19, 16  ;;  %6540 = vmatmul.mubr.bf16.gmra.mxu0 %v9419_v11 }
 0x2ee   : > { %v2758_v5 = vrot.slane %v2757_v13, 4  ;;  %v4070_v22 = vrot.slane %v4068_v0, 5  ;;  %v4914_v29 = vld [vmem:[#allocation3 + $0x3d4] sm:$0xff]  ;;  %v4074_v51 = vrot.slane %v4072_v52, 4  ;;  %v3179_v16 = vld [vmem:[#allocation2 + $0x14] sm:$0x1]  ;;  %6547 = vmatprep.mubr.bf16.mxu0 %v10564_v43  ;;  %6371 = vmatmul.mubr.bf16.gmra.mxu1 %v10555_v3 }
 0x2ef   : > { %v2768_v8 = vrot.slane %v2767_v62, 4  ;;  %v4065_v6 = vor.u32 %v4064_v40, %v4061_v57  ;;  %v3226_v50 = vshrl.u32 %v3177_v58, 16  ;;  %v3956_v59 = vld [vmem:[#allocation2 + $0x54] sm:$0xf]  ;;  %v10558_v25 = vld [vmem:[#allocation3 + $0x364] ss:$36 sps:$4 sm:$0xff]   ;;  %v9428_v48 = vcombine.low %v4909_v21, %v4914_v29 }
 0x2f0   : > { %v2763_v9 = vsel %vm12300_vm6, %v2758_v5, %v2762_v31  ;;  %v3229_v23 = vshll.u32 %v3177_v58, 16  ;;  %v3235_v56 = vshll.u32 %v3178_v38, 16  ;;  %v3957_v17 = vld [vmem:[#allocation2 + $0x58] sm:$0xf]  ;;  %3988 = vst [vmem:[#allocation3 + $0x180] sm:$0xf] %v3956_v59  ;;  %v4075_v46 = vor.u32 %v4074_v51, %v4070_v22  ;;  %6378 = vmatprep.mubr.bf16.mxu1 %v10558_v25 }
 0x2f1   : > { %v2773_v18 = vsel %vm12300_vm6, %v2768_v8, %v2772_v49  ;;  %2836 = vst [vmem:[#allocation3 + $0x43c] sm:$0xf] %v2763_v9  ;;  %v4066_v26 = vrot.slane %v4065_v6, 4  ;;  %v3228_v45 = vrot.slane %v3226_v50, 4  ;;  %v3673_v2 = vld [vmem:[#allocation2 + $0xc] sm:$0xe] }
 0x2f2   : > { %3989 = vst [vmem:[#allocation3 + $0x1a4] sm:$0xf] %v3957_v17  ;;  %2837 = vst [vmem:[#allocation3 + $0x460] sm:$0xf] %v2773_v18  ;;  %v3231_v36 = vrot.slane %v3229_v23, 5  ;;  %v4076_v10 = vrot.slane %v4075_v46, 4 }
 0x2f3   : > { %v3674_v14 = vld [vmem:[#allocation2 + $0x10] sm:$0xf]  ;;  %v4013_v33 = vld [vmem:[#allocation2 + $0x24] sm:$0xf]  ;;  %v4071_v39 = vsel %vm12300_vm6, %v4066_v26, %v4070_v22  ;;  %v4080_v54 = vrot.slane %v4078_v53, 5  ;;  %v3237_v63 = vrot.slane %v3235_v56, 5 }
 0x2f4   : > { %v3675_v55 = vld [vmem:[#allocation2 + $0x14] sm:$0x1]  ;;  %4474 = vst [vmem:[#allocation3 + $0x1c] sm:$0xf] %v4071_v39  ;;  %v3232_v1 = vor.u32 %v3231_v36, %v3228_v45  ;;  %v3239_v4 = vshrl.u32 %v3178_v38, 16  ;;  %v3245_v34 = vshll.u32 %v3179_v16, 16 }
 0x2f5   : > { %v4014_v28 = vld [vmem:[#allocation2 + $0x28] sm:$0xf]  ;;  %v4081_v30 = vsel %vm12300_vm6, %v4076_v10, %v4080_v54  ;;  %v9277_v47 = vrot.slane %v3673_v2, 9  ;;  %v3771_v42 = vrot.slane %v3674_v14, 5  ;;  %v4015_v61 = vld [vmem:[#allocation2 + $0x2c] sm:$0x1]  ;;  %6548 = vmatmul.mubr.bf16.gmra.mxu0 %v9428_v48 }
 0x2f6   : > { %v4083_v7 = vshrl.u32 %v4013_v33, 16  ;;  %v10570_v19 = vld [vmem:[#allocation3 + $0x3fc] ss:$36 sps:$4 sm:$0xff]   ;;  %4475 = vst [vmem:[#allocation3 + $0x40] sm:$0xf] %v4081_v30  ;;  %v3233_v37 = vrot.slane %v3232_v1, 4 }
 0x2f7   : > { %v3241_v35 = vrot.slane %v3239_v4, 4  ;;  %v3774_v32 = vrot.slane %v3675_v55, 5  ;;  %v4086_v31 = vshll.u32 %v4013_v33, 16  ;;  %v3180_v58 = vld [vmem:[#allocation2 + $0x18] sm:$0xf]  ;;  %v3772_v12 = vsel %vm12249_vm15, %v9277_v47, %v3771_v42  ;;  %6555 = vmatprep.mubr.bf16.mxu0 %v10570_v19  ;;  %v4919_v9 = vld [vmem:[#allocation3 + $0x3f8] sm:$0xff] }
 0x2f8   : > { %v3181_v41 = vld [vmem:[#allocation2 + $0x1c] sm:$0xf]  ;;  %v3773_v44 = vrot.slane %v3771_v42, 4  ;;  %v4085_v11 = vrot.slane %v4083_v7, 4  ;;  %v4092_v13 = vshll.u32 %v4014_v28, 16  ;;  %v3238_v0 = vsel %vm12300_vm6, %v3233_v37, %v3237_v63  ;;  %v4924_v43 = vld [vmem:[#allocation3 + $0x41c] sm:$0xff] }
 0x2f9   : > { %v10563_v15 = vld [vmem:[#allocation3 + $0x360] ss:$36 sps:$4 sm:$0xff]   ;;  %v10567_v49 = vld [vmem:[#allocation3 + $0x3ac] ss:$36 sps:$4 sm:$0xff]   ;;  %v3242_v38 = vor.u32 %v3241_v35, %v3237_v63  ;;  %3913 = vst [vmem:[#allocation3 + $0x14] sm:$0xf] %v3772_v12  ;;  %v9437_v45 = vcombine.low %v4919_v9, %v4924_v43 }
 0x2fa   : > { %v4088_v3 = vrot.slane %v4086_v31, 5  ;;  %v4096_v62 = vshrl.u32 %v4014_v28, 16  ;;  %6379 = vmatmul.mubr.bf16.gmra.mxu1 %v10563_v15  ;;  %v3247_v57 = vrot.slane %v3245_v34, 5  ;;  %3641 = vst [vmem:[#allocation3 + $0x10] sm:$0xf] %v3238_v0  ;;  %v3775_v40 = vsel %vm12249_vm15, %v3773_v44, %v3774_v32 }
 0x2fb   : > { %v4094_v52 = vrot.slane %v4092_v13, 5  ;;  %6386 = vmatprep.mubr.bf16.mxu1 %v10567_v49  ;;  %v3243_v5 = vrot.slane %v3242_v38, 4  ;;  %3914 = vst [vmem:[#allocation3 + $0x38] sm:$0xf] %v3775_v40  ;;  %v4102_v29 = vshll.u32 %v4015_v61, 16  ;;  %v3250_v16 = vshrl.u32 %v3180_v58, 16 }
 0x2fc   : > { %v4089_v22 = vor.u32 %v4088_v3, %v4085_v11  ;;  %v4098_v53 = vrot.slane %v4096_v62, 4  ;;  %v3182_v8 = vld [vmem:[#allocation2 + $0x20] sm:$0x1]  ;;  %v3676_v6 = vld [vmem:[#allocation2 + $0x18] sm:$0xe]  ;;  %v3253_v50 = vshll.u32 %v3180_v58, 16 }
 0x2fd   : > { %v3677_v51 = vld [vmem:[#allocation2 + $0x1c] sm:$0xf]  ;;  %v3259_v59 = vshll.u32 %v3181_v41, 16  ;;  %v3263_v25 = vshrl.u32 %v3181_v41, 16  ;;  %v3248_v23 = vsel %vm12300_vm6, %v3243_v5, %v3247_v57  ;;  %v3678_v18 = vld [vmem:[#allocation2 + $0x20] sm:$0x1]  ;;  %6556 = vmatmul.mubr.bf16.gmra.mxu0 %v9437_v45 }
 0x2fe   : > { %v4090_v56 = vrot.slane %v4089_v22, 4  ;;  %v4099_v17 = vor.u32 %v4098_v53, %v4094_v52  ;;  %v4016_v26 = vld [vmem:[#allocation2 + $0x30] sm:$0xf]  ;;  %v3958_v46 = vld [vmem:[#allocation2 + $0x60] sm:$0xf]  ;;  %v4104_v21 = vrot.slane %v4102_v29, 5 }
 0x2ff   : > { %v10579_v2 = vld [vmem:[#allocation3 + $0x444] ss:$36 sps:$4 sm:$0xff]   ;;  %3642 = vst [vmem:[#allocation3 + $0x34] sm:$0xf] %v3248_v23  ;;  %v3252_v36 = vrot.slane %v3250_v16, 4  ;;  %v3255_v39 = vrot.slane %v3253_v50, 5 }
 0x300   : > { %v4017_v14 = vld [vmem:[#allocation2 + $0x34] sm:$0xf]  ;;  %3990 = vst [vmem:[#allocation3 + $0x1c8] sm:$0xf] %v3958_v46  ;;  %v4095_v33 = vsel %vm12300_vm6, %v4090_v56, %v4094_v52  ;;  %v4100_v48 = vrot.slane %v4099_v17, 4  ;;  %v3261_v10 = vrot.slane %v3259_v59, 5  ;;  %6563 = vmatprep.mubr.bf16.mxu0 %v10579_v2 }
 0x301   : > { %v3959_v54 = vld [vmem:[#allocation2 + $0x64] sm:$0xf]  ;;  %4476 = vst [vmem:[#allocation3 + $0x64] sm:$0xf] %v4095_v33  ;;  %v3265_v1 = vrot.slane %v3263_v25, 4  ;;  %v3269_v63 = vshll.u32 %v3182_v8, 16  ;;  %v3256_v47 = vor.u32 %v3255_v39, %v3252_v36 }
 0x302   : > { %v10569_v55 = vld [vmem:[#allocation3 + $0x3a8] ss:$36 sps:$4 sm:$0xff]   ;;  %v9278_v4 = vrot.slane %v3676_v6, 9  ;;  %v3778_v34 = vrot.slane %v3677_v51, 5  ;;  %3991 = vst [vmem:[#allocation3 + $0x1ec] sm:$0xf] %v3959_v54  ;;  %v4105_v30 = vsel %vm12300_vm6, %v4100_v48, %v4104_v21 }
 0x303   : > { %v10572_v28 = vld [vmem:[#allocation3 + $0x3f4] ss:$36 sps:$4 sm:$0xff]   ;;  %v4107_v42 = vshrl.u32 %v4016_v26, 16  ;;  %6387 = vmatmul.mubr.bf16.gmra.mxu1 %v10569_v55  ;;  %4477 = vst [vmem:[#allocation3 + $0x88] sm:$0xf] %v4105_v30  ;;  %v3266_v61 = vor.u32 %v3265_v1, %v3261_v10  ;;  %v3781_v37 = vrot.slane %v3678_v18, 5 }
 0x304   : > { %v3779_v7 = vsel %vm12249_vm15, %v9278_v4, %v3778_v34  ;;  %v3780_v19 = vrot.slane %v3778_v34, 4  ;;  %v4018_v35 = vld [vmem:[#allocation2 + $0x38] sm:$0x1]  ;;  %v3183_v32 = vld [vmem:[#allocation2 + $0x24] sm:$0xf]  ;;  %6394 = vmatprep.mubr.bf16.mxu1 %v10572_v28  ;;  %v4934_v58 = vld [vmem:[#allocation3 + $0x464] sm:$0xff] }
 0x305   : > { %v12566_v31 = vld [vmem:[#allocation2 + $0x24] sm:$0xe]  ;;  %v3257_v41 = vrot.slane %v3256_v47, 4  ;;  %3915 = vst [vmem:[#allocation3 + $0x5c] sm:$0xf] %v3779_v7  ;;  %v4109_v15 = vrot.slane %v4107_v42, 4 }
 0x306   : > { %v4110_v12 = vshll.u32 %v4016_v26, 16  ;;  %v4116_v44 = vshll.u32 %v4017_v14, 16  ;;  %v3267_v11 = vrot.slane %v3266_v61, 4  ;;  %v3271_v13 = vrot.slane %v3269_v63, 5  ;;  %v3184_v38 = vld [vmem:[#allocation2 + $0x28] sm:$0xf] }
 0x307   : > { %v3782_v49 = vsel %vm12249_vm15, %v3780_v19, %v3781_v37  ;;  %v4120_v0 = vshrl.u32 %v4017_v14, 16  ;;  %v4929_v3 = vld [vmem:[#allocation3 + $0x440] sm:$0xff]  ;;  %v3262_v62 = vsel %vm12300_vm6, %v3257_v41, %v3261_v10  ;;  %v4126_v40 = vshll.u32 %v4018_v35, 16  ;;  %v3185_v52 = vld [vmem:[#allocation2 + $0x2c] sm:$0x1] }
 0x308   : > { %3916 = vst [vmem:[#allocation3 + $0x80] sm:$0xf] %v3782_v49  ;;  %v4112_v57 = vrot.slane %v4110_v12, 5  ;;  %v9446_v43 = vcombine.low %v4929_v3, %v4934_v58  ;;  %v3272_v5 = vsel %vm12300_vm6, %v3267_v11, %v3271_v13  ;;  %3643 = vst [vmem:[#allocation3 + $0x58] sm:$0xf] %v3262_v62  ;;  %v4118_v22 = vrot.slane %v4116_v44, 5 }
 0x309   : > { %v4122_v53 = vrot.slane %v4120_v0, 4  ;;  %v3679_v29 = vld [vmem:[#allocation2 + $0x24] sm:$0xe]  ;;  %v3680_v8 = vld [vmem:[#allocation2 + $0x28] sm:$0xf]  ;;  %v3274_v16 = vshrl.u32 %v3183_v32, 16 }
 0x30a   : > { %v10592_v6 = vld [vmem:[#allocation3 + $0x1c] ss:$36 sps:$4 sm:$0xff]   ;;  %3644 = vst [vmem:[#allocation3 + $0x7c] sm:$0xf] %v3272_v5  ;;  %v4113_v51 = vor.u32 %v4112_v57, %v4109_v15  ;;  %v3277_v50 = vshll.u32 %v3183_v32, 16  ;;  %v3283_v59 = vshll.u32 %v3184_v38, 16  ;;  %6564 = vmatmul.mubr.bf16.gmra.mxu0 %v9446_v43 }
 0x30b   : > { %v3681_v25 = vld [vmem:[#allocation2 + $0x2c] sm:$0x1]  ;;  %v9294_v9 = vrot.slane %v12566_v31, 9  ;;  %v4123_v56 = vor.u32 %v4122_v53, %v4118_v22  ;;  %v3287_v17 = vshrl.u32 %v3184_v38, 16  ;;  %v4019_v18 = vld [vmem:[#allocation2 + $0x3c] sm:$0xf]  ;;  %6765 = vmatprep.mubr.bf16.mxu0 %v10592_v6 }
 0x30c   : > { %v10578_v23 = vld [vmem:[#allocation3 + $0x3f0] ss:$36 sps:$4 sm:$0xff]   ;;  %v10583_v26 = vld [vmem:[#allocation3 + $0x43c] ss:$36 sps:$4 sm:$0xff]   ;;  %v4114_v46 = vrot.slane %v4113_v51, 4  ;;  %v4128_v45 = vrot.slane %v4126_v40, 5 }
 0x30d   : > { %v3276_v2 = vrot.slane %v3274_v16, 4  ;;  %v3279_v21 = vrot.slane %v3277_v50, 5  ;;  %6395 = vmatmul.mubr.bf16.gmra.mxu1 %v10578_v23  ;;  %v4124_v36 = vrot.slane %v4123_v56, 4  ;;  %v3285_v14 = vrot.slane %v3283_v59, 5  ;;  %v3960_v39 = vld [vmem:[#allocation2 + $0x6c] sm:$0xf] }
 0x30e   : > { %v3289_v33 = vrot.slane %v3287_v17, 4  ;;  %v3293_v48 = vshll.u32 %v3185_v52, 16  ;;  %v12575_v10 = vld [vmem:[#allocation2 + $0x28] sm:$0xf]  ;;  %6402 = vmatprep.mubr.bf16.mxu1 %v10583_v26  ;;  %v4119_v54 = vsel %vm12300_vm6, %v4114_v46, %v4118_v22  ;;  %v9279_v1 = vrot.slane %v3679_v29, 9  ;;  %v4796_v53 = vld [vmem:[#allocation3 + $0x84] sm:$0xff] }
 0x30f   : > { %v3280_v55 = vor.u32 %v3279_v21, %v3276_v2  ;;  %v3785_v63 = vrot.slane %v3680_v8, 5  ;;  %v3961_v4 = vld [vmem:[#allocation2 + $0x70] sm:$0xf]  ;;  %3992 = vst [vmem:[#allocation3 + $0x210] sm:$0xf] %v3960_v39  ;;  %v4129_v34 = vsel %vm12300_vm6, %v4124_v36, %v4128_v45  ;;  %v3788_v30 = vrot.slane %v3681_v25, 5 }
 0x310   : > { %4478 = vst [vmem:[#allocation3 + $0xac] sm:$0xf] %v4119_v54  ;;  %v3290_v28 = vor.u32 %v3289_v33, %v3285_v14  ;;  %v4020_v47 = vld [vmem:[#allocation2 + $0x40] sm:$0xf]  ;;  %v4131_v42 = vshrl.u32 %v4019_v18, 16  ;;  %v4134_v32 = vshll.u32 %v4019_v18, 16 }
 0x311   : > { %v3186_v61 = vld [vmem:[#allocation2 + $0x30] sm:$0xf]  ;;  %3993 = vst [vmem:[#allocation3 + $0x234] sm:$0xf] %v3961_v4  ;;  %4479 = vst [vmem:[#allocation3 + $0xd0] sm:$0xf] %v4129_v34  ;;  %v3786_v19 = vsel %vm12249_vm15, %v9279_v1, %v3785_v63 }
 0x312   : > { %v3281_v7 = vrot.slane %v3280_v55, 4  ;;  %v3787_v37 = vrot.slane %v3785_v63, 4  ;;  %v4021_v35 = vld [vmem:[#allocation2 + $0x44] sm:$0x1]  ;;  %v3187_v58 = vld [vmem:[#allocation2 + $0x34] sm:$0xf] }
 0x313   : > { %v4611_v41 = vrot.slane %v12575_v10, 5  ;;  %v10590_v15 = vld [vmem:[#allocation3 + $0x18] ss:$36 sps:$4 sm:$0xff]   ;;  %v3291_v12 = vrot.slane %v3290_v28, 4  ;;  %v3295_v44 = vrot.slane %v3293_v48, 5  ;;  %v4133_v0 = vrot.slane %v4131_v42, 4 }
 0x314   : > { %3917 = vst [vmem:[#allocation3 + $0xa4] sm:$0xf] %v3786_v19  ;;  %v10599_v11 = vld [vmem:[#allocation3 + $0x64] ss:$36 sps:$4 sm:$0xff]   ;;  %v3286_v13 = vsel %vm12300_vm6, %v3281_v7, %v3285_v14  ;;  %v3789_v49 = vsel %vm12249_vm15, %v3787_v37, %v3788_v30  ;;  %v4136_v38 = vrot.slane %v4134_v32, 5  ;;  %6766 = vmatmul.mubr.bf16.vlgmr.msra.gmra.mxu0 %v10590_v15  ;;  %v4140_v40 = vshll.u32 %v4020_v47, 16 }
 0x315   : > { %v3188_v3 = vld [vmem:[#allocation2 + $0x38] sm:$0x1]  ;;  %v10588_v62 = vld [vmem:[#allocation3 + $0x438] ss:$36 sps:$4 sm:$0xff]   ;;  %v3296_v57 = vsel %vm12300_vm6, %v3291_v12, %v3295_v44  ;;  %3645 = vst [vmem:[#allocation3 + $0xa0] sm:$0xf] %v3286_v13  ;;  %6773 = vmatprep.mubr.bf16.mxu0 %v10599_v11 }
 0x316   : > { %3918 = vst [vmem:[#allocation3 + $0xc8] sm:$0xf] %v3789_v49  ;;  %v4144_v52 = vshrl.u32 %v4020_v47, 16  ;;  %v3682_v43 = vld [vmem:[#allocation2 + $0x30] sm:$0xe]  ;;  %v4137_v29 = vor.u32 %v4136_v38, %v4133_v0  ;;  %v3298_v8 = vshrl.u32 %v3186_v61, 16  ;;  %6403 = vmatmul.mubr.bf16.gmra.mxu1 %v10588_v62 }
 0x317   : > { %v3683_v5 = vld [vmem:[#allocation2 + $0x34] sm:$0xf]  ;;  %v10595_v22 = vld [vmem:[#allocation3 + $0x14] ss:$36 sps:$4 sm:$0xff]   ;;  %3646 = vst [vmem:[#allocation3 + $0xc4] sm:$0xf] %v3296_v57 }
 0x318   : > { %v3301_v6 = vshll.u32 %v3186_v61, 16  ;;  %v3307_v51 = vshll.u32 %v3187_v58, 16  ;;  %v4142_v16 = vrot.slane %v4140_v40, 5  ;;  %v4146_v50 = vrot.slane %v4144_v52, 4  ;;  %v3684_v23 = vld [vmem:[#allocation2 + $0x38] sm:$0x1]  ;;  %6604 = vmatprep.mubr.bf16.mxu1 %v10595_v22 }
 0x319   : > { %v4150_v59 = vshll.u32 %v4021_v35, 16  ;;  %v3311_v25 = vshrl.u32 %v3187_v58, 16  ;;  %v4791_v56 = vld [vmem:[#allocation3 + $0x60] sm:$0xff]  ;;  %v4138_v17 = vrot.slane %v4137_v29, 4  ;;  %v3300_v18 = vrot.slane %v3298_v8, 4  ;;  %v10608_v58 = vld [vmem:[#allocation9 + $0x230] sm:$0xff]  }
 0x31a   : > { %v3303_v26 = vrot.slane %v3301_v6, 5  ;;  %v3309_v46 = vrot.slane %v3307_v51, 5  ;;  %v9324_v45 = vcombine.low %v4791_v56, %v4796_v53  ;;  %v4147_v2 = vor.u32 %v4146_v50, %v4142_v16  ;;  %v4022_v14 = vld [vmem:[#allocation2 + $0x48] sm:$0xf]  ;;  %v4023_v55 = vld [vmem:[#allocation2 + $0x4c] sm:$0xf] }
 0x31b   : > { %v3313_v21 = vrot.slane %v3311_v25, 4  ;;  %v3317_v36 = vshll.u32 %v3188_v3, 16  ;;  %v4143_v33 = vsel %vm12300_vm6, %v4138_v17, %v4142_v16  ;;  %v9280_v39 = vrot.slane %v3682_v43, 9  ;;  %v3962_v1 = vld [vmem:[#allocation2 + $0x78] sm:$0xf]  ;;  %v4806_v22 = vld [vmem:[#allocation3 + $0xcc] sm:$0xff] }
 0x31c   : > { %v3304_v48 = vor.u32 %v3303_v26, %v3300_v18  ;;  %v3792_v54 = vrot.slane %v3683_v5, 5  ;;  %v3963_v63 = vld [vmem:[#allocation2 + $0x7c] sm:$0xf]  ;;  %v4148_v4 = vrot.slane %v4147_v2, 4  ;;  %v4152_v34 = vrot.slane %v4150_v59, 5  ;;  %6774 = vmatmul.mubr.bf16.gmra.mxu0 %v9324_v45  ;;  %v10969_v5 = vld [vmem:[#allocation9 + $0x238] sm:$0xff]  }
 0x31d   : > { %4480 = vst [vmem:[#allocation3 + $0xf4] sm:$0xf] %v4143_v33  ;;  %v3314_v28 = vor.u32 %v3313_v21, %v3309_v46  ;;  %v3795_v30 = vrot.slane %v3684_v23, 5  ;;  %v3189_v47 = vld [vmem:[#allocation2 + $0x3c] sm:$0xf]  ;;  %v4155_v35 = vshrl.u32 %v4022_v14, 16 }
 0x31e   : > { %v3190_v42 = vld [vmem:[#allocation2 + $0x40] sm:$0xf]  ;;  %3994 = vst [vmem:[#allocation3 + $0x258] sm:$0xf] %v3962_v1  ;;  %3995 = vst [vmem:[#allocation3 + $0x27c] sm:$0xf] %v3963_v63  ;;  %v3793_v19 = vsel %vm12249_vm15, %v9280_v39, %v3792_v54  ;;  %v4153_v15 = vsel %vm12300_vm6, %v4148_v4, %v4152_v34 }
 0x31f   : > { %v10604_v61 = vld [vmem:[#allocation3 + $0xac] ss:$36 sps:$4 sm:$0xff]   ;;  %v3305_v7 = vrot.slane %v3304_v48, 4  ;;  %v3794_v37 = vrot.slane %v3792_v54, 4  ;;  %v3315_v12 = vrot.slane %v3314_v28, 4  ;;  %v3319_v44 = vrot.slane %v3317_v36, 5 }
 0x320   : > { %v10593_v32 = vld [vmem:[#allocation3 + $0x10] ss:$36 sps:$4 sm:$0xff]   ;;  %3919 = vst [vmem:[#allocation3 + $0xec] sm:$0xf] %v3793_v19  ;;  %v10601_v11 = vld [vmem:[#allocation3 + $0x5c] ss:$36 sps:$4 sm:$0xff]   ;;  %6781 = vmatprep.mubr.bf16.mxu0 %v10604_v61 }
 0x321   : > { %4481 = vst [vmem:[#allocation3 + $0x118] sm:$0xf] %v4153_v15  ;;  %v3310_v13 = vsel %vm12300_vm6, %v3305_v7, %v3309_v46  ;;  %v3796_v49 = vsel %vm12249_vm15, %v3794_v37, %v3795_v30  ;;  %v4024_v0 = vld [vmem:[#allocation2 + $0x50] sm:$0x1]  ;;  %v4157_v38 = vrot.slane %v4155_v35, 4  ;;  %v4158_v3 = vshll.u32 %v4022_v14, 16  ;;  %6605 = vmatmul.mubr.bf16.vlgmr.msra.gmra.mxu1 %v10593_v32 }
 0x322   : > { %v3320_v62 = vsel %vm12300_vm6, %v3315_v12, %v3319_v44  ;;  %3647 = vst [vmem:[#allocation3 + $0xe8] sm:$0xf] %v3310_v13  ;;  %3920 = vst [vmem:[#allocation3 + $0x110] sm:$0xf] %v3796_v49  ;;  %v4164_v57 = vshll.u32 %v4023_v55, 16  ;;  %v4168_v40 = vshrl.u32 %v4023_v55, 16  ;;  %10303 = vmatpush3.bf16.msra.mxu1 %v10969_v5  ;;  %6612 = vmatprep.mubr.bf16.mxu1 %v10601_v11 }
 0x323   : > { %v3191_v52 = vld [vmem:[#allocation2 + $0x44] sm:$0x1]  ;;  %v3685_v43 = vld [vmem:[#allocation2 + $0x3c] sm:$0xe]  ;;  %3648 = vst [vmem:[#allocation3 + $0x10c] sm:$0xf] %v3320_v62  ;;  %10304 = vmatprep.subr.bf16.mxu1 %v10608_v58 }
 0x324   : > { %v4160_v53 = vrot.slane %v4158_v3, 5  ;;  %v3322_v29 = vshrl.u32 %v3189_v47, 16  ;;  %v3325_v8 = vshll.u32 %v3189_v47, 16  ;;  %v3331_v6 = vshll.u32 %v3190_v42, 16  ;;  %v10620_v51 = vld [vmem:[#allocation9 + $0x228] sm:$0xff]   ;;  %v10633_v7 = vld [vmem:[#allocation9 + $0x220] sm:$0xff]  }
 0x325   : > { %v4166_v16 = vrot.slane %v4164_v57, 5  ;;  %v4170_v50 = vrot.slane %v4168_v40, 4  ;;  %v4174_v59 = vshll.u32 %v4024_v0, 16  ;;  %v3335_v25 = vshrl.u32 %v3190_v42, 16  ;;  %v3686_v23 = vld [vmem:[#allocation2 + $0x40] sm:$0xf] }
 0x326   : > { %v4801_v56 = vld [vmem:[#allocation3 + $0xa8] sm:$0xff]  ;;  %v4161_v17 = vor.u32 %v4160_v53, %v4157_v38  ;;  %v3324_v18 = vrot.slane %v3322_v29, 4  ;;  %v3327_v26 = vrot.slane %v3325_v8, 5  ;;  %v3333_v46 = vrot.slane %v3331_v6, 5  ;;  %v4025_v45 = vld [vmem:[#allocation2 + $0x54] sm:$0xf]  ;;  %10305 = vmatpush3.bf16.msra.mxu1 %v10608_v58 }
 0x327   : > { %v10603_v2 = vld [vmem:[#allocation3 + $0x58] ss:$36 sps:$4 sm:$0xff]   ;;  %v9333_v21 = vcombine.low %v4801_v56, %v4806_v22  ;;  %v4171_v36 = vor.u32 %v4170_v50, %v4166_v16  ;;  %v3337_v14 = vrot.slane %v3335_v25, 4  ;;  %v3341_v33 = vshll.u32 %v3191_v52, 16  ;;  %v3687_v48 = vld [vmem:[#allocation2 + $0x44] sm:$0x1]  ;;  %10306 = vmatprep.subr.bf16.mxu1 %v10620_v51 }
 0x328   : > { %v10606_v39 = vld [vmem:[#allocation3 + $0xa4] ss:$36 sps:$4 sm:$0xff]   ;;  %v4162_v54 = vrot.slane %v4161_v17, 4  ;;  %v3328_v55 = vor.u32 %v3327_v26, %v3324_v18  ;;  %v9281_v1 = vrot.slane %v3685_v43, 9  ;;  %v3799_v63 = vrot.slane %v3686_v23, 5  ;;  %v4816_v37 = vld [vmem:[#allocation3 + $0x114] sm:$0xff] }
 0x329   : > { %v4026_v4 = vld [vmem:[#allocation2 + $0x58] sm:$0xf]  ;;  %v3964_v34 = vld [vmem:[#allocation2 + $0x84] sm:$0xf]  ;;  %6782 = vmatmul.mubr.bf16.gmra.mxu0 %v9333_v21  ;;  %v10610_v28 = vld [vmem:[#allocation3 + $0xf4] ss:$36 sps:$4 sm:$0xff]   ;;  %v3338_v42 = vor.u32 %v3337_v14, %v3333_v46  ;;  %6613 = vmatmul.mubr.bf16.gmra.mxu1 %v10603_v2 }
 0x32a   : > { %v4172_v30 = vrot.slane %v4171_v36, 4  ;;  %v4176_v47 = vrot.slane %v4174_v59, 5  ;;  %v4179_v61 = vshrl.u32 %v4025_v45, 16  ;;  %3996 = vst [vmem:[#allocation3 + $0x2a0] sm:$0xf] %v3964_v34  ;;  %v12604_v19 = vrot.slane %v4611_v41, 4  ;;  %6789 = vmatprep.mubr.bf16.mxu0 %v10610_v28  ;;  %6620 = vmatprep.mubr.bf16.mxu1 %v10606_v39 }
 0x32b   : > { %v4167_v35 = vsel %vm12300_vm6, %v4162_v54, %v4166_v16  ;;  %v3329_v32 = vrot.slane %v3328_v55, 4  ;;  %v3800_v58 = vsel %vm12249_vm15, %v9281_v1, %v3799_v63  ;;  %v12610_v15 = vld [vmem:[#allocation2 + $0x5c] sm:$0x1]  ;;  %v3965_v12 = vld [vmem:[#allocation2 + $0x88] sm:$0xf]  ;;  %v3339_v11 = vrot.slane %v3338_v42, 4  ;;  %10307 = vmatpush3.bf16.msra.mxu1 %v10620_v51 }
 0x32c   : > { %v4177_v44 = vsel %vm12300_vm6, %v4172_v30, %v4176_v47  ;;  %4482 = vst [vmem:[#allocation3 + $0x13c] sm:$0xf] %v4167_v35  ;;  %v3343_v13 = vrot.slane %v3341_v33, 5  ;;  %v3802_v49 = vrot.slane %v3687_v48, 5  ;;  %3921 = vst [vmem:[#allocation3 + $0x134] sm:$0xf] %v3800_v58  ;;  %10308 = vmatprep.subr.bf16.mxu1 %v10633_v7  ;;  %v4612_v35 = vsel %vm12249_vm15, %v9294_v9, %v4611_v41 }
 0x32d   : > { %v3192_v0 = vld [vmem:[#allocation2 + $0x48] sm:$0xf]  ;;  %3997 = vst [vmem:[#allocation3 + $0x2c4] sm:$0xf] %v3965_v12  ;;  %4483 = vst [vmem:[#allocation3 + $0x160] sm:$0xf] %v4177_v44  ;;  %v3334_v3 = vsel %vm12300_vm6, %v3329_v32, %v3333_v46 }
 0x32e   : > { %v4811_v38 = vld [vmem:[#allocation3 + $0xf0] sm:$0xff]  ;;  %v3801_v62 = vrot.slane %v3799_v63, 4  ;;  %v4181_v57 = vrot.slane %v4179_v61, 4  ;;  %v4182_v40 = vshll.u32 %v4025_v45, 16  ;;  %v3344_v5 = vsel %vm12300_vm6, %v3339_v11, %v3343_v13  ;;  %3649 = vst [vmem:[#allocation3 + $0x130] sm:$0xf] %v3334_v3 }
 0x32f   : > { %v3193_v52 = vld [vmem:[#allocation2 + $0x4c] sm:$0xf]  ;;  %v9342_v43 = vcombine.low %v4811_v38, %v4816_v37  ;;  %v4188_v22 = vshll.u32 %v4026_v4, 16  ;;  %v4192_v53 = vshrl.u32 %v4026_v4, 16  ;;  %v10646_v29 = vld [vmem:[#allocation9 + $0x218] sm:$0xff]   ;;  %v3346_v50 = vshrl.u32 %v3192_v0, 16  ;;  %10309 = vmatpush3.bf16.msra.mxu1 %v10633_v7 }
 0x330   : > { %3650 = vst [vmem:[#allocation3 + $0x154] sm:$0xf] %v3344_v5  ;;  %v3803_v8 = vsel %vm12249_vm15, %v3801_v62, %v3802_v49  ;;  %v4184_v6 = vrot.slane %v4182_v40, 5  ;;  %v3194_v16 = vld [vmem:[#allocation2 + $0x50] sm:$0x1]  ;;  %v3349_v59 = vshll.u32 %v3192_v0, 16  ;;  %10310 = vmatprep.subr.bf16.mxu1 %v10646_v29 }
 0x331   : > { %v12620_v25 = vld [vmem:[#allocation2 + $0x2c] sm:$0x1]  ;;  %3922 = vst [vmem:[#allocation3 + $0x158] sm:$0xf] %v3803_v8  ;;  %v4190_v51 = vrot.slane %v4188_v22, 5  ;;  %v4194_v23 = vrot.slane %v4192_v53, 4  ;;  %6790 = vmatmul.mubr.bf16.gmra.mxu0 %v9342_v43 }
 0x332   : > { %v4198_v56 = vshll.u32 %v12610_v15, 16  ;;  %v3355_v17 = vshll.u32 %v3193_v52, 16  ;;  %v3689_v18 = vld [vmem:[#allocation2 + $0x4c] sm:$0xf]  ;;  %v4185_v26 = vor.u32 %v4184_v6, %v4181_v57  ;;  %v3348_v46 = vrot.slane %v3346_v50, 4  ;;  %v10673_v11 = vld [vmem:[#allocation9 + $0x208] sm:$0xff]  }
 0x333   : > { %v3351_v45 = vrot.slane %v3349_v59, 5  ;;  %v3359_v2 = vshrl.u32 %v3193_v52, 16  ;;  %v3688_v21 = vld [vmem:[#allocation2 + $0x48] sm:$0xe]  ;;  %v10609_v14 = vld [vmem:[#allocation3 + $0xa0] ss:$36 sps:$4 sm:$0xff]   ;;  %v4195_v33 = vor.u32 %v4194_v23, %v4190_v51  ;;  %10311 = vmatpush3.bf16.msra.mxu1 %v10646_v29 }
 0x334   : > { %v10659_v36 = vld [vmem:[#allocation9 + $0x210] sm:$0xff]   ;;  %v3357_v48 = vrot.slane %v3355_v17, 5  ;;  %v3365_v39 = vshll.u32 %v3194_v16, 16  ;;  %v3690_v54 = vld [vmem:[#allocation2 + $0x50] sm:$0x1]  ;;  %v4186_v1 = vrot.slane %v4185_v26, 4  ;;  %6621 = vmatmul.mubr.bf16.gmra.mxu1 %v10609_v14 }
 0x335   : > { %v10612_v55 = vld [vmem:[#allocation3 + $0xec] ss:$36 sps:$4 sm:$0xff]   ;;  %v3352_v63 = vor.u32 %v3351_v45, %v3348_v46  ;;  %v3361_v4 = vrot.slane %v3359_v2, 4  ;;  %v3806_v34 = vrot.slane %v3689_v18, 5  ;;  %v4028_v28 = vld [vmem:[#allocation2 + $0x60] sm:$0xf]  ;;  %10312 = vmatprep.subr.bf16.mxu1 %v10659_v36 }
 0x336   : > { %v4029_v30 = vld [vmem:[#allocation2 + $0x64] sm:$0xf]  ;;  %v10617_v47 = vld [vmem:[#allocation3 + $0x13c] ss:$36 sps:$4 sm:$0xff]   ;;  %v4196_v42 = vrot.slane %v4195_v33, 4  ;;  %v4200_v61 = vrot.slane %v4198_v56, 5  ;;  %6628 = vmatprep.mubr.bf16.mxu1 %v10612_v55  ;;  %v4191_v58 = vsel %vm12300_vm6, %v4186_v1, %v4190_v51 }
 0x337   : > { %v9282_v7 = vrot.slane %v3688_v21, 9  ;;  %v12623_v37 = vld [vmem:[#allocation2 + $0x68] sm:$0x1]  ;;  %v4614_v32 = vrot.slane %v12620_v25, 5  ;;  %v3353_v15 = vrot.slane %v3352_v63, 4  ;;  %v3362_v12 = vor.u32 %v3361_v4, %v3357_v48  ;;  %6797 = vmatprep.mubr.bf16.mxu0 %v10617_v47  ;;  %10313 = vmatpush3.bf16.msra.mxu1 %v10659_v36 }
 0x338   : > { %v3195_v44 = vld [vmem:[#allocation2 + $0x54] sm:$0xf]  ;;  %4748 = vst [vmem:[#allocation3 + $0x68] sm:$0xf] %v4612_v35  ;;  %v4201_v10 = vsel %vm12300_vm6, %v4196_v42, %v4200_v61  ;;  %4484 = vst [vmem:[#allocation3 + $0x184] sm:$0xf] %v4191_v58  ;;  %10314 = vmatprep.subr.bf16.mxu1 %v10673_v11 }
 0x339   : > { %v3807_v31 = vsel %vm12249_vm15, %v9282_v7, %v3806_v34  ;;  %v3808_v9 = vrot.slane %v3806_v34, 4  ;;  %v3809_v41 = vrot.slane %v3690_v54, 5  ;;  %v3966_v13 = vld [vmem:[#allocation2 + $0x90] sm:$0xf]  ;;  %v3967_v49 = vld [vmem:[#allocation2 + $0x94] sm:$0xf]  ;;  %v3358_v0 = vsel %vm12300_vm6, %v3353_v15, %v3357_v48 }
 0x33a   : > { %4485 = vst [vmem:[#allocation3 + $0x1a8] sm:$0xf] %v4201_v10  ;;  %v3363_v38 = vrot.slane %v3362_v12, 4  ;;  %v3367_v3 = vrot.slane %v3365_v39, 5  ;;  %3923 = vst [vmem:[#allocation3 + $0x17c] sm:$0xf] %v3807_v31  ;;  %v4615_v57 = vsel %vm12249_vm15, %v12604_v19, %v4614_v32 }
 0x33b   : > { %v3196_v62 = vld [vmem:[#allocation2 + $0x58] sm:$0xf]  ;;  %3998 = vst [vmem:[#allocation3 + $0x2e8] sm:$0xf] %v3966_v13  ;;  %3999 = vst [vmem:[#allocation3 + $0x30c] sm:$0xf] %v3967_v49  ;;  %v3810_v52 = vsel %vm12249_vm15, %v3808_v9, %v3809_v41  ;;  %10315 = vmatpush3.bf16.msra.mxu1 %v10673_v11 }
 0x33c   : > { %v10615_v40 = vld [vmem:[#allocation3 + $0x138] ss:$36 sps:$4 sm:$0xff]   ;;  %3651 = vst [vmem:[#allocation3 + $0x178] sm:$0xf] %v3358_v0  ;;  %v4203_v43 = vshrl.u32 %v4028_v28, 16  ;;  %v4206_v5 = vshll.u32 %v4028_v28, 16  ;;  %v3368_v29 = vsel %vm12300_vm6, %v3363_v38, %v3367_v3 }
 0x33d   : > { %v4212_v22 = vshll.u32 %v4029_v30, 16  ;;  %v3691_v53 = vld [vmem:[#allocation2 + $0x54] sm:$0xe]  ;;  %4749 = vst [vmem:[#allocation3 + $0x8c] sm:$0xf] %v4615_v57  ;;  %v4216_v8 = vshrl.u32 %v4029_v30, 16  ;;  %6798 = vmatmul.mubr.bf16.gmra.mxu0 %v10615_v40 }
 0x33e   : > { %3924 = vst [vmem:[#allocation3 + $0x1a0] sm:$0xf] %v3810_v52  ;;  %v4222_v6 = vshll.u32 %v12623_v37, 16  ;;  %v3370_v16 = vshrl.u32 %v3195_v44, 16  ;;  %v3692_v50 = vld [vmem:[#allocation2 + $0x58] sm:$0xf] }
 0x33f   : > { %v10686_v19 = vld [vmem:[#allocation9 + $0x200] sm:$0xff]   ;;  %v10614_v59 = vld [vmem:[#allocation3 + $0xe8] ss:$36 sps:$4 sm:$0xff]   ;;  %3652 = vst [vmem:[#allocation3 + $0x19c] sm:$0xf] %v3368_v29  ;;  %v4205_v25 = vrot.slane %v4203_v43, 4 }
 0x340   : > { %v4208_v51 = vrot.slane %v4206_v5, 5  ;;  %v4214_v23 = vrot.slane %v4212_v22, 5  ;;  %v3197_v56 = vld [vmem:[#allocation2 + $0x5c] sm:$0x1]  ;;  %v3373_v17 = vshll.u32 %v3195_v44, 16  ;;  %v4218_v26 = vrot.slane %v4216_v8, 4  ;;  %6629 = vmatmul.mubr.bf16.gmra.mxu1 %v10614_v59  ;;  %10316 = vmatprep.subr.bf16.mxu1 %v10686_v19 }
 0x341   : > { %v10618_v18 = vld [vmem:[#allocation3 + $0x134] ss:$36 sps:$4 sm:$0xff]   ;;  %v3372_v46 = vrot.slane %v3370_v16, 4  ;;  %v3379_v45 = vshll.u32 %v3196_v62, 16  ;;  %v3383_v14 = vshrl.u32 %v3196_v62, 16  ;;  %v9283_v54 = vrot.slane %v3691_v53, 9  ;;  %10317 = vmatpush3.bf16.msra.mxu1 %v10686_v19 }
 0x342   : > { %v4209_v2 = vor.u32 %v4208_v51, %v4205_v25  ;;  %v3375_v21 = vrot.slane %v3373_v17, 5  ;;  %v3693_v33 = vld [vmem:[#allocation2 + $0x5c] sm:$0x1]  ;;  %v4031_v36 = vld [vmem:[#allocation2 + $0x6c] sm:$0xf]  ;;  %6636 = vmatprep.mubr.bf16.mxu1 %v10618_v18  ;;  %v4219_v48 = vor.u32 %v4218_v26, %v4214_v23  ;;  %v3813_v55 = vrot.slane %v3692_v50, 5 }
 0x343   : > { %v3381_v39 = vrot.slane %v3379_v45, 5  ;;  %v4032_v1 = vld [vmem:[#allocation2 + $0x70] sm:$0xf]  ;;  %v10624_v63 = vld [vmem:[#allocation3 + $0x184] ss:$36 sps:$4 sm:$0xff]   ;;  %v4224_v34 = vrot.slane %v4222_v6, 5 }
 0x344   : > { %v4210_v4 = vrot.slane %v4209_v2, 4  ;;  %v3376_v28 = vor.u32 %v3375_v21, %v3372_v46  ;;  %v4220_v30 = vrot.slane %v4219_v48, 4  ;;  %v3385_v47 = vrot.slane %v3383_v14, 4  ;;  %v3198_v7 = vld [vmem:[#allocation2 + $0x60] sm:$0xf]  ;;  %6805 = vmatprep.mubr.bf16.mxu0 %v10624_v63 }
 0x345   : > { %v3389_v42 = vshll.u32 %v3197_v56, 16  ;;  %v3814_v61 = vsel %vm12249_vm15, %v9283_v54, %v3813_v55  ;;  %v10622_v37 = vld [vmem:[#allocation3 + $0x180] ss:$36 sps:$4 sm:$0xff]   ;;  %v3815_v58 = vrot.slane %v3813_v55, 4  ;;  %v3816_v15 = vrot.slane %v3693_v33, 5 }
 0x346   : > { %v4215_v35 = vsel %vm12300_vm6, %v4210_v4, %v4214_v23  ;;  %v3377_v32 = vrot.slane %v3376_v28, 4  ;;  %3925 = vst [vmem:[#allocation3 + $0x1c4] sm:$0xf] %v3814_v61  ;;  %v4033_v12 = vld [vmem:[#allocation2 + $0x74] sm:$0x1]  ;;  %v4225_v11 = vsel %vm12300_vm6, %v4220_v30, %v4224_v34  ;;  %v3386_v10 = vor.u32 %v3385_v47, %v3381_v39  ;;  %6806 = vmatmul.mubr.bf16.gmra.mxu0 %v10622_v37 }
 0x347   : > { %v10621_v44 = vld [vmem:[#allocation3 + $0x130] ss:$36 sps:$4 sm:$0xff]   ;;  %4486 = vst [vmem:[#allocation3 + $0x1cc] sm:$0xf] %v4215_v35  ;;  %v4227_v31 = vshrl.u32 %v4031_v36, 16  ;;  %v3817_v49 = vsel %vm12249_vm15, %v3815_v58, %v3816_v15  ;;  %v4230_v0 = vshll.u32 %v4031_v36, 16 }
 0x348   : > { %v3199_v9 = vld [vmem:[#allocation2 + $0x64] sm:$0xf]  ;;  %v10625_v41 = vld [vmem:[#allocation3 + $0x17c] ss:$36 sps:$4 sm:$0xff]   ;;  %4487 = vst [vmem:[#allocation3 + $0x1f0] sm:$0xf] %v4225_v11  ;;  %v3382_v13 = vsel %vm12300_vm6, %v3377_v32, %v3381_v39  ;;  %6637 = vmatmul.mubr.bf16.gmra.mxu1 %v10621_v44 }
 0x349   : > { %v4236_v38 = vshll.u32 %v4032_v1, 16  ;;  %v3968_v3 = vld [vmem:[#allocation2 + $0x9c] sm:$0xf]  ;;  %v3387_v62 = vrot.slane %v3386_v10, 4  ;;  %v3391_v57 = vrot.slane %v3389_v42, 5  ;;  %v4229_v40 = vrot.slane %v4227_v31, 4  ;;  %6644 = vmatprep.mubr.bf16.mxu1 %v10625_v41 }
 0x34a   : > { %3653 = vst [vmem:[#allocation3 + $0x1c0] sm:$0xf] %v3382_v13  ;;  %3926 = vst [vmem:[#allocation3 + $0x1e8] sm:$0xf] %v3817_v49  ;;  %v4240_v52 = vshrl.u32 %v4032_v1, 16  ;;  %v4232_v5 = vrot.slane %v4230_v0, 5 }
 0x34b   : > { %v3969_v43 = vld [vmem:[#allocation2 + $0xa0] sm:$0xf]  ;;  %4000 = vst [vmem:[#allocation3 + $0x330] sm:$0xf] %v3968_v3  ;;  %v4238_v22 = vrot.slane %v4236_v38, 5  ;;  %v3394_v29 = vshrl.u32 %v3198_v7, 16  ;;  %v3392_v6 = vsel %vm12300_vm6, %v3387_v62, %v3391_v57 }
 0x34c   : > { %v3200_v53 = vld [vmem:[#allocation2 + $0x68] sm:$0x1]  ;;  %v3397_v8 = vshll.u32 %v3198_v7, 16  ;;  %4001 = vst [vmem:[#allocation3 + $0x354] sm:$0xf] %v3969_v43  ;;  %v4242_v16 = vrot.slane %v4240_v52, 4  ;;  %v4233_v25 = vor.u32 %v4232_v5, %v4229_v40 }
 0x34d   : > { %v4246_v50 = vshll.u32 %v4033_v12, 16  ;;  %v3403_v19 = vshll.u32 %v3199_v9, 16  ;;  %v3695_v59 = vld [vmem:[#allocation2 + $0x64] sm:$0xf]  ;;  %3654 = vst [vmem:[#allocation3 + $0x1e4] sm:$0xf] %v3392_v6 }
 0x34e   : > { %v3396_v51 = vrot.slane %v3394_v29, 4  ;;  %v3399_v23 = vrot.slane %v3397_v8, 5  ;;  %v3407_v56 = vshrl.u32 %v3199_v9, 16  ;;  %v3694_v17 = vld [vmem:[#allocation2 + $0x60] sm:$0xe]  ;;  %v4243_v18 = vor.u32 %v4242_v16, %v4238_v22 }
 0x34f   : > { %v3405_v26 = vrot.slane %v3403_v19, 5  ;;  %v3413_v46 = vshll.u32 %v3200_v53, 16  ;;  %v3696_v45 = vld [vmem:[#allocation2 + $0x68] sm:$0x1]  ;;  %v4034_v2 = vld [vmem:[#allocation2 + $0x78] sm:$0xf] }
 0x350   : > { %v10627_v21 = vld [vmem:[#allocation3 + $0x178] ss:$36 sps:$4 sm:$0xff]   ;;  %v4234_v14 = vrot.slane %v4233_v25, 4  ;;  %v3400_v33 = vor.u32 %v3399_v23, %v3396_v51  ;;  %v3409_v36 = vrot.slane %v3407_v56, 4  ;;  %v3820_v48 = vrot.slane %v3695_v59, 5 }
 0x351   : > { %v4035_v39 = vld [vmem:[#allocation2 + $0x7c] sm:$0xf]  ;;  %v10630_v54 = vld [vmem:[#allocation3 + $0x1cc] ss:$36 sps:$4 sm:$0xff]   ;;  %v4244_v55 = vrot.slane %v4243_v18, 4  ;;  %v4248_v1 = vrot.slane %v4246_v50, 5  ;;  %6645 = vmatmul.mubr.bf16.gmra.mxu1 %v10627_v21 }
 0x352   : > { %v9284_v63 = vrot.slane %v3694_v17, 9  ;;  %v10628_v4 = vld [vmem:[#allocation3 + $0x1c8] ss:$36 sps:$4 sm:$0xff]   ;;  %v4239_v34 = vsel %vm12300_vm6, %v4234_v14, %v4238_v22  ;;  %v3401_v28 = vrot.slane %v3400_v33, 4  ;;  %v3410_v30 = vor.u32 %v3409_v36, %v3405_v26  ;;  %6813 = vmatprep.mubr.bf16.mxu0 %v10630_v54  ;;  %v3201_v32 = vld [vmem:[#allocation2 + $0x6c] sm:$0xf] }
 0x353   : > { %v3415_v47 = vrot.slane %v3413_v46, 5  ;;  %v4249_v42 = vsel %vm12300_vm6, %v4244_v55, %v4248_v1  ;;  %4488 = vst [vmem:[#allocation3 + $0x214] sm:$0xf] %v4239_v34  ;;  %v3822_v7 = vrot.slane %v3820_v48, 4  ;;  %v3823_v37 = vrot.slane %v3696_v45, 5  ;;  %6814 = vmatmul.mubr.bf16.gmra.mxu0 %v10628_v4 }
 0x354   : > { %v3821_v61 = vsel %vm12249_vm15, %v9284_v63, %v3820_v48  ;;  %v4036_v35 = vld [vmem:[#allocation2 + $0x80] sm:$0x1]  ;;  %4489 = vst [vmem:[#allocation3 + $0x238] sm:$0xf] %v4249_v42  ;;  %v3406_v58 = vsel %vm12300_vm6, %v3401_v28, %v3405_v26  ;;  %v3411_v15 = vrot.slane %v3410_v30, 4  ;;  %v4251_v12 = vshrl.u32 %v4034_v2, 16 }
 0x355   : > { %3927 = vst [vmem:[#allocation3 + $0x20c] sm:$0xf] %v3821_v61  ;;  %v4254_v44 = vshll.u32 %v4034_v2, 16  ;;  %v3202_v11 = vld [vmem:[#allocation2 + $0x70] sm:$0xf]  ;;  %v3824_v31 = vsel %vm12249_vm15, %v3822_v7, %v3823_v37  ;;  %v4260_v9 = vshll.u32 %v4035_v39, 16 }
 0x356   : > { %v10631_v10 = vld [vmem:[#allocation3 + $0x1c4] ss:$36 sps:$4 sm:$0xff]   ;;  %3655 = vst [vmem:[#allocation3 + $0x208] sm:$0xf] %v3406_v58  ;;  %v3203_v41 = vld [vmem:[#allocation2 + $0x74] sm:$0x1]  ;;  %v3416_v13 = vsel %vm12300_vm6, %v3411_v15, %v3415_v47  ;;  %v9798_v58 = vpop.f32.mrf.mxu1 }
 0x357   : > { %3928 = vst [vmem:[#allocation3 + $0x230] sm:$0xf] %v3824_v31  ;;  %v4253_v49 = vrot.slane %v4251_v12, 4  ;;  %v4256_v0 = vrot.slane %v4254_v44, 5  ;;  %v4264_v38 = vshrl.u32 %v4035_v39, 16  ;;  %6652 = vmatprep.mubr.bf16.mxu1 %v10631_v10  ;;  %v4262_v62 = vrot.slane %v4260_v9, 5  ;;  %v9910_v9 = vpop.f32.mrf.mxu0 }
 0x358   : > { %v3970_v3 = vld [vmem:[#allocation2 + $0xa8] sm:$0xf]  ;;  %3656 = vst [vmem:[#allocation3 + $0x22c] sm:$0xf] %v3416_v13  ;;  %v4270_v57 = vshll.u32 %v4036_v35, 16  ;;  %v3418_v40 = vshrl.u32 %v3201_v32, 16 }
 0x359   : > { %v3421_v52 = vshll.u32 %v3201_v32, 16  ;;  %v3971_v43 = vld [vmem:[#allocation2 + $0xac] sm:$0xf]  ;;  %4002 = vst [vmem:[#allocation3 + $0x378] sm:$0xf] %v3970_v3  ;;  %v4257_v5 = vor.u32 %v4256_v0, %v4253_v49  ;;  %v4266_v22 = vrot.slane %v4264_v38, 4  ;;  %v9799_v0 = vpop.f32.mrf.mxu1 }
 0x35a   : > { %v3427_v53 = vshll.u32 %v3202_v11, 16  ;;  %v3431_v29 = vshrl.u32 %v3202_v11, 16  ;;  %v3697_v8 = vld [vmem:[#allocation2 + $0x6c] sm:$0xe]  ;;  %v3698_v6 = vld [vmem:[#allocation2 + $0x70] sm:$0xf] }
 0x35b   : > { %4003 = vst [vmem:[#allocation3 + $0x39c] sm:$0xf] %v3971_v43  ;;  %v3420_v16 = vrot.slane %v3418_v40, 4  ;;  %v3423_v50 = vrot.slane %v3421_v52, 5  ;;  %v3437_v19 = vshll.u32 %v3203_v41, 16  ;;  %v4258_v23 = vrot.slane %v4257_v5, 4  ;;  %v9911_v43 = vpop.f32.mrf.mxu0 }
 0x35c   : > { %v3699_v59 = vld [vmem:[#allocation2 + $0x74] sm:$0x1]  ;;  %v4037_v25 = vld [vmem:[#allocation2 + $0x84] sm:$0xf]  ;;  %v10634_v51 = vld [vmem:[#allocation3 + $0x1c0] ss:$36 sps:$4 sm:$0xff]   ;;  %v4267_v56 = vor.u32 %v4266_v22, %v4262_v62  ;;  %v9800_v52 = vadd.f32 %v9799_v0, %v9798_v58 }
 0x35d   : > { %v3429_v17 = vrot.slane %v3427_v53, 5  ;;  %v3433_v18 = vrot.slane %v3431_v29, 4  ;;  %v10637_v26 = vld [vmem:[#allocation3 + $0x214] ss:$36 sps:$4 sm:$0xff]   ;;  %v3424_v46 = vor.u32 %v3423_v50, %v3420_v16  ;;  %v4038_v45 = vld [vmem:[#allocation2 + $0x88] sm:$0xf]  ;;  %6653 = vmatmul.mubr.bf16.gmra.mxu1 %v10634_v51  ;;  %v4263_v21 = vsel %vm12300_vm6, %v4258_v23, %v4262_v62 }
 0x35e   : > { %v10635_v2 = vld [vmem:[#allocation3 + $0x210] ss:$36 sps:$4 sm:$0xff]   ;;  %v4268_v14 = vrot.slane %v4267_v56, 4  ;;  %v4272_v33 = vrot.slane %v4270_v57, 5  ;;  %6821 = vmatprep.mubr.bf16.mxu0 %v10637_v26  ;;  %4490 = vst [vmem:[#allocation3 + $0x25c] sm:$0xf] %v4263_v21  ;;  %v9912_v50 = vadd.f32 %v9911_v43, %v9910_v9 }
 0x35f   : > { %v3434_v36 = vor.u32 %v3433_v18, %v3429_v17  ;;  %v12674_v48 = vld [vmem:[#allocation2 + $0x8c] sm:$0x1]  ;;  %v3425_v39 = vrot.slane %v3424_v46, 4  ;;  %v9285_v54 = vrot.slane %v3697_v8, 9  ;;  %v3827_v55 = vrot.slane %v3698_v6, 5  ;;  %6822 = vmatmul.mubr.bf16.gmra.mxu0 %v10635_v2  ;;  %v9801_v8 = vpop.f32.mrf.mxu1 }
 0x360   : > { %v4275_v1 = vshrl.u32 %v4037_v25, 16  ;;  %v3204_v63 = vld [vmem:[#allocation2 + $0x78] sm:$0xf]  ;;  %v10638_v4 = vld [vmem:[#allocation3 + $0x20c] ss:$36 sps:$4 sm:$0xff]   ;;  %v4273_v34 = vsel %vm12300_vm6, %v4268_v14, %v4272_v33  ;;  %v3439_v30 = vrot.slane %v3437_v19, 5  ;;  %v12687_v21 = vadd.f32 %v9912_v50, %v9800_v52 }
 0x361   : > { %v3435_v28 = vrot.slane %v3434_v36, 4  ;;  %v3830_v47 = vrot.slane %v3699_v59, 5  ;;  %4491 = vst [vmem:[#allocation3 + $0x280] sm:$0xf] %v4273_v34  ;;  %v3430_v42 = vsel %vm12300_vm6, %v3425_v39, %v3429_v17  ;;  %v3828_v61 = vsel %vm12249_vm15, %v9285_v54, %v3827_v55  ;;  %v3205_v35 = vld [vmem:[#allocation2 + $0x7c] sm:$0xf]  ;;  %6660 = vmatprep.mubr.bf16.mxu1 %v10638_v4  ;;  %v9913_v17 = vpop.f32.mrf.mxu0  ;;  %v9802_v46 = vpop.f32.mrf.mxu1 }
 0x362   : > { %v3829_v7 = vrot.slane %v3827_v55, 4  ;;  %v4277_v37 = vrot.slane %v4275_v1, 4  ;;  %3657 = vst [vmem:[#allocation3 + $0x250] sm:$0xf] %v3430_v42  ;;  %3929 = vst [vmem:[#allocation3 + $0x254] sm:$0xf] %v3828_v61 }
 0x363   : > { %v3440_v32 = vsel %vm12300_vm6, %v3435_v28, %v3439_v30  ;;  %v4278_v15 = vshll.u32 %v4037_v25, 16  ;;  %v4284_v12 = vshll.u32 %v4038_v45, 16  ;;  %v4288_v44 = vshrl.u32 %v4038_v45, 16  ;;  %v3206_v11 = vld [vmem:[#allocation2 + $0x80] sm:$0x1]  ;;  %v9914_v1 = vpop.f32.mrf.mxu0  ;;  %v9804_v52 = vpop.f32.mrf.mxu1 }
 0x364   : > { %v10640_v10 = vld [vmem:[#allocation3 + $0x208] ss:$36 sps:$4 sm:$0xff]   ;;  %3658 = vst [vmem:[#allocation3 + $0x274] sm:$0xf] %v3440_v32  ;;  %v3831_v31 = vsel %vm12249_vm15, %v3829_v7, %v3830_v47  ;;  %v4294_v41 = vshll.u32 %v12674_v48, 16  ;;  %v3442_v13 = vshrl.u32 %v3204_v63, 16  ;;  %v9803_v48 = vadd.f32 %v9802_v46, %v9801_v8 }
 0x365   : > { %v3445_v49 = vshll.u32 %v3204_v63, 16  ;;  %3930 = vst [vmem:[#allocation3 + $0x278] sm:$0xf] %v3831_v31  ;;  %v4280_v38 = vrot.slane %v4278_v15, 5  ;;  %v4286_v3 = vrot.slane %v4284_v12, 5  ;;  %v4290_v62 = vrot.slane %v4288_v44, 4  ;;  %6661 = vmatmul.mubr.bf16.gmra.mxu1 %v10640_v10 }
 0x366   : > { %v3451_v57 = vshll.u32 %v3205_v35, 16  ;;  %v3972_v40 = vld [vmem:[#allocation2 + $0xb4] sm:$0xf]  ;;  %v3444_v5 = vrot.slane %v3442_v13, 4  ;;  %v3700_v53 = vld [vmem:[#allocation2 + $0x78] sm:$0xe] }
 0x367   : > { %v3447_v22 = vrot.slane %v3445_v49, 5  ;;  %v3973_v29 = vld [vmem:[#allocation2 + $0xb8] sm:$0xf]  ;;  %4004 = vst [vmem:[#allocation3 + $0x3c0] sm:$0xf] %v3972_v40  ;;  %v4281_v6 = vor.u32 %v4280_v38, %v4277_v37  ;;  %v4291_v16 = vor.u32 %v4290_v62, %v4286_v3  ;;  %v3455_v23 = vshrl.u32 %v3205_v35, 16  ;;  %v9916_v35 = vpop.f32.mrf.mxu0 }
 0x368   : > { %v3701_v19 = vld [vmem:[#allocation2 + $0x7c] sm:$0xf]  ;;  %v3702_v59 = vld [vmem:[#allocation2 + $0x80] sm:$0x1]  ;;  %4005 = vst [vmem:[#allocation3 + $0x3e4] sm:$0xf] %v3973_v29  ;;  %v9915_v37 = vadd.f32 %v9914_v1, %v9913_v17  ;;  %v9805_v17 = vpop.f32.mrf.mxu1 }
 0x369   : > { %v3448_v25 = vor.u32 %v3447_v22, %v3444_v5  ;;  %v3453_v51 = vrot.slane %v3451_v57, 5  ;;  %v3461_v56 = vshll.u32 %v3206_v11, 16  ;;  %v4040_v18 = vld [vmem:[#allocation2 + $0x90] sm:$0xf]  ;;  %v10643_v26 = vld [vmem:[#allocation3 + $0x25c] ss:$36 sps:$4 sm:$0xff]   ;;  %v9917_v13 = vpop.f32.mrf.mxu0 }
 0x36a   : > { %v4282_v45 = vrot.slane %v4281_v6, 4  ;;  %v4296_v2 = vrot.slane %v4294_v41, 5  ;;  %v9286_v14 = vrot.slane %v3700_v53, 9  ;;  %v4041_v33 = vld [vmem:[#allocation2 + $0x94] sm:$0xf]  ;;  %v4292_v39 = vrot.slane %v4291_v16, 4  ;;  %6829 = vmatprep.mubr.bf16.mxu0 %v10643_v26 }
 0x36b   : > { %v10641_v36 = vld [vmem:[#allocation3 + $0x258] ss:$36 sps:$4 sm:$0xff]   ;;  %v3449_v54 = vrot.slane %v3448_v25, 4  ;;  %v3457_v55 = vrot.slane %v3455_v23, 4  ;;  %v3463_v4 = vrot.slane %v3461_v56, 5  ;;  %v3834_v34 = vrot.slane %v3701_v19, 5  ;;  %v9919_v53 = vpop.f32.mrf.mxu0 }
 0x36c   : > { %v4287_v63 = vsel %vm12300_vm6, %v4282_v45, %v4286_v3  ;;  %v3837_v28 = vrot.slane %v3702_v59, 5  ;;  %v4042_v30 = vld [vmem:[#allocation2 + $0x98] sm:$0x1]  ;;  %v10644_v47 = vld [vmem:[#allocation3 + $0x254] ss:$36 sps:$4 sm:$0xff]   ;;  %6830 = vmatmul.mubr.bf16.gmra.mxu0 %v10641_v36  ;;  %v4297_v42 = vsel %vm12300_vm6, %v4292_v39, %v4296_v2  ;;  %v4299_v44 = vshrl.u32 %v4040_v18, 16  ;;  %v9807_v39 = vpop.f32.mrf.mxu1 }
 0x36d   : > { %4492 = vst [vmem:[#allocation3 + $0x2a4] sm:$0xf] %v4287_v63  ;;  %v3454_v61 = vsel %vm12300_vm6, %v3449_v54, %v3453_v51  ;;  %v3458_v7 = vor.u32 %v3457_v55, %v3453_v51  ;;  %v3207_v32 = vld [vmem:[#allocation2 + $0x84] sm:$0xf]  ;;  %v10647_v58 = vld [vmem:[#allocation3 + $0x250] ss:$36 sps:$4 sm:$0xff]   ;;  %v3835_v15 = vsel %vm12249_vm15, %v9286_v14, %v3834_v34  ;;  %6668 = vmatprep.mubr.bf16.mxu1 %v10644_v47 }
 0x36e   : > { %4493 = vst [vmem:[#allocation3 + $0x2c8] sm:$0xf] %v4297_v42  ;;  %3659 = vst [vmem:[#allocation3 + $0x298] sm:$0xf] %v3454_v61  ;;  %v3836_v12 = vrot.slane %v3834_v34, 4  ;;  %v4302_v11 = vshll.u32 %v4040_v18, 16  ;;  %v12697_v31 = vadd.f32 %v9915_v37, %v9803_v48  ;;  %6669 = vmatmul.mubr.bf16.gmra.mxu1 %v10647_v58  ;;  %v9918_v22 = vadd.f32 %v9917_v13, %v9916_v35  ;;  %v9920_v18 = vpop.f32.mrf.mxu0  ;;  %v9808_v37 = vpop.f32.mrf.mxu1 }
 0x36f   : > { %v3459_v10 = vrot.slane %v3458_v7, 4  ;;  %3931 = vst [vmem:[#allocation3 + $0x29c] sm:$0xf] %v3835_v15  ;;  %v4308_v9 = vshll.u32 %v4041_v33, 16  ;;  %v4312_v41 = vshrl.u32 %v4041_v33, 16  ;;  %v4301_v38 = vrot.slane %v4299_v44, 4 }
 0x370   : > { %v3208_v49 = vld [vmem:[#allocation2 + $0x88] sm:$0xf]  ;;  %v3838_v0 = vsel %vm12249_vm15, %v3836_v12, %v3837_v28  ;;  %v4304_v3 = vrot.slane %v4302_v11, 5  ;;  %v4318_v62 = vshll.u32 %v4042_v30, 16  ;;  %v3209_v57 = vld [vmem:[#allocation2 + $0x8c] sm:$0x1]  ;;  %v9806_v48 = vadd.f32 %v9805_v17, %v9804_v52  ;;  %v9922_v55 = vpop.f32.mrf.mxu0 }
 0x371   : > { %v3464_v40 = vsel %vm12300_vm6, %v3459_v10, %v3463_v4  ;;  %3932 = vst [vmem:[#allocation3 + $0x2c0] sm:$0xf] %v3838_v0  ;;  %v4310_v43 = vrot.slane %v4308_v9, 5  ;;  %v4314_v5 = vrot.slane %v4312_v41, 4  ;;  %v3974_v29 = vld [vmem:[#allocation2 + $0xc0] sm:$0xf]  ;;  %v9921_v54 = vadd.f32 %v9920_v18, %v9919_v53 }
 0x372   : > { %3660 = vst [vmem:[#allocation3 + $0x2bc] sm:$0xf] %v3464_v40  ;;  %v4305_v8 = vor.u32 %v4304_v3, %v4301_v38  ;;  %v3466_v6 = vshrl.u32 %v3207_v32, 16  ;;  %v3469_v16 = vshll.u32 %v3207_v32, 16  ;;  %v3703_v50 = vld [vmem:[#allocation2 + $0x84] sm:$0xe]  ;;  %v9923_v32 = vpop.f32.mrf.mxu0  ;;  %v12707_v12 = vadd.f32 %v9918_v22, %v9806_v48 }
 0x373   : > { %v3975_v19 = vld [vmem:[#allocation2 + $0xc4] sm:$0xf]  ;;  %4006 = vst [vmem:[#allocation3 + $0x408] sm:$0xf] %v3974_v29  ;;  %v4315_v59 = vor.u32 %v4314_v5, %v4310_v43  ;;  %v3475_v25 = vshll.u32 %v3208_v49, 16  ;;  %v3479_v51 = vshrl.u32 %v3208_v49, 16  ;;  %v9809_v44 = vadd.f32 %v9808_v37, %v9807_v39 }
 0x374   : > { %v3485_v23 = vshll.u32 %v3209_v57, 16  ;;  %v3704_v56 = vld [vmem:[#allocation2 + $0x88] sm:$0xf]  ;;  %4007 = vst [vmem:[#allocation3 + $0x42c] sm:$0xf] %v3975_v19  ;;  %v4306_v26 = vrot.slane %v4305_v8, 4  ;;  %v12711_v0 = vadd.f32 %v9923_v32, %v9922_v55  ;;  %v9925_v38 = vpop.f32.mrf.mxu0 }
 0x375   : > { %v3468_v46 = vrot.slane %v3466_v6, 4  ;;  %v3471_v45 = vrot.slane %v3469_v16, 5  ;;  %v3705_v2 = vld [vmem:[#allocation2 + $0x8c] sm:$0x1]  ;;  %v10650_v14 = vld [vmem:[#allocation3 + $0x2a4] ss:$36 sps:$4 sm:$0xff]   ;;  %v12715_v40 = vadd.f32 %v9921_v54, %v9809_v44 }
 0x376   : > { %v4316_v33 = vrot.slane %v4315_v59, 4  ;;  %v4320_v36 = vrot.slane %v4318_v62, 5  ;;  %v4043_v1 = vld [vmem:[#allocation2 + $0x9c] sm:$0xf]  ;;  %v4311_v4 = vsel %vm12300_vm6, %v4306_v26, %v4310_v43  ;;  %v3477_v28 = vrot.slane %v3475_v25, 5  ;;  %6837 = vmatprep.mubr.bf16.mxu0 %v10650_v14  ;;  %v9926_v6 = vpop.f32.mrf.mxu0 }
 0x377   : > { %v10648_v63 = vld [vmem:[#allocation3 + $0x2a0] ss:$36 sps:$4 sm:$0xff]   ;;  %v3472_v34 = vor.u32 %v3471_v45, %v3468_v46  ;;  %v3481_v30 = vrot.slane %v3479_v51, 4  ;;  %4494 = vst [vmem:[#allocation3 + $0x2ec] sm:$0xf] %v4311_v4  ;;  %v3487_v42 = vrot.slane %v3485_v23, 5  ;;  %v12721_v54 = vadd.f32 %v9926_v6, %v9925_v38 }
 0x378   : > { %v4321_v47 = vsel %vm12300_vm6, %v4316_v33, %v4320_v36  ;;  %v9287_v61 = vrot.slane %v3703_v50, 9  ;;  %v3841_v7 = vrot.slane %v3704_v56, 5  ;;  %v4044_v35 = vld [vmem:[#allocation2 + $0xa0] sm:$0xf]  ;;  %6838 = vmatmul.mubr.bf16.gmra.mxu0 %v10648_v63  ;;  %v4045_v11 = vld [vmem:[#allocation2 + $0xa4] sm:$0x1]  ;;  %v9928_v14 = vpop.f32.mrf.mxu0  ;;  %v9810_v63 = vpop.f32.mrf.mxu1 }
 0x379   : > { %4495 = vst [vmem:[#allocation3 + $0x310] sm:$0xf] %v4321_v47  ;;  %v3473_v58 = vrot.slane %v3472_v34, 4  ;;  %v3482_v15 = vor.u32 %v3481_v30, %v3477_v28  ;;  %v3210_v10 = vld [vmem:[#allocation2 + $0x90] sm:$0xf]  ;;  %v3844_v49 = vrot.slane %v3705_v2, 5 }
 0x37a   : > { %v10651_v9 = vld [vmem:[#allocation3 + $0x29c] ss:$36 sps:$4 sm:$0xff]   ;;  %v3842_v41 = vsel %vm12249_vm15, %v9287_v61, %v3841_v7  ;;  %v3843_v13 = vrot.slane %v3841_v7, 4  ;;  %v4323_v52 = vshrl.u32 %v4043_v1, 16  ;;  %v4326_v22 = vshll.u32 %v4043_v1, 16  ;;  %v9929_v47 = vpop.f32.mrf.mxu0 }
 0x37b   : > { %v10653_v3 = vld [vmem:[#allocation3 + $0x298] ss:$36 sps:$4 sm:$0xff]   ;;  %v3478_v62 = vsel %vm12300_vm6, %v3473_v58, %v3477_v28  ;;  %v3483_v57 = vrot.slane %v3482_v15, 4  ;;  %3933 = vst [vmem:[#allocation3 + $0x2e4] sm:$0xf] %v3842_v41  ;;  %6676 = vmatprep.mubr.bf16.mxu1 %v10651_v9  ;;  %v4332_v53 = vshll.u32 %v4044_v35, 16  ;;  %v9811_v15 = vpop.f32.mrf.mxu1 }
 0x37c   : > { %v3211_v43 = vld [vmem:[#allocation2 + $0x94] sm:$0xf]  ;;  %3661 = vst [vmem:[#allocation3 + $0x2e0] sm:$0xf] %v3478_v62  ;;  %v3845_v5 = vsel %vm12249_vm15, %v3843_v13, %v3844_v49  ;;  %v4336_v29 = vshrl.u32 %v4044_v35, 16  ;;  %6677 = vmatmul.mubr.bf16.gmra.mxu1 %v10653_v3  ;;  %v4325_v50 = vrot.slane %v4323_v52, 4 }
 0x37d   : > { %v3212_v8 = vld [vmem:[#allocation2 + $0x98] sm:$0x1]  ;;  %v3488_v16 = vsel %vm12300_vm6, %v3483_v57, %v3487_v42  ;;  %3934 = vst [vmem:[#allocation3 + $0x308] sm:$0xf] %v3845_v5  ;;  %v4342_v19 = vshll.u32 %v4045_v11, 16  ;;  %v3490_v59 = vshrl.u32 %v3210_v10, 16  ;;  %v9813_v5 = vpop.f32.mrf.mxu1 }
 0x37e   : > { %v3706_v25 = vld [vmem:[#allocation2 + $0x90] sm:$0xe]  ;;  %3662 = vst [vmem:[#allocation3 + $0x304] sm:$0xf] %v3488_v16  ;;  %v4328_v51 = vrot.slane %v4326_v22, 5  ;;  %v4334_v23 = vrot.slane %v4332_v53, 5  ;;  %v12731_v22 = vadd.f32 %v9929_v47, %v9928_v14 }
 0x37f   : > { %v4338_v56 = vrot.slane %v4336_v29, 4  ;;  %v3493_v17 = vshll.u32 %v3210_v10, 16  ;;  %v3707_v18 = vld [vmem:[#allocation2 + $0x94] sm:$0xf]  ;;  %v4344_v26 = vrot.slane %v4342_v19, 5  ;;  %v3492_v46 = vrot.slane %v3490_v59, 4  ;;  %v12723_v10 = vpop.f32.mrf.mxu0 }
 0x380   : > { %v3499_v45 = vshll.u32 %v3211_v43, 16  ;;  %v3503_v2 = vshrl.u32 %v3211_v43, 16  ;;  %v10656_v33 = vld [vmem:[#allocation3 + $0x2ec] ss:$36 sps:$4 sm:$0xff]   ;;  %v4329_v36 = vor.u32 %v4328_v51, %v4325_v50  ;;  %v3509_v28 = vshll.u32 %v3212_v8, 16 }
 0x381   : > { %v4339_v48 = vor.u32 %v4338_v56, %v4334_v23  ;;  %v3495_v39 = vrot.slane %v3493_v17, 5  ;;  %v4046_v55 = vld [vmem:[#allocation2 + $0xa8] sm:$0xf]  ;;  %v10654_v1 = vld [vmem:[#allocation3 + $0x2e8] ss:$36 sps:$4 sm:$0xff]   ;;  %v9288_v30 = vrot.slane %v3706_v25, 9  ;;  %6845 = vmatprep.mubr.bf16.mxu0 %v10656_v33  ;;  %v9812_v43 = vadd.f32 %v9811_v15, %v9810_v63  ;;  %v9932_v53 = vpop.f32.mrf.mxu0  ;;  %v9814_v25 = vpop.f32.mrf.mxu1 }
 0x382   : > { %v3501_v4 = vrot.slane %v3499_v45, 5  ;;  %v3505_v34 = vrot.slane %v3503_v2, 4  ;;  %v4330_v42 = vrot.slane %v4329_v36, 4  ;;  %v3708_v37 = vld [vmem:[#allocation2 + $0x98] sm:$0x1]  ;;  %v3848_v35 = vrot.slane %v3707_v18, 5  ;;  %6846 = vmatmul.mubr.bf16.gmra.mxu0 %v10654_v1 }
 0x383   : > { %v4340_v61 = vrot.slane %v4339_v48, 4  ;;  %v3496_v7 = vor.u32 %v3495_v39, %v3492_v46  ;;  %v3511_v58 = vrot.slane %v3509_v28, 5  ;;  %v4047_v44 = vld [vmem:[#allocation2 + $0xac] sm:$0xf]  ;;  %v4347_v11 = vshrl.u32 %v4046_v55, 16  ;;  %v12740_v17 = vpop.f32.mrf.mxu0 }
 0x384   : > { %v3506_v32 = vor.u32 %v3505_v34, %v3501_v4  ;;  %v4335_v9 = vsel %vm12300_vm6, %v4330_v42, %v4334_v23  ;;  %v3849_v49 = vsel %vm12249_vm15, %v9288_v30, %v3848_v35  ;;  %v4048_v38 = vld [vmem:[#allocation2 + $0xb0] sm:$0x1]  ;;  %v3213_v3 = vld [vmem:[#allocation2 + $0x9c] sm:$0xf]  ;;  %v3851_v52 = vrot.slane %v3708_v37, 5 }
 0x385   : > { %v4345_v41 = vsel %vm12300_vm6, %v4340_v61, %v4344_v26  ;;  %v3497_v13 = vrot.slane %v3496_v7, 4  ;;  %v10657_v62 = vld [vmem:[#allocation3 + $0x2e4] ss:$36 sps:$4 sm:$0xff]   ;;  %4496 = vst [vmem:[#allocation3 + $0x334] sm:$0xf] %v4335_v9  ;;  %v3850_v6 = vrot.slane %v3848_v35, 4  ;;  %v12738_v59 = vadd.f32 %v12711_v0, %v9812_v43  ;;  %v9816_v0 = vpop.f32.mrf.mxu1  ;;  %v12744_v63 = vpop.f32.mrf.mxu0 }
 0x386   : > { %4497 = vst [vmem:[#allocation3 + $0x358] sm:$0xf] %v4345_v41  ;;  %v3507_v57 = vrot.slane %v3506_v32, 4  ;;  %3935 = vst [vmem:[#allocation3 + $0x32c] sm:$0xf] %v3849_v49  ;;  %v4349_v16 = vrot.slane %v4347_v11, 4  ;;  %6684 = vmatprep.mubr.bf16.mxu1 %v10657_v62  ;;  %v9815_v46 = vadd.f32 %v9814_v25, %v9813_v5  ;;  %v9933_v11 = vadd.f32 %v9932_v53, %v12723_v10 }
 0x387   : > { %v10660_v29 = vld [vmem:[#allocation3 + $0x2e0] ss:$36 sps:$4 sm:$0xff]   ;;  %v3502_v8 = vsel %vm12300_vm6, %v3497_v13, %v3501_v4  ;;  %v4350_v50 = vshll.u32 %v4046_v55, 16  ;;  %v4356_v51 = vshll.u32 %v4047_v44, 16  ;;  %v4360_v23 = vshrl.u32 %v4047_v44, 16  ;;  %v9817_v35 = vpop.f32.mrf.mxu1  ;;  %v12749_v32 = vpop.f32.mrf.mxu0 }
 0x388   : > { %v3512_v19 = vsel %vm12300_vm6, %v3507_v57, %v3511_v58  ;;  %3663 = vst [vmem:[#allocation3 + $0x328] sm:$0xf] %v3502_v8  ;;  %v3214_v56 = vld [vmem:[#allocation2 + $0xa0] sm:$0xf]  ;;  %v3977_v18 = vld [vmem:[#allocation2 + $0xd0] sm:$0xf]  ;;  %6685 = vmatmul.mubr.bf16.gmra.mxu1 %v10660_v29  ;;  %v3852_v26 = vsel %vm12249_vm15, %v3850_v6, %v3851_v52  ;;  %v12747_v4 = vadd.f32 %v12721_v54, %v9815_v46 }
 0x389   : > { %3664 = vst [vmem:[#allocation3 + $0x34c] sm:$0xf] %v3512_v19  ;;  %v4352_v45 = vrot.slane %v4350_v50, 5  ;;  %v4366_v2 = vshll.u32 %v4048_v38, 16  ;;  %v3215_v14 = vld [vmem:[#allocation2 + $0xa4] sm:$0x1]  ;;  %v9818_v44 = vadd.f32 %v9817_v35, %v9816_v0  ;;  %v12752_v62 = vpop.f32.mrf.mxu0 }
 0x38a   : > { %4009 = vst [vmem:[#allocation3 + $0x474] sm:$0xf] %v3977_v18  ;;  %3936 = vst [vmem:[#allocation3 + $0x350] sm:$0xf] %v3852_v26  ;;  %v4358_v33 = vrot.slane %v4356_v51, 5  ;;  %v4362_v36 = vrot.slane %v4360_v23, 4 }
 0x38b   : > { %v3514_v48 = vshrl.u32 %v3213_v3, 16  ;;  %v3517_v39 = vshll.u32 %v3213_v3, 16  ;;  %v3709_v55 = vld [vmem:[#allocation2 + $0x9c] sm:$0xe]  ;;  %v3710_v1 = vld [vmem:[#allocation2 + $0xa0] sm:$0xf]  ;;  %v4353_v34 = vor.u32 %v4352_v45, %v4349_v16  ;;  %v9819_v3 = vpop.f32.mrf.mxu1  ;;  %v9940_v25 = vpop.f32.mrf.mxu0  ;;  %v12761_v18 = vadd.f32 %v12731_v22, %v9818_v44 }
 0x38c   : > { %v4368_v28 = vrot.slane %v4366_v2, 5  ;;  %v3523_v30 = vshll.u32 %v3214_v56, 16  ;;  %v3711_v47 = vld [vmem:[#allocation2 + $0xa4] sm:$0x1]  ;;  %v4363_v42 = vor.u32 %v4362_v36, %v4358_v33  ;;  %v3527_v37 = vshrl.u32 %v3214_v56, 16 }
 0x38d   : > { %v3516_v61 = vrot.slane %v3514_v48, 4  ;;  %v3519_v7 = vrot.slane %v3517_v39, 5  ;;  %v4354_v58 = vrot.slane %v4353_v34, 4  ;;  %v4049_v9 = vld [vmem:[#allocation2 + $0xb4] sm:$0xf]  ;;  %v3533_v38 = vshll.u32 %v3215_v14, 16  ;;  %v9820_v16 = vpop.f32.mrf.mxu1  ;;  %v9941_v48 = vpop.f32.mrf.mxu0 }
 0x38e   : > { %v3525_v15 = vrot.slane %v3523_v30, 5  ;;  %v10663_v41 = vld [vmem:[#allocation3 + $0x334] ss:$36 sps:$4 sm:$0xff]   ;;  %v4364_v54 = vrot.slane %v4363_v42, 4  ;;  %v3529_v49 = vrot.slane %v3527_v37, 4  ;;  %v9289_v43 = vrot.slane %v3709_v55, 9 }
 0x38f   : > { %v3520_v13 = vor.u32 %v3519_v7, %v3516_v61  ;;  %v10661_v57 = vld [vmem:[#allocation3 + $0x330] ss:$36 sps:$4 sm:$0xff]   ;;  %v4359_v52 = vsel %vm12300_vm6, %v4354_v58, %v4358_v33  ;;  %v3855_v5 = vrot.slane %v3710_v1, 5  ;;  %v3858_v29 = vrot.slane %v3711_v47, 5  ;;  %6853 = vmatprep.mubr.bf16.mxu0 %v10663_v41  ;;  %v4050_v50 = vld [vmem:[#allocation2 + $0xb8] sm:$0xf]  ;;  %v9822_v0 = vpop.f32.mrf.mxu1  ;;  %v12771_v37 = vpop.f32.mrf.mxu0 }
 0x390   : > { %v4369_v10 = vsel %vm12300_vm6, %v4364_v54, %v4368_v28  ;;  %4498 = vst [vmem:[#allocation3 + $0x37c] sm:$0xf] %v4359_v52  ;;  %v3530_v8 = vor.u32 %v3529_v49, %v3525_v15  ;;  %v3535_v6 = vrot.slane %v3533_v38, 5  ;;  %v4051_v19 = vld [vmem:[#allocation2 + $0xbc] sm:$0x1]  ;;  %6854 = vmatmul.mubr.bf16.gmra.mxu0 %v10661_v57  ;;  %v9821_v26 = vadd.f32 %v9820_v16, %v9819_v3 }
 0x391   : > { %v3521_v53 = vrot.slane %v3520_v13, 4  ;;  %v10664_v51 = vld [vmem:[#allocation3 + $0x32c] ss:$36 sps:$4 sm:$0xff]   ;;  %4499 = vst [vmem:[#allocation3 + $0x3a0] sm:$0xf] %v4369_v10  ;;  %v3856_v23 = vsel %vm12249_vm15, %v9289_v43, %v3855_v5  ;;  %v3857_v56 = vrot.slane %v3855_v5, 4  ;;  %v9823_v7 = vpop.f32.mrf.mxu1  ;;  %v12775_v38 = vpop.f32.mrf.mxu0 }
 0x392   : > { %v3216_v46 = vld [vmem:[#allocation2 + $0xa8] sm:$0xf]  ;;  %v10666_v45 = vld [vmem:[#allocation3 + $0x328] ss:$36 sps:$4 sm:$0xff]   ;;  %v3531_v14 = vrot.slane %v3530_v8, 4  ;;  %v4371_v33 = vshrl.u32 %v4049_v9, 16  ;;  %6692 = vmatprep.mubr.bf16.mxu1 %v10664_v51  ;;  %v12767_v55 = vadd.f32 %v9933_v11, %v9821_v26  ;;  %v9824_v8 = vadd.f32 %v9823_v7, %v9822_v0 }
 0x393   : > { %v3526_v2 = vsel %vm12300_vm6, %v3521_v53, %v3525_v15  ;;  %3937 = vst [vmem:[#allocation3 + $0x374] sm:$0xf] %v3856_v23  ;;  %v4374_v36 = vshll.u32 %v4049_v9, 16  ;;  %v3859_v39 = vsel %vm12249_vm15, %v3857_v56, %v3858_v29  ;;  %v4380_v22 = vshll.u32 %v4050_v50, 16  ;;  %v3217_v34 = vld [vmem:[#allocation2 + $0xac] sm:$0xf]  ;;  %6693 = vmatmul.mubr.bf16.gmra.mxu1 %v10666_v45  ;;  %v9825_v49 = vpop.f32.mrf.mxu1  ;;  %v12781_v16 = vpop.f32.mrf.mxu0 }
 0x394   : > { %3665 = vst [vmem:[#allocation3 + $0x370] sm:$0xf] %v3526_v2  ;;  %v4384_v1 = vshrl.u32 %v4050_v50, 16  ;;  %v3536_v28 = vsel %vm12300_vm6, %v3531_v14, %v3535_v6  ;;  %3938 = vst [vmem:[#allocation3 + $0x398] sm:$0xf] %v3859_v39  ;;  %v4373_v30 = vrot.slane %v4371_v33, 4  ;;  %v9936_v15 = vadd.f32 %v12744_v63, %v12740_v17 }
 0x395   : > { %v4376_v47 = vrot.slane %v4374_v36, 5  ;;  %v4390_v42 = vshll.u32 %v4051_v19, 16  ;;  %v3218_v61 = vld [vmem:[#allocation2 + $0xb0] sm:$0x1]  ;;  %3666 = vst [vmem:[#allocation3 + $0x394] sm:$0xf] %v3536_v28  ;;  %v9939_v17 = vadd.f32 %v12752_v62, %v12749_v32  ;;  %v9826_v63 = vpop.f32.mrf.mxu1  ;;  %v12779_v6 = vadd.f32 %v9941_v48, %v9940_v25  ;;  %v12787_v62 = vpop.f32.mrf.mxu0 }
 0x396   : > { %v4382_v35 = vrot.slane %v4380_v22, 5  ;;  %v4386_v58 = vrot.slane %v4384_v1, 4  ;;  %v3538_v44 = vshrl.u32 %v3216_v46, 16  ;;  %v3541_v41 = vshll.u32 %v3216_v46, 16  ;;  %v3712_v13 = vld [vmem:[#allocation2 + $0xa8] sm:$0xe] }
 0x397   : > { %v4377_v11 = vor.u32 %v4376_v47, %v4373_v30  ;;  %v4392_v9 = vrot.slane %v4390_v42, 5  ;;  %v3547_v54 = vshll.u32 %v3217_v34, 16  ;;  %v3551_v52 = vshrl.u32 %v3217_v34, 16  ;;  %v3713_v5 = vld [vmem:[#allocation2 + $0xac] sm:$0xf]  ;;  %v12785_v14 = vpop.f32.mrf.mxu1 }
 0x398   : > { %v4387_v3 = vor.u32 %v4386_v58, %v4382_v35  ;;  %v3540_v57 = vrot.slane %v3538_v44, 4  ;;  %v3557_v43 = vshll.u32 %v3218_v61, 16  ;;  %v10669_v29 = vld [vmem:[#allocation3 + $0x37c] ss:$36 sps:$4 sm:$0xff]   ;;  %v3714_v53 = vld [vmem:[#allocation2 + $0xb0] sm:$0x1]  ;;  %v12793_v28 = vadd.f32 %v9936_v15, %v9824_v8  ;;  %v12795_v61 = vpop.f32.mrf.mxu0 }
 0x399   : > { %v4378_v10 = vrot.slane %v4377_v11, 4  ;;  %v10667_v50 = vld [vmem:[#allocation3 + $0x378] ss:$36 sps:$4 sm:$0xff]   ;;  %v3543_v51 = vrot.slane %v3541_v41, 5  ;;  %v3549_v23 = vrot.slane %v3547_v54, 5  ;;  %v3553_v56 = vrot.slane %v3551_v52, 4  ;;  %6861 = vmatprep.mubr.bf16.mxu0 %v10669_v29  ;;  %v9829_v42 = vpop.f32.mrf.mxu1 }
 0x39a   : > { %v4388_v19 = vrot.slane %v4387_v3, 4  ;;  %v3559_v46 = vrot.slane %v3557_v43, 5  ;;  %v9290_v45 = vrot.slane %v3712_v13, 9  ;;  %v3862_v2 = vrot.slane %v3713_v5, 5  ;;  %v4052_v32 = vld [vmem:[#allocation2 + $0xc0] sm:$0xf]  ;;  %6862 = vmatmul.mubr.bf16.gmra.mxu0 %v10667_v50  ;;  %v12801_v3 = vpop.f32.mrf.mxu0 }
 0x39b   : > { %v4383_v26 = vsel %vm12300_vm6, %v4378_v10, %v4382_v35  ;;  %v3544_v0 = vor.u32 %v3543_v51, %v3540_v57  ;;  %v3554_v33 = vor.u32 %v3553_v56, %v3549_v23  ;;  %v3865_v36 = vrot.slane %v3714_v53, 5  ;;  %v4053_v48 = vld [vmem:[#allocation2 + $0xc4] sm:$0xf]  ;;  %v4054_v39 = vld [vmem:[#allocation2 + $0xc8] sm:$0x1] }
 0x39c   : > { %v4393_v25 = vsel %vm12300_vm6, %v4388_v19, %v4392_v9  ;;  %4500 = vst [vmem:[#allocation3 + $0x3c4] sm:$0xf] %v4383_v26  ;;  %v10672_v22 = vld [vmem:[#allocation3 + $0x374] ss:$36 sps:$4 sm:$0xff]   ;;  %v3863_v1 = vsel %vm12249_vm15, %v9290_v45, %v3862_v2  ;;  %v3864_v34 = vrot.slane %v3862_v2, 4  ;;  %v9827_v30 = vadd.f32 %v9826_v63, %v9825_v49  ;;  %v9831_v49 = vpop.f32.mrf.mxu1  ;;  %v12807_v19 = vpop.f32.mrf.mxu0 }
 0x39d   : > { %4501 = vst [vmem:[#allocation3 + $0x3e8] sm:$0xf] %v4393_v25  ;;  %v3219_v47 = vld [vmem:[#allocation2 + $0xb4] sm:$0xf]  ;;  %v10670_v7 = vld [vmem:[#allocation3 + $0x370] ss:$36 sps:$4 sm:$0xff]   ;;  %6700 = vmatprep.mubr.bf16.mxu1 %v10672_v22  ;;  %v9830_v22 = vadd.f32 %v9829_v42, %v12785_v14 }
 0x39e   : > { %v3545_v35 = vrot.slane %v3544_v0, 4  ;;  %v3555_v58 = vrot.slane %v3554_v33, 4  ;;  %3939 = vst [vmem:[#allocation3 + $0x3bc] sm:$0xf] %v3863_v1  ;;  %v4395_v44 = vshrl.u32 %v4052_v32, 16  ;;  %v4398_v11 = vshll.u32 %v4052_v32, 16  ;;  %6701 = vmatmul.mubr.bf16.gmra.mxu1 %v10670_v7  ;;  %v9832_v50 = vpop.f32.mrf.mxu1 }
 0x39f   : > { %v3866_v9 = vsel %vm12249_vm15, %v3864_v34, %v3865_v36  ;;  %v12799_v41 = vadd.f32 %v9939_v17, %v9827_v30  ;;  %v4404_v54 = vshll.u32 %v4053_v48, 16  ;;  %v4408_v15 = vshrl.u32 %v4053_v48, 16  ;;  %v3220_v13 = vld [vmem:[#allocation2 + $0xb8] sm:$0xf]  ;;  %v3221_v29 = vld [vmem:[#allocation2 + $0xbc] sm:$0x1]  ;;  %v12811_v36 = vpop.f32.mrf.mxu0 }
 0x3a0   : > { %v3550_v57 = vsel %vm12300_vm6, %v3545_v35, %v3549_v23  ;;  %v3560_v52 = vsel %vm12300_vm6, %v3555_v58, %v3559_v46  ;;  %3940 = vst [vmem:[#allocation3 + $0x3e0] sm:$0xf] %v3866_v9  ;;  %v4397_v43 = vrot.slane %v4395_v44, 4  ;;  %v4400_v5 = vrot.slane %v4398_v11, 5  ;;  %v3715_v63 = vld [vmem:[#allocation2 + $0xb4] sm:$0xe]  ;;  %v12809_v33 = vpop.f32.mrf.mxu1 }
 0x3a1   : > { %3667 = vst [vmem:[#allocation3 + $0x3b8] sm:$0xf] %v3550_v57  ;;  %3668 = vst [vmem:[#allocation3 + $0x3dc] sm:$0xf] %v3560_v52  ;;  %v4406_v10 = vrot.slane %v4404_v54, 5  ;;  %v4410_v53 = vrot.slane %v4408_v15, 4  ;;  %v9945_v1 = vadd.f32 %v12775_v38, %v12771_v37  ;;  %v9833_v34 = vadd.f32 %v9832_v50, %v9831_v49  ;;  %v12816_v9 = vpop.f32.mrf.mxu0 }
 0x3a2   : > { %v4414_v8 = vshll.u32 %v4054_v39, 16  ;;  %v3562_v17 = vshrl.u32 %v3219_v47, 16  ;;  %v4401_v51 = vor.u32 %v4400_v5, %v4397_v43  ;;  %v3565_v56 = vshll.u32 %v3219_v47, 16  ;;  %v3716_v45 = vld [vmem:[#allocation2 + $0xb8] sm:$0xf]  ;;  %v9835_v11 = vpop.f32.mrf.mxu1 }
 0x3a3   : > { %v3571_v23 = vshll.u32 %v3220_v13, 16  ;;  %v3575_v26 = vshrl.u32 %v3220_v13, 16  ;;  %v4411_v46 = vor.u32 %v4410_v53, %v4406_v10  ;;  %v3581_v25 = vshll.u32 %v3221_v29, 16  ;;  %v3717_v0 = vld [vmem:[#allocation2 + $0xbc] sm:$0x1]  ;;  %v12822_v29 = vpop.f32.mrf.mxu0 }
 0x3a4   : > { %v4416_v2 = vrot.slane %v4414_v8, 5  ;;  %v3564_v32 = vrot.slane %v3562_v17, 4  ;;  %v10676_v48 = vld [vmem:[#allocation3 + $0x3c4] ss:$36 sps:$4 sm:$0xff]   ;;  %v4402_v39 = vrot.slane %v4401_v51, 4  ;;  %v3567_v35 = vrot.slane %v3565_v56, 5  ;;  %v9837_v5 = vpop.f32.mrf.mxu1 }
 0x3a5   : > { %v3222_v30 = vld [vmem:[#allocation2 + $0xc0] sm:$0xf]  ;;  %v10674_v47 = vld [vmem:[#allocation3 + $0x3c0] ss:$36 sps:$4 sm:$0xff]   ;;  %v4412_v7 = vrot.slane %v4411_v46, 4  ;;  %v3573_v58 = vrot.slane %v3571_v23, 5  ;;  %6869 = vmatprep.mubr.bf16.mxu0 %v10676_v48  ;;  %v12827_v8 = vadd.f32 %v12779_v6, %v9830_v22  ;;  %v12829_v17 = vadd.f32 %v9945_v1, %v9833_v34 }
 0x3a6   : > { %v3577_v44 = vrot.slane %v3575_v26, 4  ;;  %v4407_v54 = vsel %vm12300_vm6, %v4402_v39, %v4406_v10  ;;  %v3583_v15 = vrot.slane %v3581_v25, 5  ;;  %v9291_v13 = vrot.slane %v3715_v63, 9  ;;  %v3223_v42 = vld [vmem:[#allocation2 + $0xc4] sm:$0xf]  ;;  %6870 = vmatmul.mubr.bf16.gmra.mxu0 %v10674_v47  ;;  %v9838_v46 = vpop.f32.mrf.mxu1 }
 0x3a7   : > { %v3869_v14 = vrot.slane %v3716_v45, 5  ;;  %v4417_v37 = vsel %vm12300_vm6, %v4412_v7, %v4416_v2  ;;  %4502 = vst [vmem:[#allocation3 + $0x40c] sm:$0xf] %v4407_v54  ;;  %v3568_v38 = vor.u32 %v3567_v35, %v3564_v32  ;;  %v3872_v57 = vrot.slane %v3717_v0, 5  ;;  %v3224_v52 = vld [vmem:[#allocation2 + $0xc8] sm:$0x1]  ;;  %v12833_v2 = vpop.f32.mrf.mxu0 }
 0x3a8   : > { %v3578_v49 = vor.u32 %v3577_v44, %v3573_v58  ;;  %v3718_v43 = vld [vmem:[#allocation2 + $0xc0] sm:$0xe]  ;;  %4503 = vst [vmem:[#allocation3 + $0x430] sm:$0xf] %v4417_v37  ;;  %v3719_v63 = vld [vmem:[#allocation2 + $0xc4] sm:$0xf]  ;;  %v9948_v26 = vadd.f32 %v12787_v62, %v12781_v16  ;;  %v9840_v1 = vpop.f32.mrf.mxu1 }
 0x3a9   : > { %v3870_v10 = vsel %vm12249_vm15, %v9291_v13, %v3869_v14  ;;  %v3871_v53 = vrot.slane %v3869_v14, 4  ;;  %v3720_v50 = vld [vmem:[#allocation2 + $0xc8] sm:$0x1]  ;;  %v10679_v51 = vld [vmem:[#allocation3 + $0x3bc] ss:$36 sps:$4 sm:$0xff]   ;;  %v3569_v56 = vrot.slane %v3568_v38, 4  ;;  %v12841_v34 = vpop.f32.mrf.mxu0  ;;  %v9836_v14 = vadd.f32 %v9835_v11, %v12809_v33 }
 0x3aa   : > { %v3579_v23 = vrot.slane %v3578_v49, 4  ;;  %3941 = vst [vmem:[#allocation3 + $0x404] sm:$0xf] %v3870_v10  ;;  %v3586_v45 = vshrl.u32 %v3222_v30, 16  ;;  %v10677_v32 = vld [vmem:[#allocation3 + $0x3b8] ss:$36 sps:$4 sm:$0xff]   ;;  %6708 = vmatprep.mubr.bf16.mxu1 %v10679_v51  ;;  %v9954_v33 = vadd.f32 %v12811_v36, %v12807_v19 }
 0x3ab   : > { %v3873_v6 = vsel %vm12249_vm15, %v3871_v53, %v3872_v57  ;;  %v3589_v25 = vshll.u32 %v3222_v30, 16  ;;  %v3595_v0 = vshll.u32 %v3223_v42, 16  ;;  %v3599_v48 = vshrl.u32 %v3223_v42, 16  ;;  %6709 = vmatmul.mubr.bf16.gmra.mxu1 %v10677_v32  ;;  %v1683_v44 = vld [vmem:[#allocation2 + $0xcc] sm:$0x1]  ;;  %v9841_v42 = vpop.f32.mrf.mxu1  ;;  %v12844_v37 = vpop.f32.mrf.mxu0 }
 0x3ac   : > { %v3574_v39 = vsel %vm12300_vm6, %v3569_v56, %v3573_v58  ;;  %v3584_v22 = vsel %vm12300_vm6, %v3579_v23, %v3583_v15  ;;  %3942 = vst [vmem:[#allocation3 + $0x428] sm:$0xf] %v3873_v6  ;;  %v3588_v16 = vrot.slane %v3586_v45, 4  ;;  %v3605_v62 = vshll.u32 %v3224_v52, 16  ;;  %v1739_v15 = vld [vmem:[#allocation2 + $0xd4] sm:$0x1] }
 0x3ad   : > { %3669 = vst [vmem:[#allocation3 + $0x400] sm:$0xf] %v3574_v39  ;;  %3670 = vst [vmem:[#allocation3 + $0x424] sm:$0xf] %v3584_v22  ;;  %v3591_v47 = vrot.slane %v3589_v25, 5  ;;  %v3597_v30 = vrot.slane %v3595_v0, 5  ;;  %v9951_v57 = vadd.f32 %v12801_v3, %v12795_v61  ;;  %v9839_v52 = vadd.f32 %v9838_v46, %v9837_v5  ;;  %v9843_v56 = vpop.f32.mrf.mxu1  ;;  %v9962_v23 = vpop.f32.mrf.mxu0 }
 0x3ae   : > { %v3601_v7 = vrot.slane %v3599_v48, 4  ;;  %v9292_v35 = vrot.slane %v3718_v43, 9  ;;  %v3607_v54 = vrot.slane %v3605_v62, 5  ;;  %v3876_v13 = vrot.slane %v3719_v63, 5  ;;  %v4056_v10 = vld [vmem:[#allocation2 + $0xd0] sm:$0xf] }
 0x3af   : > { %v3879_v58 = vrot.slane %v3720_v50, 5  ;;  %v3592_v38 = vor.u32 %v3591_v47, %v3588_v16  ;;  %v4506_v53 = vld [vmem:[#allocation2 + $0x18] sm:$0xe]  ;;  %v10682_v51 = vld [vmem:[#allocation3 + $0x40c] ss:$36 sps:$4 sm:$0xff]   ;;  %v12850_v50 = vadd.f32 %v9948_v26, %v9836_v14  ;;  %v12854_v61 = vadd.f32 %v9951_v57, %v9839_v52  ;;  %v9844_v25 = vpop.f32.mrf.mxu1  ;;  %v9964_v0 = vpop.f32.mrf.mxu0 }
 0x3b0   : > { %v3602_v49 = vor.u32 %v3601_v7, %v3597_v30  ;;  %v3877_v43 = vsel %vm12249_vm15, %v9292_v35, %v3876_v13  ;;  %v3878_v63 = vrot.slane %v3876_v13, 4  ;;  %v4507_v11 = vld [vmem:[#allocation2 + $0x1c] sm:$0xf]  ;;  %v10680_v45 = vld [vmem:[#allocation3 + $0x408] ss:$36 sps:$4 sm:$0xff]   ;;  %v1684_v3 = vsel %vm11341_vm2, 0, %v1683_v44  ;;  %6877 = vmatprep.mubr.bf16.mxu0 %v10682_v51 }
 0x3b1   : > { %v3593_v32 = vrot.slane %v3592_v38, 4  ;;  %3943 = vst [vmem:[#allocation3 + $0x44c] sm:$0xf] %v3877_v43  ;;  %1685 = vst [vmem:[#allocation2 + $0xcc] sm:$0x1] %v1684_v3  ;;  %v1740_v19 = vsel %vm11348_vm4, 0, %v1739_v15  ;;  %6878 = vmatmul.mubr.bf16.gmra.mxu0 %v10680_v45  ;;  %v9842_v7 = vadd.f32 %v9841_v42, %v9840_v1  ;;  %v9957_v35 = vadd.f32 %v12822_v29, %v12816_v9  ;;  %v9846_v44 = vpop.f32.mrf.mxu1  ;;  %v9965_v13 = vpop.f32.mrf.mxu0 }
 0x3b2   : > { %v3603_v6 = vrot.slane %v3602_v49, 4  ;;  %v3880_v5 = vsel %vm12249_vm15, %v3878_v63, %v3879_v58  ;;  %v4428_v36 = vshll.u32 %v4056_v10, 16  ;;  %v4432_v26 = vshrl.u32 %v4056_v10, 16  ;;  %v4508_v46 = vld [vmem:[#allocation2 + $0x20] sm:$0x1] }
 0x3b3   : > { %v3598_v48 = vsel %vm12300_vm6, %v3593_v32, %v3597_v30  ;;  %3944 = vst [vmem:[#allocation3 + $0x470] sm:$0xf] %v3880_v5  ;;  %1741 = vst [vmem:[#allocation2 + $0xd4] sm:$0x1] %v1740_v19  ;;  %v9293_v39 = vrot.slane %v4506_v53, 9  ;;  %v4604_v22 = vrot.slane %v4507_v11, 5  ;;  %v9845_v38 = vadd.f32 %v9844_v25, %v9843_v56  ;;  %v9847_v29 = vpop.f32.mrf.mxu1  ;;  %v9967_v42 = vpop.f32.mrf.mxu0 }
 0x3b4   : > { %v3608_v24 = vsel %vm12300_vm6, %v3603_v6, %v3607_v54  ;;  %v4512_v16 = vld [vmem:[#allocation2 + $0x30] sm:$0xe]  ;;  %v4513_v62 = vld [vmem:[#allocation2 + $0x34] sm:$0xf]  ;;  %3671 = vst [vmem:[#allocation3 + $0x448] sm:$0xf] %v3598_v48  ;;  %v12873_v10 = vadd.f32 %v9954_v33, %v9842_v7  ;;  %v9960_v9 = vadd.f32 %v12841_v34, %v12833_v2  ;;  %v9848_v33 = vadd.f32 %v9847_v29, %v9846_v44 }
 0x3b5   : > { %3672 = vst [vmem:[#allocation3 + $0x46c] sm:$0xf] %v3608_v24  ;;  %v12866_v27 = vrot.slane %v4428_v36, 5  ;;  %v4434_v47 = vrot.slane %v4432_v26, 4  ;;  %v4514_v30 = vld [vmem:[#allocation2 + $0x38] sm:$0x1]  ;;  %v4605_v54 = vsel %vm12249_vm15, %v9293_v39, %v4604_v22  ;;  %v12879_v51 = vadd.f32 %v9957_v35, %v9845_v38  ;;  %v9849_v45 = vpop.f32.mrf.mxu1  ;;  %v9968_v3 = vpop.f32.mrf.mxu0 }
 0x3b6   : > { %v10685_v58 = vld [vmem:[#allocation3 + $0x404] ss:$36 sps:$4 sm:$0xff]   ;;  %v4606_v14 = vrot.slane %v4604_v22, 4  ;;  %v4607_v15 = vrot.slane %v4508_v46, 5  ;;  %4746 = vst [vmem:[#allocation3 + $0x20] sm:$0xf] %v4605_v54  ;;  %v9963_v32 = vadd.f32 %v9962_v23, %v12844_v37  ;;  %v12884_v25 = vadd.f32 %v9965_v13, %v9964_v0 }
 0x3b7   : > { %v4515_v49 = vld [vmem:[#allocation2 + $0x3c] sm:$0xe]  ;;  %v4435_v52 = vor.u32 %v4434_v47, %v12866_v27  ;;  %v4516_v1 = vld [vmem:[#allocation2 + $0x40] sm:$0xf]  ;;  %6716 = vmatprep.mubr.bf16.mxu1 %v10685_v58  ;;  %v9295_v43 = vrot.slane %v4512_v16, 9  ;;  %v4618_v63 = vrot.slane %v4513_v62, 5  ;;  %v12888_v23 = vadd.f32 %v9960_v9, %v9848_v33  ;;  %v9850_v16 = vpop.f32.mrf.mxu1  ;;  %v9970_v62 = vpop.f32.mrf.mxu0 }
 0x3b8   : > { %v10683_v57 = vld [vmem:[#allocation3 + $0x400] ss:$36 sps:$4 sm:$0xff]   ;;  %v4608_v53 = vsel %vm12249_vm15, %v4606_v14, %v4607_v15  ;;  %v4517_v11 = vld [vmem:[#allocation2 + $0x44] sm:$0x1]  ;;  %v4621_v56 = vrot.slane %v4514_v30, 5  ;;  %v9296_v2 = vrot.slane %v4515_v49, 9  ;;  %v9851_v35 = vadd.f32 %v9850_v16, %v9849_v45 }
 0x3b9   : > { %6717 = vmatmul.mubr.bf16.gmra.mxu1 %v10683_v57  ;;  %4747 = vst [vmem:[#allocation3 + $0x44] sm:$0xf] %v4608_v53  ;;  %v4518_v34 = vld [vmem:[#allocation2 + $0x48] sm:$0xe]  ;;  %v4519_v6 = vld [vmem:[#allocation2 + $0x4c] sm:$0xf]  ;;  %v4619_v36 = vsel %vm12249_vm15, %v9295_v43, %v4618_v63  ;;  %v9852_v14 = vpop.f32.mrf.mxu1  ;;  %v9971_v49 = vpop.f32.mrf.mxu0 }
 0x3ba   : > { %v3976_v5 = vld [vmem:[#allocation2 + $0xcc] sm:$0xf]  ;;  %v4620_v26 = vrot.slane %v4618_v63, 4  ;;  %v4625_v46 = vrot.slane %v4516_v1, 5  ;;  %v12886_v48 = vld [vmem:[#allocation2 + $0x50] sm:$0x1]  ;;  %v12894_v29 = vadd.f32 %v9963_v32, %v9851_v35 }
 0x3bb   : > { %v4055_v19 = vld [vmem:[#allocation2 + $0xcc] sm:$0xf]  ;;  %4008 = vst [vmem:[#allocation3 + $0x450] sm:$0xf] %v3976_v5  ;;  %v4057_v24 = vld [vmem:[#allocation2 + $0xd4] sm:$0x1] }
 0x3bc   : > { %v4419_v39 = vshrl.u32 %v4055_v19, 16  ;;  %v4422_v22 = vshll.u32 %v4055_v19, 16  ;;  %v4436_v37 = vrot.slane %v4435_v52, 4  ;;  %4750 = vst [vmem:[#allocation3 + $0xb0] sm:$0xf] %v4619_v36  ;;  %v4438_v47 = vshll.u32 %v4057_v24, 16  ;;  %v9973_v19 = vpop.f32.mrf.mxu0 }
 0x3bd   : > { %v4622_v7 = vsel %vm12249_vm15, %v4620_v26, %v4621_v56  ;;  %v4626_v0 = vsel %vm12249_vm15, %v9296_v2, %v4625_v46  ;;  %v4521_v44 = vld [vmem:[#allocation2 + $0x54] sm:$0xe]  ;;  %v4522_v30 = vld [vmem:[#allocation2 + $0x58] sm:$0xf]  ;;  %v10689_v13 = vld [vmem:[#allocation3 + $0x44c] ss:$36 sps:$4 sm:$0xff]   ;;  %v9853_v2 = vpop.f32.mrf.mxu1 }
 0x3be   : > { %v4421_v58 = vrot.slane %v4419_v39, 4  ;;  %v4424_v54 = vrot.slane %v4422_v22, 5  ;;  %4751 = vst [vmem:[#allocation3 + $0xd4] sm:$0xf] %v4622_v7  ;;  %v4627_v15 = vrot.slane %v4625_v46, 4  ;;  %v4628_v38 = vrot.slane %v4517_v11, 5  ;;  %6724 = vmatprep.mubr.bf16.mxu1 %v10689_v13  ;;  %v9974_v16 = vpop.f32.mrf.mxu0 }
 0x3bf   : > { %4752 = vst [vmem:[#allocation3 + $0xf8] sm:$0xf] %v4626_v0  ;;  %v4524_v57 = vld [vmem:[#allocation2 + $0x60] sm:$0xe]  ;;  %v4525_v52 = vld [vmem:[#allocation2 + $0x64] sm:$0xf]  ;;  %v9969_v11 = vadd.f32 %v9968_v3, %v9967_v42  ;;  %v9854_v26 = vadd.f32 %v9853_v2, %v9852_v14  ;;  %v12903_v22 = vadd.f32 %v9971_v49, %v9970_v62 }
 0x3c0   : > { %v4440_v9 = vrot.slane %v4438_v47, 5  ;;  %v9297_v1 = vrot.slane %v4518_v34, 9  ;;  %v4632_v53 = vrot.slane %v4519_v6, 5  ;;  %v4523_v43 = vld [vmem:[#allocation2 + $0x5c] sm:$0x1]  ;;  %v4425_v56 = vor.u32 %v4424_v54, %v4421_v58 }
 0x3c1   : > { %v10687_v63 = vld [vmem:[#allocation3 + $0x448] ss:$36 sps:$4 sm:$0xff]   ;;  %v4629_v33 = vsel %vm12249_vm15, %v4627_v15, %v4628_v38  ;;  %v4635_v45 = vrot.slane %v12886_v48, 5  ;;  %v4526_v5 = vld [vmem:[#allocation2 + $0x68] sm:$0x1]  ;;  %v9855_v48 = vpop.f32.mrf.mxu1  ;;  %v9298_v42 = vrot.slane %v4521_v44, 9  ;;  %v12908_v35 = vadd.f32 %v12884_v25, %v9854_v26  ;;  %v9976_v15 = vpop.f32.mrf.mxu0 }
 0x3c2   : > { %v4441_v36 = vsel %vm12300_vm6, %v4436_v37, %v4440_v9  ;;  %v10693_v32 = vld [vmem:[#allocation3 + $0x20] ss:$36 sps:$4 sm:$0xff]   ;;  %4753 = vst [vmem:[#allocation3 + $0x11c] sm:$0xf] %v4629_v33  ;;  %v4633_v34 = vsel %vm12249_vm15, %v9297_v1, %v4632_v53  ;;  %v4634_v6 = vrot.slane %v4632_v53, 4  ;;  %6725 = vmatmul.mubr.bf16.gmra.mxu1 %v10687_v63  ;;  %v4426_v39 = vrot.slane %v4425_v56, 4 }
 0x3c3   : > { %v4527_v46 = vld [vmem:[#allocation2 + $0x6c] sm:$0xe]  ;;  %v4528_v24 = vld [vmem:[#allocation2 + $0x70] sm:$0xf]  ;;  %4505 = vst [vmem:[#allocation3 + $0x478] sm:$0xf] %v4441_v36  ;;  %10318 = vmatprep.mubr.bf16.mxu1 %v10693_v32  ;;  %v9856_v62 = vpop.f32.mrf.mxu1  ;;  %v12917_v9 = vadd.f32 %v9974_v16, %v9973_v19  ;;  %v9977_v63 = vpop.f32.mrf.mxu0 }
 0x3c4   : > { %4754 = vst [vmem:[#allocation3 + $0x140] sm:$0xf] %v4633_v34  ;;  %v4639_v3 = vrot.slane %v4522_v30, 5  ;;  %v4529_v37 = vld [vmem:[#allocation2 + $0x74] sm:$0x1]  ;;  %v4636_v7 = vsel %vm12249_vm15, %v4634_v6, %v4635_v45  ;;  %v9299_v0 = vrot.slane %v4524_v57, 9  ;;  %v4431_v44 = vsel %vm12300_vm6, %v4426_v39, %v12866_v27 }
 0x3c5   : > { %v4530_v47 = vld [vmem:[#allocation2 + $0x78] sm:$0xe]  ;;  %v4646_v13 = vrot.slane %v4525_v52, 5  ;;  %v4531_v58 = vld [vmem:[#allocation2 + $0x7c] sm:$0xf]  ;;  %v4642_v14 = vrot.slane %v4523_v43, 5  ;;  %v9857_v25 = vadd.f32 %v9856_v62, %v9855_v48  ;;  %v9858_v20 = vpop.f32.mrf.mxu1  ;;  %v12923_v36 = vadd.f32 %v9977_v63, %v9976_v15  ;;  %v9979_v39 = vpop.f32.mrf.mxu0 }
 0x3c6   : > { %4755 = vst [vmem:[#allocation3 + $0x164] sm:$0xf] %v4636_v7  ;;  %v4640_v30 = vsel %vm12249_vm15, %v9298_v42, %v4639_v3  ;;  %v4641_v54 = vrot.slane %v4639_v3, 4  ;;  %v4532_v38 = vld [vmem:[#allocation2 + $0x80] sm:$0x1]  ;;  %v4649_v52 = vrot.slane %v4526_v5, 5 }
 0x3c7   : > { %v4533_v49 = vld [vmem:[#allocation2 + $0x84] sm:$0xe]  ;;  %4504 = vst [vmem:[#allocation3 + $0x454] sm:$0xf] %v4431_v44  ;;  %4756 = vst [vmem:[#allocation3 + $0x188] sm:$0xf] %v4640_v30  ;;  %v4647_v57 = vsel %vm12249_vm15, %v9299_v0, %v4646_v13  ;;  %v12921_v45 = vadd.f32 %v9969_v11, %v9857_v25  ;;  %v9859_v6 = vpop.f32.mrf.mxu1  ;;  %v9980_v44 = vpop.f32.mrf.mxu0 }
 0x3c8   : > { %v4643_v27 = vsel %vm12249_vm15, %v4641_v54, %v4642_v14  ;;  %v4648_v1 = vrot.slane %v4646_v13, 4  ;;  %4758 = vst [vmem:[#allocation3 + $0x1d0] sm:$0xf] %v4647_v57  ;;  %v9300_v53 = vrot.slane %v4527_v46, 9  ;;  %v4653_v43 = vrot.slane %v4528_v24, 5 }
 0x3c9   : > { %v4534_v56 = vld [vmem:[#allocation2 + $0x88] sm:$0xf]  ;;  %v10694_v33 = vld [vmem:[#allocation3 + $0x68] ss:$36 sps:$4 sm:$0xff]   ;;  %4757 = vst [vmem:[#allocation3 + $0x1ac] sm:$0xf] %v4643_v27  ;;  %v9860_v42 = vadd.f32 %v9859_v6, %v9858_v20  ;;  %v12936_v14 = vadd.f32 %v9980_v44, %v9979_v39  ;;  %v9982_v27 = vpop.f32.mrf.mxu0 }
 0x3ca   : > { %v4656_v2 = vrot.slane %v4529_v37, 5  ;;  %v9301_v5 = vrot.slane %v4530_v47, 9  ;;  %v4535_v19 = vld [vmem:[#allocation2 + $0x8c] sm:$0x1]  ;;  %v4650_v34 = vsel %vm12249_vm15, %v4648_v1, %v4649_v52  ;;  %v4654_v26 = vsel %vm12249_vm15, %v9300_v53, %v4653_v43  ;;  %v4536_v48 = vld [vmem:[#allocation2 + $0x90] sm:$0xe]  ;;  %10319 = vmatmul.mubr.bf16.vlgmr.msra.gmra.mxu1 %v10694_v33  ;;  %v9861_v47 = vpop.f32.mrf.mxu1 }
 0x3cb   : > { %v10695_v32 = vld [vmem:[#allocation3 + $0xb0] ss:$36 sps:$4 sm:$0xff]   ;;  %v4655_v46 = vrot.slane %v4653_v43, 4  ;;  %v4660_v24 = vrot.slane %v4531_v58, 5  ;;  %v4537_v11 = vld [vmem:[#allocation2 + $0x94] sm:$0xf]  ;;  %v12934_v54 = vadd.f32 %v12903_v22, %v9860_v42  ;;  %v9983_v33 = vpop.f32.mrf.mxu0 }
 0x3cc   : > { %4759 = vst [vmem:[#allocation3 + $0x1f4] sm:$0xf] %v4650_v34  ;;  %4760 = vst [vmem:[#allocation3 + $0x218] sm:$0xf] %v4654_v26  ;;  %v4663_v3 = vrot.slane %v4532_v38, 5  ;;  %v9302_v16 = vrot.slane %v4533_v49, 9  ;;  %10322 = vmatprep.mubr.bf16.mxu1 %v10695_v32  ;;  %v9862_v52 = vpop.f32.mrf.mxu1  ;;  %v12947_v34 = vadd.f32 %v9983_v33, %v9982_v27 }
 0x3cd   : > { %v4667_v37 = vrot.slane %v4534_v56, 5  ;;  %v4657_v7 = vsel %vm12249_vm15, %v4655_v46, %v4656_v2  ;;  %v4661_v0 = vsel %vm12249_vm15, %v9301_v5, %v4660_v24  ;;  %v4662_v13 = vrot.slane %v4660_v24, 4  ;;  %v4538_v62 = vld [vmem:[#allocation2 + $0x98] sm:$0x1]  ;;  %v4539_v30 = vld [vmem:[#allocation2 + $0x9c] sm:$0xe] }
 0x3ce   : > { %v4670_v58 = vrot.slane %v4535_v19, 5  ;;  %4761 = vst [vmem:[#allocation3 + $0x23c] sm:$0xf] %v4657_v7  ;;  %4762 = vst [vmem:[#allocation3 + $0x260] sm:$0xf] %v4661_v0  ;;  %v9863_v22 = vadd.f32 %v9862_v52, %v9861_v47  ;;  %v9303_v43 = vrot.slane %v4536_v48, 9  ;;  %v9864_v56 = vpop.f32.mrf.mxu1 }
 0x3cf   : > { %v4668_v15 = vsel %vm12249_vm15, %v9302_v16, %v4667_v37  ;;  %v4669_v38 = vrot.slane %v4667_v37, 4  ;;  %v4540_v49 = vld [vmem:[#allocation2 + $0xa0] sm:$0xf]  ;;  %v10690_v25 = vld [vmem:[#allocation3 + $0x450] ss:$36 sps:$4 sm:$0xff]   ;;  %v4664_v20 = vsel %vm12249_vm15, %v4662_v13, %v4663_v3  ;;  %v4674_v63 = vrot.slane %v4537_v11, 5  ;;  %v9985_v11 = vpop.f32.mrf.mxu0 }
 0x3d0   : > { %v10692_v57 = vld [vmem:[#allocation3 + $0x454] ss:$36 sps:$4 sm:$0xff]   ;;  %4764 = vst [vmem:[#allocation3 + $0x2a8] sm:$0xf] %v4668_v15  ;;  %v4541_v1 = vld [vmem:[#allocation2 + $0xa4] sm:$0x1]  ;;  %v12945_v32 = vadd.f32 %v12917_v9, %v9863_v22  ;;  %v9865_v48 = vpop.f32.mrf.mxu1 }
 0x3d1   : > { %4763 = vst [vmem:[#allocation3 + $0x284] sm:$0xf] %v4664_v20  ;;  %v4671_v53 = vsel %vm12249_vm15, %v4669_v38, %v4670_v58  ;;  %6885 = vmatprep.mubr.bf16.mxu0 %v10692_v57  ;;  %v4677_v2 = vrot.slane %v4538_v62, 5  ;;  %v9304_v5 = vrot.slane %v4539_v30, 9  ;;  %v4681_v19 = vrot.slane %v4540_v49, 5  ;;  %v9986_v62 = vpop.f32.mrf.mxu0 }
 0x3d2   : > { %4765 = vst [vmem:[#allocation3 + $0x2cc] sm:$0xf] %v4671_v53  ;;  %6886 = vmatmul.mubr.bf16.gmra.mxu0 %v10690_v25  ;;  %v4675_v6 = vsel %vm12249_vm15, %v9303_v43, %v4674_v63  ;;  %v4676_v26 = vrot.slane %v4674_v63, 4  ;;  %v4542_v46 = vld [vmem:[#allocation2 + $0xa8] sm:$0xe]  ;;  %v9866_v47 = vadd.f32 %v9865_v48, %v9864_v56  ;;  %v4684_v13 = vrot.slane %v4541_v1, 5  ;;  %v9867_v58 = vpop.f32.mrf.mxu1 }
 0x3d3   : > { %v4543_v24 = vld [vmem:[#allocation2 + $0xac] sm:$0xf]  ;;  %v10696_v39 = vld [vmem:[#allocation3 + $0xf8] ss:$36 sps:$4 sm:$0xff]   ;;  %4766 = vst [vmem:[#allocation3 + $0x2f0] sm:$0xf] %v4675_v6  ;;  %v4682_v42 = vsel %vm12249_vm15, %v9304_v5, %v4681_v19  ;;  %v12958_v38 = vadd.f32 %v9986_v62, %v9985_v11  ;;  %v9988_v27 = vpop.f32.mrf.mxu0 }
 0x3d4   : > { %v4544_v3 = vld [vmem:[#allocation2 + $0xb0] sm:$0x1]  ;;  %v4545_v16 = vld [vmem:[#allocation2 + $0xb4] sm:$0xe]  ;;  %v4546_v37 = vld [vmem:[#allocation2 + $0xb8] sm:$0xf]  ;;  %v4678_v7 = vsel %vm12249_vm15, %v4676_v26, %v4677_v2  ;;  %10323 = vmatmul.mubr.bf16.gmra.mxu1 %v10696_v39  ;;  %v12956_v15 = vadd.f32 %v12923_v36, %v9866_v47  ;;  %v9868_v20 = vpop.f32.mrf.mxu1 }
 0x3d5   : > { %v10697_v9 = vld [vmem:[#allocation3 + $0x140] ss:$36 sps:$4 sm:$0xff]   ;;  %v4683_v0 = vrot.slane %v4681_v19, 4  ;;  %4768 = vst [vmem:[#allocation3 + $0x338] sm:$0xf] %v4682_v42  ;;  %v9305_v1 = vrot.slane %v4542_v46, 9  ;;  %v9869_v43 = vadd.f32 %v9868_v20, %v9867_v58  ;;  %v9989_v2 = vpop.f32.mrf.mxu0 }
 0x3d6   : > { %v4547_v44 = vld [vmem:[#allocation2 + $0xbc] sm:$0x1]  ;;  %4767 = vst [vmem:[#allocation3 + $0x314] sm:$0xf] %v4678_v7  ;;  %v4548_v30 = vld [vmem:[#allocation2 + $0xc0] sm:$0xe]  ;;  %10326 = vmatprep.mubr.bf16.mxu1 %v10697_v9  ;;  %v9870_v36 = vpop.f32.mrf.mxu1  ;;  %v9990_v46 = vadd.f32 %v9989_v2, %v9988_v27 }
 0x3d7   : > { %v4685_v49 = vsel %vm12249_vm15, %v4683_v0, %v4684_v13  ;;  %v4549_v25 = vld [vmem:[#allocation2 + $0xc4] sm:$0xf]  ;;  %v4550_v57 = vld [vmem:[#allocation2 + $0xc8] sm:$0x1]  ;;  %v4551_v52 = vld [vmem:[#allocation2 + $0xcc] sm:$0xe]  ;;  %v12965_v11 = vadd.f32 %v12936_v14, %v9869_v43 }
 0x3d8   : > { %4769 = vst [vmem:[#allocation3 + $0x35c] sm:$0xf] %v4685_v49  ;;  %v4688_v22 = vrot.slane %v4543_v24, 5  ;;  %v4552_v53 = vld [vmem:[#allocation2 + $0xd0] sm:$0xf]  ;;  %v4691_v63 = vrot.slane %v4544_v3, 5  ;;  %v9871_v3 = vpop.f32.mrf.mxu1 }
 0x3d9   : > { %v9306_v56 = vrot.slane %v4545_v16, 9  ;;  %v4695_v33 = vrot.slane %v4546_v37, 5  ;;  %v4698_v6 = vrot.slane %v4547_v44, 5  ;;  %v9307_v26 = vrot.slane %v4548_v30, 9  ;;  %v4553_v39 = vld [vmem:[#allocation2 + $0xd4] sm:$0x1]  ;;  %v9991_v37 = vpop.f32.mrf.mxu0 }
 0x3da   : > { %v4689_v5 = vsel %vm12249_vm15, %v9305_v1, %v4688_v22  ;;  %v4690_v19 = vrot.slane %v4688_v22, 4  ;;  %v10698_v48 = vld [vmem:[#allocation3 + $0x188] ss:$36 sps:$4 sm:$0xff]   ;;  %v4702_v9 = vrot.slane %v4549_v25, 5  ;;  %v4705_v47 = vrot.slane %v4550_v57, 5  ;;  %v9873_v62 = vpop.f32.mrf.mxu1 }
 0x3db   : > { %4770 = vst [vmem:[#allocation3 + $0x380] sm:$0xf] %v4689_v5  ;;  %v4696_v24 = vsel %vm12249_vm15, %v9306_v56, %v4695_v33  ;;  %v4697_v42 = vrot.slane %v4695_v33, 4  ;;  %v9308_v7 = vrot.slane %v4551_v52, 9  ;;  %v10699_v0 = vld [vmem:[#allocation3 + $0x1d0] ss:$36 sps:$4 sm:$0xff]   ;;  %v9872_v13 = vadd.f32 %v9871_v3, %v9870_v36  ;;  %v9992_v30 = vpop.f32.mrf.mxu0 }
 0x3dc   : > { %v4692_v16 = vsel %vm12249_vm15, %v4690_v19, %v4691_v63  ;;  %4772 = vst [vmem:[#allocation3 + $0x3c8] sm:$0xf] %v4696_v24  ;;  %v4709_v44 = vrot.slane %v4552_v53, 5  ;;  %v4712_v58 = vrot.slane %v4553_v39, 5  ;;  %10327 = vmatmul.mubr.bf16.gmra.mxu1 %v10698_v48  ;;  %v4703_v49 = vsel %vm12249_vm15, %v9307_v26, %v4702_v9  ;;  %v9874_v1 = vpop.f32.mrf.mxu1  ;;  %v10700_v2 = vld [vmem:[#allocation3 + $0x218] ss:$36 sps:$4 sm:$0xff]  }
 0x3dd   : > { %4771 = vst [vmem:[#allocation3 + $0x3a4] sm:$0xf] %v4692_v16  ;;  %v4699_v14 = vsel %vm12249_vm15, %v4697_v42, %v4698_v6  ;;  %v4704_v20 = vrot.slane %v4702_v9, 4  ;;  %10330 = vmatprep.mubr.bf16.mxu1 %v10699_v0  ;;  %v12976_v25 = vadd.f32 %v12947_v34, %v9872_v13  ;;  %v9993_v57 = vadd.f32 %v9992_v30, %v9991_v37  ;;  %v9994_v22 = vpop.f32.mrf.mxu0  ;;  %v10701_v6 = vld [vmem:[#allocation3 + $0x260] ss:$36 sps:$4 sm:$0xff]  }
 0x3de   : > { %4773 = vst [vmem:[#allocation3 + $0x3ec] sm:$0xf] %v4699_v14  ;;  %4774 = vst [vmem:[#allocation3 + $0x410] sm:$0xf] %v4703_v49  ;;  %v4710_v52 = vsel %vm12249_vm15, %v9308_v7, %v4709_v44  ;;  %v4711_v27 = vrot.slane %v4709_v44, 4  ;;  %v9875_v43 = vadd.f32 %v9874_v1, %v9873_v62  ;;  %v9876_v56 = vpop.f32.mrf.mxu1  ;;  %vm8942_vm10 = vcmask 1041409  }
 0x3df   : > { %v4706_v53 = vsel %vm12249_vm15, %v4704_v20, %v4705_v47  ;;  %4776 = vst [vmem:[#allocation3 + $0x458] sm:$0xf] %v4710_v52  ;;  %v9995_v34 = vpop.f32.mrf.mxu0  ;;  %v10702_v7 = vld [vmem:[#allocation3 + $0x2a8] ss:$36 sps:$4 sm:$0xff]   ;;  %v10703_v14 = vld [vmem:[#allocation3 + $0x2f0] ss:$36 sps:$4 sm:$0xff]  }
 0x3e0   : > { %4775 = vst [vmem:[#allocation3 + $0x434] sm:$0xf] %v4706_v53  ;;  %v4713_v63 = vsel %vm12249_vm15, %v4711_v27, %v4712_v58  ;;  %v12985_v33 = vadd.f32 %v12958_v38, %v9875_v43  ;;  %v9996_v36 = vadd.f32 %v9995_v34, %v9994_v22  ;;  %v9877_v5 = vpop.f32.mrf.mxu1  ;;  %vm8945_vm12 = vcmask 1042434  }
 0x3e1   : > { %4777 = vst [vmem:[#allocation3 + $0x47c] sm:$0xf] %v4713_v63  ;;  %v9997_v19 = vpop.f32.mrf.mxu0  ;;  %v9878_v26 = vadd.f32 %v9877_v5, %v9876_v56  ;;  %vm8948_vm15 = vcmask 1043459   ;;  %vm8951_vm0 = vcmask 1044484   ;;  %vm8954_vm1 = vcmask 1045509  }
 0x3e2   : > { %v9879_v39 = vpop.f32.mrf.mxu1  ;;  %vm8957_vm3 = vcmask 1046534   ;;  %vm8960_vm5 = vcmask 1047559  }
 0x3e3   : > { %v9998_v48 = vpop.f32.mrf.mxu0  ;;  %v12987_v24 = vadd.f32 %v9990_v46, %v9878_v26 }
 0x3e4   : > { %10331 = vmatmul.mubr.bf16.gmra.mxu1 %v10700_v2  ;;  %v9999_v60 = vadd.f32 %v9998_v48, %v9997_v19  ;;  %v9880_v42 = vpop.f32.mrf.mxu1  ;;  %v10705_v22 = vld [vmem:[#allocation3 + $0x380] ss:$36 sps:$4 sm:$0xff]  }
 0x3e5   : > { %10334 = vmatprep.mubr.bf16.mxu1 %v10701_v6  ;;  %v10000_v3 = vpop.f32.mrf.mxu0  ;;  %v9881_v16 = vadd.f32 %v9880_v42, %v9879_v39  ;;  %v10706_v5 = vld [vmem:[#allocation3 + $0x3c8] ss:$36 sps:$4 sm:$0xff]  }
 0x3e6   : > { %v9882_v37 = vpop.f32.mrf.mxu1 }
 0x3e7   : > { %v10001_v9 = vpop.f32.mrf.mxu0  ;;  %v12989_v38 = vadd.f32 %v9993_v57, %v9881_v16  ;;  %v10704_v57 = vld [vmem:[#allocation3 + $0x338] ss:$36 sps:$4 sm:$0xff]   ;;  %v10707_v6 = vld [vmem:[#allocation3 + $0x410] ss:$36 sps:$4 sm:$0xff]  }
 0x3e8   : > { %v10002_v47 = vadd.f32 %v10001_v9, %v10000_v3  ;;  %v9883_v0 = vpop.f32.mrf.mxu1  ;;  %v10708_v3 = vld [vmem:[#allocation3 + $0x458] ss:$36 sps:$4 sm:$0xff]  }
 0x3e9   : > { %v10003_v13 = vpop.f32.mrf.mxu0  ;;  %v9884_v44 = vadd.f32 %v9883_v0, %v9882_v37 }
 0x3ea   : > { %v9885_v58 = vpop.f32.mrf.mxu1 }
 0x3eb   : > { %v10004_v62 = vpop.f32.mrf.mxu0  ;;  %v12991_v46 = vadd.f32 %v9996_v36, %v9884_v44 }
 0x3ec   : > { %10335 = vmatmul.mubr.bf16.gmra.mxu1 %v10702_v7  ;;  %v10005_v30 = vadd.f32 %v10004_v62, %v10003_v13  ;;  %v9886_v49 = vpop.f32.mrf.mxu1 }
 0x3ed   : > { %10338 = vmatprep.mubr.bf16.mxu1 %v10703_v14  ;;  %v9887_v20 = vadd.f32 %v9886_v49, %v9885_v58 }
 0x3ee   : > { %v9888_v52 = vpop.f32.mrf.mxu1 }
 0x3ef   : > { %v12993_v27 = vadd.f32 %v9999_v60, %v9887_v20 }
 0x3f0   : > { %v9889_v1 = vpop.f32.mrf.mxu1 }
 0x3f1   : > { %v9890_v53 = vadd.f32 %v9889_v1, %v9888_v52 }
 0x3f2   : > { %v9891_v43 = vpop.f32.mrf.mxu1 }
 0x3f3   : > { %v12995_v63 = vadd.f32 %v10002_v47, %v9890_v53 }
 0x3f4   : > { %10339 = vmatmul.mubr.bf16.gmra.mxu1 %v10704_v57  ;;  %v9892_v56 = vpop.f32.mrf.mxu1 }
 0x3f5   : > { %10342 = vmatprep.mubr.bf16.mxu1 %v10705_v22  ;;  %v9893_v34 = vadd.f32 %v9892_v56, %v9891_v43 }
 0x3f6   : > { %v10022_v2 = vpop.f32.mrf.mxu1 }
 0x3f7   : > { %v12997_v36 = vadd.f32 %v10005_v30, %v9893_v34 }
 0x3f8   : > { %v10023_v19 = vpop.f32.mrf.mxu1 }
 0x3f9   : > { %v10024_v26 = vadd.f32 %v10023_v19, %v10022_v2 }
 0x3fa   : > { %v10025_v39 = vpop.f32.mrf.mxu1 }
 0x3fb   : > { %v13000_v48 = vadd.f32 %v10024_v26, %v12687_v21 }
 0x3fc   : > { %10343 = vmatmul.mubr.bf16.gmra.mxu1 %v10706_v5  ;;  %v10026_v60 = vpop.f32.mrf.mxu1 }
 0x3fd   : > { %10346 = vmatprep.mubr.bf16.mxu1 %v10707_v6  ;;  %v10027_v42 = vadd.f32 %v10026_v60, %v10025_v39 }
 0x3fe   : > { %v10028_v16 = vpop.f32.mrf.mxu1 }
 0x3ff   : > { %v13003_v37 = vadd.f32 %v10027_v42, %v12697_v31 }
 0x400   : > { %v10029_v9 = vpop.f32.mrf.mxu1 }
 0x401   : > { %v10030_v47 = vadd.f32 %v10029_v9, %v10028_v16 }
 0x402   : > { %v10031_v7 = vpop.f32.mrf.mxu1 }
 0x403   : > { %v13006_v0 = vadd.f32 %v10030_v47, %v12707_v12 }
 0x404   : > { %10347 = vmatmul.mubr.bf16.gmra.mxu1 %v10708_v3  ;;  %v10032_v13 = vpop.f32.mrf.mxu1 }
 0x405   : > { %v10033_v14 = vadd.f32 %v10032_v13, %v10031_v7 }
 0x406   : > { %v10034_v44 = vpop.f32.mrf.mxu1 }
 0x407   : > { %v13009_v21 = vadd.f32 %v10033_v14, %v12715_v40 }
 0x408   : > { %v10035_v58 = vpop.f32.mrf.mxu1 }
 0x409   : > { %v10036_v62 = vadd.f32 %v10035_v58, %v10034_v44 }
 0x40a   : > { %v10037_v30 = vpop.f32.mrf.mxu1 }
 0x40b   : > { %v13012_v49 = vadd.f32 %v10036_v62, %v12738_v59 }
 0x40c   : > { %v10038_v31 = vpop.f32.mrf.mxu1 }
 0x40d   : > { %v10039_v20 = vadd.f32 %v10038_v31, %v10037_v30  ;;  %v13041_v31 = vpop.f32.mrf.mxu0 }
 0x40e   : > { %v10040_v52 = vpop.f32.mrf.mxu1 }
 0x40f   : > { %v13015_v57 = vadd.f32 %v10039_v20, %v12747_v4 }
 0x410   : > { %v10041_v12 = vpop.f32.mrf.mxu1 }
 0x411   : > { %v10042_v1 = vadd.f32 %v10041_v12, %v10040_v52 }
 0x412   : > { %v10043_v22 = vpop.f32.mrf.mxu1 }
 0x413   : > { %v13018_v53 = vadd.f32 %v10042_v1, %v12761_v18  ;;  %v13046_v1 = vpop.f32.mrf.mxu0 }
 0x414   : > { %v10044_v40 = vpop.f32.mrf.mxu1 }
 0x415   : > { %v10045_v43 = vadd.f32 %v10044_v40, %v10043_v22 }
 0x416   : > { %v10046_v56 = vpop.f32.mrf.mxu1 }
 0x417   : > { %v13021_v34 = vadd.f32 %v10045_v43, %v12767_v55 }
 0x418   : > { %v10047_v59 = vpop.f32.mrf.mxu1 }
 0x419   : > { %v10048_v2 = vadd.f32 %v10047_v59, %v10046_v56 }
 0x41a   : > { %v10049_v5 = vpop.f32.mrf.mxu1 }
 0x41b   : > { %v13024_v19 = vadd.f32 %v10048_v2, %v12793_v28 }
 0x41c   : > { %v10050_v4 = vpop.f32.mrf.mxu1 }
 0x41d   : > { %v10051_v6 = vadd.f32 %v10050_v4, %v10049_v5 }
 0x41e   : > { %v10052_v26 = vpop.f32.mrf.mxu1 }
 0x41f   : > { %v13027_v39 = vadd.f32 %v10051_v6, %v12799_v41 }
 0x420   : > { %v10053_v18 = vpop.f32.mrf.mxu1 }
 0x421   : > { %v10054_v60 = vadd.f32 %v10053_v18, %v10052_v26 }
 0x422   : > { %v10055_v42 = vpop.f32.mrf.mxu1 }
 0x423   : > { %v13030_v3 = vadd.f32 %v10054_v60, %v12827_v8 }
 0x424   : > { %v10056_v55 = vpop.f32.mrf.mxu1 }
 0x425   : > { %v10057_v16 = vadd.f32 %v10056_v55, %v10055_v42 }
 0x426   : > { %v10058_v9 = vpop.f32.mrf.mxu1 }
 0x427   : > { %v13033_v47 = vadd.f32 %v10057_v16, %v12829_v17 }
 0x428   : > { %v10059_v28 = vpop.f32.mrf.mxu1 }
 0x429   : > { %v10060_v7 = vadd.f32 %v10059_v28, %v10058_v9 }
 0x42a   : > { %v10061_v13 = vpop.f32.mrf.mxu1 }
 0x42b   : > { %v13036_v14 = vadd.f32 %v10060_v7, %v12850_v50 }
 0x42c   : > { %v10062_v41 = vpop.f32.mrf.mxu1 }
 0x42d   : > { %v10063_v44 = vadd.f32 %v10062_v41, %v10061_v13 }
 0x42e   : > { %v10064_v58 = vpop.f32.mrf.mxu1 }
 0x42f   : > { %v13039_v62 = vadd.f32 %v10063_v44, %v12854_v61  ;;  %v13051_v61 = vpop.f32.mrf.mxu0 }
 0x430   : > { %v10065_v8 = vpop.f32.mrf.mxu1 }
 0x431   : > { %14237 = vst [vmem:[#allocation14_spill] sm:$0xff] %v13039_v62  ;;  %v10066_v30 = vadd.f32 %v10065_v8, %v10064_v58 }
 0x432   : > { %v10067_v20 = vpop.f32.mrf.mxu1 }
 0x433   : > { %v13044_v17 = vadd.f32 %v10066_v30, %v12873_v10  ;;  %v13056_v10 = vpop.f32.mrf.mxu0 }
 0x434   : > { %v10068_v52 = vpop.f32.mrf.mxu1 }
 0x435   : > { %v10069_v12 = vadd.f32 %v10068_v52, %v10067_v20  ;;  %v13061_v6 = vpop.f32.mrf.mxu0 }
 0x436   : > { %v10070_v50 = vpop.f32.mrf.mxu1 }
 0x437   : > { %v13049_v22 = vadd.f32 %v10069_v12, %v12879_v51  ;;  %v13063_v60 = vpop.f32.mrf.mxu0 }
 0x438   : > { %v10071_v40 = vpop.f32.mrf.mxu1 }
 0x439   : > { %v10072_v43 = vadd.f32 %v10071_v40, %v10070_v50  ;;  %v13068_v9 = vpop.f32.mrf.mxu0 }
 0x43a   : > { %v10073_v56 = vpop.f32.mrf.mxu1 }
 0x43b   : > { %v13054_v59 = vadd.f32 %v10072_v43, %v12888_v23  ;;  %v13073_v7 = vpop.f32.mrf.mxu0 }
 0x43c   : > { %v10074_v2 = vpop.f32.mrf.mxu1 }
 0x43d   : > { %14238 = vst [vmem:[#allocation15_spill] sm:$0xff] %v13054_v59  ;;  %v10075_v5 = vadd.f32 %v10074_v2, %v10073_v56  ;;  %v13075_v58 = vpop.f32.mrf.mxu0 }
 0x43e   : > { %v10076_v26 = vpop.f32.mrf.mxu1 }
 0x43f   : > { %v13059_v4 = vadd.f32 %v10075_v5, %v12894_v29  ;;  %v13080_v20 = vpop.f32.mrf.mxu0 }
 0x440   : > { %v10077_v51 = vpop.f32.mrf.mxu1 }
 0x441   : > { %14239 = vst [vmem:[#allocation16_spill] sm:$0xff] %v13059_v4  ;;  %v10078_v18 = vadd.f32 %v10077_v51, %v10076_v26  ;;  %v13085_v12 = vpop.f32.mrf.mxu0 }
 0x442   : > { %v10079_v42 = vpop.f32.mrf.mxu1 }
 0x443   : > { %v13066_v55 = vadd.f32 %v10078_v18, %v12908_v35  ;;  %v13090_v2 = vpop.f32.mrf.mxu0 }
 0x444   : > { %v10080_v23 = vpop.f32.mrf.mxu1 }
 0x445   : > { %14240 = vst [vmem:[#allocation17_spill] sm:$0xff] %v13066_v55  ;;  %v10081_v16 = vadd.f32 %v10080_v23, %v10079_v42  ;;  %v13095_v51 = vpop.f32.mrf.mxu0 }
 0x447   : > { %v13071_v28 = vadd.f32 %v10081_v16, %v12921_v45  ;;  %v13097_v42 = vpop.f32.mrf.mxu0 }
 0x448   : > { %v10082_v29 = vpop.f32.mrf.mxu1 }
 0x449   : > { %14241 = vst [vmem:[#allocation18_spill] sm:$0xff] %v13071_v28 }
 0x44a   : > { %v10083_v13 = vpop.f32.mrf.mxu1 }
 0x44b   : > { %v10084_v41 = vadd.f32 %v10083_v13, %v10082_v29  ;;  %v13102_v13 = vpop.f32.mrf.mxu0 }
 0x44c   : > { %v10085_v44 = vpop.f32.mrf.mxu1 }
 0x44d   : > { %v13078_v8 = vadd.f32 %v10084_v41, %v12934_v54 }
 0x44e   : > { %v10086_v35 = vpop.f32.mrf.mxu1 }
 0x44f   : > { %14242 = vst [vmem:[#allocation19_spill] sm:$0xff] %v13078_v8  ;;  %v10087_v30 = vadd.f32 %v10086_v35, %v10085_v44 }
 0x451   : > { %v13083_v52 = vadd.f32 %v10087_v30, %v12945_v32 }
 0x453   : > { %14243 = vst [vmem:[#allocation20_spill] sm:$0xff] %v13083_v52  ;;  %v10088_v45 = vpop.f32.mrf.mxu1 }
 0x455   : > { %v10089_v50 = vpop.f32.mrf.mxu1 }
 0x456   : > { %v10090_v40 = vadd.f32 %v10089_v50, %v10088_v45 }
 0x457   : > { %v10091_v43 = vpop.f32.mrf.mxu1 }
 0x458   : > { %v13088_v56 = vadd.f32 %v10090_v40, %v12956_v15 }
 0x459   : > { %v10092_v54 = vpop.f32.mrf.mxu1 }
 0x45a   : > { %14244 = vst [vmem:[#allocation21_spill] sm:$0xff] %v13088_v56  ;;  %v10093_v5 = vadd.f32 %v10092_v54, %v10091_v43 }
 0x45c   : > { %v13093_v26 = vadd.f32 %v10093_v5, %v12965_v11  ;;  %v13107_v11 = vpop.f32.mrf.mxu0 }
 0x45e   : > { %14245 = vst [vmem:[#allocation22_spill] sm:$0xff] %v13093_v26  ;;  %v10094_v32 = vpop.f32.mrf.mxu1  ;;  %v13109_v45 = vpop.f32.mrf.mxu0 }
 0x460   : > { %v10095_v18 = vpop.f32.mrf.mxu1  ;;  %v10159_v54 = vpop.f32.mrf.mxu0 }
 0x461   : > { %v10096_v23 = vadd.f32 %v10095_v18, %v10094_v32 }
 0x462   : > { %v10097_v16 = vpop.f32.mrf.mxu1  ;;  %v10161_v18 = vpop.f32.mrf.mxu0 }
 0x463   : > { %v13100_v29 = vadd.f32 %v10096_v23, %v12976_v25 }
 0x464   : > { %v10098_v15 = vpop.f32.mrf.mxu1 }
 0x465   : > { %14246 = vst [vmem:[#allocation23_spill] sm:$0xff] %v13100_v29  ;;  %v10099_v41 = vadd.f32 %v10098_v15, %v10097_v16  ;;  %v10162_v15 = vpop.f32.mrf.mxu0 }
 0x467   : > { %v13105_v44 = vadd.f32 %v10099_v41, %v12985_v33  ;;  %v10164_v29 = vpop.f32.mrf.mxu0 }
 0x469   : > { %14247 = vst [vmem:[#allocation24_spill] sm:$0xff] %v13105_v44 }
 0x46b   : > { %v10100_v35 = vpop.f32.mrf.mxu1 }
 0x46d   : > { %v10101_v30 = vpop.f32.mrf.mxu1 }
 0x46e   : > { %v10102_v50 = vadd.f32 %v10101_v30, %v10100_v35 }
 0x46f   : > { %v10103_v40 = vpop.f32.mrf.mxu1 }
 0x470   : > { %v13112_v43 = vadd.f32 %v10102_v50, %v12987_v24 }
 0x471   : > { %v10104_v25 = vpop.f32.mrf.mxu1 }
 0x472   : > { %14248 = vst [vmem:[#allocation25_spill] sm:$0xff] %v13112_v43  ;;  %v10105_v5 = vadd.f32 %v10104_v25, %v10103_v40 }
 0x474   : > { %v13115_v32 = vadd.f32 %v10105_v5, %v12989_v38  ;;  %v10165_v38 = vpop.f32.mrf.mxu0 }
 0x476   : > { %14249 = vst [vmem:[#allocation26_spill] sm:$0xff] %v13115_v32  ;;  %v10142_v32 = vadd.f32 %v13063_v60, %v13061_v6  ;;  %v10145_v6 = vadd.f32 %v13073_v7, %v13068_v9  ;;  %v10139_v9 = vadd.f32 %v13056_v10, %v13051_v61  ;;  %v10148_v61 = vadd.f32 %v13080_v20, %v13075_v58 }
 0x477   : > { %v10157_v58 = vadd.f32 %v13107_v11, %v13102_v13  ;;  %v10160_v20 = vadd.f32 %v10159_v54, %v13109_v45  ;;  %v10166_v54 = vadd.f32 %v10165_v38, %v10164_v29 }
 0x479   : > { %v10106_v33 = vpop.f32.mrf.mxu1 }
 0x47b   : > { %v10107_v23 = vpop.f32.mrf.mxu1 }
 0x47c   : > { %v10108_v16 = vadd.f32 %v10107_v23, %v10106_v33 }
 0x47d   : > { %v10109_v41 = vpop.f32.mrf.mxu1 }
 0x47e   : > { %v13118_v44 = vadd.f32 %v10108_v16, %v12991_v46  ;;  %v10136_v46 = vadd.f32 %v13046_v1, %v13041_v31 }
 0x47f   : > { %v10110_v35 = vpop.f32.mrf.mxu1 }
 0x480   : > { %14250 = vst [vmem:[#allocation27_spill] sm:$0xff] %v13118_v44  ;;  %v10111_v30 = vadd.f32 %v10110_v35, %v10109_v41  ;;  %v6776_v41 = vadd.f32 %v10142_v32, %v13006_v0  ;;  %v10167_v35 = vpop.f32.mrf.mxu0  ;;  %v13145_v0 = vld [vmem:[%s14202_s6] ss:$0 sm:$0xff] }
 0x482   : > { %v10112_v24 = vpop.f32.mrf.mxu1  ;;  %v13121_v50 = vadd.f32 %v10111_v30, %v12993_v27  ;;  %v13134_v30 = vld [vmem:[%s14201_s5] ss:$0 sm:$0xff]  ;;  %v10168_v7 = vpop.f32.mrf.mxu0 }
 0x484   : > { %14251 = vst [vmem:[#allocation28_spill] sm:$0xff] %v13121_v50  ;;  %v10113_v40 = vpop.f32.mrf.mxu1  ;;  %v10170_v10 = vpop.f32.mrf.mxu0 }
 0x485   : > { %v10114_v25 = vadd.f32 %v10113_v40, %v10112_v24  ;;  %v6768_v24 = vadd.f32 %v10136_v46, %v13000_v48  ;;  %v6779_v40 = vadd.f32 %v10145_v6, %v13009_v21 }
 0x486   : > { %v10115_v5 = vpop.f32.mrf.mxu1 }
 0x487   : > { %v13126_v33 = vadd.f32 %v10114_v25, %v12995_v63 }
 0x488   : > { %v10116_v23 = vpop.f32.mrf.mxu1 }
 0x489   : > { %14252 = vst [vmem:[#allocation29_spill] sm:$0xff] %v13126_v33  ;;  %v10117_v16 = vadd.f32 %v10116_v23, %v10115_v5  ;;  %v6771_v23 = vadd.f32 %v10139_v9, %v13003_v37  ;;  %v10151_v37 = vadd.f32 %v13090_v2, %v13085_v12  ;;  %v13180_v12 = vadd.f32 %v10162_v15, %v10161_v18 }
 0x48a   : > { %v10320_v27 = vpop.f32.mrf.mxu1  ;;  %v13190_v15 = vadd.f32 %v10168_v7, %v10167_v35 }
 0x48b   : > { %v13139_v63 = vadd.f32 %v10117_v16, %v12997_v36  ;;  %v6937_v60 = vadd.f32 %v10320_v27, %v6776_v41  ;;  %v11130_v27 = vmov 1983009808  }
 0x48c   : > { %v6928_v31 = vpop.f32.mrf.mxu1  ;;  %v8031_v6 = vunpack.c.l.s4 %v11130_v27 }
 0x48d   : > { %14253 = vst [vmem:[#allocation30_spill] sm:$0xff] %v13139_v63  ;;  %v7064_v1 = vmul.f32 %v13134_v30, %v6937_v60  ;;  %v6929_v32 = vadd.f32 %v6928_v31, %v6768_v24  ;;  %v8033_v60 = vlaneseq }
 0x48e   : > { %v10321_v36 = vpop.f32.mrf.mxu1 }
 0x48f   : > { %v13152_v25 = vadd.f32 %v13145_v0, %v7064_v1  ;;  %v7062_v48 = vmul.f32 %v13134_v30, %v6929_v32  ;;  %v6940_v5 = vadd.f32 %v10321_v36, %v6779_v40  ;;  %v10154_v1 = vadd.f32 %v13097_v42, %v13095_v51 }
 0x490   : > { %v6931_v46 = vpop.f32.mrf.mxu1 }
 0x491   : > { %v13157_v16 = vmul.f32 0.70710677, %v13152_v25  ;;  %v13160_v41 = vadd.f32 %v13145_v0, %v7062_v48  ;;  %v7065_v21 = vmul.f32 %v13134_v30, %v6940_v5  ;;  %v6932_v24 = vadd.f32 %v6931_v46, %v6771_v23  ;;  %v10171_v5 = vpop.f32.mrf.mxu0 }
 0x492   : > { %v6792_v42 = vadd.f32 %v10154_v1, %v13018_v53  ;;  %v8032_v23 = vunpack.c.0.s8 %v8031_v6  ;;  %v8034_v46 = vshrl.u32 %v8033_v60, 7  ;;  %v13196_v6 = vadd.f32 %v10171_v5, %v10170_v10 }
 0x493   : > { %v7199_v32 = vand.u32 2147483647, %v13157_v16  ;;  %v13171_v40 = vmul.f32 0.70710677, %v13160_v41  ;;  %v13177_v9 = vadd.f32 %v13145_v0, %v7065_v21  ;;  %v7063_v36 = vmul.f32 %v13134_v30, %v6932_v24 }
 0x494   : > { %v10324_v31 = vpop.f32.mrf.mxu1  ;;  %v6784_v1 = vadd.f32 %v10148_v61, %v13012_v49  ;;  %v13199_v29 = vsub.s32 %v8032_v23, %v8034_v46  ;;  %v6808_v23 = vadd.f32 %v10166_v54, %v13030_v3  ;;  %v13218_v3 = vmul.f32 0.5, %v13152_v25 }
 0x495   : > { %v7231_v2 = vmul.f32 0.3275911, %v7199_v32  ;;  %v7197_v51 = vand.u32 2147483647, %v13171_v40  ;;  %v13185_v13 = vmul.f32 0.70710677, %v13177_v9  ;;  %v13188_v11 = vadd.f32 %v13145_v0, %v7063_v36 }
 0x496   : > { %v6944_v48 = vpop.f32.mrf.mxu1  ;;  %v6953_v18 = vadd.f32 %v10324_v31, %v6792_v42  ;;  %v7647_v24 = vsub.f32 0.0, %v7199_v32  ;;  %v6787_v42 = vadd.f32 %v10151_v37, %v13015_v57  ;;  %v13214_v37 = vadd.f32 %v10160_v20, %v13024_v19 }
 0x497   : > { %v7263_v21 = vadd.f32 1.0, %v7231_v2  ;;  %v7229_v27 = vmul.f32 0.3275911, %v7197_v51  ;;  %v7200_v50 = vand.u32 2147483647, %v13185_v13  ;;  %v7645_v63 = vsub.f32 0.0, %v7197_v51 }
 0x498   : > { %v10325_v45 = vpop.f32.mrf.mxu1  ;;  %v13194_v53 = vmul.f32 0.70710677, %v13188_v11  ;;  %v7068_v7 = vmul.f32 %v13134_v30, %v6953_v18  ;;  %v6945_v31 = vadd.f32 %v6944_v48, %v6784_v1  ;;  %v6795_v2 = vadd.f32 %v10157_v58, %v13021_v34 }
 0x499   : > { %10837 = vrcp.f32 %v7263_v21  ;;  %v7261_v60 = vadd.f32 1.0, %v7229_v27  ;;  %v7232_v38 = vmul.f32 0.3275911, %v7200_v50  ;;  %v7679_v10 = vmul.f32 %v7647_v24, %v7199_v32 }
 0x49a   : > { %v6947_v36 = vpop.f32.mrf.mxu1  ;;  %v7198_v35 = vand.u32 2147483647, %v13194_v53  ;;  %v7648_v27 = vsub.f32 0.0, %v7200_v50  ;;  %v7107_v49 = vadd.f32 %v13145_v0, %v7068_v7  ;;  %v7066_v61 = vmul.f32 %v13134_v30, %v6945_v31 }
 0x49b   : > { %10839 = vrcp.f32 %v7261_v60  ;;  %v7264_v5 = vadd.f32 1.0, %v7232_v38  ;;  %v7677_v44 = vmul.f32 %v7645_v63, %v7197_v51  ;;  %v6956_v48 = vadd.f32 %v10325_v45, %v6795_v2 }
 0x49c   : > { %v7230_v21 = vmul.f32 0.3275911, %v7198_v35  ;;  %v10328_v46 = vpop.f32.mrf.mxu1  ;;  %v7646_v1 = vsub.f32 0.0, %v7198_v35  ;;  %v13208_v34 = vmul.f32 0.70710677, %v7107_v49  ;;  %v13211_v57 = vadd.f32 %v13145_v0, %v7066_v61 }
 0x49d   : > { %10841 = vrcp.f32 %v7264_v5  ;;  %v7713_v32 = vmul.f32 1.442695, %v7679_v10  ;;  %v7069_v58 = vmul.f32 %v13134_v30, %v6956_v48  ;;  %v6948_v24 = vadd.f32 %v6947_v36, %v6787_v42 }
 0x49e   : > { %v7262_v18 = vadd.f32 1.0, %v7230_v21  ;;  %v6969_v60 = vadd.f32 %v10328_v46, %v6808_v23  ;;  %v7680_v63 = vmul.f32 %v7648_v27, %v7200_v50  ;;  %v7203_v51 = vand.u32 2147483647, %v13208_v34 }
 0x49f   : > { %v7709_v45 = vmul.f32 1.442695, %v7677_v44  ;;  %v13222_v54 = vmul.f32 0.70710677, %v13211_v57  ;;  %v13225_v38 = vadd.f32 %v13145_v0, %v7069_v58  ;;  %v7067_v19 = vmul.f32 %v13134_v30, %v6948_v24 }
 0x4a0   : > { %10843 = vrcp.f32 %v7262_v18  ;;  %v13229_v20 = vmul.f32 0.5, %v13160_v41  ;;  %v7678_v36 = vmul.f32 %v7646_v1, %v7198_v35  ;;  %v7235_v7 = vmul.f32 0.3275911, %v7203_v51 }
 0x4a1   : > { %v7651_v25 = vsub.f32 0.0, %v7203_v51  ;;  %10845 = vpow2.f32 %v7713_v32  ;;  %v7201_v50 = vand.u32 2147483647, %v13222_v54  ;;  %v13233_v31 = vmul.f32 0.70710677, %v13225_v38 }
 0x4a2   : > { %v7072_v44 = vmul.f32 %v13134_v30, %v6969_v60  ;;  %v7715_v2 = vmul.f32 1.442695, %v7680_v63  ;;  %v7267_v42 = vadd.f32 1.0, %v7235_v7  ;;  %v13237_v5 = vadd.f32 %v13145_v0, %v7067_v19 }
 0x4a3   : > { %v7683_v10 = vmul.f32 %v7651_v25, %v7203_v51  ;;  %10847 = vpow2.f32 %v7709_v45  ;;  %v13242_v41 = vmul.f32 0.5, %v13177_v9  ;;  %v7233_v35 = vmul.f32 0.3275911, %v7201_v50 }
 0x4a4   : > { %v7204_v27 = vand.u32 2147483647, %v13233_v31  ;;  %v13247_v23 = vmul.f32 0.5, %v13188_v11  ;;  %v7711_v46 = vmul.f32 1.442695, %v7678_v36  ;;  %10849 = vrcp.f32 %v7267_v42 }
 0x4a5   : > { %v7721_v18 = vmul.f32 1.442695, %v7683_v10  ;;  %v7265_v48 = vadd.f32 1.0, %v7233_v35  ;;  %v13250_v32 = vadd.f32 %v13145_v0, %v7072_v44  ;;  %10851 = vpow2.f32 %v7715_v2 }
 0x4a6   : > { %v13239_v21 = vpop.eup %10837  ;;  %v7236_v1 = vmul.f32 0.3275911, %v7204_v27  ;;  %v7649_v24 = vsub.f32 0.0, %v7201_v50  ;;  %v13255_v60 = vmul.f32 0.70710677, %v13237_v5  ;;  %v13258_v11 = vmul.f32 0.5, %v7107_v49 }
 0x4a7   : > { %v7359_v61 = vmul.f32 1.0614054, %v13239_v21  ;;  %10853 = vrcp.f32 %v7265_v48  ;;  %v7652_v36 = vsub.f32 0.0, %v7204_v27  ;;  %v13266_v2 = vmul.f32 0.70710677, %v13250_v32 }
 0x4a8   : > { %v13252_v58 = vpop.eup %10839  ;;  %v7268_v51 = vadd.f32 1.0, %v7236_v1  ;;  %10855 = vpow2.f32 %v7711_v46  ;;  %v7202_v7 = vand.u32 2147483647, %v13255_v60  ;;  %v7681_v49 = vmul.f32 %v7649_v24, %v7201_v50 }
 0x4a9   : > { %v7391_v9 = vadd.f32 -1.4531521, %v7359_v61  ;;  %v7357_v63 = vmul.f32 1.0614054, %v13252_v58  ;;  %10857 = vpow2.f32 %v7721_v18  ;;  %v7207_v1 = vand.u32 2147483647, %v13266_v2 }
 0x4aa   : > { %v13260_v45 = vpop.eup %10841  ;;  %10859 = vrcp.f32 %v7268_v51  ;;  %v7234_v10 = vmul.f32 0.3275911, %v7202_v7  ;;  %v7650_v46 = vsub.f32 0.0, %v7202_v7  ;;  %v7684_v18 = vmul.f32 %v7652_v36, %v7204_v27 }
 0x4ab   : > { %v7423_v19 = vmul.f32 %v13239_v21, %v7391_v9  ;;  %v7389_v25 = vadd.f32 -1.4531521, %v7357_v63  ;;  %v7360_v44 = vmul.f32 1.0614054, %v13260_v45  ;;  %v7239_v24 = vmul.f32 0.3275911, %v7207_v1 }
 0x4ac   : > { %v7266_v33 = vadd.f32 1.0, %v7234_v10  ;;  %v7682_v50 = vmul.f32 %v7650_v46, %v7202_v7  ;;  %v7717_v56 = vmul.f32 1.442695, %v7681_v49  ;;  %v7723_v7 = vmul.f32 1.442695, %v7684_v18 }
 0x4ad   : > { %v7455_v42 = vadd.f32 1.4214138, %v7423_v19  ;;  %v13268_v35 = vpop.eup %10843  ;;  %v7421_v61 = vmul.f32 %v13252_v58, %v7389_v25  ;;  %v7392_v48 = vadd.f32 -1.4531521, %v7360_v44  ;;  %v13276_v25 = vmul.f32 0.5, %v13211_v57  ;;  %v6960_v44 = vpop.f32.mrf.mxu1 }
 0x4ae   : > { %v7358_v63 = vmul.f32 1.0614054, %v13268_v35  ;;  %v10846_v51 = vpop.eup %10845  ;;  %10861 = vrcp.f32 %v7266_v33  ;;  %v7271_v4 = vadd.f32 1.0, %v7239_v24  ;;  %v6961_v33 = vadd.f32 %v6960_v44, %v13214_v37 }
 0x4af   : > { %v7487_v9 = vmul.f32 %v13239_v21, %v7455_v42  ;;  %v7453_v43 = vadd.f32 1.4214138, %v7421_v61  ;;  %v7424_v19 = vmul.f32 %v13260_v45, %v7392_v48  ;;  %v7655_v61 = vsub.f32 0.0, %v7207_v1 }
 0x4b0   : > { %v7390_v26 = vadd.f32 -1.4531521, %v7358_v63  ;;  %v10848_v27 = vpop.eup %10847  ;;  %10863 = vrcp.f32 %v7271_v4  ;;  %vm7839_vm2 = vcmp.lt.f32.partialorder %v13157_v16, 0.0  ;;  %v7070_v18 = vmul.f32 %v13134_v30, %v6961_v33 }
 0x4b1   : > { %v7519_v52 = vadd.f32 -0.28449672, %v7487_v9  ;;  %v7485_v8 = vmul.f32 %v13252_v58, %v7453_v43  ;;  %v7456_v42 = vadd.f32 1.4214138, %v7424_v19  ;;  %v13281_v48 = vpop.eup %10849  ;;  %v7719_v9 = vmul.f32 1.442695, %v7682_v50 }
 0x4b2   : > { %v7422_v10 = vmul.f32 %v13268_v35, %v7390_v26  ;;  %v7363_v49 = vmul.f32 1.0614054, %v13281_v48  ;;  %v10852_v19 = vpop.eup %10851  ;;  %10865 = vpow2.f32 %v7717_v56  ;;  %vm7837_vm4 = vcmp.lt.f32.partialorder %v13171_v40, 0.0 }
 0x4b3   : > { %v7551_v36 = vmul.f32 %v13239_v21, %v7519_v52  ;;  %v7517_v46 = vadd.f32 -0.28449672, %v7485_v8  ;;  %v7488_v57 = vmul.f32 %v13260_v45, %v7456_v42  ;;  %10867 = vpow2.f32 %v7723_v7 }
 0x4b4   : > { %v7454_v43 = vadd.f32 1.4214138, %v7422_v10  ;;  %v13289_v8 = vpop.eup %10853  ;;  %v7395_v24 = vadd.f32 -1.4531521, %v7363_v49  ;;  %v7687_v10 = vmul.f32 %v7655_v61, %v7207_v1  ;;  %10869 = vpow2.f32 %v7719_v9 }
 0x4b5   : > { %v7583_v63 = vadd.f32 0.2548296, %v7551_v36  ;;  %v7549_v52 = vmul.f32 %v13252_v58, %v7517_v46  ;;  %v7520_v26 = vadd.f32 -0.28449672, %v7488_v57  ;;  %v10856_v44 = vpop.eup %10855  ;;  %v7361_v36 = vmul.f32 1.0614054, %v13289_v8 }
 0x4b6   : > { %v7486_v37 = vmul.f32 %v13268_v35, %v7454_v43  ;;  %v13295_v46 = vpop.eup %10857  ;;  %v7427_v33 = vmul.f32 %v13281_v48, %v7395_v24  ;;  %v13303_v49 = vadd.f32 %v13145_v0, %v7070_v18  ;;  %vm7840_vm13 = vcmp.lt.f32.partialorder %v13185_v13, 0.0 }
 0x4b7   : > { %v7615_v50 = vmul.f32 %v13239_v21, %v7583_v63  ;;  %v7581_v42 = vadd.f32 0.2548296, %v7549_v52  ;;  %v7552_v4 = vmul.f32 %v13260_v45, %v7520_v26  ;;  %v13299_v21 = vpop.eup %10859  ;;  %v7393_v43 = vadd.f32 -1.4531521, %v7361_v36 }
 0x4b8   : > { %v7518_v57 = vadd.f32 -0.28449672, %v7486_v37  ;;  %14254 = vst [vmem:[#allocation31_spill] sm:$0xff] %v13303_v49  ;;  %v7364_v61 = vmul.f32 1.0614054, %v13299_v21  ;;  %vm7838_vm14 = vcmp.lt.f32.partialorder %v13194_v53, 0.0 }
 0x4b9   : > { %v7775_v56 = vmul.f32 %v10846_v51, %v7615_v50  ;;  %v7613_v7 = vmul.f32 %v13252_v58, %v7581_v42  ;;  %v7584_v63 = vadd.f32 0.2548296, %v7552_v4  ;;  %v7459_v51 = vadd.f32 1.4214138, %v7427_v33  ;;  %v13312_v58 = vpop.f32.mrf.mxu0 }
 0x4ba   : > { %v7550_v1 = vmul.f32 %v13268_v35, %v7518_v57  ;;  %v7425_v50 = vmul.f32 %v13289_v8, %v7393_v43  ;;  %v13310_v37 = vmul.f32 1.442695, %v7687_v10  ;;  %v7396_v4 = vadd.f32 -1.4531521, %v7364_v61 }
 0x4bb   : > { %v7807_v52 = vsub.f32 1.0, %v7775_v56  ;;  %v7773_v26 = vmul.f32 %v10848_v27, %v7613_v7  ;;  %v7616_v9 = vmul.f32 %v13260_v45, %v7584_v63  ;;  %v7491_v42 = vmul.f32 %v13281_v48, %v7459_v51  ;;  %v13315_v36 = vpop.eup %10861 }
 0x4bc   : > { %v7582_v18 = vadd.f32 0.2548296, %v7550_v1  ;;  %v7457_v27 = vadd.f32 1.4214138, %v7425_v50  ;;  %v13319_v45 = vmul.f32 0.70710677, %v13303_v49  ;;  %v7428_v63 = vmul.f32 %v13299_v21, %v7396_v4 }
 0x4bd   : > { %v7871_v24 = vsub.f32 0.0, %v7807_v52  ;;  %v7805_v56 = vsub.f32 1.0, %v7773_v26  ;;  %v7776_v57 = vmul.f32 %v10852_v19, %v7616_v9  ;;  %v7523_v7 = vadd.f32 -0.28449672, %v7491_v42  ;;  %v13326_v19 = vpop.f32.mrf.mxu0  ;;  %v13330_v16 = vpop.eup %10863 }
 0x4be   : > { %v7614_v33 = vmul.f32 %v13268_v35, %v7582_v18  ;;  %v7489_v61 = vmul.f32 %v13289_v8, %v7457_v27  ;;  %v7460_v50 = vadd.f32 1.4214138, %v7428_v63  ;;  %v7362_v28 = vmul.f32 1.0614054, %v13315_v36 }
 0x4bf   : > { %v7903_v10 = vsel %vm7839_vm2, %v7871_v24, %v7807_v52  ;;  %v7869_v1 = vsub.f32 0.0, %v7805_v56  ;;  %v7808_v51 = vsub.f32 1.0, %v7776_v57  ;;  %v7555_v9 = vmul.f32 %v13281_v48, %v7523_v7  ;;  %v10866_v42 = vpop.eup %10865  ;;  %v13342_v40 = vpop.f32.mrf.mxu0 }
 0x4c0   : > { %v7935_v43 = vadd.f32 1.0, %v7903_v10  ;;  %v7774_v26 = vmul.f32 %v10856_v44, %v7614_v33  ;;  %v7521_v18 = vadd.f32 -0.28449672, %v7489_v61  ;;  %v7492_v44 = vmul.f32 %v13299_v21, %v7460_v50  ;;  %v13336_v10 = vpop.eup %10867 }
 0x4c1   : > { %v7901_v52 = vsel %vm7837_vm4, %v7869_v1, %v7805_v56  ;;  %v7872_v24 = vsub.f32 0.0, %v7808_v51  ;;  %v7587_v27 = vadd.f32 0.2548296, %v7555_v9  ;;  %v7394_v63 = vadd.f32 -1.4531521, %v7362_v28 }
 0x4c2   : > { %v7967_v35 = vmul.f32 %v7935_v43, %v13218_v3  ;;  %v7933_v4 = vadd.f32 1.0, %v7901_v52  ;;  %v7806_v57 = vsub.f32 1.0, %v7774_v26  ;;  %v7553_v7 = vmul.f32 %v13289_v8, %v7521_v18  ;;  %v13347_v26 = vpop.eup %10869 }
 0x4c3   : > { %v7904_v33 = vsel %vm7840_vm13, %v7872_v24, %v7808_v51  ;;  %v7367_v3 = vmul.f32 1.0614054, %v13330_v16  ;;  %v7619_v61 = vmul.f32 %v13281_v48, %v7587_v27  ;;  %vm7843_vm9 = vcmp.lt.f32.partialorder %v13208_v34, 0.0 }
 0x4c4   : > { %v7965_v56 = vmul.f32 %v7933_v4, %v13229_v20  ;;  %v7936_v43 = vadd.f32 1.0, %v7904_v33  ;;  %v7870_v1 = vsub.f32 0.0, %v7806_v57  ;;  %v7585_v9 = vadd.f32 0.2548296, %v7553_v7  ;;  %v13356_v33 = vpop.f32.mrf.mxu0 }
 0x4c5   : > { %v7524_v13 = vadd.f32 -0.28449672, %v7492_v44  ;;  %v7426_v51 = vmul.f32 %v13315_v36, %v7394_v63  ;;  %v7399_v50 = vadd.f32 -1.4531521, %v7367_v3  ;;  %v7779_v20 = vmul.f32 %v13295_v46, %v7619_v61 }
 0x4c6   : > { %v7997_v28 = vmax.f32 %v7965_v56, %v7967_v35  ;;  %v7968_v52 = vmul.f32 %v7936_v43, %v13242_v41  ;;  %v7902_v24 = vsel %vm7838_vm14, %v7870_v1, %v7806_v57  ;;  %v7617_v48 = vmul.f32 %v13289_v8, %v7585_v9 }
 0x4c7   : > { %v7934_v18 = vadd.f32 1.0, %v7902_v24  ;;  %v7556_v4 = vmul.f32 %v13299_v21, %v7524_v13  ;;  %v7458_v27 = vadd.f32 1.4214138, %v7426_v51  ;;  %v7811_v63 = vsub.f32 1.0, %v7779_v20  ;;  %v13369_v51 = vpop.f32.mrf.mxu0 }
 0x4c8   : > { %v8029_v44 = vcombine.high %v7997_v28, %v7997_v28  ;;  %v8036_v7 = vrot.slane %v7997_v28, %v13199_v29  ;;  %v13360_v35 = vmul.f32 %v13330_v16, %v7399_v50  ;;  %v7777_v41 = vmul.f32 %v10866_v42, %v7617_v48 }
 0x4c9   : > { %v7966_v53 = vmul.f32 %v7934_v18, %v13247_v23  ;;  %v7588_v57 = vadd.f32 0.2548296, %v7556_v4  ;;  %v7490_v46 = vmul.f32 %v13315_v36, %v7458_v27  ;;  %v7875_v43 = vsub.f32 0.0, %v7811_v63 }
 0x4ca   : > { %v8043_v8 = vrot.slane %v8029_v44, %v13199_v29  ;;  %v8044_v3 = vcombine.high %v8036_v7, %v8036_v7  ;;  %v9527_v56 = vrot.slane %v8036_v7, 9  ;;  %v7809_v61 = vsub.f32 1.0, %v7777_v41 }
 0x4cb   : > { %v7998_v1 = vmax.f32 %v7966_v53, %v7968_v52  ;;  %vm7841_vm11 = vcmp.lt.f32.partialorder %v13222_v54, 0.0  ;;  %v7620_v9 = vmul.f32 %v13299_v21, %v7588_v57  ;;  %v13367_v13 = vadd.f32 -0.28449672, %v7490_v46 }
 0x4cc   : > { %v8045_v23 = vcombine.high %v8043_v8, %v8043_v8  ;;  %v9528_v42 = vrot.slane %v8044_v3, 9  ;;  %v9529_v50 = vrot.slane %v8043_v8, 9  ;;  %v8557_v28 = vmax.f32 %v8036_v7, %v9527_v56  ;;  %v13375_v7 = vpop.f32.mrf.mxu0 }
 0x4cd   : > { %v8046_v24 = vcombine.high %v7998_v1, %v7998_v1  ;;  %v8053_v20 = vrot.slane %v7998_v1, %v13199_v29  ;;  %v7907_v52 = vsel %vm7843_vm9, %v7875_v43, %v7811_v63  ;;  %v7873_v18 = vsub.f32 0.0, %v7809_v61 }
 0x4ce   : > { %v9530_v48 = vrot.slane %v8045_v23, 9  ;;  %v8558_v4 = vmax.f32 %v8044_v3, %v9528_v42  ;;  %v8559_v21 = vmax.f32 %v8043_v8, %v9529_v50  ;;  %v9693_v27 = vpack.c.bf16 %v8557_v28, %v8557_v28 }
 0x4cf   : > { %v8060_v44 = vrot.slane %v8046_v24, %v13199_v29  ;;  %v8061_v53 = vcombine.high %v8053_v20, %v8053_v20  ;;  %v9531_v41 = vrot.slane %v8053_v20, 9  ;;  %v7939_v57 = vadd.f32 1.0, %v7907_v52 }
 0x4d0   : > { %v8560_v46 = vmax.f32 %v8045_v23, %v9530_v48  ;;  %v9694_v56 = vpack.c.bf16 %v8558_v4, %v8558_v4  ;;  %v9695_v1 = vpack.c.bf16 %v8559_v21, %v8559_v21  ;;  %v8877_v59 = vunpack.c.l.b16 %v9693_v27  ;;  %v13378_v23 = vpop.f32.mrf.mxu0 }
 0x4d1   : > { %v8062_v34 = vcombine.high %v8060_v44, %v8060_v44  ;;  %v9532_v63 = vrot.slane %v8061_v53, 9  ;;  %v9533_v43 = vrot.slane %v8060_v44, 9  ;;  %v8561_v55 = vmax.f32 %v8053_v20, %v9531_v41 }
 0x4d2   : > { %v9696_v8 = vpack.c.bf16 %v8560_v46, %v8560_v46  ;;  %v8878_v3 = vunpack.c.l.b16 %v9694_v56  ;;  %v8879_v42 = vunpack.c.l.b16 %v9695_v1  ;;  %v7971_v50 = vmul.f32 %v7939_v57, %v13258_v11  ;;  %v13386_v54 = vpop.f32.mrf.mxu0 }
 0x4d3   : > { %v9534_v28 = vrot.slane %v8062_v34, 9  ;;  %v8562_v24 = vmax.f32 %v8061_v53, %v9532_v63  ;;  %v8563_v52 = vmax.f32 %v8060_v44, %v9533_v43  ;;  %v9697_v62 = vpack.c.bf16 %v8561_v55, %v8561_v55 }
 0x4d4   : > { %v8880_v48 = vunpack.c.l.b16 %v9696_v8  ;;  %v8941_v4 = vrot.slane %v8878_v3, 7  ;;  %v8944_v21 = vrot.slane %v8879_v42, 6  ;;  %v7905_v27 = vsel %vm7841_vm11, %v7873_v18, %v7809_v61 }
 0x4d5   : > { %v8564_v20 = vmax.f32 %v8062_v34, %v9534_v28  ;;  %v9698_v41 = vpack.c.bf16 %v8562_v24, %v8562_v24  ;;  %v9699_v46 = vpack.c.bf16 %v8563_v52, %v8563_v52  ;;  %v8881_v56 = vunpack.c.l.b16 %v9697_v62  ;;  %v13398_v52 = vpop.f32.mrf.mxu0 }
 0x4d6   : > { %v8943_v1 = vsel %vm8942_vm10, %v8941_v4, %v8877_v59  ;;  %v8947_v49 = vrot.slane %v8880_v48, 5  ;;  %v7937_v11 = vadd.f32 1.0, %v7905_v27  ;;  %v7780_v44 = vmul.f32 %v13336_v10, %v7620_v9 }
 0x4d7   : > { %v8946_v55 = vsel %vm8945_vm12, %v8944_v21, %v8943_v1  ;;  %v9700_v53 = vpack.c.bf16 %v8564_v20, %v8564_v20  ;;  %v8882_v57 = vunpack.c.l.b16 %v9698_v41  ;;  %v8883_v63 = vunpack.c.l.b16 %v9699_v46 }
 0x4d8   : > { %vm7844_vm6 = vcmp.lt.f32.partialorder %v13233_v31, 0.0  ;;  %v8949_v61 = vsel %vm8948_vm15, %v8947_v49, %v8946_v55  ;;  %v8950_v18 = vrot.slane %v8881_v56, 4  ;;  %v7969_v62 = vmul.f32 %v7937_v11, %v13276_v25  ;;  %v13410_v55 = vpop.f32.mrf.mxu0 }
 0x4d9   : > { %v7812_v59 = vsub.f32 1.0, %v7780_v44  ;;  %v8884_v34 = vunpack.c.l.b16 %v9700_v53  ;;  %v8953_v43 = vrot.slane %v8882_v57, 3  ;;  %v8956_v8 = vrot.slane %v8883_v63, 2 }
 0x4da   : > { %v7554_v10 = vmul.f32 %v13315_v36, %v13367_v13  ;;  %v8952_v9 = vsel %vm8951_vm0, %v8950_v18, %v8949_v61  ;;  %v7999_v3 = vmax.f32 %v7969_v62, %v7971_v50  ;;  %v7463_v42 = vadd.f32 1.4214138, %v13360_v35  ;;  %v10329_v61 = vpop.f32.mrf.mxu1 }
 0x4db   : > { %10871 = vpow2.f32 %v13310_v37  ;;  %v8955_v49 = vsel %vm8954_vm1, %v8953_v43, %v8952_v9  ;;  %v8959_v28 = vrot.slane %v8884_v34, 1  ;;  %v7205_v25 = vand.u32 2147483647, %v13319_v45 }
 0x4dc   : > { %v7586_v24 = vadd.f32 0.2548296, %v7554_v10  ;;  %v8958_v48 = vsel %vm8957_vm3, %v8956_v8, %v8955_v49  ;;  %v8063_v4 = vcombine.high %v7999_v3, %v7999_v3  ;;  %v8070_v13 = vrot.slane %v7999_v3, %v13199_v29 }
 0x4dd   : > { %v7876_v21 = vsub.f32 0.0, %v7812_v59  ;;  %v8961_v50 = vsel %vm8960_vm5, %v8959_v28, %v8958_v48  ;;  %vm7842_vm7 = vcmp.lt.f32.partialorder %v13255_v60, 0.0  ;;  %v7495_v37 = vmul.f32 %v13330_v16, %v7463_v42  ;;  %v10188_v42 = vpop.f32.mrf.mxu0 }
 0x4de   : > { %v7618_v35 = vmul.f32 %v13315_v36, %v7586_v24  ;;  %v9060_v27 = vpack.c.b16 %v8961_v50, %v8961_v50  ;;  %v8077_v20 = vrot.slane %v8063_v4, %v13199_v29  ;;  %v8078_v41 = vcombine.high %v8070_v13, %v8070_v13 }
 0x4df   : > { %v9535_v46 = vrot.slane %v8070_v13, 9  ;;  %v7527_v1 = vadd.f32 -0.28449672, %v7495_v37  ;;  %v7237_v11 = vmul.f32 0.3275911, %v7205_v25  ;;  %v6811_v44 = vadd.f32 %v13190_v15, %v13033_v47 }
 0x4e0   : > { %v7778_v56 = vmul.f32 %v13347_v26, %v7618_v35  ;;  %9076 = vst [vmem:[%s13412_s22] sm:$0xf] %v9060_v27  ;;  %v8079_v36 = vcombine.high %v8077_v20, %v8077_v20  ;;  %v9536_v53 = vrot.slane %v8078_v41, 9  ;;  %v9537_v57 = vrot.slane %v8077_v20, 9  ;;  %v6963_v27 = vpop.f32.mrf.mxu1 }
 0x4e1   : > { %v7908_v63 = vsel %vm7844_vm6, %v7876_v21, %v7812_v59  ;;  %v8565_v18 = vmax.f32 %v8070_v13, %v9535_v46  ;;  %v7559_v62 = vmul.f32 %v13330_v16, %v7527_v1  ;;  %v7269_v34 = vadd.f32 1.0, %v7237_v11 }
 0x4e2   : > { %v7810_v26 = vsub.f32 1.0, %v7778_v56  ;;  %v9538_v43 = vrot.slane %v8079_v36, 9  ;;  %v8566_v47 = vmax.f32 %v8078_v41, %v9536_v53  ;;  %v8567_v15 = vmax.f32 %v8077_v20, %v9537_v57 }
 0x4e3   : > { %v7653_v8 = vsub.f32 0.0, %v7205_v25  ;;  %v7591_v9 = vadd.f32 0.2548296, %v7559_v62  ;;  %10873 = vrcp.f32 %v7269_v34  ;;  %v6972_v3 = vadd.f32 %v10329_v61, %v6811_v44 }
 0x4e4   : > { %v7874_v10 = vsub.f32 0.0, %v7810_v26  ;;  %v8568_v49 = vmax.f32 %v8079_v36, %v9538_v43  ;;  %v9702_v28 = vpack.c.bf16 %v8566_v47, %v8566_v47  ;;  %v9703_v24 = vpack.c.bf16 %v8567_v15, %v8567_v15 }
 0x4e5   : > { %v7940_v31 = vadd.f32 1.0, %v7908_v63  ;;  %v9701_v59 = vpack.c.bf16 %v8565_v18, %v8565_v18  ;;  %v7140_v48 = vmul.f32 0.5, %v13225_v38  ;;  %v7138_v4 = vmul.f32 0.5, %v13237_v5  ;;  %v10189_v5 = vpop.f32.mrf.mxu0 }
 0x4e6   : > { %v7906_v13 = vsel %vm7842_vm7, %v7874_v10, %v7810_v26  ;;  %v8886_v21 = vunpack.c.l.b16 %v9702_v28  ;;  %v7623_v35 = vmul.f32 %v13330_v16, %v7591_v9  ;;  %v7685_v37 = vmul.f32 %v7653_v8, %v7205_v25 }
 0x4e7   : > { %v7938_v50 = vadd.f32 1.0, %v7906_v13  ;;  %v9704_v41 = vpack.c.bf16 %v8568_v49, %v8568_v49  ;;  %v8887_v46 = vunpack.c.l.b16 %v9703_v24  ;;  %v7073_v56 = vmul.f32 %v13134_v30, %v6972_v3 }
 0x4e8   : > { %v10872_v20 = vpop.eup %10871  ;;  %v6803_v1 = vadd.f32 %v13180_v12, %v13027_v39  ;;  %v13428_v38 = vadd.f32 %v13326_v19, %v13312_v58  ;;  %v8962_v60 = vrot.slane %v8886_v21, 7  ;;  %v7972_v11 = vmul.f32 %v7940_v31, %v7140_v48  ;;  %v10332_v19 = vpop.f32.mrf.mxu1 }
 0x4e9   : > { %v7970_v44 = vmul.f32 %v7938_v50, %v7138_v4  ;;  %v10178_v16 = vadd.f32 %v13356_v33, %v13342_v40  ;;  %v13434_v25 = vadd.f32 %v13375_v7, %v13369_v51  ;;  %v13437_v36 = vadd.f32 %v13145_v0, %v7073_v56  ;;  %v10191_v51 = vpop.f32.mrf.mxu0 }
 0x4ea   : > { %v6964_v53 = vadd.f32 %v6963_v27, %v6803_v1  ;;  %v8885_v39 = vunpack.c.l.b16 %v9701_v59  ;;  %v13439_v57 = vmul.f32 %v10872_v20, %v7623_v35  ;;  %v7725_v58 = vmul.f32 1.442695, %v7685_v37 }
 0x4eb   : > { %v8000_v12 = vmax.f32 %v7970_v44, %v7972_v11  ;;  %v8888_v63 = vunpack.c.l.b16 %v9704_v41  ;;  %v8964_v61 = vrot.slane %v8887_v46, 6  ;;  %v13442_v18 = vmul.f32 0.70710677, %v13437_v36 }
 0x4ec   : > { %v6824_v40 = vadd.f32 %v10178_v16, %v13044_v17  ;;  %v13447_v33 = vadd.f32 %v13386_v54, %v13378_v23  ;;  %v8963_v7 = vsel %vm8942_vm10, %v8962_v60, %v8885_v39  ;;  %v13451_v34 = vadd.f32 %v10189_v5, %v10188_v42  ;;  %v10192_v42 = vpop.f32.mrf.mxu0 }
 0x4ed   : > { %v8080_v26 = vcombine.high %v8000_v12, %v8000_v12  ;;  %v8087_v62 = vrot.slane %v8000_v12, %v13199_v29  ;;  %v7208_v43 = vand.u32 2147483647, %v13442_v18  ;;  %v7071_v47 = vmul.f32 %v13134_v30, %v6964_v53  ;;  %v6976_v53 = vpop.f32.mrf.mxu1 }
 0x4ee   : > { %v6985_v15 = vadd.f32 %v10332_v19, %v6824_v40  ;;  %10875 = vpow2.f32 %v7725_v58  ;;  %v8965_v23 = vsel %vm8945_vm12, %v8964_v61, %v8963_v7  ;;  %v8966_v54 = vrot.slane %v8888_v63, 5 }
 0x4ef   : > { %v8094_v8 = vrot.slane %v8080_v26, %v13199_v29  ;;  %v8095_v17 = vcombine.high %v8087_v62, %v8087_v62  ;;  %v9539_v10 = vrot.slane %v8087_v62, 9  ;;  %v7815_v9 = vsub.f32 1.0, %v13439_v57 }
 0x4f0   : > { %v7240_v3 = vmul.f32 0.3275911, %v7208_v43  ;;  %v13458_v49 = vpop.eup %10873  ;;  %v13462_v13 = vadd.f32 %v13145_v0, %v7071_v47  ;;  %v7076_v21 = vmul.f32 %v13134_v30, %v6985_v15  ;;  %v13465_v20 = vadd.f32 %v10192_v42, %v10191_v51 }
 0x4f1   : > { %v8096_v28 = vcombine.high %v8094_v8, %v8094_v8  ;;  %v9540_v24 = vrot.slane %v8095_v17, 9  ;;  %v9541_v31 = vrot.slane %v8094_v8, 9  ;;  %v8569_v59 = vmax.f32 %v8087_v62, %v9539_v10 }
 0x4f2   : > { %v7365_v48 = vmul.f32 1.0614054, %v13458_v49  ;;  %v7272_v4 = vadd.f32 1.0, %v7240_v3  ;;  %v7879_v41 = vsub.f32 0.0, %v7815_v9  ;;  %v8967_v11 = vsel %vm8948_vm15, %v8966_v54, %v8965_v23 }
 0x4f3   : > { %v9542_v50 = vrot.slane %v8096_v28, 9  ;;  %v8570_v35 = vmax.f32 %v8095_v17, %v9540_v24  ;;  %v8571_v37 = vmax.f32 %v8094_v8, %v9541_v31  ;;  %v9705_v27 = vpack.c.bf16 %v8569_v59, %v8569_v59  ;;  %v10333_v8 = vpop.f32.mrf.mxu1  ;;  %v13491_v31 = vld [vmem:[%s14201_s5] ss:$0 sm:$0xff] }
 0x4f4   : > { %v7397_v46 = vadd.f32 -1.4531521, %v7365_v48  ;;  %10877 = vrcp.f32 %v7272_v4  ;;  %v13470_v16 = vmul.f32 0.70710677, %v13462_v13  ;;  %v13473_v30 = vadd.f32 %v13145_v0, %v7076_v21 }
 0x4f5   : > { %v8572_v56 = vmax.f32 %v8096_v28, %v9542_v50  ;;  %v9706_v1 = vpack.c.bf16 %v8570_v35, %v8570_v35  ;;  %v9707_v5 = vpack.c.bf16 %v8571_v37, %v8571_v37  ;;  %v8889_v60 = vunpack.c.l.b16 %v9705_v27  ;;  %v6979_v21 = vpop.f32.mrf.mxu1  ;;  %v13498_v50 = vpop.f32.mrf.mxu0  ;;  %v13503_v27 = vld [vmem:[%s14202_s6] ss:$0 sm:$0xff] }
 0x4f6   : > { %v7429_v44 = vmul.f32 %v13458_v49, %v7397_v46  ;;  %v7656_v63 = vsub.f32 0.0, %v7208_v43  ;;  %v7206_v61 = vand.u32 2147483647, %v13470_v16  ;;  %v6816_v40 = vadd.f32 %v13196_v6, %v13036_v14 }
 0x4f7   : > { %v9708_v39 = vpack.c.bf16 %v8572_v56, %v8572_v56  ;;  %v8890_v12 = vunpack.c.l.b16 %v9706_v1  ;;  %v8891_v57 = vunpack.c.l.b16 %v9707_v5  ;;  %v8968_v58 = vrot.slane %v8889_v60, 4  ;;  %v14256_v1 = vld [vmem:[#allocation14_spill] sm:$0xff] }
 0x4f8   : > { %v7461_v19 = vadd.f32 1.4214138, %v7429_v44  ;;  %vm7847_vm8 = vcmp.lt.f32.partialorder %v13266_v2, 0.0  ;;  %v7238_v47 = vmul.f32 0.3275911, %v7206_v61  ;;  %v6977_v54 = vadd.f32 %v6976_v53, %v6816_v40  ;;  %v13521_v40 = vpop.f32.mrf.mxu0 }
 0x4f9   : > { %v8892_v51 = vunpack.c.l.b16 %v9708_v39  ;;  %v8969_v7 = vsel %vm8951_vm0, %v8968_v58, %v8967_v11  ;;  %v8970_v26 = vrot.slane %v8890_v12, 3  ;;  %v8972_v62 = vrot.slane %v8891_v57, 2 }
 0x4fa   : > { %v7493_v0 = vmul.f32 %v13458_v49, %v7461_v19  ;;  %v13482_v15 = vmul.f32 0.70710677, %v13473_v30  ;;  %v7911_v23 = vsel %vm7847_vm8, %v7879_v41, %v7815_v9  ;;  %v7688_v42 = vmul.f32 %v7656_v63, %v7208_v43  ;;  %v10336_v63 = vpop.f32.mrf.mxu1 }
 0x4fb   : > { %v8971_v17 = vsel %vm8954_vm1, %v8970_v26, %v8969_v7  ;;  %v8974_v10 = vrot.slane %v8892_v51, 1  ;;  %v10876_v14 = vpop.eup %10875  ;;  %v7270_v28 = vadd.f32 1.0, %v7238_v47  ;;  %v7074_v59 = vmul.f32 %v13491_v31, %v6977_v54  ;;  %v14257_v7 = vld [vmem:[#allocation17_spill] sm:$0xff] }
 0x4fc   : > { %v8973_v6 = vsel %vm8957_vm3, %v8972_v62, %v8971_v17  ;;  %v7525_v3 = vadd.f32 -0.28449672, %v7493_v0  ;;  %v7211_v24 = vand.u32 2147483647, %v13482_v15  ;;  %v6827_v9 = vadd.f32 %v13434_v25, %v13049_v22 }
 0x4fd   : > { %v8975_v2 = vsel %vm8960_vm5, %v8974_v10, %v8973_v6  ;;  %v7143_v4 = vmul.f32 0.5, %v13250_v32  ;;  %10879 = vrcp.f32 %v7270_v28  ;;  %v7654_v35 = vsub.f32 0.0, %v7206_v61  ;;  %v14255_v32 = vld [vmem:[#allocation31_spill] sm:$0xff] }
 0x4fe   : > { %v9061_v48 = vpack.c.b16 %v8975_v2, %v8975_v2  ;;  %v7557_v43 = vmul.f32 %v13458_v49, %v7525_v3  ;;  %v7243_v37 = vmul.f32 0.3275911, %v7211_v24  ;;  %v13506_v41 = vadd.f32 %v13503_v27, %v7074_v59  ;;  %v13534_v3 = vpop.f32.mrf.mxu0 }
 0x4ff   : > { %v6988_v22 = vadd.f32 %v10333_v8, %v6827_v9  ;;  %v7943_v25 = vadd.f32 1.0, %v7911_v23  ;;  %v7141_v46 = vmul.f32 0.5, %v14255_v32  ;;  %v6819_v5 = vadd.f32 %v13428_v38, %v14256_v1 }
 0x500   : > { %9077 = vst [vmem:[%s13412_s22 + $0x4] sm:$0xf] %v9061_v48  ;;  %v7589_v56 = vadd.f32 0.2548296, %v7557_v43  ;;  %vm7845_vm2 = vcmp.lt.f32.partialorder %v13319_v45, 0.0  ;;  %v7275_v44 = vadd.f32 1.0, %v7243_v37  ;;  %v7686_v38 = vmul.f32 %v7654_v35, %v7206_v61 }
 0x501   : > { %v13512_v60 = vpop.eup %10877  ;;  %v7731_v11 = vmul.f32 1.442695, %v7688_v42  ;;  %v7659_v53 = vsub.f32 0.0, %v7211_v24  ;;  %v13516_v39 = vmul.f32 0.70710677, %v13506_v41  ;;  %v7077_v58 = vmul.f32 %v13491_v31, %v6988_v22  ;;  %v13555_v22 = vpop.f32.mrf.mxu0 }
 0x502   : > { %v7621_v12 = vmul.f32 %v13458_v49, %v7589_v56  ;;  %v7368_v57 = vmul.f32 1.0614054, %v13512_v60  ;;  %v6980_v19 = vadd.f32 %v6979_v21, %v6819_v5  ;;  %10881 = vrcp.f32 %v7275_v44 }
 0x503   : > { %v7209_v51 = vand.u32 2147483647, %v13516_v39  ;;  %v6840_v26 = vadd.f32 %v13451_v34, %v14257_v7  ;;  %v7116_v47 = vadd.f32 %v13503_v27, %v7077_v58  ;;  %v13529_v8 = vmul.f32 0.5, %v13437_v36 }
 0x504   : > { %v7781_v62 = vmul.f32 %v10876_v14, %v7621_v12  ;;  %v7400_v0 = vadd.f32 -1.4531521, %v7368_v57  ;;  %v7075_v49 = vmul.f32 %v13491_v31, %v6980_v19  ;;  %v7691_v17 = vmul.f32 %v7659_v53, %v7211_v24  ;;  %v13566_v19 = vpop.f32.mrf.mxu0 }
 0x505   : > { %v7241_v10 = vmul.f32 0.3275911, %v7209_v51  ;;  %v7001_v23 = vadd.f32 %v10336_v63, %v6840_v26  ;;  %10883 = vpow2.f32 %v7731_v11  ;;  %v13532_v6 = vmul.f32 0.70710677, %v7116_v47 }
 0x506   : > { %v7813_v54 = vsub.f32 1.0, %v7781_v62  ;;  %v7432_v61 = vmul.f32 %v13512_v60, %v7400_v0  ;;  %v7975_v34 = vmul.f32 %v7943_v25, %v7143_v4  ;;  %v7727_v14 = vmul.f32 1.442695, %v7686_v38 }
 0x507   : > { %v7273_v42 = vadd.f32 1.0, %v7241_v10  ;;  %v13537_v28 = vadd.f32 %v13503_v27, %v7075_v49  ;;  %v13540_v24 = vmul.f32 0.5, %v13462_v13  ;;  %v7212_v59 = vand.u32 2147483647, %v13532_v6 }
 0x508   : > { %v7877_v2 = vsub.f32 0.0, %v7813_v54  ;;  %v7464_v36 = vadd.f32 1.4214138, %v7432_v61  ;;  %v7737_v9 = vmul.f32 1.442695, %v7691_v17  ;;  %v7080_v43 = vmul.f32 %v13491_v31, %v7001_v23 }
 0x509   : > { %10885 = vrcp.f32 %v7273_v42  ;;  %v13544_v48 = vmul.f32 0.70710677, %v13537_v28  ;;  %v13551_v35 = vmul.f32 0.5, %v13473_v30  ;;  %v7244_v37 = vmul.f32 0.3275911, %v7212_v59  ;;  %v13582_v42 = vpop.f32.mrf.mxu0 }
 0x50a   : > { %v7909_v4 = vsel %vm7845_vm2, %v7877_v2, %v7813_v54  ;;  %v7496_v21 = vmul.f32 %v13512_v60, %v7464_v36  ;;  %v13553_v13 = vpop.eup %10879  ;;  %v7657_v32 = vsub.f32 0.0, %v7209_v51  ;;  %v7660_v56 = vsub.f32 0.0, %v7212_v59 }
 0x50b   : > { %v7941_v25 = vadd.f32 1.0, %v7909_v4  ;;  %v7210_v1 = vand.u32 2147483647, %v13544_v48  ;;  %v7366_v11 = vmul.f32 1.0614054, %v13553_v13  ;;  %10887 = vpow2.f32 %v7727_v14 }
 0x50c   : > { %v7528_v5 = vadd.f32 -0.28449672, %v7496_v21  ;;  %v7276_v45 = vadd.f32 1.0, %v7244_v37  ;;  %10889 = vpow2.f32 %v7737_v9  ;;  %v13560_v30 = vadd.f32 %v13503_v27, %v7080_v43 }
 0x50d   : > { %v7973_v44 = vmul.f32 %v7941_v25, %v7141_v46  ;;  %v7242_v53 = vmul.f32 0.3275911, %v7210_v1  ;;  %v7398_v57 = vadd.f32 -1.4531521, %v7366_v11  ;;  %v13564_v58 = vmul.f32 0.5, %v13506_v41 }
 0x50e   : > { %v7560_v12 = vmul.f32 %v13512_v60, %v7528_v5  ;;  %10891 = vrcp.f32 %v7276_v45  ;;  %v7689_v38 = vmul.f32 %v7657_v32, %v7209_v51  ;;  %v7692_v7 = vmul.f32 %v7660_v56, %v7212_v59 }
 0x50f   : > { %v8001_v63 = vmax.f32 %v7973_v44, %v7975_v34  ;;  %v7274_v26 = vadd.f32 1.0, %v7242_v53  ;;  %v13568_v62 = vpop.eup %10881  ;;  %v7430_v0 = vmul.f32 %v13553_v13, %v7398_v57  ;;  %v7658_v49 = vsub.f32 0.0, %v7210_v1  ;;  %v13591_v53 = vpop.f32.mrf.mxu0 }
 0x510   : > { %v7592_v46 = vadd.f32 0.2548296, %v7560_v12  ;;  %v13572_v17 = vmul.f32 0.70710677, %v13560_v30  ;;  %v7371_v23 = vmul.f32 1.0614054, %v13568_v62 }
 0x511   : > { %v8097_v10 = vcombine.high %v8001_v63, %v8001_v63  ;;  %v8104_v41 = vrot.slane %v8001_v63, %v13199_v29  ;;  %10893 = vrcp.f32 %v7274_v26  ;;  %v7462_v51 = vadd.f32 1.4214138, %v7430_v0 }
 0x512   : > { %v7624_v54 = vmul.f32 %v13512_v60, %v7592_v46  ;;  %v13577_v61 = vmul.f32 0.5, %v7116_v47  ;;  %v13580_v34 = vand.u32 2147483647, %v13572_v17  ;;  %v10884_v14 = vpop.eup %10883  ;;  %v7403_v9 = vadd.f32 -1.4531521, %v7371_v23 }
 0x513   : > { %v8111_v2 = vrot.slane %v8097_v10, %v13199_v29  ;;  %v8112_v36 = vcombine.high %v8104_v41, %v8104_v41  ;;  %v9543_v59 = vrot.slane %v8104_v41, 9  ;;  %vm7848_vm4 = vcmp.lt.f32.partialorder %v13442_v18, 0.0 }
 0x514   : > { %v7784_v43 = vmul.f32 %v10884_v14, %v7624_v54  ;;  %v7494_v4 = vmul.f32 %v13553_v13, %v7462_v51  ;;  %v7733_v60 = vmul.f32 1.442695, %v7689_v38  ;;  %v7690_v21 = vmul.f32 %v7658_v49, %v7210_v1 }
 0x515   : > { %v8113_v47 = vcombine.high %v8111_v2, %v8111_v2  ;;  %v9544_v37 = vrot.slane %v8112_v36, 9  ;;  %v9545_v25 = vrot.slane %v8111_v2, 9  ;;  %v7739_v32 = vmul.f32 1.442695, %v7692_v7 }
 0x516   : > { %v13587_v56 = vpop.eup %10885  ;;  %v7816_v5 = vsub.f32 1.0, %v7784_v43  ;;  %v7526_v11 = vadd.f32 -0.28449672, %v7494_v4  ;;  %v7435_v45 = vmul.f32 %v13568_v62, %v7403_v9  ;;  %v7247_v44 = vmul.f32 0.3275911, %v13580_v34 }
 0x517   : > { %v9546_v12 = vrot.slane %v8113_v47, 9  ;;  %v8573_v57 = vmax.f32 %v8104_v41, %v9543_v59  ;;  %v8574_v63 = vmax.f32 %v8112_v36, %v9544_v37  ;;  %v8575_v26 = vmax.f32 %v8111_v2, %v9545_v25  ;;  %v13598_v2 = vpop.f32.mrf.mxu0 }
 0x518   : > { %v7558_v1 = vmul.f32 %v13553_v13, %v7526_v11  ;;  %v7467_v38 = vadd.f32 1.4214138, %v7435_v45  ;;  %v7369_v46 = vmul.f32 1.0614054, %v13587_v56  ;;  %v7735_v7 = vmul.f32 1.442695, %v7690_v21  ;;  %v10888_v0 = vpop.eup %10887 }
 0x519   : > { %v8576_v49 = vmax.f32 %v8113_v47, %v9546_v12  ;;  %v9710_v10 = vpack.c.bf16 %v8574_v63, %v8574_v63  ;;  %v9711_v23 = vpack.c.bf16 %v8575_v26, %v8575_v26  ;;  %v7880_v54 = vsub.f32 0.0, %v7816_v5  ;;  %v10890_v51 = vpop.eup %10889  ;;  %v13609_v26 = vpop.f32.mrf.mxu0 }
 0x51a   : > { %v7590_v14 = vadd.f32 0.2548296, %v7558_v1  ;;  %v7499_v9 = vmul.f32 %v13568_v62, %v7467_v38  ;;  %v7401_v43 = vadd.f32 -1.4531521, %v7369_v46  ;;  %10895 = vpow2.f32 %v7733_v60 }
 0x51b   : > { %v13596_v41 = vpop.eup %10891  ;;  %v9709_v36 = vpack.c.bf16 %v8573_v57, %v8573_v57  ;;  %v8894_v59 = vunpack.c.l.b16 %v9710_v10  ;;  %vm7846_vm13 = vcmp.lt.f32.partialorder %v13470_v16, 0.0  ;;  %10897 = vpow2.f32 %v7739_v32 }
 0x51c   : > { %v7279_v4 = vadd.f32 1.0, %v7247_v44  ;;  %v7622_v21 = vmul.f32 %v13553_v13, %v7590_v14  ;;  %v7531_v47 = vadd.f32 -0.28449672, %v7499_v9  ;;  %v7433_v37 = vmul.f32 %v13587_v56, %v7401_v43  ;;  %v13619_v43 = vpop.f32.mrf.mxu0 }
 0x51d   : > { %v7372_v25 = vmul.f32 1.0614054, %v13596_v41  ;;  %v9712_v11 = vpack.c.bf16 %v8576_v49, %v8576_v49  ;;  %v8895_v45 = vunpack.c.l.b16 %v9711_v23  ;;  %v7912_v60 = vsel %vm7848_vm4, %v7880_v54, %v7816_v5 }
 0x51e   : > { %10899 = vpow2.f32 %v7735_v7  ;;  %v13606_v12 = vpop.eup %10893  ;;  %v7782_v57 = vmul.f32 %v10888_v0, %v7622_v21  ;;  %v7563_v63 = vmul.f32 %v13568_v62, %v7531_v47  ;;  %v7465_v32 = vadd.f32 1.4214138, %v7433_v37  ;;  %v6992_v47 = vpop.f32.mrf.mxu1 }
 0x51f   : > { %v7404_v44 = vadd.f32 -1.4531521, %v7372_v25  ;;  %v8976_v13 = vrot.slane %v8894_v59, 7  ;;  %v13612_v1 = vmul.f32 0.5, %v13537_v28  ;;  %v7370_v38 = vmul.f32 1.0614054, %v13606_v12 }
 0x520   : > { %10901 = vrcp.f32 %v7279_v4  ;;  %v8893_v46 = vunpack.c.l.b16 %v9709_v36  ;;  %v7814_v18 = vsub.f32 1.0, %v7782_v57  ;;  %v7595_v5 = vadd.f32 0.2548296, %v7563_v63 }
 0x521   : > { %v7497_v7 = vmul.f32 %v13587_v56, %v7465_v32  ;;  %v8896_v49 = vunpack.c.l.b16 %v9712_v11  ;;  %v7944_v0 = vadd.f32 1.0, %v7912_v60  ;;  %vm7851_vm14 = vcmp.lt.f32.partialorder %v13482_v15, 0.0 }
 0x522   : > { %v7436_v10 = vmul.f32 %v13596_v41, %v7404_v44  ;;  %v7402_v23 = vadd.f32 -1.4531521, %v7370_v38  ;;  %v8978_v54 = vrot.slane %v8895_v45, 6  ;;  %v7878_v14 = vsub.f32 0.0, %v7814_v18  ;;  %v14258_v45 = vld [vmem:[#allocation15_spill] sm:$0xff] }
 0x523   : > { %v7627_v28 = vmul.f32 %v13568_v62, %v7595_v5  ;;  %v7529_v9 = vadd.f32 -0.28449672, %v7497_v7  ;;  %v8977_v36 = vsel %vm8942_vm10, %v8976_v13, %v8893_v46  ;;  %v7663_v21 = vsub.f32 0.0, %v13580_v34  ;;  %v13631_v7 = vpop.f32.mrf.mxu0 }
 0x524   : > { %v7468_v59 = vadd.f32 1.4214138, %v7436_v10  ;;  %v7434_v4 = vmul.f32 %v13606_v12, %v7402_v23  ;;  %v7910_v37 = vsel %vm7846_vm13, %v7878_v14, %v7814_v18  ;;  %v6832_v62 = vadd.f32 %v13447_v33, %v14258_v45 }
 0x525   : > { %v7787_v25 = vmul.f32 %v10890_v51, %v7627_v28  ;;  %v7561_v11 = vmul.f32 %v13587_v56, %v7529_v9  ;;  %v8980_v60 = vrot.slane %v8896_v49, 5  ;;  %v7942_v57 = vadd.f32 1.0, %v7910_v37 }
 0x526   : > { %v7500_v63 = vmul.f32 %v13596_v41, %v7468_v59  ;;  %v7466_v32 = vadd.f32 1.4214138, %v7434_v4  ;;  %v8979_v44 = vsel %vm8945_vm12, %v8978_v54, %v8977_v36  ;;  %v6993_v46 = vadd.f32 %v6992_v47, %v6832_v62 }
 0x527   : > { %v7819_v13 = vsub.f32 1.0, %v7787_v25  ;;  %v7593_v38 = vadd.f32 0.2548296, %v7561_v11  ;;  %v10896_v5 = vpop.eup %10895  ;;  %v7976_v16 = vmul.f32 %v7944_v0, %v13529_v8  ;;  %v7974_v51 = vmul.f32 %v7942_v57, %v13540_v24 }
 0x528   : > { %vm7849_vm9 = vcmp.lt.f32.partialorder %v13516_v39, 0.0  ;;  %v7532_v33 = vadd.f32 -0.28449672, %v7500_v63  ;;  %v7498_v18 = vmul.f32 %v13606_v12, %v7466_v32  ;;  %v10898_v49 = vpop.eup %10897  ;;  %v7695_v54 = vmul.f32 %v7663_v21, %v13580_v34  ;;  %v13653_v21 = vpop.f32.mrf.mxu0 }
 0x529   : > { %v7883_v10 = vsub.f32 0.0, %v7819_v13  ;;  %v7625_v23 = vmul.f32 %v13587_v56, %v7593_v38  ;;  %v7078_v14 = vmul.f32 %v13491_v31, %v6993_v46  ;;  %v8002_v28 = vmax.f32 %v7974_v51, %v7976_v16  ;;  %v14259_v56 = vld [vmem:[#allocation18_spill] sm:$0xff] }
 0x52a   : > { %v13641_v9 = vsel %vm8948_vm15, %v8980_v60, %v8979_v44  ;;  %v7564_v8 = vmul.f32 %v13596_v41, %v7532_v33  ;;  %v7530_v24 = vadd.f32 -0.28449672, %v7498_v18  ;;  %v13651_v34 = vadd.f32 %v13465_v20, %v14259_v56  ;;  %v13669_v16 = vpop.f32.mrf.mxu0 }
 0x52b   : > { %v10900_v0 = vpop.eup %10899  ;;  %v7915_v36 = vsel %vm7851_vm14, %v7883_v10, %v7819_v13  ;;  %v7785_v59 = vmul.f32 %v10896_v5, %v7625_v23  ;;  %v13647_v4 = vadd.f32 %v13503_v27, %v7078_v14  ;;  %v8114_v47 = vcombine.high %v8002_v28, %v8002_v28 }
 0x52c   : > { %v8121_v37 = vrot.slane %v8002_v28, %v13199_v29  ;;  %v7947_v25 = vadd.f32 1.0, %v7915_v36  ;;  %v7596_v11 = vadd.f32 0.2548296, %v7564_v8  ;;  %v7562_v15 = vmul.f32 %v13606_v12, %v7530_v24 }
 0x52d   : > { %v13656_v45 = vpop.eup %10901  ;;  %v7817_v62 = vsub.f32 1.0, %v7785_v59  ;;  %v13659_v60 = vmul.f32 1.442695, %v7695_v54  ;;  %v13662_v57 = vmul.f32 0.70710677, %v13647_v4  ;;  %v8128_v20 = vrot.slane %v8114_v47, %v13199_v29 }
 0x52e   : > { %v8129_v63 = vcombine.high %v8121_v37, %v8121_v37  ;;  %v9547_v32 = vrot.slane %v8121_v37, 9  ;;  %v7979_v44 = vmul.f32 %v7947_v25, %v13551_v35  ;;  %vm7852_vm11 = vcmp.lt.f32.partialorder %v13532_v6, 0.0  ;;  %v13676_v25 = vpop.f32.mrf.mxu0  ;;  %v10337_v6 = vpop.f32.mrf.mxu1 }
 0x52f   : > { %v7881_v13 = vsub.f32 0.0, %v7817_v62  ;;  %v7628_v38 = vmul.f32 %v13596_v41, %v7596_v11  ;;  %v7594_v46 = vadd.f32 0.2548296, %v7562_v15  ;;  %v7375_v5 = vmul.f32 1.0614054, %v13656_v45 }
 0x530   : > { %v8130_v51 = vcombine.high %v8128_v20, %v8128_v20  ;;  %v9548_v33 = vrot.slane %v8129_v63, 9  ;;  %v9549_v18 = vrot.slane %v8128_v20, 9  ;;  %v8577_v10 = vmax.f32 %v8121_v37, %v9547_v32 }
 0x531   : > { %vm7850_vm6 = vcmp.lt.f32.partialorder %v13544_v48, 0.0  ;;  %v7913_v23 = vsel %vm7849_vm9, %v7881_v13, %v7817_v62  ;;  %v7788_v35 = vmul.f32 %v10898_v49, %v7628_v38  ;;  %v7626_v54 = vmul.f32 %v13606_v12, %v7594_v46 }
 0x532   : > { %v7407_v14 = vadd.f32 -1.4531521, %v7375_v5  ;;  %v9550_v28 = vrot.slane %v8130_v51, 9  ;;  %v8578_v41 = vmax.f32 %v8129_v63, %v9548_v33  ;;  %v8579_v8 = vmax.f32 %v8128_v20, %v9549_v18 }
 0x533   : > { %v9713_v24 = vpack.c.bf16 %v8577_v10, %v8577_v10  ;;  %v7945_v36 = vadd.f32 1.0, %v7913_v23  ;;  %v7820_v59 = vsub.f32 1.0, %v7788_v35  ;;  %v7786_v56 = vmul.f32 %v10900_v0, %v7626_v54 }
 0x534   : > { %v7439_v47 = vmul.f32 %v13656_v45, %v7407_v14  ;;  %v8580_v37 = vmax.f32 %v8130_v51, %v9550_v28  ;;  %v9714_v11 = vpack.c.bf16 %v8578_v41, %v8578_v41  ;;  %v9715_v15 = vpack.c.bf16 %v8579_v8, %v8579_v8  ;;  %v13682_v51 = vpop.f32.mrf.mxu0 }
 0x535   : > { %v8897_v39 = vunpack.c.l.b16 %v9713_v24  ;;  %v7977_v49 = vmul.f32 %v7945_v36, %v13564_v58  ;;  %v7884_v62 = vsub.f32 0.0, %v7820_v59  ;;  %v7818_v12 = vsub.f32 1.0, %v7786_v56 }
 0x536   : > { %v7471_v32 = vadd.f32 1.4214138, %v7439_v47  ;;  %v9716_v13 = vpack.c.bf16 %v8580_v37, %v8580_v37  ;;  %v8898_v63 = vunpack.c.l.b16 %v9714_v11  ;;  %v8899_v20 = vunpack.c.l.b16 %v9715_v15  ;;  %v13692_v47 = vpop.f32.mrf.mxu0 }
 0x537   : > { %v8982_v38 = vrot.slane %v8897_v39, 4  ;;  %v8003_v46 = vmax.f32 %v7977_v49, %v7979_v44  ;;  %v7916_v0 = vsel %vm7852_vm11, %v7884_v62, %v7820_v59  ;;  %v7882_v5 = vsub.f32 0.0, %v7818_v12 }
 0x538   : > { %v7503_v33 = vmul.f32 %v13656_v45, %v7471_v32  ;;  %v8900_v18 = vunpack.c.l.b16 %v9716_v13  ;;  %v8984_v10 = vrot.slane %v8898_v63, 3  ;;  %v8986_v23 = vrot.slane %v8899_v20, 2 }
 0x539   : > { %v8983_v58 = vsel %vm8951_vm0, %v8982_v38, %v13641_v9  ;;  %v8131_v35 = vcombine.high %v8003_v46, %v8003_v46  ;;  %v8138_v54 = vrot.slane %v8003_v46, %v13199_v29  ;;  %v7948_v14 = vadd.f32 1.0, %v7916_v0 }
 0x53a   : > { %v7914_v44 = vsel %vm7850_vm6, %v7882_v5, %v7818_v12  ;;  %v8985_v28 = vsel %vm8954_vm1, %v8984_v10, %v8983_v58  ;;  %v8988_v41 = vrot.slane %v8900_v18, 1  ;;  %v7535_v24 = vadd.f32 -0.28449672, %v7503_v33 }
 0x53b   : > { %v7946_v8 = vadd.f32 1.0, %v7914_v44  ;;  %v8987_v36 = vsel %vm8957_vm3, %v8986_v23, %v8985_v28  ;;  %v8145_v59 = vrot.slane %v8131_v35, %v13199_v29  ;;  %v8146_v9 = vcombine.high %v8138_v54, %v8138_v54  ;;  %v6995_v44 = vpop.f32.mrf.mxu1 }
 0x53c   : > { %v9551_v56 = vrot.slane %v8138_v54, 9  ;;  %v8989_v37 = vsel %vm8960_vm5, %v8988_v41, %v8987_v36  ;;  %v7980_v48 = vmul.f32 %v7948_v14, %v13577_v61  ;;  %v7004_v15 = vadd.f32 %v10337_v6, %v13651_v34  ;;  %v13706_v34 = vpop.f32.mrf.mxu0 }
 0x53d   : > { %v7978_v11 = vmul.f32 %v7946_v8, %v13612_v1  ;;  %v9062_v39 = vpack.c.b16 %v8989_v37, %v8989_v37  ;;  %v8147_v49 = vcombine.high %v8145_v59, %v8145_v59  ;;  %v9552_v62 = vrot.slane %v8146_v9, 9 }
 0x53e   : > { %v9553_v12 = vrot.slane %v8145_v59, 9  ;;  %v8581_v32 = vmax.f32 %v8138_v54, %v9551_v56  ;;  %v7567_v63 = vmul.f32 %v13656_v45, %v7535_v24  ;;  %10903 = vpow2.f32 %v13659_v60  ;;  %v13712_v41 = vpop.f32.mrf.mxu0 }
 0x53f   : > { %v8004_v13 = vmax.f32 %v7978_v11, %v7980_v48  ;;  %9078 = vst [vmem:[%s13412_s22 + $0x8] sm:$0xf] %v9062_v39  ;;  %v9554_v20 = vrot.slane %v8147_v49, 9  ;;  %v8582_v38 = vmax.f32 %v8146_v9, %v9552_v62  ;;  %v13702_v61 = vand.u32 2147483647, %v13662_v57  ;;  %v10340_v62 = vpop.f32.mrf.mxu1 }
 0x540   : > { %v8583_v46 = vmax.f32 %v8145_v59, %v9553_v12  ;;  %v10187_v1 = vadd.f32 %v13410_v55, %v13398_v52  ;;  %v7081_v33 = vmul.f32 %v13491_v31, %v7004_v15  ;;  %v9717_v58 = vpack.c.bf16 %v8581_v32, %v8581_v32 }
 0x541   : > { %v8148_v0 = vcombine.high %v8004_v13, %v8004_v13  ;;  %v8155_v5 = vrot.slane %v8004_v13, %v13199_v29  ;;  %v8584_v18 = vmax.f32 %v8147_v49, %v9554_v20  ;;  %v9718_v60 = vpack.c.bf16 %v8582_v38, %v8582_v38  ;;  %v13718_v20 = vpop.f32.mrf.mxu0 }
 0x542   : > { %v9719_v10 = vpack.c.bf16 %v8583_v46, %v8583_v46  ;;  %v7599_v14 = vadd.f32 0.2548296, %v7567_v63  ;;  %v7245_v55 = vmul.f32 0.3275911, %v13702_v61  ;;  %v8901_v9 = vunpack.c.l.b16 %v9717_v58 }
 0x543   : > { %v8162_v23 = vrot.slane %v8148_v0, %v13199_v29  ;;  %v8163_v35 = vcombine.high %v8155_v5, %v8155_v5  ;;  %v9555_v54 = vrot.slane %v8155_v5, 9  ;;  %v9720_v6 = vpack.c.bf16 %v8584_v18, %v8584_v18 }
 0x544   : > { %v8902_v28 = vunpack.c.l.b16 %v9718_v60  ;;  %v8903_v52 = vunpack.c.l.b16 %v9719_v10  ;;  %v7277_v13 = vadd.f32 1.0, %v7245_v55  ;;  %v13716_v63 = vadd.f32 %v13503_v27, %v7081_v33 }
 0x545   : > { %v8164_v8 = vcombine.high %v8162_v23, %v8162_v23  ;;  %v9556_v24 = vrot.slane %v8163_v35, 9  ;;  %v9557_v36 = vrot.slane %v8162_v23, 9  ;;  %v8585_v59 = vmax.f32 %v8155_v5, %v9555_v54  ;;  %v7008_v54 = vpop.f32.mrf.mxu1 }
 0x546   : > { %v8904_v56 = vunpack.c.l.b16 %v9720_v6  ;;  %v8990_v37 = vrot.slane %v8902_v28, 7  ;;  %v8992_v48 = vrot.slane %v8903_v52, 6  ;;  %v10196_v18 = vadd.f32 %v13521_v40, %v13498_v50  ;;  %v13732_v40 = vpop.f32.mrf.mxu0 }
 0x547   : > { %v9558_v11 = vrot.slane %v8164_v8, 9  ;;  %v8586_v15 = vmax.f32 %v8163_v35, %v9556_v24  ;;  %v8587_v39 = vmax.f32 %v8162_v23, %v9557_v36  ;;  %v9721_v49 = vpack.c.bf16 %v8585_v59, %v8585_v59  ;;  %v14260_v24 = vld [vmem:[#allocation16_spill] sm:$0xff] }
 0x548   : > { %v8991_v12 = vsel %vm8942_vm10, %v8990_v37, %v8901_v9  ;;  %v8994_v32 = vrot.slane %v8904_v56, 5  ;;  %v7631_v60 = vmul.f32 %v13656_v45, %v7599_v14  ;;  %10905 = vrcp.f32 %v7277_v13 }
 0x549   : > { %v8993_v38 = vsel %vm8945_vm12, %v8992_v48, %v8991_v12  ;;  %v8588_v46 = vmax.f32 %v8164_v8, %v9558_v11  ;;  %v9722_v0 = vpack.c.bf16 %v8586_v15, %v8586_v15  ;;  %v9723_v5 = vpack.c.bf16 %v8587_v39, %v8587_v39  ;;  %v14261_v48 = vld [vmem:[#allocation21_spill] sm:$0xff]  ;;  %v10341_v15 = vpop.f32.mrf.mxu1 }
 0x54a   : > { %v8905_v58 = vunpack.c.l.b16 %v9721_v49  ;;  %v8995_v33 = vsel %vm8948_vm15, %v8994_v32, %v8993_v38  ;;  %v10199_v28 = vadd.f32 %v13555_v22, %v13534_v3  ;;  %v10202_v52 = vadd.f32 %v13582_v42, %v13566_v19  ;;  %v10224_v19 = vpop.f32.mrf.mxu0  ;;  %v14262_v38 = vld [vmem:[#allocation19_spill] sm:$0xff] }
 0x54b   : > { %v9724_v10 = vpack.c.bf16 %v8588_v46, %v8588_v46  ;;  %v8906_v23 = vunpack.c.l.b16 %v9722_v0  ;;  %v8907_v35 = vunpack.c.l.b16 %v9723_v5  ;;  %v10904_v6 = vpop.eup %10903  ;;  %v13730_v50 = vmul.f32 0.70710677, %v13716_v63 }
 0x54c   : > { %v8996_v55 = vrot.slane %v8905_v58, 4  ;;  %v6835_v36 = vadd.f32 %v10187_v1, %v14260_v24  ;;  %v13736_v9 = vmul.f32 %v10904_v6, %v7631_v60  ;;  %v7661_v3 = vsub.f32 0.0, %v13702_v61 }
 0x54d   : > { %v8908_v45 = vunpack.c.l.b16 %v9724_v10  ;;  %v8998_v14 = vrot.slane %v8906_v23, 3  ;;  %v9000_v8 = vrot.slane %v8907_v35, 2  ;;  %v13740_v22 = vand.u32 2147483647, %v13730_v50 }
 0x54e   : > { %v8997_v59 = vsel %vm8951_vm0, %v8996_v55, %v8995_v33  ;;  %v6996_v37 = vadd.f32 %v6995_v44, %v6835_v36  ;;  %v6856_v11 = vadd.f32 %v10202_v52, %v14261_v48  ;;  %v10205_v1 = vadd.f32 %v13598_v2, %v13591_v53 }
 0x54f   : > { %v8999_v42 = vsel %vm8954_vm1, %v8998_v14, %v8997_v59  ;;  %v9002_v56 = vrot.slane %v8908_v45, 1  ;;  %v13748_v39 = vadd.f32 %v13619_v43, %v13609_v26  ;;  %v7248_v12 = vmul.f32 0.3275911, %v13740_v22  ;;  %v10225_v43 = vpop.f32.mrf.mxu0 }
 0x550   : > { %v9001_v49 = vsel %vm8957_vm3, %v9000_v8, %v8999_v42  ;;  %v7079_v13 = vmul.f32 %v13491_v31, %v6996_v37  ;;  %v7017_v44 = vadd.f32 %v10340_v62, %v6856_v11  ;;  %v6848_v46 = vadd.f32 %v10196_v18, %v14262_v38  ;;  %v7011_v62 = vpop.f32.mrf.mxu1 }
 0x551   : > { %v9003_v32 = vsel %vm8960_vm5, %v9002_v56, %v9001_v49  ;;  %v13757_v0 = vadd.f32 %v13653_v21, %v13631_v7  ;;  %v7823_v2 = vsub.f32 1.0, %v13736_v9  ;;  %v7280_v26 = vadd.f32 1.0, %v7248_v12  ;;  %v14263_v21 = vld [vmem:[#allocation22_spill] sm:$0xff] }
 0x552   : > { %v9063_v53 = vpack.c.b16 %v9003_v32, %v9003_v32  ;;  %v7693_v5 = vmul.f32 %v7661_v3, %v13702_v61  ;;  %v13762_v58 = vadd.f32 %v13503_v27, %v7079_v13  ;;  %v7084_v60 = vmul.f32 %v13491_v31, %v7017_v44  ;;  %v10344_v24 = vpop.f32.mrf.mxu1 }
 0x553   : > { %v7009_v10 = vadd.f32 %v7008_v54, %v6848_v46  ;;  %v10214_v18 = vadd.f32 %v13676_v25, %v13669_v16  ;;  %v13769_v7 = vadd.f32 %v13692_v47, %v13682_v51  ;;  %10907 = vrcp.f32 %v7280_v26  ;;  %v14264_v54 = vld [vmem:[#allocation20_spill] sm:$0xff] }
 0x554   : > { %9079 = vst [vmem:[%s13412_s22 + $0xc] sm:$0xf] %v9063_v53  ;;  %v6859_v23 = vadd.f32 %v10205_v1, %v14263_v21  ;;  %v13774_v61 = vmul.f32 0.70710677, %v13762_v58  ;;  %v13777_v35 = vadd.f32 %v13503_v27, %v7084_v60  ;;  %v6851_v6 = vadd.f32 %v10199_v28, %v14264_v54 }
 0x555   : > { %v7082_v33 = vmul.f32 %v13491_v31, %v7009_v10  ;;  %v13783_v16 = vadd.f32 %v13712_v41, %v13706_v34  ;;  %v13785_v25 = vadd.f32 %v10225_v43, %v10224_v19  ;;  %v7887_v51 = vsub.f32 0.0, %v7823_v2  ;;  %v13787_v52 = vpop.eup %10905  ;;  %v14265_v41 = vld [vmem:[#allocation25_spill] sm:$0xff] }
 0x556   : > { %v7020_v47 = vadd.f32 %v10341_v15, %v6859_v23  ;;  %v7741_v55 = vmul.f32 1.442695, %v7693_v5  ;;  %v7214_v45 = vand.u32 2147483647, %v13774_v61  ;;  %v13791_v14 = vmul.f32 0.70710677, %v13777_v35 }
 0x557   : > { %v7012_v8 = vadd.f32 %v7011_v62, %v6851_v6  ;;  %v7373_v28 = vmul.f32 1.0614054, %v13787_v52  ;;  %v13795_v36 = vadd.f32 %v13503_v27, %v7082_v33  ;;  %v6872_v59 = vadd.f32 %v10214_v18, %v14265_v41 }
 0x558   : > { %v7085_v34 = vmul.f32 %v13491_v31, %v7020_v47  ;;  %v7151_v9 = vmul.f32 0.5, %v13560_v30  ;;  %v7664_v3 = vsub.f32 0.0, %v13740_v22  ;;  %v7246_v19 = vmul.f32 0.3275911, %v7214_v45 }
 0x559   : > { %v7219_v42 = vand.u32 2147483647, %v13791_v14  ;;  %vm7855_vm7 = vcmp.lt.f32.partialorder %v13572_v17, 0.0  ;;  %v7405_v56 = vadd.f32 -1.4531521, %v7373_v28  ;;  %v7033_v48 = vadd.f32 %v10344_v24, %v6872_v59 }
 0x55a   : > { %v13804_v37 = vmul.f32 0.70710677, %v13795_v36  ;;  %v7278_v11 = vadd.f32 1.0, %v7246_v19  ;;  %v13807_v1 = vadd.f32 %v13503_v27, %v7085_v34  ;;  %v7083_v49 = vmul.f32 %v13491_v31, %v7012_v8 }
 0x55b   : > { %v7251_v15 = vmul.f32 0.3275911, %v7219_v42  ;;  %v7919_v30 = vsel %vm7855_vm7, %v7887_v51, %v7823_v2  ;;  %v7437_v12 = vmul.f32 %v13787_v52, %v7405_v56  ;;  %10909 = vpow2.f32 %v7741_v55 }
 0x55c   : > { %v7217_v32 = vand.u32 2147483647, %v13804_v37  ;;  %v7696_v17 = vmul.f32 %v7664_v3, %v13740_v22  ;;  %10911 = vrcp.f32 %v7278_v11  ;;  %v7662_v13 = vsub.f32 0.0, %v7214_v45  ;;  %v7024_v11 = vpop.f32.mrf.mxu1 }
 0x55d   : > { %v7283_v44 = vadd.f32 1.0, %v7251_v15  ;;  %v13814_v38 = vmul.f32 0.5, %v13647_v4  ;;  %v7469_v46 = vadd.f32 1.4214138, %v7437_v12  ;;  %v7667_v53 = vsub.f32 0.0, %v7219_v42 }
 0x55e   : > { %v7249_v26 = vmul.f32 0.3275911, %v7217_v32  ;;  %v7951_v43 = vadd.f32 1.0, %v7919_v30  ;;  %v13817_v5 = vmul.f32 0.70710677, %v13807_v1  ;;  %v13820_v2 = vadd.f32 %v13503_v27, %v7083_v49  ;;  %v14266_v49 = vld [vmem:[#allocation23_spill] sm:$0xff] }
 0x55f   : > { %v7088_v60 = vmul.f32 %v13491_v31, %v7033_v48  ;;  %v7501_v22 = vmul.f32 %v13787_v52, %v7469_v46  ;;  %10913 = vrcp.f32 %v7283_v44  ;;  %v7665_v62 = vsub.f32 0.0, %v7217_v32 }
 0x560   : > { %v7281_v10 = vadd.f32 1.0, %v7249_v26  ;;  %v13824_v18 = vpop.eup %10907  ;;  %v13827_v4 = vmul.f32 0.5, %v13716_v63  ;;  %v7747_v21 = vmul.f32 1.442695, %v7696_v17  ;;  %v7694_v23 = vmul.f32 %v7662_v13, %v7214_v45 }
 0x561   : > { %v7220_v33 = vand.u32 2147483647, %v13817_v5  ;;  %v7533_v54 = vadd.f32 -0.28449672, %v7501_v22  ;;  %v7376_v6 = vmul.f32 1.0614054, %v13824_v18  ;;  %v7699_v51 = vmul.f32 %v7667_v53, %v7219_v42 }
 0x562   : > { %10915 = vrcp.f32 %v7281_v10  ;;  %v13832_v8 = vmul.f32 0.70710677, %v13820_v2  ;;  %v13835_v24 = vadd.f32 %v13503_v27, %v7088_v60  ;;  %v13837_v28 = vmul.f32 %v7951_v43, %v7151_v9 }
 0x563   : > { %v7252_v47 = vmul.f32 0.3275911, %v7220_v33  ;;  %v7668_v55 = vsub.f32 0.0, %v7220_v33  ;;  %v7565_v63 = vmul.f32 %v13787_v52, %v7533_v54  ;;  %v7408_v45 = vadd.f32 -1.4531521, %v7376_v6 }
 0x564   : > { %v7697_v34 = vmul.f32 %v7665_v62, %v7217_v32  ;;  %10917 = vpow2.f32 %v7747_v21  ;;  %v7218_v3 = vand.u32 2147483647, %v13832_v8  ;;  %v7743_v56 = vmul.f32 1.442695, %v7694_v23 }
 0x565   : > { %v7284_v41 = vadd.f32 1.0, %v7252_v47  ;;  %v7700_v59 = vmul.f32 %v7668_v55, %v7220_v33  ;;  %v7597_v19 = vadd.f32 0.2548296, %v7565_v63  ;;  %v7440_v42 = vmul.f32 %v13824_v18, %v7408_v45 }
 0x566   : > { %v13843_v48 = vmul.f32 0.70710677, %v13835_v24  ;;  %vm7853_vm8 = vcmp.lt.f32.partialorder %v13662_v57, 0.0  ;;  %v7753_v9 = vmul.f32 1.442695, %v7699_v51  ;;  %v7666_v15 = vsub.f32 0.0, %v7218_v3 }
 0x567   : > { %10919 = vrcp.f32 %v7284_v41  ;;  %v6864_v30 = vadd.f32 %v13748_v39, %v14266_v49  ;;  %v7629_v12 = vmul.f32 %v13787_v52, %v7597_v19  ;;  %v7472_v32 = vadd.f32 1.4214138, %v7440_v42 }
 0x568   : > { %v13850_v17 = vmul.f32 0.5, %v13762_v58  ;;  %v7749_v13 = vmul.f32 1.442695, %v7697_v34  ;;  %v10910_v44 = vpop.eup %10909  ;;  %v13853_v46 = vmul.f32 0.5, %v13777_v35  ;;  %v7755_v53 = vmul.f32 1.442695, %v7700_v59 }
 0x569   : > { %v7250_v26 = vmul.f32 0.3275911, %v7218_v3  ;;  %v7025_v43 = vadd.f32 %v7024_v11, %v6864_v30  ;;  %v13855_v60 = vpop.eup %10911  ;;  %v7789_v22 = vmul.f32 %v10910_v44, %v7629_v12  ;;  %v7504_v10 = vmul.f32 %v13824_v18, %v7472_v32 }
 0x56a   : > { %10921 = vpow2.f32 %v7743_v56  ;;  %v7223_v39 = vand.u32 2147483647, %v13843_v48  ;;  %v7374_v52 = vmul.f32 1.0614054, %v13855_v60  ;;  %v7698_v58 = vmul.f32 %v7666_v15, %v7218_v3 }
 0x56b   : > { %10923 = vpow2.f32 %v7753_v9  ;;  %v7086_v62 = vmul.f32 %v13491_v31, %v7025_v43  ;;  %v7821_v21 = vsub.f32 1.0, %v7789_v22  ;;  %v7536_v35 = vadd.f32 -0.28449672, %v7504_v10 }
 0x56c   : > { %v13862_v23 = vmul.f32 0.5, %v13795_v36  ;;  %10925 = vpow2.f32 %v7749_v13  ;;  %v13864_v33 = vpop.eup %10913  ;;  %v7406_v54 = vadd.f32 -1.4531521, %v7374_v52  ;;  %v7282_v6 = vadd.f32 1.0, %v7250_v26 }
 0x56d   : > { %10927 = vpow2.f32 %v7755_v53  ;;  %v13867_v51 = vadd.f32 %v13503_v27, %v7086_v62  ;;  %v7885_v47 = vsub.f32 0.0, %v7821_v21  ;;  %v7568_v55 = vmul.f32 %v13824_v18, %v7536_v35 }
 0x56e   : > { %v7379_v63 = vmul.f32 1.0614054, %v13864_v33  ;;  %v7255_v31 = vmul.f32 0.3275911, %v7223_v39  ;;  %v7438_v36 = vmul.f32 %v13855_v60, %v7406_v54  ;;  %v7751_v34 = vmul.f32 1.442695, %v7698_v58 }
 0x56f   : > { %v13871_v45 = vpop.eup %10915  ;;  %v7671_v41 = vsub.f32 0.0, %v7223_v39  ;;  %v13875_v59 = vmul.f32 0.70710677, %v13867_v51  ;;  %v7917_v3 = vsel %vm7853_vm8, %v7885_v47, %v7821_v21  ;;  %v7600_v27 = vadd.f32 0.2548296, %v7568_v55 }
 0x570   : > { %v7411_v19 = vadd.f32 -1.4531521, %v7379_v63  ;;  %v7377_v42 = vmul.f32 1.0614054, %v13871_v45  ;;  %v7949_v56 = vadd.f32 1.0, %v7917_v3  ;;  %vm7856_vm2 = vcmp.lt.f32.partialorder %v13730_v50, 0.0 }
 0x571   : > { %v7470_v11 = vadd.f32 1.4214138, %v7438_v36  ;;  %10929 = vrcp.f32 %v7282_v6  ;;  %v13882_v9 = vand.u32 2147483647, %v13875_v59  ;;  %v10918_v15 = vpop.eup %10917  ;;  %v7632_v49 = vmul.f32 %v13824_v18, %v7600_v27 }
 0x572   : > { %v7443_v30 = vmul.f32 %v13864_v33, %v7411_v19  ;;  %v7409_v12 = vadd.f32 -1.4531521, %v7377_v42  ;;  %v7287_v57 = vadd.f32 1.0, %v7255_v31  ;;  %v7981_v32 = vmul.f32 %v7949_v56, %v13814_v38 }
 0x573   : > { %v7502_v13 = vmul.f32 %v13855_v60, %v7470_v11  ;;  %v7703_v44 = vmul.f32 %v7671_v41, %v7223_v39  ;;  %v7253_v53 = vmul.f32 0.3275911, %v13882_v9  ;;  %v7792_v43 = vmul.f32 %v10918_v15, %v7632_v49  ;;  %v14267_v49 = vld [vmem:[#allocation26_spill] sm:$0xff] }
 0x574   : > { %v13889_v26 = vpop.eup %10919  ;;  %v7475_v22 = vadd.f32 1.4214138, %v7443_v30  ;;  %v7441_v10 = vmul.f32 %v13871_v45, %v7409_v12  ;;  %10931 = vpow2.f32 %v7751_v34  ;;  %v8005_v18 = vmax.f32 %v7981_v32, %v13837_v28 }
 0x575   : > { %v7534_v52 = vadd.f32 -0.28449672, %v7502_v13  ;;  %v7380_v58 = vmul.f32 1.0614054, %v13889_v26  ;;  %v7285_v62 = vadd.f32 1.0, %v7253_v53  ;;  %v7824_v21 = vsub.f32 1.0, %v7792_v43 }
 0x576   : > { %v7507_v38 = vmul.f32 %v13864_v33, %v7475_v22  ;;  %v7473_v35 = vadd.f32 1.4214138, %v7441_v10  ;;  %10933 = vrcp.f32 %v7287_v57  ;;  %v8165_v54 = vcombine.high %v8005_v18, %v8005_v18 }
 0x577   : > { %v10922_v39 = vpop.eup %10921  ;;  %v8172_v6 = vrot.slane %v8005_v18, %v13199_v29  ;;  %v7566_v47 = vmul.f32 %v13855_v60, %v7534_v52  ;;  %v7412_v55 = vadd.f32 -1.4531521, %v7380_v58  ;;  %v7888_v31 = vsub.f32 0.0, %v7824_v21 }
 0x578   : > { %v10924_v63 = vpop.eup %10923  ;;  %v7539_v36 = vadd.f32 -0.28449672, %v7507_v38  ;;  %v7505_v28 = vmul.f32 %v13871_v45, %v7473_v35  ;;  %10935 = vrcp.f32 %v7285_v62  ;;  %v8179_v41 = vrot.slane %v8165_v54, %v13199_v29 }
 0x579   : > { %v10926_v34 = vpop.eup %10925  ;;  %v8180_v3 = vcombine.high %v8172_v6, %v8172_v6  ;;  %v9559_v27 = vrot.slane %v8172_v6, 9  ;;  %v7598_v19 = vadd.f32 0.2548296, %v7566_v47  ;;  %v7920_v56 = vsel %vm7856_vm2, %v7888_v31, %v7824_v21 }
 0x57a   : > { %v13899_v42 = vpop.eup %10927  ;;  %v7571_v11 = vmul.f32 %v13864_v33, %v7539_v36  ;;  %v7537_v15 = vadd.f32 -0.28449672, %v7505_v28  ;;  %v13906_v30 = vadd.f32 %v13769_v7, %v14267_v49  ;;  %v8181_v12 = vcombine.high %v8179_v41, %v8179_v41 }
 0x57b   : > { %v9560_v57 = vrot.slane %v8180_v3, 9  ;;  %v9561_v32 = vrot.slane %v8179_v41, 9  ;;  %v8589_v13 = vmax.f32 %v8172_v6, %v9559_v27  ;;  %vm7854_vm4 = vcmp.lt.f32.partialorder %v13774_v61, 0.0 }
 0x57c   : > { %v7630_v53 = vmul.f32 %v13855_v60, %v7598_v19  ;;  %v7603_v43 = vadd.f32 0.2548296, %v7571_v11  ;;  %v7569_v22 = vmul.f32 %v13871_v45, %v7537_v15  ;;  %v7444_v50 = vmul.f32 %v13889_v26, %v7412_v55 }
 0x57d   : > { %v9562_v10 = vrot.slane %v8181_v12, 9  ;;  %v8590_v18 = vmax.f32 %v8180_v3, %v9560_v57  ;;  %v8591_v52 = vmax.f32 %v8179_v41, %v9561_v32  ;;  %vm7859_vm13 = vcmp.lt.f32.partialorder %v13791_v14, 0.0 }
 0x57e   : > { %v13913_v7 = vmul.f32 1.442695, %v7703_v44  ;;  %v13915_v58 = vpop.eup %10929  ;;  %v7952_v62 = vadd.f32 1.0, %v7920_v56  ;;  %v7790_v21 = vmul.f32 %v10922_v39, %v7630_v53  ;;  %v7635_v38 = vmul.f32 %v13864_v33, %v7603_v43 }
 0x57f   : > { %v7601_v35 = vadd.f32 0.2548296, %v7569_v22  ;;  %v8592_v60 = vmax.f32 %v8181_v12, %v9562_v10  ;;  %v9725_v54 = vpack.c.bf16 %v8589_v13, %v8589_v13  ;;  %v9726_v6 = vpack.c.bf16 %v8590_v18, %v8590_v18 }
 0x580   : > { %v9727_v47 = vpack.c.bf16 %v8591_v52, %v8591_v52  ;;  %vm7857_vm14 = vcmp.lt.f32.partialorder %v13804_v37, 0.0  ;;  %v7822_v55 = vsub.f32 1.0, %v7790_v21  ;;  %v7795_v31 = vmul.f32 %v10924_v63, %v7635_v38 }
 0x581   : > { %v7633_v36 = vmul.f32 %v13871_v45, %v7601_v35  ;;  %v7476_v28 = vadd.f32 1.4214138, %v7444_v50  ;;  %v13920_v44 = vpop.eup %10931  ;;  %v9728_v41 = vpack.c.bf16 %v8592_v60, %v8592_v60  ;;  %v8910_v3 = vunpack.c.l.b16 %v9726_v6 }
 0x582   : > { %v8911_v27 = vunpack.c.l.b16 %v9727_v47  ;;  %v7378_v39 = vmul.f32 1.0614054, %v13915_v58  ;;  %v7886_v33 = vsub.f32 0.0, %v7822_v55  ;;  %v7827_v19 = vsub.f32 1.0, %v7795_v31 }
 0x583   : > { %v7793_v56 = vmul.f32 %v10926_v34, %v7633_v36  ;;  %v7508_v11 = vmul.f32 %v13889_v26, %v7476_v28  ;;  %v13924_v15 = vpop.eup %10933  ;;  %v9004_v49 = vrot.slane %v8910_v3, 7  ;;  %v7984_v63 = vmul.f32 %v7952_v62, %v13827_v4  ;;  %v10345_v28 = vpop.f32.mrf.mxu1 }
 0x584   : > { %v7410_v12 = vadd.f32 -1.4531521, %v7378_v39  ;;  %v7669_v45 = vsub.f32 0.0, %v13882_v9  ;;  %v7918_v57 = vsel %vm7854_vm4, %v7886_v33, %v7822_v55  ;;  %v7891_v32 = vsub.f32 0.0, %v7827_v19 }
 0x585   : > { %v7825_v13 = vsub.f32 1.0, %v7793_v56  ;;  %v7540_v53 = vadd.f32 -0.28449672, %v7508_v11  ;;  %v13930_v43 = vpop.eup %10935  ;;  %v8909_v22 = vunpack.c.l.b16 %v9725_v54  ;;  %v8912_v34 = vunpack.c.l.b16 %v9728_v41 }
 0x586   : > { %v7950_v50 = vadd.f32 1.0, %v7918_v57  ;;  %v7442_v10 = vmul.f32 %v13915_v58, %v7410_v12  ;;  %v9006_v18 = vrot.slane %v8911_v27, 6  ;;  %v7923_v4 = vsel %vm7859_vm13, %v7891_v32, %v7827_v19 }
 0x587   : > { %v7889_v52 = vsub.f32 0.0, %v7825_v13  ;;  %v7572_v62 = vmul.f32 %v13889_v26, %v7540_v53  ;;  %v9005_v61 = vsel %vm8942_vm10, %v9004_v49, %v8909_v22  ;;  %v7955_v38 = vadd.f32 1.0, %v7923_v4 }
 0x588   : > { %v7982_v21 = vmul.f32 %v7950_v50, %v13850_v17  ;;  %v7474_v35 = vadd.f32 1.4214138, %v7442_v10  ;;  %v7383_v6 = vmul.f32 1.0614054, %v13924_v15  ;;  %v7381_v47 = vmul.f32 1.0614054, %v13930_v43 }
 0x589   : > { %v7921_v60 = vsel %vm7857_vm14, %v7889_v52, %v7825_v13  ;;  %v7604_v54 = vadd.f32 0.2548296, %v7572_v62  ;;  %v7701_v36 = vmul.f32 %v7669_v45, %v13882_v9  ;;  %v9007_v41 = vsel %vm8945_vm12, %v9006_v18, %v9005_v61 }
 0x58a   : > { %v8006_v55 = vmax.f32 %v7982_v21, %v7984_v63  ;;  %v7953_v14 = vadd.f32 1.0, %v7921_v60  ;;  %v7506_v31 = vmul.f32 %v13915_v58, %v7474_v35  ;;  %v9008_v17 = vrot.slane %v8912_v34, 5 }
 0x58b   : > { %v7987_v3 = vmul.f32 %v7955_v38, %v13853_v46  ;;  %v7636_v37 = vmul.f32 %v13889_v26, %v7604_v54  ;;  %v7415_v56 = vadd.f32 -1.4531521, %v7383_v6  ;;  %10937 = vpow2.f32 %v13913_v7 }
 0x58c   : > { %v8182_v27 = vcombine.high %v8006_v55, %v8006_v55  ;;  %v8189_v39 = vrot.slane %v8006_v55, %v13199_v29  ;;  %v7985_v33 = vmul.f32 %v7953_v14, %v13862_v23  ;;  %v7538_v19 = vadd.f32 -0.28449672, %v7506_v31 }
 0x58d   : > { %v7413_v11 = vadd.f32 -1.4531521, %v7381_v47  ;;  %v13951_v9 = vadd.f32 %v10345_v28, %v13906_v30  ;;  %v9009_v26 = vsel %vm8948_vm15, %v9008_v17, %v9007_v41  ;;  %v7796_v45 = vmul.f32 %v13899_v42, %v7636_v37 }
 0x58e   : > { %v8196_v49 = vrot.slane %v8182_v27, %v13199_v29  ;;  %v8197_v63 = vcombine.high %v8189_v39, %v8189_v39  ;;  %v9563_v12 = vrot.slane %v8189_v39, 9  ;;  %v8007_v46 = vmax.f32 %v7985_v33, %v7987_v3 }
 0x58f   : > { %v7570_v57 = vmul.f32 %v13915_v58, %v7538_v19  ;;  %v7757_v23 = vmul.f32 1.442695, %v7701_v36  ;;  %v7447_v34 = vmul.f32 %v13924_v15, %v7415_v56  ;;  %v7445_v50 = vmul.f32 %v13930_v43, %v7413_v11 }
 0x590   : > { %v8198_v32 = vcombine.high %v8196_v49, %v8196_v49  ;;  %v9564_v13 = vrot.slane %v8197_v63, 9  ;;  %v9565_v53 = vrot.slane %v8196_v49, 9  ;;  %v8593_v7 = vmax.f32 %v8189_v39, %v9563_v12 }
 0x591   : > { %v8199_v22 = vcombine.high %v8007_v46, %v8007_v46  ;;  %v8206_v30 = vrot.slane %v8007_v46, %v13199_v29  ;;  %vm7860_vm9 = vcmp.lt.f32.partialorder %v13817_v5, 0.0  ;;  %v7828_v61 = vsub.f32 1.0, %v7796_v45  ;;  %v13977_v5 = vld [vmem:[%s14201_s5] ss:$0 sm:$0xff] }
 0x592   : > { %v9566_v10 = vrot.slane %v8198_v32, 9  ;;  %v8594_v18 = vmax.f32 %v8197_v63, %v9564_v13  ;;  %v8595_v4 = vmax.f32 %v8196_v49, %v9565_v53  ;;  %v9729_v52 = vpack.c.bf16 %v8593_v7, %v8593_v7 }
 0x593   : > { %v8213_v42 = vrot.slane %v8199_v22, %v13199_v29  ;;  %v8214_v62 = vcombine.high %v8206_v30, %v8206_v30  ;;  %v7602_v21 = vadd.f32 0.2548296, %v7570_v57  ;;  %v9567_v47 = vrot.slane %v8206_v30, 9 }
 0x594   : > { %v8596_v38 = vmax.f32 %v8198_v32, %v9566_v10  ;;  %v9730_v35 = vpack.c.bf16 %v8594_v18, %v8594_v18  ;;  %v9731_v60 = vpack.c.bf16 %v8595_v4, %v8595_v4  ;;  %v8913_v54 = vunpack.c.l.b16 %v9729_v52 }
 0x595   : > { %v8215_v6 = vcombine.high %v8213_v42, %v8213_v42  ;;  %v9568_v55 = vrot.slane %v8214_v62, 9  ;;  %v9569_v14 = vrot.slane %v8213_v42, 9  ;;  %v7892_v37 = vsub.f32 0.0, %v7828_v61 }
 0x596   : > { %v9732_v31 = vpack.c.bf16 %v8596_v38, %v8596_v38  ;;  %v8914_v36 = vunpack.c.l.b16 %v9730_v35  ;;  %v8915_v28 = vunpack.c.l.b16 %v9731_v60  ;;  %v9010_v41 = vrot.slane %v8913_v54, 4 }
 0x597   : > { %v9570_v17 = vrot.slane %v8215_v6, 9  ;;  %v8598_v3 = vmax.f32 %v8214_v62, %v9568_v55  ;;  %v7479_v27 = vadd.f32 1.4214138, %v7447_v34  ;;  %v8597_v11 = vmax.f32 %v8206_v30, %v9567_v47 }
 0x598   : > { %v8916_v39 = vunpack.c.l.b16 %v9732_v31  ;;  %v9011_v33 = vsel %vm8951_vm0, %v9010_v41, %v9009_v26  ;;  %v9012_v19 = vrot.slane %v8914_v36, 3  ;;  %v9014_v56 = vrot.slane %v8915_v28, 2  ;;  %v10938_v12 = vpop.eup %10937 }
 0x599   : > { %v8599_v49 = vmax.f32 %v8213_v42, %v9569_v14  ;;  %v9734_v63 = vpack.c.bf16 %v8598_v3, %v8598_v3  ;;  %10939 = vpow2.f32 %v7757_v23  ;;  %v7634_v57 = vmul.f32 %v13915_v58, %v7602_v21  ;;  %v7027_v42 = vpop.f32.mrf.mxu1 }
 0x59a   : > { %v9013_v46 = vsel %vm8954_vm1, %v9012_v19, %v9011_v33  ;;  %v9016_v45 = vrot.slane %v8916_v39, 1  ;;  %v7477_v32 = vadd.f32 1.4214138, %v7445_v50  ;;  %v7156_v53 = vmul.f32 0.5, %v13807_v1  ;;  %v14269_v33 = vld [vmem:[#allocation29_spill] sm:$0xff] }
 0x59b   : > { %v9015_v13 = vsel %vm8957_vm3, %v9014_v56, %v9013_v46  ;;  %v7924_v26 = vsel %vm7860_vm9, %v7892_v37, %v7828_v61  ;;  %v7154_v7 = vmul.f32 0.5, %v13820_v2  ;;  %v8600_v23 = vmax.f32 %v8215_v6, %v9570_v17  ;;  %v14268_v61 = vld [vmem:[#allocation24_spill] sm:$0xff]  ;;  %v10348_v3 = vpop.f32.mrf.mxu1 }
 0x59c   : > { %v9017_v22 = vsel %vm8960_vm5, %v9016_v45, %v9015_v13  ;;  %v7794_v30 = vmul.f32 %v13920_v44, %v7634_v57  ;;  %v7511_v34 = vmul.f32 %v13924_v15, %v7479_v27  ;;  %v9733_v58 = vpack.c.bf16 %v8597_v11, %v8597_v11 }
 0x59d   : > { %v9064_v10 = vpack.c.b16 %v9017_v22, %v9017_v22  ;;  %v9735_v50 = vpack.c.bf16 %v8599_v49, %v8599_v49  ;;  %v8918_v18 = vunpack.c.l.b16 %v9734_v63  ;;  %v7509_v1 = vmul.f32 %v13930_v43, %v7477_v32 }
 0x59e   : > { %v7826_v4 = vsub.f32 1.0, %v7794_v30  ;;  %v7543_v52 = vadd.f32 -0.28449672, %v7511_v34  ;;  %v7089_v2 = vmul.f32 %v13977_v5, %v13951_v9  ;;  %v7956_v44 = vadd.f32 1.0, %v7924_v26  ;;  %v13992_v9 = vld [vmem:[%s14202_s6] ss:$0 sm:$0xff] }
 0x59f   : > { %9080 = vst [vmem:[%s13412_s22 + $0x10] sm:$0xf] %v9064_v10  ;;  %vm7858_vm11 = vcmp.lt.f32.partialorder %v13832_v8, 0.0  ;;  %v13984_v62 = vmul.f32 0.5, %v13835_v24  ;;  %v6867_v21 = vadd.f32 %v13757_v0, %v14268_v61  ;;  %v9736_v38 = vpack.c.bf16 %v8600_v23, %v8600_v23 }
 0x5a0   : > { %v7890_v35 = vsub.f32 0.0, %v7826_v4  ;;  %v7575_v60 = vmul.f32 %v13924_v15, %v7543_v52  ;;  %v7541_v54 = vadd.f32 -0.28449672, %v7509_v1  ;;  %v8917_v6 = vunpack.c.l.b16 %v9733_v58 }
 0x5a1   : > { %v8919_v47 = vunpack.c.l.b16 %v9735_v50  ;;  %v13995_v8 = vadd.f32 %v13992_v9, %v7089_v2  ;;  %v7028_v24 = vadd.f32 %v7027_v42, %v6867_v21  ;;  %v9018_v55 = vrot.slane %v8918_v18, 7 }
 0x5a2   : > { %v7922_v14 = vsel %vm7858_vm11, %v7890_v35, %v7826_v4  ;;  %v7607_v31 = vadd.f32 0.2548296, %v7575_v60  ;;  %v7573_v0 = vmul.f32 %v13930_v43, %v7541_v54  ;;  %v7988_v36 = vmul.f32 %v7956_v44, %v7156_v53  ;;  %v14270_v44 = vld [vmem:[#allocation27_spill] sm:$0xff]  ;;  %v7040_v54 = vpop.f32.mrf.mxu1 }
 0x5a3   : > { %v7954_v28 = vadd.f32 1.0, %v7922_v14  ;;  %vm7863_vm6 = vcmp.lt.f32.partialorder %v13843_v48, 0.0  ;;  %v14000_v41 = vmul.f32 0.70710677, %v13995_v8  ;;  %v7087_v17 = vmul.f32 %v13977_v5, %v7028_v24 }
 0x5a4   : > { %v8920_v37 = vunpack.c.l.b16 %v9736_v38  ;;  %v7639_v27 = vmul.f32 %v13924_v15, %v7607_v31  ;;  %v7605_v39 = vadd.f32 0.2548296, %v7573_v0  ;;  %v6888_v19 = vadd.f32 %v13785_v25, %v14269_v33 }
 0x5a5   : > { %v9020_v56 = vrot.slane %v8919_v47, 6  ;;  %v7986_v11 = vmul.f32 %v7954_v28, %v7154_v7  ;;  %v7224_v49 = vand.u32 2147483647, %v14000_v41  ;;  %v14008_v63 = vadd.f32 %v13992_v9, %v7087_v17 }
 0x5a6   : > { %v10940_v46 = vpop.eup %10939  ;;  %v9019_v45 = vsel %vm8942_vm10, %v9018_v55, %v8917_v6  ;;  %v7799_v57 = vmul.f32 %v10938_v12, %v7639_v27  ;;  %v7637_v32 = vmul.f32 %v13930_v43, %v7605_v39  ;;  %v7049_v13 = vadd.f32 %v10348_v3, %v6888_v19 }
 0x5a7   : > { %v8008_v53 = vmax.f32 %v7986_v11, %v7988_v36  ;;  %v7157_v15 = vmul.f32 0.5, %v13867_v51  ;;  %vm7861_vm7 = vcmp.lt.f32.partialorder %v13875_v59, 0.0  ;;  %v7256_v25 = vmul.f32 0.3275911, %v7224_v49 }
 0x5a8   : > { %v9022_v26 = vrot.slane %v8920_v37, 5  ;;  %v7831_v7 = vsub.f32 1.0, %v7799_v57  ;;  %v7797_v22 = vmul.f32 %v10940_v46, %v7637_v32  ;;  %v14015_v23 = vmul.f32 0.70710677, %v14008_v63  ;;  %v10227_v57 = vpop.f32.mrf.mxu0 }
 0x5a9   : > { %v9021_v30 = vsel %vm8945_vm12, %v9020_v56, %v9019_v45  ;;  %v8216_v34 = vcombine.high %v8008_v53, %v8008_v53  ;;  %v8223_v12 = vrot.slane %v8008_v53, %v13199_v29  ;;  %v7288_v10 = vadd.f32 1.0, %v7256_v25 }
 0x5aa   : > { %v7895_v43 = vsub.f32 0.0, %v7831_v7  ;;  %v7829_v58 = vsub.f32 1.0, %v7797_v22  ;;  %v7222_v50 = vand.u32 2147483647, %v14015_v23  ;;  %v7092_v51 = vmul.f32 %v13977_v5, %v7049_v13 }
 0x5ab   : > { %v8230_v18 = vrot.slane %v8216_v34, %v13199_v29  ;;  %v8231_v4 = vcombine.high %v8223_v12, %v8223_v12  ;;  %v9571_v52 = vrot.slane %v8223_v12, 9  ;;  %10941 = vrcp.f32 %v7288_v10 }
 0x5ac   : > { %v7927_v1 = vsel %vm7863_vm6, %v7895_v43, %v7831_v7  ;;  %v7893_v2 = vsub.f32 0.0, %v7829_v58  ;;  %v7254_v42 = vmul.f32 0.3275911, %v7222_v50  ;;  %v6880_v61 = vadd.f32 %v13783_v16, %v14270_v44  ;;  %v10228_v43 = vpop.f32.mrf.mxu0 }
 0x5ad   : > { %v8232_v21 = vcombine.high %v8230_v18, %v8230_v18  ;;  %v9572_v38 = vrot.slane %v8231_v4, 9  ;;  %v9573_v35 = vrot.slane %v8230_v18, 9  ;;  %v8601_v60 = vmax.f32 %v8223_v12, %v9571_v52 }
 0x5ae   : > { %v7959_v6 = vadd.f32 1.0, %v7927_v1  ;;  %v7925_v47 = vsel %vm7861_vm7, %v7893_v2, %v7829_v58  ;;  %v7286_v24 = vadd.f32 1.0, %v7254_v42  ;;  %v14029_v55 = vadd.f32 %v13992_v9, %v7092_v51 }
 0x5af   : > { %v9574_v48 = vrot.slane %v8232_v21, 9  ;;  %v8602_v14 = vmax.f32 %v8231_v4, %v9572_v38  ;;  %v8603_v31 = vmax.f32 %v8230_v18, %v9573_v35  ;;  %v9737_v0 = vpack.c.bf16 %v8601_v60, %v8601_v60 }
 0x5b0   : > { %v7957_v36 = vadd.f32 1.0, %v7925_v47  ;;  %v7672_v28 = vsub.f32 0.0, %v7224_v49  ;;  %10943 = vrcp.f32 %v7286_v24  ;;  %v7041_v16 = vadd.f32 %v7040_v54, %v6880_v61 }
 0x5b1   : > { %v8604_v17 = vmax.f32 %v8232_v21, %v9574_v48  ;;  %v9738_v3 = vpack.c.bf16 %v8602_v14, %v8602_v14  ;;  %v9739_v37 = vpack.c.bf16 %v8603_v31, %v8603_v31  ;;  %v8921_v27 = vunpack.c.l.b16 %v9737_v0 }
 0x5b2   : > { %v9023_v39 = vsel %vm8948_vm15, %v9022_v26, %v9021_v30  ;;  %v7991_v59 = vmul.f32 %v7959_v6, %v13984_v62  ;;  %v7989_v33 = vmul.f32 %v7957_v36, %v7157_v15  ;;  %v14034_v19 = vmul.f32 0.70710677, %v14029_v55  ;;  %v10349_v6 = vpop.f32.mrf.mxu1 }
 0x5b3   : > { %v9740_v56 = vpack.c.bf16 %v8604_v17, %v8604_v17  ;;  %v8922_v11 = vunpack.c.l.b16 %v9738_v3  ;;  %v8923_v46 = vunpack.c.l.b16 %v9739_v37  ;;  %v9024_v45 = vrot.slane %v8921_v27, 4 }
 0x5b4   : > { %v8009_v32 = vmax.f32 %v7989_v33, %v7991_v59  ;;  %v7704_v13 = vmul.f32 %v7672_v28, %v7224_v49  ;;  %v7227_v53 = vand.u32 2147483647, %v14034_v19  ;;  %v7090_v25 = vmul.f32 %v13977_v5, %v7041_v16 }
 0x5b5   : > { %v8924_v7 = vunpack.c.l.b16 %v9740_v56  ;;  %v9025_v26 = vsel %vm8951_vm0, %v9024_v45, %v9023_v39  ;;  %v9026_v22 = vrot.slane %v8922_v11, 3  ;;  %v9028_v62 = vrot.slane %v8923_v46, 2  ;;  %v7043_v56 = vpop.f32.mrf.mxu1  ;;  %v14272_v46 = vld [vmem:[#allocation28_spill] sm:$0xff] }
 0x5b6   : > { %v7670_v15 = vsub.f32 0.0, %v7222_v50  ;;  %v7259_v30 = vmul.f32 0.3275911, %v7227_v53  ;;  %v14042_v49 = vadd.f32 %v13992_v9, %v7090_v25  ;;  %v7763_v4 = vmul.f32 1.442695, %v7704_v13 }
 0x5b7   : > { %v9027_v34 = vsel %vm8954_vm1, %v9026_v22, %v9025_v26  ;;  %v9030_v12 = vrot.slane %v8924_v7, 1  ;;  %v10229_v42 = vadd.f32 %v10228_v43, %v10227_v57  ;;  %v8240_v35 = vrot.slane %v8009_v32, %v13199_v29 }
 0x5b8   : > { %v10942_v10 = vpop.eup %10941  ;;  %v9029_v58 = vsel %vm8957_vm3, %v9028_v62, %v9027_v34  ;;  %v7291_v52 = vadd.f32 1.0, %v7259_v30  ;;  %v7702_v2 = vmul.f32 %v7670_v15, %v7222_v50  ;;  %v14047_v61 = vmul.f32 0.70710677, %v14042_v49  ;;  %v14271_v50 = vld [vmem:[#allocation30_spill] sm:$0xff] }
 0x5b9   : > { %v9031_v51 = vsel %vm8960_vm5, %v9030_v12, %v9029_v58  ;;  %v7384_v18 = vmul.f32 1.0614054, %v10942_v10  ;;  %v8233_v47 = vcombine.high %v8009_v32, %v8009_v32  ;;  %v6891_v14 = vadd.f32 %v10229_v42, %v14271_v50 }
 0x5ba   : > { %v9065_v1 = vpack.c.b16 %v9031_v51, %v9031_v51  ;;  %10945 = vrcp.f32 %v7291_v52  ;;  %v7759_v54 = vmul.f32 1.442695, %v7702_v2  ;;  %v14051_v48 = vand.u32 2147483647, %v14047_v61 }
 0x5bb   : > { %v7416_v44 = vadd.f32 -1.4531521, %v7384_v18  ;;  %10947 = vpow2.f32 %v7763_v4  ;;  %v7675_v36 = vsub.f32 0.0, %v7227_v53  ;;  %v7052_v16 = vadd.f32 %v10349_v6, %v6891_v14 }
 0x5bc   : > { %9081 = vst [vmem:[%s13412_s22 + $0x14] sm:$0xf] %v9065_v1  ;;  %v7257_v28 = vmul.f32 0.3275911, %v14051_v48  ;;  %v10223_v17 = vadd.f32 %v13732_v40, %v13718_v20  ;;  %v8248_v3 = vcombine.high %v8240_v35, %v8240_v35  ;;  %10949 = vpow2.f32 %v7759_v54 }
 0x5bd   : > { %v10944_v21 = vpop.eup %10943  ;;  %v7448_v38 = vmul.f32 %v10942_v10, %v7416_v44  ;;  %v8247_v27 = vrot.slane %v8233_v47, %v13199_v29  ;;  %v7093_v33 = vmul.f32 %v13977_v5, %v7052_v16  ;;  %v7707_v32 = vmul.f32 %v7675_v36, %v7227_v53 }
 0x5be   : > { %v7382_v60 = vmul.f32 1.0614054, %v10944_v21  ;;  %v7289_v59 = vadd.f32 1.0, %v7257_v28  ;;  %v6883_v45 = vadd.f32 %v10223_v17, %v14272_v46  ;;  %v9576_v13 = vrot.slane %v8248_v3, 9 }
 0x5bf   : > { %v7480_v24 = vadd.f32 1.4214138, %v7448_v38  ;;  %v14061_v20 = vadd.f32 %v13992_v9, %v7093_v33  ;;  %v8249_v7 = vcombine.high %v8247_v27, %v8247_v27  ;;  %v9577_v62 = vrot.slane %v8247_v27, 9 }
 0x5c0   : > { %v7414_v31 = vadd.f32 -1.4531521, %v7382_v60  ;;  %10951 = vrcp.f32 %v7289_v59  ;;  %v7044_v40 = vadd.f32 %v7043_v56, %v6883_v45  ;;  %v9575_v12 = vrot.slane %v8240_v35, 9 }
 0x5c1   : > { %v7512_v0 = vmul.f32 %v10942_v10, %v7480_v24  ;;  %v14066_v30 = vmul.f32 0.70710677, %v14061_v20  ;;  %v7769_v58 = vmul.f32 1.442695, %v7707_v32  ;;  %v8606_v18 = vmax.f32 %v8248_v3, %v9576_v13 }
 0x5c2   : > { %v7446_v37 = vmul.f32 %v10944_v21, %v7414_v31  ;;  %v7091_v34 = vmul.f32 %v13977_v5, %v7044_v40  ;;  %v9578_v2 = vrot.slane %v8249_v7, 9  ;;  %v8607_v38 = vmax.f32 %v8247_v27, %v9577_v62 }
 0x5c3   : > { %v7544_v39 = vadd.f32 -0.28449672, %v7512_v0  ;;  %v14071_v52 = vand.u32 2147483647, %v14066_v30  ;;  %v7673_v5 = vsub.f32 0.0, %v14051_v48  ;;  %v8605_v54 = vmax.f32 %v8240_v35, %v9575_v12 }
 0x5c4   : > { %v7478_v11 = vadd.f32 1.4214138, %v7446_v37  ;;  %v14074_v1 = vadd.f32 %v13992_v9, %v7091_v34  ;;  %v9742_v50 = vpack.c.bf16 %v8606_v18, %v8606_v18  ;;  %10953 = vpow2.f32 %v7769_v58 }
 0x5c5   : > { %v7576_v57 = vmul.f32 %v10942_v10, %v7544_v39  ;;  %v8608_v0 = vmax.f32 %v8249_v7, %v9578_v2  ;;  %v9743_v17 = vpack.c.bf16 %v8607_v38, %v8607_v38  ;;  %v7705_v35 = vmul.f32 %v7673_v5, %v14051_v48 }
 0x5c6   : > { %v7510_v25 = vmul.f32 %v10944_v21, %v7478_v11  ;;  %v14080_v24 = vmul.f32 0.70710677, %v14074_v1  ;;  %vm7864_vm8 = vcmp.lt.f32.partialorder %v14000_v41, 0.0  ;;  %vm7862_vm2 = vcmp.lt.f32.partialorder %v14015_v23, 0.0 }
 0x5c7   : > { %v7608_v26 = vadd.f32 0.2548296, %v7576_v57  ;;  %v14063_v22 = vpop.eup %10945  ;;  %v9741_v56 = vpack.c.bf16 %v8605_v54, %v8605_v54  ;;  %v9744_v57 = vpack.c.bf16 %v8608_v0, %v8608_v0  ;;  %v8927_v48 = vunpack.c.l.b16 %v9743_v17 }
 0x5c8   : > { %v7542_v15 = vadd.f32 -0.28449672, %v7510_v25  ;;  %v7387_v43 = vmul.f32 1.0614054, %v14063_v22  ;;  %v10948_v51 = vpop.eup %10947  ;;  %v7226_v16 = vand.u32 2147483647, %v14080_v24 }
 0x5c9   : > { %v7640_v53 = vmul.f32 %v10942_v10, %v7608_v26  ;;  %v7260_v10 = vmul.f32 0.3275911, %v14071_v52  ;;  %v10950_v31 = vpop.eup %10949  ;;  %v7765_v13 = vmul.f32 1.442695, %v7705_v35  ;;  %v7160_v26 = vmul.f32 0.5, %v13995_v8 }
 0x5ca   : > { %v7574_v4 = vmul.f32 %v10944_v21, %v7542_v15  ;;  %v7419_v44 = vadd.f32 -1.4531521, %v7387_v43  ;;  %v7258_v27 = vmul.f32 0.3275911, %v7226_v16  ;;  %v7676_v23 = vsub.f32 0.0, %v14071_v52 }
 0x5cb   : > { %v7800_v42 = vmul.f32 %v10948_v51, %v7640_v53  ;;  %v7292_v9 = vadd.f32 1.0, %v7260_v10  ;;  %v7158_v15 = vmul.f32 0.5, %v14008_v63  ;;  %v8925_v43 = vunpack.c.l.b16 %v9741_v56 }
 0x5cc   : > { %v7606_v60 = vadd.f32 0.2548296, %v7574_v4  ;;  %v7451_v47 = vmul.f32 %v14063_v22, %v7419_v44  ;;  %v7290_v45 = vadd.f32 1.0, %v7258_v27  ;;  %v8928_v58 = vunpack.c.l.b16 %v9744_v57 }
 0x5cd   : > { %v7832_v6 = vsub.f32 1.0, %v7800_v42  ;;  %10955 = vrcp.f32 %v7292_v9  ;;  %v14086_v39 = vpop.eup %10951  ;;  %v9034_v51 = vrot.slane %v8927_v48, 6  ;;  %v7708_v44 = vmul.f32 %v7676_v23, %v14071_v52 }
 0x5ce   : > { %v7638_v14 = vmul.f32 %v10944_v21, %v7606_v60  ;;  %v7483_v28 = vadd.f32 1.4214138, %v7451_v47  ;;  %v8926_v21 = vunpack.c.l.b16 %v9742_v50  ;;  %v7385_v46 = vmul.f32 1.0614054, %v14086_v39 }
 0x5cf   : > { %v7896_v36 = vsub.f32 0.0, %v7832_v6  ;;  %10957 = vrcp.f32 %v7290_v45  ;;  %v7674_v38 = vsub.f32 0.0, %v7226_v16  ;;  %v9036_v10 = vrot.slane %v8928_v58, 5 }
 0x5d0   : > { %v7798_v3 = vmul.f32 %v10950_v31, %v7638_v14  ;;  %v7515_v37 = vmul.f32 %v14063_v22, %v7483_v28  ;;  %v7417_v40 = vadd.f32 -1.4531521, %v7385_v46  ;;  %v9032_v7 = vrot.slane %v8926_v21, 7 }
 0x5d1   : > { %v7928_v59 = vsel %vm7864_vm8, %v7896_v36, %v7832_v6  ;;  %10959 = vpow2.f32 %v7765_v13  ;;  %v10954_v60 = vpop.eup %10953  ;;  %v7771_v31 = vmul.f32 1.442695, %v7708_v44  ;;  %v7706_v0 = vmul.f32 %v7674_v38, %v7226_v16 }
 0x5d2   : > { %v7830_v33 = vsub.f32 1.0, %v7798_v3  ;;  %v7547_v11 = vadd.f32 -0.28449672, %v7515_v37  ;;  %v7960_v41 = vadd.f32 1.0, %v7928_v59  ;;  %v7449_v53 = vmul.f32 %v14086_v39, %v7417_v40 }
 0x5d3   : > { %v9033_v8 = vsel %vm8942_vm10, %v9032_v7, %v8925_v43  ;;  %vm7867_vm4 = vcmp.lt.f32.partialorder %v14034_v19, 0.0  ;;  %10961 = vpow2.f32 %v7771_v31  ;;  %v7767_v46 = vmul.f32 1.442695, %v7706_v0 }
 0x5d4   : > { %v7894_v32 = vsub.f32 0.0, %v7830_v33  ;;  %v7579_v25 = vmul.f32 %v14063_v22, %v7547_v11  ;;  %v7992_v18 = vmul.f32 %v7960_v41, %v7160_v26  ;;  %v7481_v42 = vadd.f32 1.4214138, %v7449_v53 }
 0x5d5   : > { %v9035_v47 = vsel %vm8945_vm12, %v9034_v51, %v9033_v8  ;;  %10963 = vpow2.f32 %v7767_v46  ;;  %vm7865_vm13 = vcmp.lt.f32.partialorder %v14047_v61, 0.0  ;;  %v7163_v0 = vmul.f32 0.5, %v14029_v55 }
 0x5d6   : > { %v7926_v62 = vsel %vm7862_vm2, %v7894_v32, %v7830_v33  ;;  %v7611_v12 = vadd.f32 0.2548296, %v7579_v25  ;;  %v7513_v5 = vmul.f32 %v14086_v39, %v7481_v42  ;;  %v9037_v17 = vsel %vm8948_vm15, %v9036_v10, %v9035_v47 }
 0x5d7   : > { %v7958_v34 = vadd.f32 1.0, %v7926_v62  ;;  %vm7868_vm14 = vcmp.lt.f32.partialorder %v14066_v30, 0.0  ;;  %vm7866_vm9 = vcmp.lt.f32.partialorder %v14080_v24, 0.0 }
 0x5d8   : > { %v7643_v2 = vmul.f32 %v14063_v22, %v7611_v12  ;;  %v7545_v22 = vadd.f32 -0.28449672, %v7513_v5 }
 0x5d9   : > { %v7990_v4 = vmul.f32 %v7958_v34, %v7158_v15 }
 0x5da   : > { %v7803_v54 = vmul.f32 %v10954_v60, %v7643_v2  ;;  %v14099_v6 = vpop.eup %10955  ;;  %v7577_v35 = vmul.f32 %v14086_v39, %v7545_v22 }
 0x5db   : > { %v8010_v63 = vmax.f32 %v7990_v4, %v7992_v18  ;;  %v7388_v9 = vmul.f32 1.0614054, %v14099_v6 }
 0x5dc   : > { %v7835_v3 = vsub.f32 1.0, %v7803_v54  ;;  %v14108_v56 = vpop.eup %10957  ;;  %v7609_v11 = vadd.f32 0.2548296, %v7577_v35 }
 0x5dd   : > { %v8250_v50 = vcombine.high %v8010_v63, %v8010_v63  ;;  %v8257_v14 = vrot.slane %v8010_v63, %v13199_v29  ;;  %v7420_v37 = vadd.f32 -1.4531521, %v7388_v9  ;;  %v7386_v40 = vmul.f32 1.0614054, %v14108_v56 }
 0x5de   : > { %v7899_v13 = vsub.f32 0.0, %v7835_v3  ;;  %v7641_v41 = vmul.f32 %v14086_v39, %v7609_v11  ;;  %v10960_v7 = vpop.eup %10959 }
 0x5df   : > { %v8264_v52 = vrot.slane %v8250_v50, %v13199_v29  ;;  %v8265_v36 = vcombine.high %v8257_v14, %v8257_v14  ;;  %v9579_v28 = vrot.slane %v8257_v14, 9  ;;  %v7452_v16 = vmul.f32 %v14099_v6, %v7420_v37 }
 0x5e0   : > { %v7801_v34 = vmul.f32 %v10960_v7, %v7641_v41  ;;  %v7418_v53 = vadd.f32 -1.4531521, %v7386_v40  ;;  %v7931_v39 = vsel %vm7867_vm4, %v7899_v13, %v7835_v3  ;;  %v10962_v35 = vpop.eup %10961 }
 0x5e1   : > { %v8266_v27 = vcombine.high %v8264_v52, %v8264_v52  ;;  %v9580_v21 = vrot.slane %v8265_v36, 9  ;;  %v9581_v59 = vrot.slane %v8264_v52, 9  ;;  %v8609_v33 = vmax.f32 %v8257_v14, %v9579_v28 }
 0x5e2   : > { %v7484_v25 = vadd.f32 1.4214138, %v7452_v16  ;;  %v7833_v4 = vsub.f32 1.0, %v7801_v34  ;;  %v7450_v42 = vmul.f32 %v14108_v56, %v7418_v53  ;;  %v7963_v50 = vadd.f32 1.0, %v7931_v39  ;;  %v10964_v16 = vpop.eup %10963 }
 0x5e3   : > { %v9582_v45 = vrot.slane %v8266_v27, 9  ;;  %v8610_v57 = vmax.f32 %v8265_v36, %v9580_v21  ;;  %v8611_v48 = vmax.f32 %v8264_v52, %v9581_v59  ;;  %v9745_v32 = vpack.c.bf16 %v8609_v33, %v8609_v33 }
 0x5e4   : > { %v7516_v12 = vmul.f32 %v14099_v6, %v7484_v25  ;;  %v7897_v63 = vsub.f32 0.0, %v7833_v4  ;;  %v7482_v10 = vadd.f32 1.4214138, %v7450_v42  ;;  %v7161_v52 = vmul.f32 0.5, %v14042_v49 }
 0x5e5   : > { %v8612_v26 = vmax.f32 %v8266_v27, %v9582_v45  ;;  %v9746_v62 = vpack.c.bf16 %v8610_v57, %v8610_v57  ;;  %v9747_v23 = vpack.c.bf16 %v8611_v48, %v8611_v48  ;;  %v8929_v15 = vunpack.c.l.b16 %v9745_v32 }
 0x5e6   : > { %v7548_v2 = vadd.f32 -0.28449672, %v7516_v12  ;;  %v7929_v14 = vsel %vm7865_vm13, %v7897_v63, %v7833_v4  ;;  %v7514_v9 = vmul.f32 %v14108_v56, %v7482_v10  ;;  %v7995_v37 = vmul.f32 %v7963_v50, %v7163_v0 }
 0x5e7   : > { %v9748_v43 = vpack.c.bf16 %v8612_v26, %v8612_v26  ;;  %v8930_v58 = vunpack.c.l.b16 %v9746_v62  ;;  %v8931_v51 = vunpack.c.l.b16 %v9747_v23  ;;  %v9038_v18 = vrot.slane %v8929_v15, 4 }
 0x5e8   : > { %v7580_v5 = vmul.f32 %v14099_v6, %v7548_v2  ;;  %v7961_v36 = vadd.f32 1.0, %v7929_v14  ;;  %v7546_v3 = vadd.f32 -0.28449672, %v7514_v9 }
 0x5e9   : > { %v8932_v8 = vunpack.c.l.b16 %v9748_v43  ;;  %v9039_v44 = vsel %vm8951_vm0, %v9038_v18, %v9037_v17  ;;  %v9040_v38 = vrot.slane %v8930_v58, 3  ;;  %v9042_v60 = vrot.slane %v8931_v51, 2 }
 0x5ea   : > { %v7612_v22 = vadd.f32 0.2548296, %v7580_v5  ;;  %v7993_v61 = vmul.f32 %v7961_v36, %v7161_v52  ;;  %v7578_v21 = vmul.f32 %v14108_v56, %v7546_v3  ;;  %v7164_v51 = vmul.f32 0.5, %v14061_v20 }
 0x5eb   : > { %v9041_v54 = vsel %vm8954_vm1, %v9040_v38, %v9039_v44  ;;  %v9044_v47 = vrot.slane %v8932_v8, 1  ;;  %v7162_v18 = vmul.f32 0.5, %v14074_v1 }
 0x5ec   : > { %v9043_v19 = vsel %vm8957_vm3, %v9042_v60, %v9041_v54  ;;  %v7644_v17 = vmul.f32 %v14099_v6, %v7612_v22  ;;  %v8011_v59 = vmax.f32 %v7993_v61, %v7995_v37  ;;  %v7610_v11 = vadd.f32 0.2548296, %v7578_v21 }
 0x5ed   : > { %v9045_v31 = vsel %vm8960_vm5, %v9044_v47, %v9043_v19 }
 0x5ee   : > { %v9066_v28 = vpack.c.b16 %v9045_v31, %v9045_v31  ;;  %v7804_v27 = vmul.f32 %v10962_v35, %v7644_v17  ;;  %v8267_v46 = vcombine.high %v8011_v59, %v8011_v59  ;;  %v8274_v55 = vrot.slane %v8011_v59, %v13199_v29 }
 0x5ef   : > { %v7642_v45 = vmul.f32 %v14108_v56, %v7610_v11 }
 0x5f0   : > { %9082 = vst [vmem:[%s13412_s22 + $0x18] sm:$0xf] %v9066_v28  ;;  %v7836_v33 = vsub.f32 1.0, %v7804_v27  ;;  %v8281_v6 = vrot.slane %v8267_v46, %v13199_v29  ;;  %v8282_v57 = vcombine.high %v8274_v55, %v8274_v55  ;;  %v9583_v13 = vrot.slane %v8274_v55, 9 }
 0x5f1   : > { %v7802_v48 = vmul.f32 %v10964_v16, %v7642_v45 }
 0x5f2   : > { %v7900_v49 = vsub.f32 0.0, %v7836_v33  ;;  %v8283_v32 = vcombine.high %v8281_v6, %v8281_v6  ;;  %v9584_v41 = vrot.slane %v8282_v57, 9  ;;  %v9585_v25 = vrot.slane %v8281_v6, 9 }
 0x5f3   : > { %v7834_v7 = vsub.f32 1.0, %v7802_v48  ;;  %v8613_v34 = vmax.f32 %v8274_v55, %v9583_v13 }
 0x5f4   : > { %v7932_v40 = vsel %vm7868_vm14, %v7900_v49, %v7836_v33  ;;  %v9586_v26 = vrot.slane %v8283_v32, 9  ;;  %v8614_v62 = vmax.f32 %v8282_v57, %v9584_v41  ;;  %v8615_v23 = vmax.f32 %v8281_v6, %v9585_v25 }
 0x5f5   : > { %v7898_v15 = vsub.f32 0.0, %v7834_v7  ;;  %v7964_v53 = vadd.f32 1.0, %v7932_v40  ;;  %v9749_v4 = vpack.c.bf16 %v8613_v34, %v8613_v34 }
 0x5f6   : > { %v9750_v12 = vpack.c.bf16 %v8614_v62, %v8614_v62  ;;  %v8616_v56 = vmax.f32 %v8283_v32, %v9586_v26  ;;  %v9751_v43 = vpack.c.bf16 %v8615_v23, %v8615_v23 }
 0x5f7   : > { %v7930_v58 = vsel %vm7866_vm9, %v7898_v15, %v7834_v7  ;;  %v7996_v2 = vmul.f32 %v7964_v53, %v7164_v51  ;;  %v8933_v63 = vunpack.c.l.b16 %v9749_v4 }
 0x5f8   : > { %v8934_v30 = vunpack.c.l.b16 %v9750_v12  ;;  %v7962_v39 = vadd.f32 1.0, %v7930_v58  ;;  %v9752_v8 = vpack.c.bf16 %v8616_v56, %v8616_v56  ;;  %v8935_v44 = vunpack.c.l.b16 %v9751_v43 }
 0x5fa   : > { %v7994_v42 = vmul.f32 %v7962_v39, %v7162_v18  ;;  %v9046_v38 = vrot.slane %v8934_v30, 7  ;;  %v8936_v10 = vunpack.c.l.b16 %v9752_v8  ;;  %v9048_v54 = vrot.slane %v8935_v44, 6 }
 0x5fc   : > { %v8012_v60 = vmax.f32 %v7994_v42, %v7996_v2  ;;  %v9047_v47 = vsel %vm8942_vm10, %v9046_v38, %v8933_v63  ;;  %v9050_v0 = vrot.slane %v8936_v10, 5 }
 0x5fd   : > { %v9049_v31 = vsel %vm8945_vm12, %v9048_v54, %v9047_v47 }
 0x5fe   : > { %v8284_v5 = vcombine.high %v8012_v60, %v8012_v60  ;;  %v8291_v24 = vrot.slane %v8012_v60, %v13199_v29 }
 0x600   : > { %v8298_v20 = vrot.slane %v8284_v5, %v13199_v29  ;;  %v8299_v50 = vcombine.high %v8291_v24, %v8291_v24  ;;  %v9587_v1 = vrot.slane %v8291_v24, 9  ;;  %v9051_v29 = vsel %vm8948_vm15, %v9050_v0, %v9049_v31 }
 0x602   : > { %v8300_v19 = vcombine.high %v8298_v20, %v8298_v20  ;;  %v9588_v14 = vrot.slane %v8299_v50, 9  ;;  %v9589_v22 = vrot.slane %v8298_v20, 9  ;;  %v8617_v9 = vmax.f32 %v8291_v24, %v9587_v1 }
 0x604   : > { %v9590_v52 = vrot.slane %v8300_v19, 9  ;;  %v8618_v36 = vmax.f32 %v8299_v50, %v9588_v14  ;;  %v8619_v28 = vmax.f32 %v8298_v20, %v9589_v22  ;;  %v9753_v17 = vpack.c.bf16 %v8617_v9, %v8617_v9 }
 0x606   : > { %v8620_v3 = vmax.f32 %v8300_v19, %v9590_v52  ;;  %v9754_v35 = vpack.c.bf16 %v8618_v36, %v8618_v36  ;;  %v9755_v37 = vpack.c.bf16 %v8619_v28, %v8619_v28  ;;  %v8937_v61 = vunpack.c.l.b16 %v9753_v17 }
 0x608   : > { %v9756_v27 = vpack.c.bf16 %v8620_v3, %v8620_v3  ;;  %v8938_v21 = vunpack.c.l.b16 %v9754_v35  ;;  %v8939_v59 = vunpack.c.l.b16 %v9755_v37  ;;  %v9052_v33 = vrot.slane %v8937_v61, 4 }
 0x60a   : > { %v8940_v11 = vunpack.c.l.b16 %v9756_v27  ;;  %v9053_v16 = vsel %vm8951_vm0, %v9052_v33, %v9051_v29  ;;  %v9054_v46 = vrot.slane %v8938_v21, 3  ;;  %v9056_v55 = vrot.slane %v8939_v59, 2 }
 0x60c   : > { %v9055_v49 = vsel %vm8954_vm1, %v9054_v46, %v9053_v16  ;;  %v9058_v45 = vrot.slane %v8940_v11, 1 }
 0x60d   : > { %v9057_v6 = vsel %vm8957_vm3, %v9056_v55, %v9055_v49 }
 0x60e   : > { %v9059_v57 = vsel %vm8960_vm5, %v9058_v45, %v9057_v6 }
 0x60f   : > { %v9067_v48 = vpack.c.b16 %v9059_v57, %v9059_v57 }
 0x611   : > { %9083 = vst [vmem:[%s13412_s22 + $0x1c] sm:$0xf] %v9067_v48 }
 0x612   : > { %11067 = shalt.err (!%p11064_p3)
}
 0x613   : > { %s11068_s22 = scalar_lea.hbm %s14150_s20, 512  ;;  %s11072_s18 = scalar_lea.hbm %s14203_s7, 1024 }
 0x614   : > { %p11069_p11 = scmp.ne.s32.totalorder %s14150_s20, %s11068_s22  ;;  %p11073_p4 = scmp.lt.s32.totalorder %s14150_s20, %s14203_s7 }
 0x615   : > { %p11074_p6 = scmp.lt.s32.totalorder %s11072_s18, %s11068_s22 }
 0x616   : > { %p11070_p9 = pnand %p11069_p11, %p14273_p2 }
 0x617   : > { %p11075_p8 = por %p11074_p6, %p11073_p4 }
 0x618   : > { %p11071_p1 = pneg %p11070_p9 }
 0x61a   : > { %p11076_p5 = pnand %p11075_p8, %p11071_p1 }
 0x61c   : > { %11079 = shalt.err (!%p11076_p5)
}
 0x61d   : > { %s11132_s30 = smov 64   ;;  %s11133_s9 = smov 4  }
 0x61e   : > { %10360 = dma.vmem_to_hbm [thread:$0]  (%p14273_p2), %s14152_s19, 512, %s14150_s20, %s9085_s28, %s11132_s30, %s11132_s30, %s11133_s9  }
 0x61f PF: > { %s9113_s10 = sand.u32 1, %s11110_s24   ;;  %p14274_p7 = scmp.ne.s32.totalorder %s14213_s8, 0 }
 0x620   : > { %p14275_p12 = scmp.ge.s32.totalorder %s11122_s27, 2  ;;  %s9114_s29 = scalar_lea.sflag [#allocation6], %s9113_s10 }
 0x622   : > { %p10374_p13 = pnand %p14275_p12, %p14274_p7 }
 0x624   : > { %p10375_p0 = pneg %p10374_p13 }
 0x626   : > { %11105 = dma.done.wait (%p10375_p0), %s9114_s29, 512  }
 0x627   : > { %11107 = vsyncadd (%p10375_p0), %s9114_s29, 4294966784  ;;  %p21_p10 = scmp.ge.s32.totalorder %s11252_s23, 4   ;;  %s14276_s24 = smov %s11114_s25 }
 0x628   : > { %s14277_s25 = smov %s11118_s26  ;;  %s14278_s26 = smov %s11268_s12 }
 0x629   : > { %s14279_s27 = smov %s11252_s23  ;;  %23 = sbr.rel (!%p21_p10) target bundleno = 8 (0x8), region = 104 }
 0x62e   :  { %9119 = vsyncpa [#allocation5], 1 }
 0x62f   :  { %9121 = vsyncpa [#allocation5 + $0x1], 1 }
 0x630   :  { %9122 = vsyncpa [#allocation8], 1 }
 0x631   :  { %9123 = vsyncpa [#allocation6], 1 }
 0x632   :  { %9125 = vsyncpa [#allocation6 + $0x1], 1 }

</bundles_post_ra>
